<compile_context>
chip_gen: v7x
topology: tpu7x:2x2x1
jax: 0.10.0
libtpu: 0.0.40
codegen_flags: <defaults>
</compile_context>

<pallas_src>
import functools

import jax
import jax.numpy as jnp
from jax.experimental import pallas as pl
from jax.experimental.pallas import tpu as pltpu


def _gated_graph_kernel(x_ref, edge_ref, w_ref, out_ref,
                        *, iteration, num_type, n, size, sec):
    f32 = jnp.float32
    hi = jax.lax.Precision.HIGHEST

    # Row layout of the packed parameter buffer (all starts 8-row aligned).
    uzur_r0 = num_type * size          # [uz | ur | 0]
    bias_r0 = uzur_r0 + size           # hoisted bias row (1 real row, 8 padded)
    uh_r0 = bias_r0 + 8                # uh (cols [0, sec))

    x = x_ref[0].astype(f32)                                   # (N, size)
    edge_rows = edge_ref[...]                                  # (E*N, N) = edge^T stacked
    # Hoisted: broadcast the (1, 3*sec) bias row once, not per iteration.
    bias_b = jnp.broadcast_to(w_ref[bias_r0:bias_r0 + 1, :], (n, 3 * sec))

    for _ in range(iteration):                                 # static -> unrolled
        # One stacked message matmul for all edge types: (E*N, N) @ (N, size).
        msgs = jnp.dot(edge_rows, x, precision=hi,
                       preferred_element_type=f32)             # (E*N, size)

        # Gate projection: bias + x @ [uz|ur|0] + sum_e msgs_e @ W_e.
        # Sublane slices of `msgs` at multiples of N are free vreg selection;
        # weight slices are re-read from VMEM at point of use to keep vreg
        # pressure low across the unrolled body.
        gates = bias_b + jnp.dot(x, w_ref[uzur_r0:uzur_r0 + size, :],
                                 precision=hi, preferred_element_type=f32)
        for e in range(num_type):
            gates = gates + jnp.dot(
                msgs[e * n:(e + 1) * n, :],
                w_ref[e * size:(e + 1) * size, :],
                precision=hi, preferred_element_type=f32)      # (N, 3*sec)

        # Fused z|r sigmoid over 2*sec lanes, then static sub-slices.
        zr = jax.nn.sigmoid(gates[:, :2 * sec])
        tz = zr[:, :sec]
        tr = zr[:, sec:]
        th = jnp.tanh(gates[:, 2 * sec:]
                      + jnp.dot(tr * x, w_ref[uh_r0:uh_r0 + sec, :sec],
                                precision=hi, preferred_element_type=f32))
        x = (1.0 - tz) * x + tz * th

    out_ref[0] = x.astype(out_ref.dtype)


def init_gated_graph_params(key, size, num_edge_style, secondary_size=0):
    if secondary_size == 0:
        secondary_size = size
    sec = secondary_size
    std_a = (2.0 / (sec + sec)) ** 0.5
    std_b = (2.0 / (size + sec)) ** 0.5
    std_c = (2.0 / (size * num_edge_style + sec)) ** 0.5
    k1, k2, k3 = jax.random.split(key, 3)
    return dict(
        size=size, secondary_size=sec, num_type=num_edge_style,
        ba=jnp.zeros((num_edge_style, size), jnp.float32),
        bw=jnp.zeros((sec * 3,), jnp.float32),
        wz_wr_wh=std_c * jax.random.normal(
            k1, (num_edge_style, size, sec * 3), jnp.float32),
        uz_ur=std_b * jax.random.normal(k2, (size, sec * 2), jnp.float32),
        uh=std_a * jax.random.normal(k3, (sec, sec), jnp.float32),
    )


def gated_graph_forward(params, x, edge_matrix, iteration=10):
    """Batched GatedGraph forward: x (B, N, size) graphs sharing edge_matrix (E, N, N)."""
    size = params["size"]
    sec = params["secondary_size"]
    E = params["num_type"]
    if sec != size:
        # TODO(synk): secondary_size != size branch (partial-state update on the
        # last `secondary_size` features) not implemented.
        raise NotImplementedError("secondary_size != size not implemented")
    if edge_matrix.shape[0] != E:
        # TODO(synk): batched-graph edge path (utils.split_note_input_to_graph_batch /
        # combine_splitted_graph_output_with_several_edges) not implemented.
        raise NotImplementedError("batched edge_matrix path not implemented")
    B, N, S = x.shape
    assert S == size

    f32 = jnp.float32
    wzrh = params["wz_wr_wh"].astype(f32)                  # (E, size, 3*sec)
    ba = params["ba"].astype(f32)                          # (E, size)
    bw = params["bw"].astype(f32)                          # (3*sec,)
    uzur = params["uz_ur"].astype(f32)                     # (size, 2*sec)
    uh = params["uh"].astype(f32)                          # (sec, sec)

    # ---- loop-invariant preprocessing (plain JAX, once per call) ----------
    # edge^T, stacked sublane-dense: row e*N + i is column i of edge[e].
    edge_rows = jnp.transpose(edge_matrix.astype(f32), (0, 2, 1)).reshape(E * N, N)

    # One packed parameter buffer (single DMA):
    #   rows [0, E*size)            : W_e stacked along the contraction axis
    #   rows [E*size, +size)        : [uz | ur | 0]   (uz/ur folded into gates)
    #   rows [.., +8)               : hoisted bias row = sum_e ba_e@W_e + E*bw
    #   rows [.., +sec)             : uh (zero-padded to 3*sec columns)
    w_rows = wzrh.reshape(E * size, 3 * sec)
    uzur_pad = jnp.concatenate([uzur, jnp.zeros((size, sec), f32)], axis=1)
    bias_row = (jnp.einsum("ed,eds->s", ba, wzrh) + E * bw)[None, :]
    bias_blk = jnp.concatenate([bias_row, jnp.zeros((7, 3 * sec), f32)], axis=0)
    uh_blk = jnp.concatenate([uh, jnp.zeros((sec, 2 * sec), f32)], axis=1)
    w_pack = jnp.concatenate([w_rows, uzur_pad, bias_blk, uh_blk], axis=0)

    kernel = functools.partial(_gated_graph_kernel, iteration=iteration,
                               num_type=E, n=N, size=S, sec=sec)

    out = pl.pallas_call(
        kernel,
        out_shape=jax.ShapeDtypeStruct((B, N, S), f32),
        grid=(B,),
        in_specs=[
            pl.BlockSpec((1, N, S), lambda b: (b, 0, 0)),      # per-graph state
            pl.BlockSpec((E * N, N), lambda b: (0, 0)),        # shared edge slab
            pl.BlockSpec(w_pack.shape, lambda b: (0, 0)),      # packed parameters
        ],
        out_specs=pl.BlockSpec((1, N, S), lambda b: (b, 0, 0)),
        compiler_params=pltpu.CompilerParams(
            dimension_semantics=("parallel",)),
    )(x.astype(f32), edge_rows, w_pack)
    return out.astype(x.dtype)


def ref_forward(params, x, edge_matrix, iteration=10):
    """Pure-JAX reference mirroring the PyTorch forward per graph (sec == size)."""
    sec = params["secondary_size"]
    ba, bw = params["ba"], params["bw"]
    wzrh, uzur, uh = params["wz_wr_wh"], params["uz_ur"], params["uh"]
    hi = jax.lax.Precision.HIGHEST
    h = x.astype(jnp.float32)                                  # (B, N, size)
    for _ in range(iteration):
        act = jnp.einsum("emn,bmd->bend", edge_matrix, h,
                         precision=hi) + ba[None, :, None, :]
        awzrh = jnp.einsum("bend,eds->bens", act, wzrh, precision=hi) + bw
        summed = awzrh.sum(1)                                  # (B, N, 3*sec)
        wz = summed[..., :sec]
        wr = summed[..., sec:2 * sec]
        wh = summed[..., 2 * sec:]
        uzr = jnp.einsum("bnd,ds->bns", h, uzur, precision=hi)
        uz, ur = uzr[..., :sec], uzr[..., sec:]
        tz = jax.nn.sigmoid(wz + uz)
        tr = jax.nn.sigmoid(wr + ur)
        th = jnp.tanh(wh + jnp.einsum("bnd,ds->bns", tr * h, uh, precision=hi))
        h = (1.0 - tz) * h + tz * th
    return h


if __name__ == "__main__":
    key = jax.random.PRNGKey(0)
    size, num_edge_style, N, B, iteration = 32, 4, 16, 4, 10
    kp, kx, ke, kba, kbw = jax.random.split(key, 5)

    params = init_gated_graph_params(kp, size, num_edge_style)
    # Non-zero biases so the hoisted-bias algebra is actually exercised
    # (the module itself initializes ba/bw to zero).
    params["ba"] = 0.1 * jax.random.normal(kba, params["ba"].shape, jnp.float32)
    params["bw"] = 0.1 * jax.random.normal(kbw, params["bw"].shape, jnp.float32)

    x = jax.random.normal(kx, (B, N, size), jnp.float32)
    edge_matrix = (jax.random.uniform(ke, (num_edge_style, N, N)) < 0.3
                   ).astype(jnp.float32)

    out = gated_graph_forward(params, x, edge_matrix, iteration=iteration)
    out = jax.block_until_ready(out)

    ref = ref_forward(params, x, edge_matrix, iteration=iteration)
    if not jnp.allclose(out, ref, rtol=2e-3, atol=2e-3):
        raise AssertionError(
            f"kernel/reference mismatch, max abs diff = "
            f"{float(jnp.max(jnp.abs(out - ref)))}")
    print("KERNEL_OK")
</pallas_src>

<mosaic_0001>
module attributes {stable_mosaic.version = 11 : i64} {
  func.func @_gated_graph_kernel(%arg0: i32, %arg1: memref<1x16x32xf32, #tpu.memory_space<vmem>>, %arg2: memref<64x16xf32, #tpu.memory_space<vmem>>, %arg3: memref<200x96xf32, #tpu.memory_space<vmem>>, %arg4: memref<1x16x32xf32, #tpu.memory_space<vmem>>) attributes {dimension_semantics = [#tpu.dimension_semantics<parallel>], iteration_bounds = array<i64: 4>, scalar_prefetch = 0 : i64, scratch_operands = 0 : i64, tpu.core_type = #tpu.core_type<tc>, window_params = [{transform_indices = @transform_0, window_bounds = array<i64: 1, 16, 32>}, {pipeline_mode = #tpu.pipeline_mode<synchronous>, transform_indices = @transform_1, window_bounds = array<i64: 64, 16>}, {pipeline_mode = #tpu.pipeline_mode<synchronous>, transform_indices = @transform_2, window_bounds = array<i64: 200, 96>}, {transform_indices = @transform_3, window_bounds = array<i64: 1, 16, 32>}]} {
    %c0 = arith.constant 0 : index
    %c0_0 = arith.constant 0 : index
    %c0_1 = arith.constant 0 : index
    %0 = vector.load %arg1[%c0, %c0_0, %c0_1] : memref<1x16x32xf32, #tpu.memory_space<vmem>>, vector<1x16x32xf32>
    %1 = vector.shape_cast %0 : vector<1x16x32xf32> to vector<16x32xf32>
    %c0_2 = arith.constant 0 : index
    %c0_3 = arith.constant 0 : index
    %2 = vector.load %arg2[%c0_2, %c0_3] : memref<64x16xf32, #tpu.memory_space<vmem>>, vector<64x16xf32>
    %c160 = arith.constant 160 : index
    %c0_4 = arith.constant 0 : index
    %3 = vector.load %arg3[%c160, %c0_4] : memref<200x96xf32, #tpu.memory_space<vmem>>, vector<1x96xf32>
    %4 = vector.shape_cast %3 : vector<1x96xf32> to vector<1x96xf32>
    %5 = vector.broadcast %4 : vector<1x96xf32> to vector<16x96xf32>
    %cst = arith.constant dense<0.000000e+00> : vector<64x32xf32>
    %6 = tpu.matmul %2, %1, %cst {dimension_numbers = #tpu.dot_dimension_numbers<[1], [0], [0], [1], [0, 0, 1, 1], [], []>, precision = #tpu.contract_precision<fp32>} : vector<64x16xf32>, vector<16x32xf32>, vector<64x32xf32> -> vector<64x32xf32>
    %c128 = arith.constant 128 : index
    %c0_5 = arith.constant 0 : index
    %7 = vector.load %arg3[%c128, %c0_5] : memref<200x96xf32, #tpu.memory_space<vmem>>, vector<32x96xf32>
    %cst_6 = arith.constant dense<0.000000e+00> : vector<16x96xf32>
    %8 = tpu.matmul %1, %7, %cst_6 {dimension_numbers = #tpu.dot_dimension_numbers<[1], [0], [0], [1], [0, 0, 1, 1], [], []>, precision = #tpu.contract_precision<fp32>} : vector<16x32xf32>, vector<32x96xf32>, vector<16x96xf32> -> vector<16x96xf32>
    %9 = arith.addf %5, %8 : vector<16x96xf32>
    %10 = vector.extract_strided_slice %6 {offsets = [0, 0], sizes = [16, 32], strides = [1, 1]} : vector<64x32xf32> to vector<16x32xf32>
    %c0_7 = arith.constant 0 : index
    %c0_8 = arith.constant 0 : index
    %11 = vector.load %arg3[%c0_7, %c0_8] : memref<200x96xf32, #tpu.memory_space<vmem>>, vector<32x96xf32>
    %cst_9 = arith.constant dense<0.000000e+00> : vector<16x96xf32>
    %12 = tpu.matmul %10, %11, %cst_9 {dimension_numbers = #tpu.dot_dimension_numbers<[1], [0], [0], [1], [0, 0, 1, 1], [], []>, precision = #tpu.contract_precision<fp32>} : vector<16x32xf32>, vector<32x96xf32>, vector<16x96xf32> -> vector<16x96xf32>
    %13 = arith.addf %9, %12 : vector<16x96xf32>
    %14 = vector.extract_strided_slice %6 {offsets = [16, 0], sizes = [16, 32], strides = [1, 1]} : vector<64x32xf32> to vector<16x32xf32>
    %c32 = arith.constant 32 : index
    %c0_10 = arith.constant 0 : index
    %15 = vector.load %arg3[%c32, %c0_10] : memref<200x96xf32, #tpu.memory_space<vmem>>, vector<32x96xf32>
    %cst_11 = arith.constant dense<0.000000e+00> : vector<16x96xf32>
    %16 = tpu.matmul %14, %15, %cst_11 {dimension_numbers = #tpu.dot_dimension_numbers<[1], [0], [0], [1], [0, 0, 1, 1], [], []>, precision = #tpu.contract_precision<fp32>} : vector<16x32xf32>, vector<32x96xf32>, vector<16x96xf32> -> vector<16x96xf32>
    %17 = arith.addf %13, %16 : vector<16x96xf32>
    %18 = vector.extract_strided_slice %6 {offsets = [32, 0], sizes = [16, 32], strides = [1, 1]} : vector<64x32xf32> to vector<16x32xf32>
    %c64 = arith.constant 64 : index
    %c0_12 = arith.constant 0 : index
    %19 = vector.load %arg3[%c64, %c0_12] : memref<200x96xf32, #tpu.memory_space<vmem>>, vector<32x96xf32>
    %cst_13 = arith.constant dense<0.000000e+00> : vector<16x96xf32>
    %20 = tpu.matmul %18, %19, %cst_13 {dimension_numbers = #tpu.dot_dimension_numbers<[1], [0], [0], [1], [0, 0, 1, 1], [], []>, precision = #tpu.contract_precision<fp32>} : vector<16x32xf32>, vector<32x96xf32>, vector<16x96xf32> -> vector<16x96xf32>
    %21 = arith.addf %17, %20 : vector<16x96xf32>
    %22 = vector.extract_strided_slice %6 {offsets = [48, 0], sizes = [16, 32], strides = [1, 1]} : vector<64x32xf32> to vector<16x32xf32>
    %c96 = arith.constant 96 : index
    %c0_14 = arith.constant 0 : index
    %23 = vector.load %arg3[%c96, %c0_14] : memref<200x96xf32, #tpu.memory_space<vmem>>, vector<32x96xf32>
    %cst_15 = arith.constant dense<0.000000e+00> : vector<16x96xf32>
    %24 = tpu.matmul %22, %23, %cst_15 {dimension_numbers = #tpu.dot_dimension_numbers<[1], [0], [0], [1], [0, 0, 1, 1], [], []>, precision = #tpu.contract_precision<fp32>} : vector<16x32xf32>, vector<32x96xf32>, vector<16x96xf32> -> vector<16x96xf32>
    %25 = arith.addf %21, %24 : vector<16x96xf32>
    %26 = vector.extract_strided_slice %25 {offsets = [0, 0], sizes = [16, 64], strides = [1, 1]} : vector<16x96xf32> to vector<16x64xf32>
    %27 = arith.negf %26 : vector<16x64xf32>
    %28 = math.exp %27 : vector<16x64xf32>
    %cst_16 = arith.constant 1.000000e+00 : f32
    %29 = vector.broadcast %cst_16 : f32 to vector<16x64xf32>
    %30 = arith.addf %29, %28 : vector<16x64xf32>
    %31 = arith.divf %29, %30 : vector<16x64xf32>
    %32 = vector.extract_strided_slice %31 {offsets = [0, 0], sizes = [16, 32], strides = [1, 1]} : vector<16x64xf32> to vector<16x32xf32>
    %33 = vector.extract_strided_slice %31 {offsets = [0, 32], sizes = [16, 32], strides = [1, 1]} : vector<16x64xf32> to vector<16x32xf32>
    %34 = vector.extract_strided_slice %25 {offsets = [0, 64], sizes = [16, 32], strides = [1, 1]} : vector<16x96xf32> to vector<16x32xf32>
    %35 = arith.mulf %33, %1 : vector<16x32xf32>
    %c168 = arith.constant 168 : index
    %c0_17 = arith.constant 0 : index
    %36 = vector.load %arg3[%c168, %c0_17] : memref<200x96xf32, #tpu.memory_space<vmem>>, vector<32x32xf32>
    %cst_18 = arith.constant dense<0.000000e+00> : vector<16x32xf32>
    %37 = tpu.matmul %35, %36, %cst_18 {dimension_numbers = #tpu.dot_dimension_numbers<[1], [0], [0], [1], [0, 0, 1, 1], [], []>, precision = #tpu.contract_precision<fp32>} : vector<16x32xf32>, vector<32x32xf32>, vector<16x32xf32> -> vector<16x32xf32>
    %38 = arith.addf %34, %37 : vector<16x32xf32>
    %39 = math.tanh %38 : vector<16x32xf32>
    %cst_19 = arith.constant 1.000000e+00 : f32
    %40 = vector.broadcast %cst_19 : f32 to vector<16x32xf32>
    %41 = arith.subf %40, %32 : vector<16x32xf32>
    %42 = arith.mulf %41, %1 : vector<16x32xf32>
    %43 = arith.mulf %32, %39 : vector<16x32xf32>
    %44 = arith.addf %42, %43 : vector<16x32xf32>
    %cst_20 = arith.constant dense<0.000000e+00> : vector<64x32xf32>
    %45 = tpu.matmul %2, %44, %cst_20 {dimension_numbers = #tpu.dot_dimension_numbers<[1], [0], [0], [1], [0, 0, 1, 1], [], []>, precision = #tpu.contract_precision<fp32>} : vector<64x16xf32>, vector<16x32xf32>, vector<64x32xf32> -> vector<64x32xf32>
    %c128_21 = arith.constant 128 : index
    %c0_22 = arith.constant 0 : index
    %46 = vector.load %arg3[%c128_21, %c0_22] : memref<200x96xf32, #tpu.memory_space<vmem>>, vector<32x96xf32>
    %cst_23 = arith.constant dense<0.000000e+00> : vector<16x96xf32>
    %47 = tpu.matmul %44, %46, %cst_23 {dimension_numbers = #tpu.dot_dimension_numbers<[1], [0], [0], [1], [0, 0, 1, 1], [], []>, precision = #tpu.contract_precision<fp32>} : vector<16x32xf32>, vector<32x96xf32>, vector<16x96xf32> -> vector<16x96xf32>
    %48 = arith.addf %5, %47 : vector<16x96xf32>
    %49 = vector.extract_strided_slice %45 {offsets = [0, 0], sizes = [16, 32], strides = [1, 1]} : vector<64x32xf32> to vector<16x32xf32>
    %c0_24 = arith.constant 0 : index
    %c0_25 = arith.constant 0 : index
    %50 = vector.load %arg3[%c0_24, %c0_25] : memref<200x96xf32, #tpu.memory_space<vmem>>, vector<32x96xf32>
    %cst_26 = arith.constant dense<0.000000e+00> : vector<16x96xf32>
    %51 = tpu.matmul %49, %50, %cst_26 {dimension_numbers = #tpu.dot_dimension_numbers<[1], [0], [0], [1], [0, 0, 1, 1], [], []>, precision = #tpu.contract_precision<fp32>} : vector<16x32xf32>, vector<32x96xf32>, vector<16x96xf32> -> vector<16x96xf32>
    %52 = arith.addf %48, %51 : vector<16x96xf32>
    %53 = vector.extract_strided_slice %45 {offsets = [16, 0], sizes = [16, 32], strides = [1, 1]} : vector<64x32xf32> to vector<16x32xf32>
    %c32_27 = arith.constant 32 : index
    %c0_28 = arith.constant 0 : index
    %54 = vector.load %arg3[%c32_27, %c0_28] : memref<200x96xf32, #tpu.memory_space<vmem>>, vector<32x96xf32>
    %cst_29 = arith.constant dense<0.000000e+00> : vector<16x96xf32>
    %55 = tpu.matmul %53, %54, %cst_29 {dimension_numbers = #tpu.dot_dimension_numbers<[1], [0], [0], [1], [0, 0, 1, 1], [], []>, precision = #tpu.contract_precision<fp32>} : vector<16x32xf32>, vector<32x96xf32>, vector<16x96xf32> -> vector<16x96xf32>
    %56 = arith.addf %52, %55 : vector<16x96xf32>
    %57 = vector.extract_strided_slice %45 {offsets = [32, 0], sizes = [16, 32], strides = [1, 1]} : vector<64x32xf32> to vector<16x32xf32>
    %c64_30 = arith.constant 64 : index
    %c0_31 = arith.constant 0 : index
    %58 = vector.load %arg3[%c64_30, %c0_31] : memref<200x96xf32, #tpu.memory_space<vmem>>, vector<32x96xf32>
    %cst_32 = arith.constant dense<0.000000e+00> : vector<16x96xf32>
    %59 = tpu.matmul %57, %58, %cst_32 {dimension_numbers = #tpu.dot_dimension_numbers<[1], [0], [0], [1], [0, 0, 1, 1], [], []>, precision = #tpu.contract_precision<fp32>} : vector<16x32xf32>, vector<32x96xf32>, vector<16x96xf32> -> vector<16x96xf32>
    %60 = arith.addf %56, %59 : vector<16x96xf32>
    %61 = vector.extract_strided_slice %45 {offsets = [48, 0], sizes = [16, 32], strides = [1, 1]} : vector<64x32xf32> to vector<16x32xf32>
    %c96_33 = arith.constant 96 : index
    %c0_34 = arith.constant 0 : index
    %62 = vector.load %arg3[%c96_33, %c0_34] : memref<200x96xf32, #tpu.memory_space<vmem>>, vector<32x96xf32>
    %cst_35 = arith.constant dense<0.000000e+00> : vector<16x96xf32>
    %63 = tpu.matmul %61, %62, %cst_35 {dimension_numbers = #tpu.dot_dimension_numbers<[1], [0], [0], [1], [0, 0, 1, 1], [], []>, precision = #tpu.contract_precision<fp32>} : vector<16x32xf32>, vector<32x96xf32>, vector<16x96xf32> -> vector<16x96xf32>
    %64 = arith.addf %60, %63 : vector<16x96xf32>
    %65 = vector.extract_strided_slice %64 {offsets = [0, 0], sizes = [16, 64], strides = [1, 1]} : vector<16x96xf32> to vector<16x64xf32>
    %66 = arith.negf %65 : vector<16x64xf32>
    %67 = math.exp %66 : vector<16x64xf32>
    %cst_36 = arith.constant 1.000000e+00 : f32
    %68 = vector.broadcast %cst_36 : f32 to vector<16x64xf32>
    %69 = arith.addf %68, %67 : vector<16x64xf32>
    %70 = arith.divf %68, %69 : vector<16x64xf32>
    %71 = vector.extract_strided_slice %70 {offsets = [0, 0], sizes = [16, 32], strides = [1, 1]} : vector<16x64xf32> to vector<16x32xf32>
    %72 = vector.extract_strided_slice %70 {offsets = [0, 32], sizes = [16, 32], strides = [1, 1]} : vector<16x64xf32> to vector<16x32xf32>
    %73 = vector.extract_strided_slice %64 {offsets = [0, 64], sizes = [16, 32], strides = [1, 1]} : vector<16x96xf32> to vector<16x32xf32>
    %74 = arith.mulf %72, %44 : vector<16x32xf32>
    %c168_37 = arith.constant 168 : index
    %c0_38 = arith.constant 0 : index
    %75 = vector.load %arg3[%c168_37, %c0_38] : memref<200x96xf32, #tpu.memory_space<vmem>>, vector<32x32xf32>
    %cst_39 = arith.constant dense<0.000000e+00> : vector<16x32xf32>
    %76 = tpu.matmul %74, %75, %cst_39 {dimension_numbers = #tpu.dot_dimension_numbers<[1], [0], [0], [1], [0, 0, 1, 1], [], []>, precision = #tpu.contract_precision<fp32>} : vector<16x32xf32>, vector<32x32xf32>, vector<16x32xf32> -> vector<16x32xf32>
    %77 = arith.addf %73, %76 : vector<16x32xf32>
    %78 = math.tanh %77 : vector<16x32xf32>
    %cst_40 = arith.constant 1.000000e+00 : f32
    %79 = vector.broadcast %cst_40 : f32 to vector<16x32xf32>
    %80 = arith.subf %79, %71 : vector<16x32xf32>
    %81 = arith.mulf %80, %44 : vector<16x32xf32>
    %82 = arith.mulf %71, %78 : vector<16x32xf32>
    %83 = arith.addf %81, %82 : vector<16x32xf32>
    %cst_41 = arith.constant dense<0.000000e+00> : vector<64x32xf32>
    %84 = tpu.matmul %2, %83, %cst_41 {dimension_numbers = #tpu.dot_dimension_numbers<[1], [0], [0], [1], [0, 0, 1, 1], [], []>, precision = #tpu.contract_precision<fp32>} : vector<64x16xf32>, vector<16x32xf32>, vector<64x32xf32> -> vector<64x32xf32>
    %c128_42 = arith.constant 128 : index
    %c0_43 = arith.constant 0 : index
    %85 = vector.load %arg3[%c128_42, %c0_43] : memref<200x96xf32, #tpu.memory_space<vmem>>, vector<32x96xf32>
    %cst_44 = arith.constant dense<0.000000e+00> : vector<16x96xf32>
    %86 = tpu.matmul %83, %85, %cst_44 {dimension_numbers = #tpu.dot_dimension_numbers<[1], [0], [0], [1], [0, 0, 1, 1], [], []>, precision = #tpu.contract_precision<fp32>} : vector<16x32xf32>, vector<32x96xf32>, vector<16x96xf32> -> vector<16x96xf32>
    %87 = arith.addf %5, %86 : vector<16x96xf32>
    %88 = vector.extract_strided_slice %84 {offsets = [0, 0], sizes = [16, 32], strides = [1, 1]} : vector<64x32xf32> to vector<16x32xf32>
    %c0_45 = arith.constant 0 : index
    %c0_46 = arith.constant 0 : index
    %89 = vector.load %arg3[%c0_45, %c0_46] : memref<200x96xf32, #tpu.memory_space<vmem>>, vector<32x96xf32>
    %cst_47 = arith.constant dense<0.000000e+00> : vector<16x96xf32>
    %90 = tpu.matmul %88, %89, %cst_47 {dimension_numbers = #tpu.dot_dimension_numbers<[1], [0], [0], [1], [0, 0, 1, 1], [], []>, precision = #tpu.contract_precision<fp32>} : vector<16x32xf32>, vector<32x96xf32>, vector<16x96xf32> -> vector<16x96xf32>
    %91 = arith.addf %87, %90 : vector<16x96xf32>
    %92 = vector.extract_strided_slice %84 {offsets = [16, 0], sizes = [16, 32], strides = [1, 1]} : vector<64x32xf32> to vector<16x32xf32>
    %c32_48 = arith.constant 32 : index
    %c0_49 = arith.constant 0 : index
    %93 = vector.load %arg3[%c32_48, %c0_49] : memref<200x96xf32, #tpu.memory_space<vmem>>, vector<32x96xf32>
    %cst_50 = arith.constant dense<0.000000e+00> : vector<16x96xf32>
    %94 = tpu.matmul %92, %93, %cst_50 {dimension_numbers = #tpu.dot_dimension_numbers<[1], [0], [0], [1], [0, 0, 1, 1], [], []>, precision = #tpu.contract_precision<fp32>} : vector<16x32xf32>, vector<32x96xf32>, vector<16x96xf32> -> vector<16x96xf32>
    %95 = arith.addf %91, %94 : vector<16x96xf32>
    %96 = vector.extract_strided_slice %84 {offsets = [32, 0], sizes = [16, 32], strides = [1, 1]} : vector<64x32xf32> to vector<16x32xf32>
    %c64_51 = arith.constant 64 : index
    %c0_52 = arith.constant 0 : index
    %97 = vector.load %arg3[%c64_51, %c0_52] : memref<200x96xf32, #tpu.memory_space<vmem>>, vector<32x96xf32>
    %cst_53 = arith.constant dense<0.000000e+00> : vector<16x96xf32>
    %98 = tpu.matmul %96, %97, %cst_53 {dimension_numbers = #tpu.dot_dimension_numbers<[1], [0], [0], [1], [0, 0, 1, 1], [], []>, precision = #tpu.contract_precision<fp32>} : vector<16x32xf32>, vector<32x96xf32>, vector<16x96xf32> -> vector<16x96xf32>
    %99 = arith.addf %95, %98 : vector<16x96xf32>
    %100 = vector.extract_strided_slice %84 {offsets = [48, 0], sizes = [16, 32], strides = [1, 1]} : vector<64x32xf32> to vector<16x32xf32>
    %c96_54 = arith.constant 96 : index
    %c0_55 = arith.constant 0 : index
    %101 = vector.load %arg3[%c96_54, %c0_55] : memref<200x96xf32, #tpu.memory_space<vmem>>, vector<32x96xf32>
    %cst_56 = arith.constant dense<0.000000e+00> : vector<16x96xf32>
    %102 = tpu.matmul %100, %101, %cst_56 {dimension_numbers = #tpu.dot_dimension_numbers<[1], [0], [0], [1], [0, 0, 1, 1], [], []>, precision = #tpu.contract_precision<fp32>} : vector<16x32xf32>, vector<32x96xf32>, vector<16x96xf32> -> vector<16x96xf32>
    %103 = arith.addf %99, %102 : vector<16x96xf32>
    %104 = vector.extract_strided_slice %103 {offsets = [0, 0], sizes = [16, 64], strides = [1, 1]} : vector<16x96xf32> to vector<16x64xf32>
    %105 = arith.negf %104 : vector<16x64xf32>
    %106 = math.exp %105 : vector<16x64xf32>
    %cst_57 = arith.constant 1.000000e+00 : f32
    %107 = vector.broadcast %cst_57 : f32 to vector<16x64xf32>
    %108 = arith.addf %107, %106 : vector<16x64xf32>
    %109 = arith.divf %107, %108 : vector<16x64xf32>
    %110 = vector.extract_strided_slice %109 {offsets = [0, 0], sizes = [16, 32], strides = [1, 1]} : vector<16x64xf32> to vector<16x32xf32>
    %111 = vector.extract_strided_slice %109 {offsets = [0, 32], sizes = [16, 32], strides = [1, 1]} : vector<16x64xf32> to vector<16x32xf32>
    %112 = vector.extract_strided_slice %103 {offsets = [0, 64], sizes = [16, 32], strides = [1, 1]} : vector<16x96xf32> to vector<16x32xf32>
    %113 = arith.mulf %111, %83 : vector<16x32xf32>
    %c168_58 = arith.constant 168 : index
    %c0_59 = arith.constant 0 : index
    %114 = vector.load %arg3[%c168_58, %c0_59] : memref<200x96xf32, #tpu.memory_space<vmem>>, vector<32x32xf32>
    %cst_60 = arith.constant dense<0.000000e+00> : vector<16x32xf32>
    %115 = tpu.matmul %113, %114, %cst_60 {dimension_numbers = #tpu.dot_dimension_numbers<[1], [0], [0], [1], [0, 0, 1, 1], [], []>, precision = #tpu.contract_precision<fp32>} : vector<16x32xf32>, vector<32x32xf32>, vector<16x32xf32> -> vector<16x32xf32>
    %116 = arith.addf %112, %115 : vector<16x32xf32>
    %117 = math.tanh %116 : vector<16x32xf32>
    %cst_61 = arith.constant 1.000000e+00 : f32
    %118 = vector.broadcast %cst_61 : f32 to vector<16x32xf32>
    %119 = arith.subf %118, %110 : vector<16x32xf32>
    %120 = arith.mulf %119, %83 : vector<16x32xf32>
    %121 = arith.mulf %110, %117 : vector<16x32xf32>
    %122 = arith.addf %120, %121 : vector<16x32xf32>
    %cst_62 = arith.constant dense<0.000000e+00> : vector<64x32xf32>
    %123 = tpu.matmul %2, %122, %cst_62 {dimension_numbers = #tpu.dot_dimension_numbers<[1], [0], [0], [1], [0, 0, 1, 1], [], []>, precision = #tpu.contract_precision<fp32>} : vector<64x16xf32>, vector<16x32xf32>, vector<64x32xf32> -> vector<64x32xf32>
    %c128_63 = arith.constant 128 : index
    %c0_64 = arith.constant 0 : index
    %124 = vector.load %arg3[%c128_63, %c0_64] : memref<200x96xf32, #tpu.memory_space<vmem>>, vector<32x96xf32>
    %cst_65 = arith.constant dense<0.000000e+00> : vector<16x96xf32>
    %125 = tpu.matmul %122, %124, %cst_65 {dimension_numbers = #tpu.dot_dimension_numbers<[1], [0], [0], [1], [0, 0, 1, 1], [], []>, precision = #tpu.contract_precision<fp32>} : vector<16x32xf32>, vector<32x96xf32>, vector<16x96xf32> -> vector<16x96xf32>
    %126 = arith.addf %5, %125 : vector<16x96xf32>
    %127 = vector.extract_strided_slice %123 {offsets = [0, 0], sizes = [16, 32], strides = [1, 1]} : vector<64x32xf32> to vector<16x32xf32>
    %c0_66 = arith.constant 0 : index
    %c0_67 = arith.constant 0 : index
    %128 = vector.load %arg3[%c0_66, %c0_67] : memref<200x96xf32, #tpu.memory_space<vmem>>, vector<32x96xf32>
    %cst_68 = arith.constant dense<0.000000e+00> : vector<16x96xf32>
    %129 = tpu.matmul %127, %128, %cst_68 {dimension_numbers = #tpu.dot_dimension_numbers<[1], [0], [0], [1], [0, 0, 1, 1], [], []>, precision = #tpu.contract_precision<fp32>} : vector<16x32xf32>, vector<32x96xf32>, vector<16x96xf32> -> vector<16x96xf32>
    %130 = arith.addf %126, %129 : vector<16x96xf32>
    %131 = vector.extract_strided_slice %123 {offsets = [16, 0], sizes = [16, 32], strides = [1, 1]} : vector<64x32xf32> to vector<16x32xf32>
    %c32_69 = arith.constant 32 : index
    %c0_70 = arith.constant 0 : index
    %132 = vector.load %arg3[%c32_69, %c0_70] : memref<200x96xf32, #tpu.memory_space<vmem>>, vector<32x96xf32>
    %cst_71 = arith.constant dense<0.000000e+00> : vector<16x96xf32>
    %133 = tpu.matmul %131, %132, %cst_71 {dimension_numbers = #tpu.dot_dimension_numbers<[1], [0], [0], [1], [0, 0, 1, 1], [], []>, precision = #tpu.contract_precision<fp32>} : vector<16x32xf32>, vector<32x96xf32>, vector<16x96xf32> -> vector<16x96xf32>
    %134 = arith.addf %130, %133 : vector<16x96xf32>
    %135 = vector.extract_strided_slice %123 {offsets = [32, 0], sizes = [16, 32], strides = [1, 1]} : vector<64x32xf32> to vector<16x32xf32>
    %c64_72 = arith.constant 64 : index
    %c0_73 = arith.constant 0 : index
    %136 = vector.load %arg3[%c64_72, %c0_73] : memref<200x96xf32, #tpu.memory_space<vmem>>, vector<32x96xf32>
    %cst_74 = arith.constant dense<0.000000e+00> : vector<16x96xf32>
    %137 = tpu.matmul %135, %136, %cst_74 {dimension_numbers = #tpu.dot_dimension_numbers<[1], [0], [0], [1], [0, 0, 1, 1], [], []>, precision = #tpu.contract_precision<fp32>} : vector<16x32xf32>, vector<32x96xf32>, vector<16x96xf32> -> vector<16x96xf32>
    %138 = arith.addf %134, %137 : vector<16x96xf32>
    %139 = vector.extract_strided_slice %123 {offsets = [48, 0], sizes = [16, 32], strides = [1, 1]} : vector<64x32xf32> to vector<16x32xf32>
    %c96_75 = arith.constant 96 : index
    %c0_76 = arith.constant 0 : index
    %140 = vector.load %arg3[%c96_75, %c0_76] : memref<200x96xf32, #tpu.memory_space<vmem>>, vector<32x96xf32>
    %cst_77 = arith.constant dense<0.000000e+00> : vector<16x96xf32>
    %141 = tpu.matmul %139, %140, %cst_77 {dimension_numbers = #tpu.dot_dimension_numbers<[1], [0], [0], [1], [0, 0, 1, 1], [], []>, precision = #tpu.contract_precision<fp32>} : vector<16x32xf32>, vector<32x96xf32>, vector<16x96xf32> -> vector<16x96xf32>
    %142 = arith.addf %138, %141 : vector<16x96xf32>
    %143 = vector.extract_strided_slice %142 {offsets = [0, 0], sizes = [16, 64], strides = [1, 1]} : vector<16x96xf32> to vector<16x64xf32>
    %144 = arith.negf %143 : vector<16x64xf32>
    %145 = math.exp %144 : vector<16x64xf32>
    %cst_78 = arith.constant 1.000000e+00 : f32
    %146 = vector.broadcast %cst_78 : f32 to vector<16x64xf32>
    %147 = arith.addf %146, %145 : vector<16x64xf32>
    %148 = arith.divf %146, %147 : vector<16x64xf32>
    %149 = vector.extract_strided_slice %148 {offsets = [0, 0], sizes = [16, 32], strides = [1, 1]} : vector<16x64xf32> to vector<16x32xf32>
    %150 = vector.extract_strided_slice %148 {offsets = [0, 32], sizes = [16, 32], strides = [1, 1]} : vector<16x64xf32> to vector<16x32xf32>
    %151 = vector.extract_strided_slice %142 {offsets = [0, 64], sizes = [16, 32], strides = [1, 1]} : vector<16x96xf32> to vector<16x32xf32>
    %152 = arith.mulf %150, %122 : vector<16x32xf32>
    %c168_79 = arith.constant 168 : index
    %c0_80 = arith.constant 0 : index
    %153 = vector.load %arg3[%c168_79, %c0_80] : memref<200x96xf32, #tpu.memory_space<vmem>>, vector<32x32xf32>
    %cst_81 = arith.constant dense<0.000000e+00> : vector<16x32xf32>
    %154 = tpu.matmul %152, %153, %cst_81 {dimension_numbers = #tpu.dot_dimension_numbers<[1], [0], [0], [1], [0, 0, 1, 1], [], []>, precision = #tpu.contract_precision<fp32>} : vector<16x32xf32>, vector<32x32xf32>, vector<16x32xf32> -> vector<16x32xf32>
    %155 = arith.addf %151, %154 : vector<16x32xf32>
    %156 = math.tanh %155 : vector<16x32xf32>
    %cst_82 = arith.constant 1.000000e+00 : f32
    %157 = vector.broadcast %cst_82 : f32 to vector<16x32xf32>
    %158 = arith.subf %157, %149 : vector<16x32xf32>
    %159 = arith.mulf %158, %122 : vector<16x32xf32>
    %160 = arith.mulf %149, %156 : vector<16x32xf32>
    %161 = arith.addf %159, %160 : vector<16x32xf32>
    %cst_83 = arith.constant dense<0.000000e+00> : vector<64x32xf32>
    %162 = tpu.matmul %2, %161, %cst_83 {dimension_numbers = #tpu.dot_dimension_numbers<[1], [0], [0], [1], [0, 0, 1, 1], [], []>, precision = #tpu.contract_precision<fp32>} : vector<64x16xf32>, vector<16x32xf32>, vector<64x32xf32> -> vector<64x32xf32>
    %c128_84 = arith.constant 128 : index
    %c0_85 = arith.constant 0 : index
    %163 = vector.load %arg3[%c128_84, %c0_85] : memref<200x96xf32, #tpu.memory_space<vmem>>, vector<32x96xf32>
    %cst_86 = arith.constant dense<0.000000e+00> : vector<16x96xf32>
    %164 = tpu.matmul %161, %163, %cst_86 {dimension_numbers = #tpu.dot_dimension_numbers<[1], [0], [0], [1], [0, 0, 1, 1], [], []>, precision = #tpu.contract_precision<fp32>} : vector<16x32xf32>, vector<32x96xf32>, vector<16x96xf32> -> vector<16x96xf32>
    %165 = arith.addf %5, %164 : vector<16x96xf32>
    %166 = vector.extract_strided_slice %162 {offsets = [0, 0], sizes = [16, 32], strides = [1, 1]} : vector<64x32xf32> to vector<16x32xf32>
    %c0_87 = arith.constant 0 : index
    %c0_88 = arith.constant 0 : index
    %167 = vector.load %arg3[%c0_87, %c0_88] : memref<200x96xf32, #tpu.memory_space<vmem>>, vector<32x96xf32>
    %cst_89 = arith.constant dense<0.000000e+00> : vector<16x96xf32>
    %168 = tpu.matmul %166, %167, %cst_89 {dimension_numbers = #tpu.dot_dimension_numbers<[1], [0], [0], [1], [0, 0, 1, 1], [], []>, precision = #tpu.contract_precision<fp32>} : vector<16x32xf32>, vector<32x96xf32>, vector<16x96xf32> -> vector<16x96xf32>
    %169 = arith.addf %165, %168 : vector<16x96xf32>
    %170 = vector.extract_strided_slice %162 {offsets = [16, 0], sizes = [16, 32], strides = [1, 1]} : vector<64x32xf32> to vector<16x32xf32>
    %c32_90 = arith.constant 32 : index
    %c0_91 = arith.constant 0 : index
    %171 = vector.load %arg3[%c32_90, %c0_91] : memref<200x96xf32, #tpu.memory_space<vmem>>, vector<32x96xf32>
    %cst_92 = arith.constant dense<0.000000e+00> : vector<16x96xf32>
    %172 = tpu.matmul %170, %171, %cst_92 {dimension_numbers = #tpu.dot_dimension_numbers<[1], [0], [0], [1], [0, 0, 1, 1], [], []>, precision = #tpu.contract_precision<fp32>} : vector<16x32xf32>, vector<32x96xf32>, vector<16x96xf32> -> vector<16x96xf32>
    %173 = arith.addf %169, %172 : vector<16x96xf32>
    %174 = vector.extract_strided_slice %162 {offsets = [32, 0], sizes = [16, 32], strides = [1, 1]} : vector<64x32xf32> to vector<16x32xf32>
    %c64_93 = arith.constant 64 : index
    %c0_94 = arith.constant 0 : index
    %175 = vector.load %arg3[%c64_93, %c0_94] : memref<200x96xf32, #tpu.memory_space<vmem>>, vector<32x96xf32>
    %cst_95 = arith.constant dense<0.000000e+00> : vector<16x96xf32>
    %176 = tpu.matmul %174, %175, %cst_95 {dimension_numbers = #tpu.dot_dimension_numbers<[1], [0], [0], [1], [0, 0, 1, 1], [], []>, precision = #tpu.contract_precision<fp32>} : vector<16x32xf32>, vector<32x96xf32>, vector<16x96xf32> -> vector<16x96xf32>
    %177 = arith.addf %173, %176 : vector<16x96xf32>
    %178 = vector.extract_strided_slice %162 {offsets = [48, 0], sizes = [16, 32], strides = [1, 1]} : vector<64x32xf32> to vector<16x32xf32>
    %c96_96 = arith.constant 96 : index
    %c0_97 = arith.constant 0 : index
    %179 = vector.load %arg3[%c96_96, %c0_97] : memref<200x96xf32, #tpu.memory_space<vmem>>, vector<32x96xf32>
    %cst_98 = arith.constant dense<0.000000e+00> : vector<16x96xf32>
    %180 = tpu.matmul %178, %179, %cst_98 {dimension_numbers = #tpu.dot_dimension_numbers<[1], [0], [0], [1], [0, 0, 1, 1], [], []>, precision = #tpu.contract_precision<fp32>} : vector<16x32xf32>, vector<32x96xf32>, vector<16x96xf32> -> vector<16x96xf32>
    %181 = arith.addf %177, %180 : vector<16x96xf32>
    %182 = vector.extract_strided_slice %181 {offsets = [0, 0], sizes = [16, 64], strides = [1, 1]} : vector<16x96xf32> to vector<16x64xf32>
    %183 = arith.negf %182 : vector<16x64xf32>
    %184 = math.exp %183 : vector<16x64xf32>
    %cst_99 = arith.constant 1.000000e+00 : f32
    %185 = vector.broadcast %cst_99 : f32 to vector<16x64xf32>
    %186 = arith.addf %185, %184 : vector<16x64xf32>
    %187 = arith.divf %185, %186 : vector<16x64xf32>
    %188 = vector.extract_strided_slice %187 {offsets = [0, 0], sizes = [16, 32], strides = [1, 1]} : vector<16x64xf32> to vector<16x32xf32>
    %189 = vector.extract_strided_slice %187 {offsets = [0, 32], sizes = [16, 32], strides = [1, 1]} : vector<16x64xf32> to vector<16x32xf32>
    %190 = vector.extract_strided_slice %181 {offsets = [0, 64], sizes = [16, 32], strides = [1, 1]} : vector<16x96xf32> to vector<16x32xf32>
    %191 = arith.mulf %189, %161 : vector<16x32xf32>
    %c168_100 = arith.constant 168 : index
    %c0_101 = arith.constant 0 : index
    %192 = vector.load %arg3[%c168_100, %c0_101] : memref<200x96xf32, #tpu.memory_space<vmem>>, vector<32x32xf32>
    %cst_102 = arith.constant dense<0.000000e+00> : vector<16x32xf32>
    %193 = tpu.matmul %191, %192, %cst_102 {dimension_numbers = #tpu.dot_dimension_numbers<[1], [0], [0], [1], [0, 0, 1, 1], [], []>, precision = #tpu.contract_precision<fp32>} : vector<16x32xf32>, vector<32x32xf32>, vector<16x32xf32> -> vector<16x32xf32>
    %194 = arith.addf %190, %193 : vector<16x32xf32>
    %195 = math.tanh %194 : vector<16x32xf32>
    %cst_103 = arith.constant 1.000000e+00 : f32
    %196 = vector.broadcast %cst_103 : f32 to vector<16x32xf32>
    %197 = arith.subf %196, %188 : vector<16x32xf32>
    %198 = arith.mulf %197, %161 : vector<16x32xf32>
    %199 = arith.mulf %188, %195 : vector<16x32xf32>
    %200 = arith.addf %198, %199 : vector<16x32xf32>
    %cst_104 = arith.constant dense<0.000000e+00> : vector<64x32xf32>
    %201 = tpu.matmul %2, %200, %cst_104 {dimension_numbers = #tpu.dot_dimension_numbers<[1], [0], [0], [1], [0, 0, 1, 1], [], []>, precision = #tpu.contract_precision<fp32>} : vector<64x16xf32>, vector<16x32xf32>, vector<64x32xf32> -> vector<64x32xf32>
    %c128_105 = arith.constant 128 : index
    %c0_106 = arith.constant 0 : index
    %202 = vector.load %arg3[%c128_105, %c0_106] : memref<200x96xf32, #tpu.memory_space<vmem>>, vector<32x96xf32>
    %cst_107 = arith.constant dense<0.000000e+00> : vector<16x96xf32>
    %203 = tpu.matmul %200, %202, %cst_107 {dimension_numbers = #tpu.dot_dimension_numbers<[1], [0], [0], [1], [0, 0, 1, 1], [], []>, precision = #tpu.contract_precision<fp32>} : vector<16x32xf32>, vector<32x96xf32>, vector<16x96xf32> -> vector<16x96xf32>
    %204 = arith.addf %5, %203 : vector<16x96xf32>
    %205 = vector.extract_strided_slice %201 {offsets = [0, 0], sizes = [16, 32], strides = [1, 1]} : vector<64x32xf32> to vector<16x32xf32>
    %c0_108 = arith.constant 0 : index
    %c0_109 = arith.constant 0 : index
    %206 = vector.load %arg3[%c0_108, %c0_109] : memref<200x96xf32, #tpu.memory_space<vmem>>, vector<32x96xf32>
    %cst_110 = arith.constant dense<0.000000e+00> : vector<16x96xf32>
    %207 = tpu.matmul %205, %206, %cst_110 {dimension_numbers = #tpu.dot_dimension_numbers<[1], [0], [0], [1], [0, 0, 1, 1], [], []>, precision = #tpu.contract_precision<fp32>} : vector<16x32xf32>, vector<32x96xf32>, vector<16x96xf32> -> vector<16x96xf32>
    %208 = arith.addf %204, %207 : vector<16x96xf32>
    %209 = vector.extract_strided_slice %201 {offsets = [16, 0], sizes = [16, 32], strides = [1, 1]} : vector<64x32xf32> to vector<16x32xf32>
    %c32_111 = arith.constant 32 : index
    %c0_112 = arith.constant 0 : index
    %210 = vector.load %arg3[%c32_111, %c0_112] : memref<200x96xf32, #tpu.memory_space<vmem>>, vector<32x96xf32>
    %cst_113 = arith.constant dense<0.000000e+00> : vector<16x96xf32>
    %211 = tpu.matmul %209, %210, %cst_113 {dimension_numbers = #tpu.dot_dimension_numbers<[1], [0], [0], [1], [0, 0, 1, 1], [], []>, precision = #tpu.contract_precision<fp32>} : vector<16x32xf32>, vector<32x96xf32>, vector<16x96xf32> -> vector<16x96xf32>
    %212 = arith.addf %208, %211 : vector<16x96xf32>
    %213 = vector.extract_strided_slice %201 {offsets = [32, 0], sizes = [16, 32], strides = [1, 1]} : vector<64x32xf32> to vector<16x32xf32>
    %c64_114 = arith.constant 64 : index
    %c0_115 = arith.constant 0 : index
    %214 = vector.load %arg3[%c64_114, %c0_115] : memref<200x96xf32, #tpu.memory_space<vmem>>, vector<32x96xf32>
    %cst_116 = arith.constant dense<0.000000e+00> : vector<16x96xf32>
    %215 = tpu.matmul %213, %214, %cst_116 {dimension_numbers = #tpu.dot_dimension_numbers<[1], [0], [0], [1], [0, 0, 1, 1], [], []>, precision = #tpu.contract_precision<fp32>} : vector<16x32xf32>, vector<32x96xf32>, vector<16x96xf32> -> vector<16x96xf32>
    %216 = arith.addf %212, %215 : vector<16x96xf32>
    %217 = vector.extract_strided_slice %201 {offsets = [48, 0], sizes = [16, 32], strides = [1, 1]} : vector<64x32xf32> to vector<16x32xf32>
    %c96_117 = arith.constant 96 : index
    %c0_118 = arith.constant 0 : index
    %218 = vector.load %arg3[%c96_117, %c0_118] : memref<200x96xf32, #tpu.memory_space<vmem>>, vector<32x96xf32>
    %cst_119 = arith.constant dense<0.000000e+00> : vector<16x96xf32>
    %219 = tpu.matmul %217, %218, %cst_119 {dimension_numbers = #tpu.dot_dimension_numbers<[1], [0], [0], [1], [0, 0, 1, 1], [], []>, precision = #tpu.contract_precision<fp32>} : vector<16x32xf32>, vector<32x96xf32>, vector<16x96xf32> -> vector<16x96xf32>
    %220 = arith.addf %216, %219 : vector<16x96xf32>
    %221 = vector.extract_strided_slice %220 {offsets = [0, 0], sizes = [16, 64], strides = [1, 1]} : vector<16x96xf32> to vector<16x64xf32>
    %222 = arith.negf %221 : vector<16x64xf32>
    %223 = math.exp %222 : vector<16x64xf32>
    %cst_120 = arith.constant 1.000000e+00 : f32
    %224 = vector.broadcast %cst_120 : f32 to vector<16x64xf32>
    %225 = arith.addf %224, %223 : vector<16x64xf32>
    %226 = arith.divf %224, %225 : vector<16x64xf32>
    %227 = vector.extract_strided_slice %226 {offsets = [0, 0], sizes = [16, 32], strides = [1, 1]} : vector<16x64xf32> to vector<16x32xf32>
    %228 = vector.extract_strided_slice %226 {offsets = [0, 32], sizes = [16, 32], strides = [1, 1]} : vector<16x64xf32> to vector<16x32xf32>
    %229 = vector.extract_strided_slice %220 {offsets = [0, 64], sizes = [16, 32], strides = [1, 1]} : vector<16x96xf32> to vector<16x32xf32>
    %230 = arith.mulf %228, %200 : vector<16x32xf32>
    %c168_121 = arith.constant 168 : index
    %c0_122 = arith.constant 0 : index
    %231 = vector.load %arg3[%c168_121, %c0_122] : memref<200x96xf32, #tpu.memory_space<vmem>>, vector<32x32xf32>
    %cst_123 = arith.constant dense<0.000000e+00> : vector<16x32xf32>
    %232 = tpu.matmul %230, %231, %cst_123 {dimension_numbers = #tpu.dot_dimension_numbers<[1], [0], [0], [1], [0, 0, 1, 1], [], []>, precision = #tpu.contract_precision<fp32>} : vector<16x32xf32>, vector<32x32xf32>, vector<16x32xf32> -> vector<16x32xf32>
    %233 = arith.addf %229, %232 : vector<16x32xf32>
    %234 = math.tanh %233 : vector<16x32xf32>
    %cst_124 = arith.constant 1.000000e+00 : f32
    %235 = vector.broadcast %cst_124 : f32 to vector<16x32xf32>
    %236 = arith.subf %235, %227 : vector<16x32xf32>
    %237 = arith.mulf %236, %200 : vector<16x32xf32>
    %238 = arith.mulf %227, %234 : vector<16x32xf32>
    %239 = arith.addf %237, %238 : vector<16x32xf32>
    %cst_125 = arith.constant dense<0.000000e+00> : vector<64x32xf32>
    %240 = tpu.matmul %2, %239, %cst_125 {dimension_numbers = #tpu.dot_dimension_numbers<[1], [0], [0], [1], [0, 0, 1, 1], [], []>, precision = #tpu.contract_precision<fp32>} : vector<64x16xf32>, vector<16x32xf32>, vector<64x32xf32> -> vector<64x32xf32>
    %c128_126 = arith.constant 128 : index
    %c0_127 = arith.constant 0 : index
    %241 = vector.load %arg3[%c128_126, %c0_127] : memref<200x96xf32, #tpu.memory_space<vmem>>, vector<32x96xf32>
    %cst_128 = arith.constant dense<0.000000e+00> : vector<16x96xf32>
    %242 = tpu.matmul %239, %241, %cst_128 {dimension_numbers = #tpu.dot_dimension_numbers<[1], [0], [0], [1], [0, 0, 1, 1], [], []>, precision = #tpu.contract_precision<fp32>} : vector<16x32xf32>, vector<32x96xf32>, vector<16x96xf32> -> vector<16x96xf32>
    %243 = arith.addf %5, %242 : vector<16x96xf32>
    %244 = vector.extract_strided_slice %240 {offsets = [0, 0], sizes = [16, 32], strides = [1, 1]} : vector<64x32xf32> to vector<16x32xf32>
    %c0_129 = arith.constant 0 : index
    %c0_130 = arith.constant 0 : index
    %245 = vector.load %arg3[%c0_129, %c0_130] : memref<200x96xf32, #tpu.memory_space<vmem>>, vector<32x96xf32>
    %cst_131 = arith.constant dense<0.000000e+00> : vector<16x96xf32>
    %246 = tpu.matmul %244, %245, %cst_131 {dimension_numbers = #tpu.dot_dimension_numbers<[1], [0], [0], [1], [0, 0, 1, 1], [], []>, precision = #tpu.contract_precision<fp32>} : vector<16x32xf32>, vector<32x96xf32>, vector<16x96xf32> -> vector<16x96xf32>
    %247 = arith.addf %243, %246 : vector<16x96xf32>
    %248 = vector.extract_strided_slice %240 {offsets = [16, 0], sizes = [16, 32], strides = [1, 1]} : vector<64x32xf32> to vector<16x32xf32>
    %c32_132 = arith.constant 32 : index
    %c0_133 = arith.constant 0 : index
    %249 = vector.load %arg3[%c32_132, %c0_133] : memref<200x96xf32, #tpu.memory_space<vmem>>, vector<32x96xf32>
    %cst_134 = arith.constant dense<0.000000e+00> : vector<16x96xf32>
    %250 = tpu.matmul %248, %249, %cst_134 {dimension_numbers = #tpu.dot_dimension_numbers<[1], [0], [0], [1], [0, 0, 1, 1], [], []>, precision = #tpu.contract_precision<fp32>} : vector<16x32xf32>, vector<32x96xf32>, vector<16x96xf32> -> vector<16x96xf32>
    %251 = arith.addf %247, %250 : vector<16x96xf32>
    %252 = vector.extract_strided_slice %240 {offsets = [32, 0], sizes = [16, 32], strides = [1, 1]} : vector<64x32xf32> to vector<16x32xf32>
    %c64_135 = arith.constant 64 : index
    %c0_136 = arith.constant 0 : index
    %253 = vector.load %arg3[%c64_135, %c0_136] : memref<200x96xf32, #tpu.memory_space<vmem>>, vector<32x96xf32>
    %cst_137 = arith.constant dense<0.000000e+00> : vector<16x96xf32>
    %254 = tpu.matmul %252, %253, %cst_137 {dimension_numbers = #tpu.dot_dimension_numbers<[1], [0], [0], [1], [0, 0, 1, 1], [], []>, precision = #tpu.contract_precision<fp32>} : vector<16x32xf32>, vector<32x96xf32>, vector<16x96xf32> -> vector<16x96xf32>
    %255 = arith.addf %251, %254 : vector<16x96xf32>
    %256 = vector.extract_strided_slice %240 {offsets = [48, 0], sizes = [16, 32], strides = [1, 1]} : vector<64x32xf32> to vector<16x32xf32>
    %c96_138 = arith.constant 96 : index
    %c0_139 = arith.constant 0 : index
    %257 = vector.load %arg3[%c96_138, %c0_139] : memref<200x96xf32, #tpu.memory_space<vmem>>, vector<32x96xf32>
    %cst_140 = arith.constant dense<0.000000e+00> : vector<16x96xf32>
    %258 = tpu.matmul %256, %257, %cst_140 {dimension_numbers = #tpu.dot_dimension_numbers<[1], [0], [0], [1], [0, 0, 1, 1], [], []>, precision = #tpu.contract_precision<fp32>} : vector<16x32xf32>, vector<32x96xf32>, vector<16x96xf32> -> vector<16x96xf32>
    %259 = arith.addf %255, %258 : vector<16x96xf32>
    %260 = vector.extract_strided_slice %259 {offsets = [0, 0], sizes = [16, 64], strides = [1, 1]} : vector<16x96xf32> to vector<16x64xf32>
    %261 = arith.negf %260 : vector<16x64xf32>
    %262 = math.exp %261 : vector<16x64xf32>
    %cst_141 = arith.constant 1.000000e+00 : f32
    %263 = vector.broadcast %cst_141 : f32 to vector<16x64xf32>
    %264 = arith.addf %263, %262 : vector<16x64xf32>
    %265 = arith.divf %263, %264 : vector<16x64xf32>
    %266 = vector.extract_strided_slice %265 {offsets = [0, 0], sizes = [16, 32], strides = [1, 1]} : vector<16x64xf32> to vector<16x32xf32>
    %267 = vector.extract_strided_slice %265 {offsets = [0, 32], sizes = [16, 32], strides = [1, 1]} : vector<16x64xf32> to vector<16x32xf32>
    %268 = vector.extract_strided_slice %259 {offsets = [0, 64], sizes = [16, 32], strides = [1, 1]} : vector<16x96xf32> to vector<16x32xf32>
    %269 = arith.mulf %267, %239 : vector<16x32xf32>
    %c168_142 = arith.constant 168 : index
    %c0_143 = arith.constant 0 : index
    %270 = vector.load %arg3[%c168_142, %c0_143] : memref<200x96xf32, #tpu.memory_space<vmem>>, vector<32x32xf32>
    %cst_144 = arith.constant dense<0.000000e+00> : vector<16x32xf32>
    %271 = tpu.matmul %269, %270, %cst_144 {dimension_numbers = #tpu.dot_dimension_numbers<[1], [0], [0], [1], [0, 0, 1, 1], [], []>, precision = #tpu.contract_precision<fp32>} : vector<16x32xf32>, vector<32x32xf32>, vector<16x32xf32> -> vector<16x32xf32>
    %272 = arith.addf %268, %271 : vector<16x32xf32>
    %273 = math.tanh %272 : vector<16x32xf32>
    %cst_145 = arith.constant 1.000000e+00 : f32
    %274 = vector.broadcast %cst_145 : f32 to vector<16x32xf32>
    %275 = arith.subf %274, %266 : vector<16x32xf32>
    %276 = arith.mulf %275, %239 : vector<16x32xf32>
    %277 = arith.mulf %266, %273 : vector<16x32xf32>
    %278 = arith.addf %276, %277 : vector<16x32xf32>
    %cst_146 = arith.constant dense<0.000000e+00> : vector<64x32xf32>
    %279 = tpu.matmul %2, %278, %cst_146 {dimension_numbers = #tpu.dot_dimension_numbers<[1], [0], [0], [1], [0, 0, 1, 1], [], []>, precision = #tpu.contract_precision<fp32>} : vector<64x16xf32>, vector<16x32xf32>, vector<64x32xf32> -> vector<64x32xf32>
    %c128_147 = arith.constant 128 : index
    %c0_148 = arith.constant 0 : index
    %280 = vector.load %arg3[%c128_147, %c0_148] : memref<200x96xf32, #tpu.memory_space<vmem>>, vector<32x96xf32>
    %cst_149 = arith.constant dense<0.000000e+00> : vector<16x96xf32>
    %281 = tpu.matmul %278, %280, %cst_149 {dimension_numbers = #tpu.dot_dimension_numbers<[1], [0], [0], [1], [0, 0, 1, 1], [], []>, precision = #tpu.contract_precision<fp32>} : vector<16x32xf32>, vector<32x96xf32>, vector<16x96xf32> -> vector<16x96xf32>
    %282 = arith.addf %5, %281 : vector<16x96xf32>
    %283 = vector.extract_strided_slice %279 {offsets = [0, 0], sizes = [16, 32], strides = [1, 1]} : vector<64x32xf32> to vector<16x32xf32>
    %c0_150 = arith.constant 0 : index
    %c0_151 = arith.constant 0 : index
    %284 = vector.load %arg3[%c0_150, %c0_151] : memref<200x96xf32, #tpu.memory_space<vmem>>, vector<32x96xf32>
    %cst_152 = arith.constant dense<0.000000e+00> : vector<16x96xf32>
    %285 = tpu.matmul %283, %284, %cst_152 {dimension_numbers = #tpu.dot_dimension_numbers<[1], [0], [0], [1], [0, 0, 1, 1], [], []>, precision = #tpu.contract_precision<fp32>} : vector<16x32xf32>, vector<32x96xf32>, vector<16x96xf32> -> vector<16x96xf32>
    %286 = arith.addf %282, %285 : vector<16x96xf32>
    %287 = vector.extract_strided_slice %279 {offsets = [16, 0], sizes = [16, 32], strides = [1, 1]} : vector<64x32xf32> to vector<16x32xf32>
    %c32_153 = arith.constant 32 : index
    %c0_154 = arith.constant 0 : index
    %288 = vector.load %arg3[%c32_153, %c0_154] : memref<200x96xf32, #tpu.memory_space<vmem>>, vector<32x96xf32>
    %cst_155 = arith.constant dense<0.000000e+00> : vector<16x96xf32>
    %289 = tpu.matmul %287, %288, %cst_155 {dimension_numbers = #tpu.dot_dimension_numbers<[1], [0], [0], [1], [0, 0, 1, 1], [], []>, precision = #tpu.contract_precision<fp32>} : vector<16x32xf32>, vector<32x96xf32>, vector<16x96xf32> -> vector<16x96xf32>
    %290 = arith.addf %286, %289 : vector<16x96xf32>
    %291 = vector.extract_strided_slice %279 {offsets = [32, 0], sizes = [16, 32], strides = [1, 1]} : vector<64x32xf32> to vector<16x32xf32>
    %c64_156 = arith.constant 64 : index
    %c0_157 = arith.constant 0 : index
    %292 = vector.load %arg3[%c64_156, %c0_157] : memref<200x96xf32, #tpu.memory_space<vmem>>, vector<32x96xf32>
    %cst_158 = arith.constant dense<0.000000e+00> : vector<16x96xf32>
    %293 = tpu.matmul %291, %292, %cst_158 {dimension_numbers = #tpu.dot_dimension_numbers<[1], [0], [0], [1], [0, 0, 1, 1], [], []>, precision = #tpu.contract_precision<fp32>} : vector<16x32xf32>, vector<32x96xf32>, vector<16x96xf32> -> vector<16x96xf32>
    %294 = arith.addf %290, %293 : vector<16x96xf32>
    %295 = vector.extract_strided_slice %279 {offsets = [48, 0], sizes = [16, 32], strides = [1, 1]} : vector<64x32xf32> to vector<16x32xf32>
    %c96_159 = arith.constant 96 : index
    %c0_160 = arith.constant 0 : index
    %296 = vector.load %arg3[%c96_159, %c0_160] : memref<200x96xf32, #tpu.memory_space<vmem>>, vector<32x96xf32>
    %cst_161 = arith.constant dense<0.000000e+00> : vector<16x96xf32>
    %297 = tpu.matmul %295, %296, %cst_161 {dimension_numbers = #tpu.dot_dimension_numbers<[1], [0], [0], [1], [0, 0, 1, 1], [], []>, precision = #tpu.contract_precision<fp32>} : vector<16x32xf32>, vector<32x96xf32>, vector<16x96xf32> -> vector<16x96xf32>
    %298 = arith.addf %294, %297 : vector<16x96xf32>
    %299 = vector.extract_strided_slice %298 {offsets = [0, 0], sizes = [16, 64], strides = [1, 1]} : vector<16x96xf32> to vector<16x64xf32>
    %300 = arith.negf %299 : vector<16x64xf32>
    %301 = math.exp %300 : vector<16x64xf32>
    %cst_162 = arith.constant 1.000000e+00 : f32
    %302 = vector.broadcast %cst_162 : f32 to vector<16x64xf32>
    %303 = arith.addf %302, %301 : vector<16x64xf32>
    %304 = arith.divf %302, %303 : vector<16x64xf32>
    %305 = vector.extract_strided_slice %304 {offsets = [0, 0], sizes = [16, 32], strides = [1, 1]} : vector<16x64xf32> to vector<16x32xf32>
    %306 = vector.extract_strided_slice %304 {offsets = [0, 32], sizes = [16, 32], strides = [1, 1]} : vector<16x64xf32> to vector<16x32xf32>
    %307 = vector.extract_strided_slice %298 {offsets = [0, 64], sizes = [16, 32], strides = [1, 1]} : vector<16x96xf32> to vector<16x32xf32>
    %308 = arith.mulf %306, %278 : vector<16x32xf32>
    %c168_163 = arith.constant 168 : index
    %c0_164 = arith.constant 0 : index
    %309 = vector.load %arg3[%c168_163, %c0_164] : memref<200x96xf32, #tpu.memory_space<vmem>>, vector<32x32xf32>
    %cst_165 = arith.constant dense<0.000000e+00> : vector<16x32xf32>
    %310 = tpu.matmul %308, %309, %cst_165 {dimension_numbers = #tpu.dot_dimension_numbers<[1], [0], [0], [1], [0, 0, 1, 1], [], []>, precision = #tpu.contract_precision<fp32>} : vector<16x32xf32>, vector<32x32xf32>, vector<16x32xf32> -> vector<16x32xf32>
    %311 = arith.addf %307, %310 : vector<16x32xf32>
    %312 = math.tanh %311 : vector<16x32xf32>
    %cst_166 = arith.constant 1.000000e+00 : f32
    %313 = vector.broadcast %cst_166 : f32 to vector<16x32xf32>
    %314 = arith.subf %313, %305 : vector<16x32xf32>
    %315 = arith.mulf %314, %278 : vector<16x32xf32>
    %316 = arith.mulf %305, %312 : vector<16x32xf32>
    %317 = arith.addf %315, %316 : vector<16x32xf32>
    %cst_167 = arith.constant dense<0.000000e+00> : vector<64x32xf32>
    %318 = tpu.matmul %2, %317, %cst_167 {dimension_numbers = #tpu.dot_dimension_numbers<[1], [0], [0], [1], [0, 0, 1, 1], [], []>, precision = #tpu.contract_precision<fp32>} : vector<64x16xf32>, vector<16x32xf32>, vector<64x32xf32> -> vector<64x32xf32>
    %c128_168 = arith.constant 128 : index
    %c0_169 = arith.constant 0 : index
    %319 = vector.load %arg3[%c128_168, %c0_169] : memref<200x96xf32, #tpu.memory_space<vmem>>, vector<32x96xf32>
    %cst_170 = arith.constant dense<0.000000e+00> : vector<16x96xf32>
    %320 = tpu.matmul %317, %319, %cst_170 {dimension_numbers = #tpu.dot_dimension_numbers<[1], [0], [0], [1], [0, 0, 1, 1], [], []>, precision = #tpu.contract_precision<fp32>} : vector<16x32xf32>, vector<32x96xf32>, vector<16x96xf32> -> vector<16x96xf32>
    %321 = arith.addf %5, %320 : vector<16x96xf32>
    %322 = vector.extract_strided_slice %318 {offsets = [0, 0], sizes = [16, 32], strides = [1, 1]} : vector<64x32xf32> to vector<16x32xf32>
    %c0_171 = arith.constant 0 : index
    %c0_172 = arith.constant 0 : index
    %323 = vector.load %arg3[%c0_171, %c0_172] : memref<200x96xf32, #tpu.memory_space<vmem>>, vector<32x96xf32>
    %cst_173 = arith.constant dense<0.000000e+00> : vector<16x96xf32>
    %324 = tpu.matmul %322, %323, %cst_173 {dimension_numbers = #tpu.dot_dimension_numbers<[1], [0], [0], [1], [0, 0, 1, 1], [], []>, precision = #tpu.contract_precision<fp32>} : vector<16x32xf32>, vector<32x96xf32>, vector<16x96xf32> -> vector<16x96xf32>
    %325 = arith.addf %321, %324 : vector<16x96xf32>
    %326 = vector.extract_strided_slice %318 {offsets = [16, 0], sizes = [16, 32], strides = [1, 1]} : vector<64x32xf32> to vector<16x32xf32>
    %c32_174 = arith.constant 32 : index
    %c0_175 = arith.constant 0 : index
    %327 = vector.load %arg3[%c32_174, %c0_175] : memref<200x96xf32, #tpu.memory_space<vmem>>, vector<32x96xf32>
    %cst_176 = arith.constant dense<0.000000e+00> : vector<16x96xf32>
    %328 = tpu.matmul %326, %327, %cst_176 {dimension_numbers = #tpu.dot_dimension_numbers<[1], [0], [0], [1], [0, 0, 1, 1], [], []>, precision = #tpu.contract_precision<fp32>} : vector<16x32xf32>, vector<32x96xf32>, vector<16x96xf32> -> vector<16x96xf32>
    %329 = arith.addf %325, %328 : vector<16x96xf32>
    %330 = vector.extract_strided_slice %318 {offsets = [32, 0], sizes = [16, 32], strides = [1, 1]} : vector<64x32xf32> to vector<16x32xf32>
    %c64_177 = arith.constant 64 : index
    %c0_178 = arith.constant 0 : index
    %331 = vector.load %arg3[%c64_177, %c0_178] : memref<200x96xf32, #tpu.memory_space<vmem>>, vector<32x96xf32>
    %cst_179 = arith.constant dense<0.000000e+00> : vector<16x96xf32>
    %332 = tpu.matmul %330, %331, %cst_179 {dimension_numbers = #tpu.dot_dimension_numbers<[1], [0], [0], [1], [0, 0, 1, 1], [], []>, precision = #tpu.contract_precision<fp32>} : vector<16x32xf32>, vector<32x96xf32>, vector<16x96xf32> -> vector<16x96xf32>
    %333 = arith.addf %329, %332 : vector<16x96xf32>
    %334 = vector.extract_strided_slice %318 {offsets = [48, 0], sizes = [16, 32], strides = [1, 1]} : vector<64x32xf32> to vector<16x32xf32>
    %c96_180 = arith.constant 96 : index
    %c0_181 = arith.constant 0 : index
    %335 = vector.load %arg3[%c96_180, %c0_181] : memref<200x96xf32, #tpu.memory_space<vmem>>, vector<32x96xf32>
    %cst_182 = arith.constant dense<0.000000e+00> : vector<16x96xf32>
    %336 = tpu.matmul %334, %335, %cst_182 {dimension_numbers = #tpu.dot_dimension_numbers<[1], [0], [0], [1], [0, 0, 1, 1], [], []>, precision = #tpu.contract_precision<fp32>} : vector<16x32xf32>, vector<32x96xf32>, vector<16x96xf32> -> vector<16x96xf32>
    %337 = arith.addf %333, %336 : vector<16x96xf32>
    %338 = vector.extract_strided_slice %337 {offsets = [0, 0], sizes = [16, 64], strides = [1, 1]} : vector<16x96xf32> to vector<16x64xf32>
    %339 = arith.negf %338 : vector<16x64xf32>
    %340 = math.exp %339 : vector<16x64xf32>
    %cst_183 = arith.constant 1.000000e+00 : f32
    %341 = vector.broadcast %cst_183 : f32 to vector<16x64xf32>
    %342 = arith.addf %341, %340 : vector<16x64xf32>
    %343 = arith.divf %341, %342 : vector<16x64xf32>
    %344 = vector.extract_strided_slice %343 {offsets = [0, 0], sizes = [16, 32], strides = [1, 1]} : vector<16x64xf32> to vector<16x32xf32>
    %345 = vector.extract_strided_slice %343 {offsets = [0, 32], sizes = [16, 32], strides = [1, 1]} : vector<16x64xf32> to vector<16x32xf32>
    %346 = vector.extract_strided_slice %337 {offsets = [0, 64], sizes = [16, 32], strides = [1, 1]} : vector<16x96xf32> to vector<16x32xf32>
    %347 = arith.mulf %345, %317 : vector<16x32xf32>
    %c168_184 = arith.constant 168 : index
    %c0_185 = arith.constant 0 : index
    %348 = vector.load %arg3[%c168_184, %c0_185] : memref<200x96xf32, #tpu.memory_space<vmem>>, vector<32x32xf32>
    %cst_186 = arith.constant dense<0.000000e+00> : vector<16x32xf32>
    %349 = tpu.matmul %347, %348, %cst_186 {dimension_numbers = #tpu.dot_dimension_numbers<[1], [0], [0], [1], [0, 0, 1, 1], [], []>, precision = #tpu.contract_precision<fp32>} : vector<16x32xf32>, vector<32x32xf32>, vector<16x32xf32> -> vector<16x32xf32>
    %350 = arith.addf %346, %349 : vector<16x32xf32>
    %351 = math.tanh %350 : vector<16x32xf32>
    %cst_187 = arith.constant 1.000000e+00 : f32
    %352 = vector.broadcast %cst_187 : f32 to vector<16x32xf32>
    %353 = arith.subf %352, %344 : vector<16x32xf32>
    %354 = arith.mulf %353, %317 : vector<16x32xf32>
    %355 = arith.mulf %344, %351 : vector<16x32xf32>
    %356 = arith.addf %354, %355 : vector<16x32xf32>
    %cst_188 = arith.constant dense<0.000000e+00> : vector<64x32xf32>
    %357 = tpu.matmul %2, %356, %cst_188 {dimension_numbers = #tpu.dot_dimension_numbers<[1], [0], [0], [1], [0, 0, 1, 1], [], []>, precision = #tpu.contract_precision<fp32>} : vector<64x16xf32>, vector<16x32xf32>, vector<64x32xf32> -> vector<64x32xf32>
    %c128_189 = arith.constant 128 : index
    %c0_190 = arith.constant 0 : index
    %358 = vector.load %arg3[%c128_189, %c0_190] : memref<200x96xf32, #tpu.memory_space<vmem>>, vector<32x96xf32>
    %cst_191 = arith.constant dense<0.000000e+00> : vector<16x96xf32>
    %359 = tpu.matmul %356, %358, %cst_191 {dimension_numbers = #tpu.dot_dimension_numbers<[1], [0], [0], [1], [0, 0, 1, 1], [], []>, precision = #tpu.contract_precision<fp32>} : vector<16x32xf32>, vector<32x96xf32>, vector<16x96xf32> -> vector<16x96xf32>
    %360 = arith.addf %5, %359 : vector<16x96xf32>
    %361 = vector.extract_strided_slice %357 {offsets = [0, 0], sizes = [16, 32], strides = [1, 1]} : vector<64x32xf32> to vector<16x32xf32>
    %c0_192 = arith.constant 0 : index
    %c0_193 = arith.constant 0 : index
    %362 = vector.load %arg3[%c0_192, %c0_193] : memref<200x96xf32, #tpu.memory_space<vmem>>, vector<32x96xf32>
    %cst_194 = arith.constant dense<0.000000e+00> : vector<16x96xf32>
    %363 = tpu.matmul %361, %362, %cst_194 {dimension_numbers = #tpu.dot_dimension_numbers<[1], [0], [0], [1], [0, 0, 1, 1], [], []>, precision = #tpu.contract_precision<fp32>} : vector<16x32xf32>, vector<32x96xf32>, vector<16x96xf32> -> vector<16x96xf32>
    %364 = arith.addf %360, %363 : vector<16x96xf32>
    %365 = vector.extract_strided_slice %357 {offsets = [16, 0], sizes = [16, 32], strides = [1, 1]} : vector<64x32xf32> to vector<16x32xf32>
    %c32_195 = arith.constant 32 : index
    %c0_196 = arith.constant 0 : index
    %366 = vector.load %arg3[%c32_195, %c0_196] : memref<200x96xf32, #tpu.memory_space<vmem>>, vector<32x96xf32>
    %cst_197 = arith.constant dense<0.000000e+00> : vector<16x96xf32>
    %367 = tpu.matmul %365, %366, %cst_197 {dimension_numbers = #tpu.dot_dimension_numbers<[1], [0], [0], [1], [0, 0, 1, 1], [], []>, precision = #tpu.contract_precision<fp32>} : vector<16x32xf32>, vector<32x96xf32>, vector<16x96xf32> -> vector<16x96xf32>
    %368 = arith.addf %364, %367 : vector<16x96xf32>
    %369 = vector.extract_strided_slice %357 {offsets = [32, 0], sizes = [16, 32], strides = [1, 1]} : vector<64x32xf32> to vector<16x32xf32>
    %c64_198 = arith.constant 64 : index
    %c0_199 = arith.constant 0 : index
    %370 = vector.load %arg3[%c64_198, %c0_199] : memref<200x96xf32, #tpu.memory_space<vmem>>, vector<32x96xf32>
    %cst_200 = arith.constant dense<0.000000e+00> : vector<16x96xf32>
    %371 = tpu.matmul %369, %370, %cst_200 {dimension_numbers = #tpu.dot_dimension_numbers<[1], [0], [0], [1], [0, 0, 1, 1], [], []>, precision = #tpu.contract_precision<fp32>} : vector<16x32xf32>, vector<32x96xf32>, vector<16x96xf32> -> vector<16x96xf32>
    %372 = arith.addf %368, %371 : vector<16x96xf32>
    %373 = vector.extract_strided_slice %357 {offsets = [48, 0], sizes = [16, 32], strides = [1, 1]} : vector<64x32xf32> to vector<16x32xf32>
    %c96_201 = arith.constant 96 : index
    %c0_202 = arith.constant 0 : index
    %374 = vector.load %arg3[%c96_201, %c0_202] : memref<200x96xf32, #tpu.memory_space<vmem>>, vector<32x96xf32>
    %cst_203 = arith.constant dense<0.000000e+00> : vector<16x96xf32>
    %375 = tpu.matmul %373, %374, %cst_203 {dimension_numbers = #tpu.dot_dimension_numbers<[1], [0], [0], [1], [0, 0, 1, 1], [], []>, precision = #tpu.contract_precision<fp32>} : vector<16x32xf32>, vector<32x96xf32>, vector<16x96xf32> -> vector<16x96xf32>
    %376 = arith.addf %372, %375 : vector<16x96xf32>
    %377 = vector.extract_strided_slice %376 {offsets = [0, 0], sizes = [16, 64], strides = [1, 1]} : vector<16x96xf32> to vector<16x64xf32>
    %378 = arith.negf %377 : vector<16x64xf32>
    %379 = math.exp %378 : vector<16x64xf32>
    %cst_204 = arith.constant 1.000000e+00 : f32
    %380 = vector.broadcast %cst_204 : f32 to vector<16x64xf32>
    %381 = arith.addf %380, %379 : vector<16x64xf32>
    %382 = arith.divf %380, %381 : vector<16x64xf32>
    %383 = vector.extract_strided_slice %382 {offsets = [0, 0], sizes = [16, 32], strides = [1, 1]} : vector<16x64xf32> to vector<16x32xf32>
    %384 = vector.extract_strided_slice %382 {offsets = [0, 32], sizes = [16, 32], strides = [1, 1]} : vector<16x64xf32> to vector<16x32xf32>
    %385 = vector.extract_strided_slice %376 {offsets = [0, 64], sizes = [16, 32], strides = [1, 1]} : vector<16x96xf32> to vector<16x32xf32>
    %386 = arith.mulf %384, %356 : vector<16x32xf32>
    %c168_205 = arith.constant 168 : index
    %c0_206 = arith.constant 0 : index
    %387 = vector.load %arg3[%c168_205, %c0_206] : memref<200x96xf32, #tpu.memory_space<vmem>>, vector<32x32xf32>
    %cst_207 = arith.constant dense<0.000000e+00> : vector<16x32xf32>
    %388 = tpu.matmul %386, %387, %cst_207 {dimension_numbers = #tpu.dot_dimension_numbers<[1], [0], [0], [1], [0, 0, 1, 1], [], []>, precision = #tpu.contract_precision<fp32>} : vector<16x32xf32>, vector<32x32xf32>, vector<16x32xf32> -> vector<16x32xf32>
    %389 = arith.addf %385, %388 : vector<16x32xf32>
    %390 = math.tanh %389 : vector<16x32xf32>
    %cst_208 = arith.constant 1.000000e+00 : f32
    %391 = vector.broadcast %cst_208 : f32 to vector<16x32xf32>
    %392 = arith.subf %391, %383 : vector<16x32xf32>
    %393 = arith.mulf %392, %356 : vector<16x32xf32>
    %394 = arith.mulf %383, %390 : vector<16x32xf32>
    %395 = arith.addf %393, %394 : vector<16x32xf32>
    %c0_209 = arith.constant 0 : index
    %c0_210 = arith.constant 0 : index
    %c0_211 = arith.constant 0 : index
    %396 = vector.load %arg4[%c0_209, %c0_210, %c0_211] : memref<1x16x32xf32, #tpu.memory_space<vmem>>, vector<1x16x32xf32>
    %397 = vector.shape_cast %396 : vector<1x16x32xf32> to vector<16x32xf32>
    %398 = vector.shape_cast %395 : vector<16x32xf32> to vector<1x16x32xf32>
    tpu.vector_store %arg4[%c0_209, %c0_210, %c0_211], %398 {strides = array<i32>} : memref<1x16x32xf32, #tpu.memory_space<vmem>>, vector<1x16x32xf32>,
    return
  }
  func.func @transform_0(%arg0: i32) -> (i32, i32, i32) {
    %c0_i32 = arith.constant 0 : i32
    %c0_i32_0 = arith.constant 0 : i32
    %c0_i32_1 = arith.constant 0 : i32
    return %arg0, %c0_i32, %c0_i32_0 : i32, i32, i32
  }
  func.func @transform_1(%arg0: i32) -> (i32, i32) {
    %c0_i32 = arith.constant 0 : i32
    %c0_i32_0 = arith.constant 0 : i32
    %c0_i32_1 = arith.constant 0 : i32
    return %c0_i32, %c0_i32_0 : i32, i32
  }
  func.func @transform_2(%arg0: i32) -> (i32, i32) {
    %c0_i32 = arith.constant 0 : i32
    %c0_i32_0 = arith.constant 0 : i32
    %c0_i32_1 = arith.constant 0 : i32
    return %c0_i32, %c0_i32_0 : i32, i32
  }
  func.func @transform_3(%arg0: i32) -> (i32, i32, i32) {
    %c0_i32 = arith.constant 0 : i32
    %c0_i32_0 = arith.constant 0 : i32
    %c0_i32_1 = arith.constant 0 : i32
    return %arg0, %c0_i32, %c0_i32_0 : i32, i32, i32
  }
}

</mosaic_0001>

<bundles_post_ra>
// kernel: tpu_custom_call.1
= control target key start
LH: loop header
LB: loop body
LE: loop exit
PB: predicated region body
PF: predicated region fallthrough
CT: control target
= control target key end

     0   :  { %8 = vsyncpa [#allocation3], 0  ;;  %s55904_s0 = inlined_call_operand.vmem [shape: f32[4,16,32], index: 0, kind: input, shape index: {}]   ;;  %s55905_s1 = inlined_call_operand.vmem [shape: f32[64,16], index: 1, kind: input, shape index: {}]   ;;  %s55906_s2 = inlined_call_operand.vmem [shape: f32[200,96], index: 2, kind: input, shape index: {}]   ;;  %s55907_s3 = inlined_call_operand.hbm [shape: f32[4,16,32], index: 3, kind: output, shape index: {}]  }
   0x1   :  { %10 = vsyncpa [#allocation3 + $0x1], 0  ;;  %s52767_s12 = smov 0   ;;  %s52769_s13 = smov 0  }
   0x2   :  { %s52771_s14 = smov 0   ;;  %s52773_s15 = smov 0  }
   0x3 LB: > { %s52788_s16 = sadd.s32 4294967295, %s52739_s15   ;;  %s40572_s17 = sadd.s32 4294967294, %s52739_s15   ;;  %s52739_s15 = sphi %s52773_s15, %s56642_s15   ;;  %s52735_s14 = sphi %s52771_s14, %s56641_s14   ;;  %s52731_s13 = sphi %s52769_s13, %s56640_s13   ;;  %s52727_s12 = sphi %s52767_s12, %s56639_s12  }
   0x4   : > { %s52792_s18 = sadd.s32 1, %s52739_s15   ;;  %s91_s19 = sadd.s32 1, %s52735_s14 }
   0x5   : > { %s88_s20 = ssub.s32 %s52739_s15, %s52792_s18  ;;  %p101_p0 = scmp.ne.s32.totalorder %s52735_s14, %s52731_s13 }
   0x6   : > { %p89_p1 = scmp.eq.s32.totalorder %s88_s20, 0  ;;  %p102_p2 = scmp.eq.s32.totalorder %s52788_s16, 3 }
   0x7   : > { %p107_p3 = scmp.ne.s32.totalorder %s52731_s13, %s52727_s12  ;;  %p108_p4 = scmp.eq.s32.totalorder %s40572_s17, 3 }
   0x8   : > { %s52803_s21 = scalar_select %p89_p1, %s52735_s14, %s91_s19  }
   0x9   : > { %p52805_p5 = por %p102_p2, %p101_p0  ;;  %p52809_p6 = por %p108_p4, %p107_p3 }
   0xa   : > { %p40575_p7 = scmp.ge.s32.totalorder %s52739_s15, 1  ;;  %p140_p8 = scmp.lt.s32.totalorder %s52739_s15, 5 }
   0xc   : > { %p141_p9 = pnand %p40575_p7, %p140_p8 }
   0xe   : > { %144 = sbr.rel (%p141_p9) target bundleno = 13696 (0x3580), region = 32 }
  0x15   : > { %p164_p10 = scmp.lt.s32.totalorder %s52788_s16, 3  ;;  %v171_v0 = vld [vmem:[%s55905_s1] sm:$0xff]  ;;  %vm184_vm0 = vcmask 130048   ;;  %v172_v1 = vld [vmem:[%s55905_s1 + $0x8] sm:$0xff]  ;;  %v173_v2 = vld [vmem:[%s55905_s1 + $0x10] sm:$0xff]  ;;  %vm973_vm1 = vcmask 261120  }
  0x16   : > { %v186_v3 = vsel %vm184_vm0, %v171_v0, 0  ;;  %v189_v4 = vsel %vm184_vm0, %v172_v1, 0  ;;  %v192_v5 = vsel %vm184_vm0, %v173_v2, 0  ;;  %v174_v6 = vld [vmem:[%s55905_s1 + $0x18] sm:$0xff]  ;;  %v175_v7 = vld [vmem:[%s55905_s1 + $0x20] sm:$0xff]  ;;  %v176_v8 = vld [vmem:[%s55905_s1 + $0x28] sm:$0xff] }
  0x17   : > { %s165_s9 = scalar_select %p164_p10, %s52788_s16, 3  ;;  %v52838_v9 = vand.u32 4294901760, %v186_v3  ;;  %v52840_v10 = vand.u32 4294901760, %v189_v4  ;;  %v52842_v11 = vand.u32 4294901760, %v192_v5  ;;  %v195_v12 = vsel %vm184_vm0, %v174_v6, 0  ;;  %v177_v13 = vld [vmem:[%s55905_s1 + $0x30] sm:$0xff] }
  0x18   : > { %v52848_v14 = vand.u32 4294901760, %v195_v12  ;;  %v198_v15 = vsel %vm184_vm0, %v175_v7, 0  ;;  %v201_v16 = vsel %vm184_vm0, %v176_v8, 0  ;;  %v204_v17 = vsel %vm184_vm0, %v177_v13, 0  ;;  %v178_v31 = vld [vmem:[%s55905_s1 + $0x38] sm:$0xff]  ;;  %v969_v8 = vld [vmem:[%s55906_s2 + $0x80] sm:$0xff] }
  0x19   : > { %s40605_s17 = sshll.u32 %s165_s9, 4  ;;  %v52854_v18 = vsub.f32 %v186_v3, %v52838_v9  ;;  %v52857_v19 = vsub.f32 %v189_v4, %v52840_v10  ;;  %v52860_v20 = vsub.f32 %v192_v5, %v52842_v11  ;;  %v52862_v21 = vand.u32 4294901760, %v198_v15  ;;  %43451 = vmatprep.mubr.f32.mxu0 %v52838_v9  ;;  %s52741_s7 = smov 32  }
  0x1a   : > { %s52868_s24 = scalar_lea.vmem %s55904_s0, %s40605_s17  ;;  %v52871_v22 = vsub.f32 %v195_v12, %v52848_v14  ;;  %v52873_v23 = vand.u32 4294901760, %v201_v16  ;;  %v52875_v24 = vand.u32 4294901760, %v204_v17  ;;  %v207_v43 = vsel %vm184_vm0, %v178_v31, 0  ;;  %v970_v12 = vld [vmem:[%s55906_s2 + $0x88] sm:$0xff]  ;;  %s52742_s28 = smov 96  }
  0x1b   : > { %v52878_v25 = vld [vmem:[%s52868_s24] sm:$0xff]  ;;  %v52881_v26 = vld [vmem:[%s52868_s24 + $0x8] sm:$0xff]  ;;  %v52884_v27 = vand.u32 4294901760, %v52854_v18  ;;  %v52887_v28 = vand.u32 4294901760, %v52857_v19  ;;  %v52890_v29 = vand.u32 4294901760, %v52860_v20  ;;  %v52893_v30 = vsub.f32 %v198_v15, %v52862_v21  ;;  %s52743_s29 = smov 64  }
  0x1c   : > { %56237 = vst [vmem:[#allocation5_spill] sm:$0xff] %v52871_v22  ;;  %v210_v32 = vand.u32 4294901760, %v52878_v25  ;;  %v213_v33 = vand.u32 4294901760, %v52881_v26  ;;  %v52901_v34 = vand.u32 4294901760, %v52871_v22  ;;  %v52904_v35 = vsub.f32 %v201_v16, %v52873_v23  ;;  %3682 = vrot.lane.b32.xlu0 %v52878_v25, %s52741_s7  ;;  %s40606_s20 = sshll.u32 %s52788_s16, 8 }
  0x1d   : > { %56238 = vst [vmem:[#allocation6_spill] sm:$0xff] %v52884_v27  ;;  %56239 = vst [vmem:[#allocation7_spill] sm:$0xff] %v52887_v28  ;;  %v279_v36 = vsub.f32 %v52854_v18, %v52884_v27  ;;  %v289_v37 = vsub.f32 %v52857_v19, %v52887_v28  ;;  %v299_v38 = vsub.f32 %v52860_v20, %v52890_v29  ;;  %v52913_v39 = vand.u32 4294901760, %v52893_v30  ;;  %s55857_s27 = scalar_lea.hbm %s55907_s3, %s40606_s20 }
  0x1e   : > { %56240 = vst [vmem:[#allocation8_spill] sm:$0xff] %v52890_v29  ;;  %56241 = vst [vmem:[#allocation9_spill] sm:$0xff] %v52893_v30  ;;  %v52915_v40 = vpack.c.bf16 %v213_v33, %v210_v32  ;;  %v52918_v41 = vsub.f32 %v52878_v25, %v210_v32  ;;  %v52921_v42 = vsub.f32 %v52881_v26, %v213_v33  ;;  %v52934_v49 = vand.u32 4294901760, %v52904_v35  ;;  %v971_v32 = vld [vmem:[%s55906_s2 + $0x90] sm:$0xff]  ;;  %v972_v33 = vld [vmem:[%s55906_s2 + $0x98] sm:$0xff] }
  0x1f   : > { %56242 = vst [vmem:[#allocation10_spill] sm:$0xff] %v52901_v34  ;;  %56243 = vst [vmem:[#allocation11_spill] sm:$0xff] %v52904_v35  ;;  %v52924_v44 = vand.u32 4294901760, %v279_v36  ;;  %v309_v45 = vsub.f32 %v52871_v22, %v52901_v34  ;;  %v52929_v46 = vand.u32 4294901760, %v289_v37  ;;  %v52939_v50 = vand.u32 4294901760, %v299_v38 }
  0x20   : > { %56244 = vst [vmem:[#allocation12_spill] sm:$0xff] %v52913_v39  ;;  %48288 = vmatprep.subr.bf16.mxu1 %v52915_v40  ;;  %v359_v47 = vand.u32 4294901760, %v52918_v41  ;;  %v366_v48 = vand.u32 4294901760, %v52921_v42  ;;  %56246 = vst [vmem:[#allocation14_spill] sm:$0xff] %v52934_v49  ;;  %48308 = vmatprep.subr.bf16.mxu0 %v52915_v40  ;;  %v319_v51 = vsub.f32 %v52893_v30, %v52913_v39  ;;  %v52946_v53 = vand.u32 4294901760, %v207_v43 }
  0x21   : > { %56245 = vst [vmem:[#allocation13_spill] sm:$0xff] %v52924_v44  ;;  %48290 = vmatpush3.bf16.msra.mxu1 %v52915_v40  ;;  %43371 = vmatprep.mubr.f32.mxu1 %v52924_v44  ;;  %v52944_v52 = vsub.f32 %v204_v17, %v52875_v24  ;;  %v52958_v58 = vand.u32 4294901760, %v309_v45  ;;  %v329_v61 = vsub.f32 %v52904_v35, %v52934_v49  ;;  %v981_v13 = vand.u32 4294901760, %v969_v8 }
  0x22   : > { %v360_v54 = vsub.f32 %v52918_v41, %v359_v47  ;;  %v367_v55 = vsub.f32 %v52921_v42, %v366_v48  ;;  %48310 = vmatpush3.bf16.msra.mxu0 %v52915_v40  ;;  %v52955_v57 = vsub.f32 %v207_v43, %v52946_v53  ;;  %v52963_v62 = vand.u32 4294901760, %v319_v51  ;;  %3684 = vrot.lane.b32.xlu0 %v52881_v26, %s52741_s7 }
  0x23   : > { %56247 = vst [vmem:[#allocation15_spill] sm:$0xff] %v52944_v52  ;;  %v52952_v56 = vand.u32 4294901760, %v52944_v52  ;;  %v48295_v2 = vpack.c.bf16 %v52921_v42, %v52918_v41  ;;  %v52975_v3 = vand.u32 4294901760, %v329_v61  ;;  %v48303_v7 = vpack.c.bf16 %v366_v48, %v359_v47 }
  0x24   : > { %56249 = vst [vmem:[#allocation17_spill] sm:$0xff] %v52955_v57  ;;  %43372 = vmatmul.mubr.f32.vlgmr.msra.gmra.mrb[0].mxu1 %v52929_v46  ;;  %v361_v59 = vand.u32 4294901760, %v360_v54  ;;  %v368_v60 = vand.u32 4294901760, %v367_v55  ;;  %v52968_v0 = vand.u32 4294901760, %v52955_v57  ;;  %v984_v15 = vand.u32 4294901760, %v970_v12 }
  0x25   : > { %56248 = vst [vmem:[#allocation16_spill] sm:$0xff] %v52952_v56  ;;  %43374 = vmatprep.mubr.f32.mxu1 %v52939_v50  ;;  %v339_v63 = vsub.f32 %v52944_v52, %v52952_v56  ;;  %43452 = vmatmul.mubr.f32.vlgmr.msra.gmra.mrb[0].mxu0 %v52840_v10  ;;  %v53022_v17 = vsub.f32 %v969_v8, %v981_v13  ;;  %v975_v36 = vsel %vm973_vm1, %v52878_v25, 0  ;;  %v990_v41 = vand.u32 4294901760, %v972_v33  ;;  %v2591_v25 = vld [vmem:[%s55906_s2 + $0x48] sm:$0xff] }
  0x26   : > { %56250 = vst [vmem:[#allocation18_spill] sm:$0xff] %v52968_v0  ;;  %v48291_v1 = vpack.c.bf16 %v368_v60, %v361_v59  ;;  %43454 = vmatprep.mubr.f32.mxu0 %v52842_v11  ;;  %v349_v4 = vsub.f32 %v52955_v57, %v52968_v0  ;;  %v53017_v16 = vpack.c.bf16 %v984_v15, %v981_v13  ;;  %v53040_v42 = vand.u32 4294901760, %v975_v36 }
  0x27   : > { %v52980_v5 = vand.u32 4294901760, %v339_v63  ;;  %v53024_v31 = vsub.f32 %v970_v12, %v984_v15  ;;  %v1072_v37 = vand.u32 4294901760, %v53022_v17  ;;  %v978_v43 = vsel %vm973_vm1, %v52881_v26, 0 }
  0x28   : > { %43375 = vmatmul.mubr.f32.gmra.mrb[2].mxu1 %v52958_v58  ;;  %48292 = vmatprep.subr.bf16.mxu1 %v48291_v1  ;;  %v52985_v6 = vand.u32 4294901760, %v349_v4  ;;  %56251 = vst [vmem:[#allocation19_spill] sm:$0xff] %v53017_v16  ;;  %v53051_v48 = vand.u32 4294901760, %v978_v43  ;;  %v1050_v54 = vsub.f32 %v975_v36, %v53040_v42  ;;  %v1092_v61 = vsub.f32 %v972_v33, %v990_v41 }
  0x29   : > { %48294 = vmatpush3.bf16.msra.mxu1 %v48291_v1  ;;  %43377 = vmatprep.mubr.f32.mxu1 %v52963_v62  ;;  %v1079_v38 = vand.u32 4294901760, %v53024_v31  ;;  %v1073_v45 = vsub.f32 %v53022_v17, %v1072_v37 }
  0x2a   : > { %48296 = vmatprep.subr.bf16.mxu1 %v48295_v2  ;;  %43455 = vmatmul.mubr.f32.gmra.mrb[2].mxu0 %v52848_v14  ;;  %v1060_v63 = vsub.f32 %v978_v43, %v53051_v48  ;;  %v1051_v1 = vand.u32 4294901760, %v1050_v54 }
  0x2b   : > { %43457 = vmatprep.mubr.f32.mxu0 %v52862_v21  ;;  %v1080_v47 = vsub.f32 %v53024_v31, %v1079_v38  ;;  %v1074_v55 = vand.u32 4294901760, %v1073_v45  ;;  %v53078_v45 = vpack.c.bf16 %v53024_v31, %v53022_v17  ;;  %v1510_v17 = vld [vmem:[%s55906_s2] sm:$0xff]  ;;  %v1511_v31 = vld [vmem:[%s55906_s2 + $0x8] sm:$0xff] }
  0x2c   : > { %43378 = vmatmul.mubr.f32.gmra.mrb[4].mxu1 %v52975_v3  ;;  %v1061_v8 = vand.u32 4294901760, %v1060_v63  ;;  %v1052_v12 = vsub.f32 %v1050_v54, %v1051_v1 }
  0x2d   : > { %43380 = vmatprep.mubr.f32.mxu1 %v52980_v5  ;;  %v1081_v59 = vand.u32 4294901760, %v1080_v47  ;;  %56255 = vst [vmem:[#allocation23_spill] sm:$0xff] %v53078_v45 }
  0x2e   : > { %43458 = vmatmul.mubr.f32.gmra.mrb[4].mxu0 %v52873_v23  ;;  %v1053_v33 = vand.u32 4294901760, %v1052_v12 }
  0x2f   : > { %43460 = vmatprep.mubr.f32.mxu0 %v52875_v24 }
  0x30   : > { %43381 = vmatmul.mubr.f32.gmra.mrb[6].mxu1 %v52985_v6 }
  0x31   : > { %43387 = vmatprep.mubr.f32.mxu1 %v52838_v9 }
  0x32   : > { %43461 = vmatmul.mubr.f32.gmra.mrb[6].mxu0 %v52946_v53 }
  0x34   : > { %43388 = vmatmul.mubr.f32.vlgmr.msra.gmra.mrb[0].mxu1 %v52840_v10 }
  0x35   : > { %43390 = vmatprep.mubr.f32.mxu1 %v52842_v11  ;;  %48298 = vmatpush3.bf16.msra.mxu1 %v48295_v2  ;;  %v53062_v2 = vpack.c.bf16 %v1081_v59, %v1074_v55  ;;  %v53095_v55 = vpack.c.bf16 %v1079_v38, %v1072_v37  ;;  %v1521_v37 = vand.u32 4294901760, %v1510_v17  ;;  %v1524_v38 = vand.u32 4294901760, %v1511_v31 }
  0x36   : > { %48300 = vmatprep.subr.bf16.mxu1 %v52915_v40 }
  0x37   : > { %56253 = vst [vmem:[#allocation21_spill] sm:$0xff] %v53062_v2  ;;  %56257 = vst [vmem:[#allocation25_spill] sm:$0xff] %v53095_v55  ;;  %v53118_v59 = vpack.c.bf16 %v1524_v38, %v1521_v37 }
  0x38   : > { %43391 = vmatmul.mubr.f32.gmra.mrb[2].mxu1 %v52848_v14 }
  0x39   : > { %43393 = vmatprep.mubr.f32.mxu1 %v52862_v21 }
  0x3c   : > { %43394 = vmatmul.mubr.f32.gmra.mrb[4].mxu1 %v52873_v23 }
  0x3d   : > { %43396 = vmatprep.mubr.f32.mxu1 %v52875_v24 }
  0x40   : > { %43397 = vmatmul.mubr.f32.gmra.mrb[6].mxu1 %v52946_v53 }
  0x41   : > { %43403 = vmatprep.mubr.f32.mxu1 %v52854_v18 }
  0x44   : > { %43404 = vmatmul.mubr.f32.vlgmr.msra.gmra.mrb[0].mxu1 %v52857_v19 }
  0x45   : > { %43406 = vmatprep.mubr.f32.mxu1 %v52860_v20  ;;  %48302 = vmatpush3.bf16.msra.mxu1 %v52915_v40  ;;  %v987_v40 = vand.u32 4294901760, %v971_v32 }
  0x46   : > { %48304 = vmatprep.subr.bf16.mxu1 %v48303_v7 }
  0x47   : > { %v53054_v51 = vpack.c.bf16 %v990_v41, %v987_v40  ;;  %v1085_v60 = vsub.f32 %v971_v32, %v987_v40  ;;  %v1062_v32 = vsub.f32 %v1060_v63, %v1061_v8 }
  0x48   : > { %43407 = vmatmul.mubr.f32.gmra.mrb[2].mxu1 %v52871_v22 }
  0x49   : > { %43409 = vmatprep.mubr.f32.mxu1 %v52893_v30  ;;  %56252 = vst [vmem:[#allocation20_spill] sm:$0xff] %v53054_v51  ;;  %v1086_v4 = vand.u32 4294901760, %v1085_v60  ;;  %v1063_v41 = vand.u32 4294901760, %v1062_v32  ;;  %v53082_v47 = vpack.c.bf16 %v1092_v61, %v1085_v60 }
  0x4b   : > { %v1087_v13 = vsub.f32 %v1085_v60, %v1086_v4  ;;  %56256 = vst [vmem:[#allocation24_spill] sm:$0xff] %v53082_v47  ;;  %v1611_v60 = vsub.f32 %v1510_v17, %v1521_v37 }
  0x4c   : > { %43410 = vmatmul.mubr.f32.gmra.mrb[4].mxu1 %v52904_v35 }
  0x4d   : > { %43412 = vmatprep.mubr.f32.mxu1 %v52944_v52  ;;  %v1088_v36 = vand.u32 4294901760, %v1087_v13 }
  0x50   : > { %43413 = vmatmul.mubr.f32.gmra.mrb[6].mxu1 %v52955_v57 }
  0x51   : > { %43419 = vmatprep.mubr.f32.mxu1 %v52884_v27 }
  0x54   : > { %43420 = vmatmul.mubr.f32.vlgmr.msra.gmra.mrb[0].mxu1 %v52887_v28 }
  0x55   : > { %43422 = vmatprep.mubr.f32.mxu1 %v52890_v29  ;;  %48306 = vmatpush3.bf16.msra.mxu1 %v48303_v7  ;;  %v1093_v7 = vand.u32 4294901760, %v1092_v61 }
  0x56   : > { %48312 = vmatprep.subr.bf16.mxu1 %v53017_v16 }
  0x57   : > { %v1094_v15 = vsub.f32 %v1092_v61, %v1093_v7  ;;  %v1512_v61 = vld [vmem:[%s55906_s2 + $0x10] sm:$0xff] }
  0x58   : > { %43423 = vmatmul.mubr.f32.gmra.mrb[2].mxu1 %v52901_v34 }
  0x59   : > { %43425 = vmatprep.mubr.f32.mxu1 %v52913_v39  ;;  %v1095_v40 = vand.u32 4294901760, %v1094_v15 }
  0x5b   : > { %v53071_v43 = vpack.c.bf16 %v1095_v40, %v1088_v36 }
  0x5c   : > { %43426 = vmatmul.mubr.f32.gmra.mrb[4].mxu1 %v52934_v49 }
  0x5d   : > { %43428 = vmatprep.mubr.f32.mxu1 %v52952_v56  ;;  %56254 = vst [vmem:[#allocation22_spill] sm:$0xff] %v53071_v43 }
  0x60   : > { %43429 = vmatmul.mubr.f32.gmra.mrb[6].mxu1 %v52968_v0 }
  0x61   : > { %43435 = vmatprep.mubr.f32.mxu1 %v52838_v9 }
  0x64   : > { %43436 = vmatmul.mubr.f32.vlgmr.msra.gmra.mrb[0].mxu1 %v52840_v10 }
  0x65   : > { %43438 = vmatprep.mubr.f32.mxu1 %v52842_v11  ;;  %48314 = vmatpush3.bf16.msra.mxu1 %v53017_v16 }
  0x66   : > { %48316 = vmatprep.subr.bf16.mxu1 %v53054_v51 }
  0x68   : > { %43439 = vmatmul.mubr.f32.gmra.mrb[2].mxu1 %v52848_v14 }
  0x69   : > { %43441 = vmatprep.mubr.f32.mxu1 %v52862_v21  ;;  %48318 = vmatpush3.bf16.msra.mxu1 %v53054_v51 }
  0x6a   : > { %48320 = vmatprep.subr.bf16.mxu1 %v53062_v2 }
  0x6c   : > { %43442 = vmatmul.mubr.f32.gmra.mrb[4].mxu1 %v52873_v23 }
  0x6d   : > { %43444 = vmatprep.mubr.f32.mxu1 %v52875_v24 }
  0x70   : > { %43445 = vmatmul.mubr.f32.gmra.mrb[6].mxu1 %v52946_v53 }
  0x71   : > { %43471 = vmatprep.mubr.f32.mxu1 %v1053_v33 }
  0x74   : > { %43472 = vmatmul.mubr.f32.vlgmr.msra.gmra.mrb[8].mxu1 %v1063_v41 }
  0x75   : > { %48322 = vmatpush3.bf16.msra.mxu1 %v53062_v2  ;;  %43482 = vmatprep.mubr.f32.mxu1 %v53040_v42 }
  0x76   : > { %48324 = vmatprep.subr.bf16.mxu1 %v53071_v43 }
  0x79   : > { %48326 = vmatpush3.bf16.msra.mxu1 %v53071_v43 }
  0x7a   : > { %48328 = vmatprep.subr.bf16.mxu1 %v53078_v45 }
  0x7c   : > { %43483 = vmatmul.mubr.f32.vlgmr.msra.gmra.mrb[8].mxu1 %v53051_v48 }
  0x7d   : > { %48330 = vmatpush3.bf16.msra.mxu1 %v53078_v45  ;;  %43493 = vmatprep.mubr.f32.mxu1 %v1050_v54  ;;  %v53099_v54 = vpack.c.bf16 %v1093_v7, %v1086_v4  ;;  %v1612_v4 = vand.u32 4294901760, %v1611_v60 }
  0x7e   : > { %48332 = vmatprep.subr.bf16.mxu1 %v53082_v47 }
  0x7f   : > { %56258 = vst [vmem:[#allocation26_spill] sm:$0xff] %v53099_v54  ;;  %v1613_v12 = vsub.f32 %v1611_v60, %v1612_v4 }
  0x81   : > { %48334 = vmatpush3.bf16.msra.mxu1 %v53082_v47  ;;  %v1614_v33 = vand.u32 4294901760, %v1613_v12 }
  0x82   : > { %48336 = vmatprep.subr.bf16.mxu1 %v53017_v16 }
  0x84   : > { %43494 = vmatmul.mubr.f32.vlgmr.msra.gmra.mrb[8].mxu1 %v1060_v63  ;;  %v1527_v63 = vand.u32 4294901760, %v1512_v61 }
  0x85   : > { %48338 = vmatpush3.bf16.msra.mxu1 %v53017_v16  ;;  %43504 = vmatprep.mubr.f32.mxu1 %v1051_v1 }
  0x86   : > { %48340 = vmatprep.subr.bf16.mxu1 %v53054_v51  ;;  %v1625_v15 = vsub.f32 %v1512_v61, %v1527_v63 }
  0x88   : > { %v1626_v40 = vand.u32 4294901760, %v1625_v15 }
  0x89   : > { %48342 = vmatpush3.bf16.msra.mxu1 %v53054_v51 }
  0x8a   : > { %48344 = vmatprep.subr.bf16.mxu1 %v53095_v55 }
  0x8c   : > { %43505 = vmatmul.mubr.f32.vlgmr.msra.gmra.mrb[8].mxu1 %v1061_v8 }
  0x8d   : > { %48346 = vmatpush3.bf16.msra.mxu1 %v53095_v55  ;;  %43515 = vmatprep.mubr.f32.mxu1 %v53040_v42 }
  0x8e   : > { %48348 = vmatprep.subr.bf16.mxu1 %v53099_v54 }
  0x91   : > { %48350 = vmatpush3.bf16.msra.mxu1 %v53099_v54 }
  0x92   : > { %48352 = vmatprep.subr.bf16.mxu1 %v53017_v16 }
  0x94   : > { %43516 = vmatmul.mubr.f32.vlgmr.msra.gmra.mrb[8].mxu1 %v53051_v48 }
  0x95   : > { %48354 = vmatpush3.bf16.msra.mxu1 %v53017_v16  ;;  %43526 = vmatprep.mubr.f32.mxu1 %v53040_v42  ;;  %v1618_v42 = vsub.f32 %v1511_v31, %v1524_v38  ;;  %v1627_v31 = vsub.f32 %v1625_v15, %v1626_v40 }
  0x96   : > { %48356 = vmatprep.subr.bf16.mxu1 %v53054_v51 }
  0x97   : > { %v1619_v7 = vand.u32 4294901760, %v1618_v42  ;;  %v1628_v38 = vand.u32 4294901760, %v1627_v31  ;;  %v53137_v61 = vpack.c.bf16 %v1618_v42, %v1611_v60 }
  0x99   : > { %48358 = vmatpush3.bf16.msra.mxu1 %v53054_v51  ;;  %v1620_v13 = vsub.f32 %v1618_v42, %v1619_v7  ;;  %56261 = vst [vmem:[#allocation29_spill] sm:$0xff] %v53137_v61 }
  0x9a   : > { %48360 = vmatprep.subr.bf16.mxu1 %v53118_v59 }
  0x9b   : > { %v1621_v36 = vand.u32 4294901760, %v1620_v13 }
  0x9c   : > { %43527 = vmatmul.mubr.f32.vlgmr.msra.gmra.mrb[8].mxu1 %v53051_v48  ;;  %v1513_v48 = vld [vmem:[%s55906_s2 + $0x18] sm:$0xff] }
  0x9d   : > { %v1530_v1 = vand.u32 4294901760, %v1513_v48  ;;  %48362 = vmatpush3.bf16.msra.mxu1 %v53118_v59  ;;  %v53132_v17 = vpack.c.bf16 %v1621_v36, %v1614_v33 }
  0x9f   : > { %v53128_v8 = vpack.c.bf16 %v1530_v1, %v1527_v63  ;;  %v1632_v32 = vsub.f32 %v1513_v48, %v1530_v1  ;;  %56259 = vst [vmem:[#allocation27_spill] sm:$0xff] %v53132_v17  ;;  %v53141_v63 = vpack.c.bf16 %v1619_v7, %v1612_v4 }
  0xa1   : > { %48364 = vmatprep.subr.bf16.mxu1 %v53128_v8  ;;  %v1633_v41 = vand.u32 4294901760, %v1632_v32  ;;  %v53139_v48 = vpack.c.bf16 %v1632_v32, %v1625_v15  ;;  %56263 = vst [vmem:[#allocation31_spill] sm:$0xff] %v53141_v63 }
  0xa2   : > { %48366 = vmatpush3.bf16.msra.mxu1 %v53128_v8 }
  0xa3   : > { %v1634_v37 = vsub.f32 %v1632_v32, %v1633_v41  ;;  %48368 = vmatprep.subr.bf16.mxu1 %v53132_v17  ;;  %56262 = vst [vmem:[#allocation30_spill] sm:$0xff] %v53139_v48  ;;  %v53143_v1 = vpack.c.bf16 %v1633_v41, %v1626_v40 }
  0xa5   : > { %v1635_v54 = vand.u32 4294901760, %v1634_v37  ;;  %56264 = vst [vmem:[#allocation32_spill] sm:$0xff] %v53143_v1 }
  0xa7   : > { %v53135_v55 = vpack.c.bf16 %v1635_v54, %v1628_v38 }
  0xa9   : > { %56260 = vst [vmem:[#allocation28_spill] sm:$0xff] %v53135_v55 }
  0xf8   : > { %v43453_v12 = vpop.f32.mrb[0].mxu0 }
  0xf9   : > { %v923_v13 = vpop.f32.mrb[1].mxu0 }
  0xfd   : > { %v43456_v33 = vpop.f32.mrb[2].mxu0 }
  0xfe   : > { %v935_v36 = vpop.f32.mrb[3].mxu0 }
 0x101   : > { %v43459_v47 = vpop.f32.mrb[4].mxu0 }
 0x102   : > { %v947_v45 = vpop.f32.mrb[5].mxu0 }
 0x105   : > { %v43462_v43 = vpop.f32.mrb[6].mxu0 }
 0x106   : > { %v959_v2 = vpop.f32.mrb[7].mxu0 }
 0x137   : > { %v43437_v31 = vpop.f32.mrb[0].mxu1 }
 0x138   : > { %v51407_v37 = vadd.f32 %v43453_v12, %v43437_v31  ;;  %v808_v54 = vpop.f32.mrb[1].mxu1 }
 0x139   : > { %v51408_v38 = vadd.f32 %v923_v13, %v808_v54 }
 0x13a   : > { %v1518_v60 = vsel %vm973_vm1, %v51407_v37, 0 }
 0x13b   : > { %v53146_v42 = vand.u32 4294901760, %v1518_v60  ;;  %v1515_v4 = vsel %vm973_vm1, %v51408_v38, 0  ;;  %v43440_v7 = vpop.f32.mrb[2].mxu1 }
 0x13c   : > { %v53149_v15 = vand.u32 4294901760, %v1515_v4  ;;  %v51409_v32 = vadd.f32 %v43456_v33, %v43440_v7  ;;  %v820_v40 = vpop.f32.mrb[3].mxu1 }
 0x13d   : > { %v1600_v41 = vsub.f32 %v1518_v60, %v53146_v42  ;;  %v51410_v51 = vadd.f32 %v935_v36, %v820_v40  ;;  %v2053_v60 = vld [vmem:[%s55906_s2 + $0x38] sm:$0xff] }
 0x13e   : > { %v1590_v16 = vsub.f32 %v1515_v4, %v53149_v15  ;;  %v2070_v40 = vand.u32 4294901760, %v2053_v60 }
 0x13f   : > { %v1601_v0 = vand.u32 4294901760, %v1600_v41  ;;  %v43443_v12 = vpop.f32.mrb[4].mxu1 }
 0x140   : > { %v53153_v31 = vadd.f32 %v43459_v47, %v43443_v12  ;;  %v832_v13 = vpop.f32.mrb[5].mxu1  ;;  %v1591_v37 = vand.u32 4294901760, %v1590_v16  ;;  %v2052_v47 = vld [vmem:[%s55906_s2 + $0x30] sm:$0xff]  ;;  %v2058_v12 = vsel %vm973_vm1, %v51409_v32, 0 }
 0x141   : > { %v53155_v54 = vadd.f32 %v947_v45, %v832_v13  ;;  %v1602_v56 = vsub.f32 %v1600_v41, %v1601_v0  ;;  %v2067_v4 = vand.u32 4294901760, %v2052_v47 }
 0x142   : > { %v1592_v38 = vsub.f32 %v1590_v16, %v1591_v37 }
 0x143   : > { %v43446_v49 = vpop.f32.mrb[6].mxu1  ;;  %v1603_v36 = vand.u32 4294901760, %v1602_v56  ;;  %v2051_v56 = vld [vmem:[%s55906_s2 + $0x28] sm:$0xff] }
 0x144   : > { %v53157_v39 = vadd.f32 %v43462_v43, %v43446_v49  ;;  %v844_v33 = vpop.f32.mrb[7].mxu1  ;;  %v1593_v7 = vand.u32 4294901760, %v1592_v38  ;;  %v2050_v49 = vld [vmem:[%s55906_s2 + $0x20] sm:$0xff]  ;;  %v2064_v43 = vand.u32 4294901760, %v2051_v56 }
 0x145   : > { %v53159_v34 = vadd.f32 %v959_v2, %v844_v33  ;;  %v2061_v2 = vand.u32 4294901760, %v2050_v49  ;;  %v53205_v33 = vsub.f32 %v2052_v47, %v2067_v4 }
 0x146   : > { %43537 = vmatprep.mubr.f32.mxu1 %v1593_v7  ;;  %v53207_v7 = vsub.f32 %v2053_v60, %v2070_v40 }
 0x147   : > { %43538 = vmatmul.mubr.f32.vlgmr.msra.gmra.mrb[8].mxu1 %v1603_v36  ;;  %v53212_v32 = vpack.c.bf16 %v2064_v43, %v2061_v2  ;;  %v2166_v47 = vand.u32 4294901760, %v53205_v33 }
 0x148   : > { %48370 = vmatpush3.bf16.msra.mxu1 %v53132_v17  ;;  %43548 = vmatprep.mubr.f32.mxu1 %v53149_v15  ;;  %v2173_v60 = vand.u32 4294901760, %v53207_v7 }
 0x149   : > { %48372 = vmatprep.subr.bf16.mxu1 %v53135_v55 }
 0x14c   : > { %48374 = vmatpush3.bf16.msra.mxu1 %v53135_v55 }
 0x14d   : > { %48376 = vmatprep.subr.bf16.mxu1 %v53137_v61 }
 0x14f   : > { %43549 = vmatmul.mubr.f32.vlgmr.msra.gmra.mrb[8].mxu1 %v53146_v42 }
 0x150   : > { %48378 = vmatpush3.bf16.msra.mxu1 %v53137_v61  ;;  %43559 = vmatprep.mubr.f32.mxu1 %v1590_v16  ;;  %v2055_v16 = vsel %vm973_vm1, %v51410_v51, 0  ;;  %v53192_v51 = vsub.f32 %v2050_v49, %v2061_v2 }
 0x151   : > { %48380 = vmatprep.subr.bf16.mxu1 %v53139_v48  ;;  %v53182_v45 = vand.u32 4294901760, %v2055_v16 }
 0x153   : > { %v2130_v13 = vsub.f32 %v2055_v16, %v53182_v45 }
 0x154   : > { %48382 = vmatpush3.bf16.msra.mxu1 %v53139_v48  ;;  %v2174_v48 = vsub.f32 %v53207_v7, %v2173_v60 }
 0x155   : > { %48384 = vmatprep.subr.bf16.mxu1 %v53118_v59  ;;  %v2131_v36 = vand.u32 4294901760, %v2130_v13 }
 0x157   : > { %43560 = vmatmul.mubr.f32.vlgmr.msra.gmra.mrb[8].mxu1 %v1600_v41  ;;  %v53195_v41 = vsub.f32 %v2051_v56, %v2064_v43 }
 0x158   : > { %48386 = vmatpush3.bf16.msra.mxu1 %v53118_v59  ;;  %43570 = vmatprep.mubr.f32.mxu1 %v1591_v37  ;;  %v53201_v37 = vand.u32 4294901760, %v2058_v12 }
 0x159   : > { %48388 = vmatprep.subr.bf16.mxu1 %v53128_v8  ;;  %v2159_v38 = vand.u32 4294901760, %v53195_v41 }
 0x15a   : > { %v2140_v56 = vsub.f32 %v2058_v12, %v53201_v37  ;;  %v2167_v12 = vsub.f32 %v53205_v33, %v2166_v47 }
 0x15b   : > { %v2160_v16 = vsub.f32 %v53195_v41, %v2159_v38 }
 0x15c   : > { %48390 = vmatpush3.bf16.msra.mxu1 %v53128_v8  ;;  %v2141_v2 = vand.u32 4294901760, %v2140_v56 }
 0x15d   : > { %48392 = vmatprep.subr.bf16.mxu1 %v53141_v63  ;;  %v2161_v43 = vand.u32 4294901760, %v2160_v16 }
 0x15e   : > { %v2142_v55 = vsub.f32 %v2140_v56, %v2141_v2 }
 0x15f   : > { %43571 = vmatmul.mubr.f32.vlgmr.msra.gmra.mrb[8].mxu1 %v1601_v0  ;;  %v2152_v0 = vand.u32 4294901760, %v53192_v51 }
 0x160   : > { %48394 = vmatpush3.bf16.msra.mxu1 %v53141_v63  ;;  %43581 = vmatprep.mubr.f32.mxu1 %v53149_v15  ;;  %v53221_v63 = vpack.c.bf16 %v2070_v40, %v2067_v4  ;;  %v2168_v40 = vand.u32 4294901760, %v2167_v12  ;;  %v2143_v16 = vand.u32 4294901760, %v2142_v55  ;;  %v53246_v55 = vpack.c.bf16 %v53207_v7, %v53205_v33 }
 0x161   : > { %48396 = vmatprep.subr.bf16.mxu1 %v53143_v1  ;;  %v2153_v49 = vsub.f32 %v53192_v51, %v2152_v0 }
 0x162   : > { %56265 = vst [vmem:[#allocation33_spill] sm:$0xff] %v53221_v63  ;;  %56269 = vst [vmem:[#allocation37_spill] sm:$0xff] %v53246_v55 }
 0x164   : > { %48398 = vmatpush3.bf16.msra.mxu1 %v53143_v1  ;;  %v2132_v1 = vsub.f32 %v2130_v13, %v2131_v36 }
 0x165   : > { %48400 = vmatprep.subr.bf16.mxu1 %v53118_v59 }
 0x166   : > { %v2133_v61 = vand.u32 4294901760, %v2132_v1  ;;  %v2590_v1 = vld [vmem:[%s55906_s2 + $0x40] sm:$0xff] }
 0x167   : > { %43582 = vmatmul.mubr.f32.vlgmr.msra.gmra.mrb[8].mxu1 %v53146_v42  ;;  %v2601_v26 = vand.u32 4294901760, %v2590_v1 }
 0x168   : > { %48402 = vmatpush3.bf16.msra.mxu1 %v53118_v59  ;;  %43592 = vmatprep.mubr.f32.mxu1 %v53149_v15  ;;  %v2154_v15 = vand.u32 4294901760, %v2153_v49  ;;  %v2175_v49 = vand.u32 4294901760, %v2174_v48  ;;  %v53259_v48 = vpack.c.bf16 %v2159_v38, %v2152_v0  ;;  %v2592_v0 = vld [vmem:[%s55906_s2 + $0x50] sm:$0xff]  ;;  %v2593_v38 = vld [vmem:[%s55906_s2 + $0x58] sm:$0xff] }
 0x169   : > { %48404 = vmatprep.subr.bf16.mxu1 %v53128_v8  ;;  %v2607_v33 = vand.u32 4294901760, %v2592_v0  ;;  %v2610_v7 = vand.u32 4294901760, %v2593_v38 }
 0x16a   : > { %v53229_v4 = vpack.c.bf16 %v2161_v43, %v2154_v15  ;;  %v53233_v17 = vpack.c.bf16 %v2175_v49, %v2168_v40  ;;  %56270 = vst [vmem:[#allocation38_spill] sm:$0xff] %v53259_v48 }
 0x16b   : > { %v2705_v43 = vsub.f32 %v2592_v0, %v2607_v33  ;;  %v2712_v12 = vsub.f32 %v2593_v38, %v2610_v7  ;;  %v53303_v38 = vpack.c.bf16 %v2610_v7, %v2607_v33 }
 0x16c   : > { %48406 = vmatpush3.bf16.msra.mxu1 %v53128_v8  ;;  %56266 = vst [vmem:[#allocation34_spill] sm:$0xff] %v53229_v4  ;;  %56267 = vst [vmem:[#allocation35_spill] sm:$0xff] %v53233_v17 }
 0x16d   : > { %48408 = vmatprep.subr.bf16.mxu1 %v53212_v32  ;;  %56273 = vst [vmem:[#allocation41_spill] sm:$0xff] %v53303_v38 }
 0x16f   : > { %43593 = vmatmul.mubr.f32.vlgmr.msra.gmra.mrb[8].mxu1 %v53146_v42  ;;  %v2595_v42 = vsel %vm973_vm1, %v53155_v54, 0  ;;  %v53283_v54 = vsub.f32 %v2590_v1, %v2601_v26 }
 0x170   : > { %48410 = vmatpush3.bf16.msra.mxu1 %v53212_v32  ;;  %43603 = vmatprep.mubr.f32.mxu1 %v2133_v61  ;;  %v53240_v61 = vpack.c.bf16 %v53195_v41, %v53192_v51  ;;  %v53271_v51 = vpack.c.bf16 %v2173_v60, %v2166_v47  ;;  %v2604_v41 = vand.u32 4294901760, %v2591_v25 }
 0x171   : > { %48412 = vmatprep.subr.bf16.mxu1 %v53221_v63  ;;  %v2692_v60 = vand.u32 4294901760, %v53283_v54 }
 0x172   : > { %56268 = vst [vmem:[#allocation36_spill] sm:$0xff] %v53240_v61  ;;  %56271 = vst [vmem:[#allocation39_spill] sm:$0xff] %v53271_v51 }
 0x173   : > { %v2693_v49 = vsub.f32 %v53283_v54, %v2692_v60 }
 0x174   : > { %48414 = vmatpush3.bf16.msra.mxu1 %v53221_v63 }
 0x175   : > { %48416 = vmatprep.subr.bf16.mxu1 %v53229_v4 }
 0x177   : > { %43604 = vmatmul.mubr.f32.vlgmr.msra.gmra.mrb[8].mxu1 %v2143_v16 }
 0x178   : > { %48418 = vmatpush3.bf16.msra.mxu1 %v53229_v4  ;;  %43614 = vmatprep.mubr.f32.mxu1 %v53182_v45 }
 0x179   : > { %48420 = vmatprep.subr.bf16.mxu1 %v53233_v17 }
 0x17c   : > { %48422 = vmatpush3.bf16.msra.mxu1 %v53233_v17 }
 0x17d   : > { %48424 = vmatprep.subr.bf16.mxu1 %v53240_v61 }
 0x17f   : > { %43615 = vmatmul.mubr.f32.vlgmr.msra.gmra.mrb[8].mxu1 %v53201_v37 }
 0x180   : > { %48426 = vmatpush3.bf16.msra.mxu1 %v53240_v61  ;;  %43625 = vmatprep.mubr.f32.mxu1 %v2130_v13  ;;  %v53273_v13 = vand.u32 4294901760, %v2595_v42 }
 0x181   : > { %48428 = vmatprep.subr.bf16.mxu1 %v53246_v55 }
 0x182   : > { %v2670_v47 = vsub.f32 %v2595_v42, %v53273_v13  ;;  %v2713_v42 = vand.u32 4294901760, %v2712_v12 }
 0x184   : > { %48430 = vmatpush3.bf16.msra.mxu1 %v53246_v55  ;;  %v2671_v40 = vand.u32 4294901760, %v2670_v47 }
 0x185   : > { %48432 = vmatprep.subr.bf16.mxu1 %v53212_v32 }
 0x186   : > { %v2672_v0 = vsub.f32 %v2670_v47, %v2671_v40 }
 0x187   : > { %43626 = vmatmul.mubr.f32.vlgmr.msra.gmra.mrb[8].mxu1 %v2140_v56  ;;  %v2598_v56 = vsel %vm973_vm1, %v53153_v31, 0  ;;  %v53297_v31 = vpack.c.bf16 %v2604_v41, %v2601_v26 }
 0x188   : > { %48434 = vmatpush3.bf16.msra.mxu1 %v53212_v32  ;;  %43636 = vmatprep.mubr.f32.mxu1 %v2131_v36  ;;  %v2698_v36 = vsub.f32 %v2591_v25, %v2604_v41  ;;  %v53291_v15 = vand.u32 4294901760, %v2598_v56  ;;  %v2706_v25 = vand.u32 4294901760, %v2705_v43  ;;  %v2714_v41 = vsub.f32 %v2712_v12, %v2713_v42 }
 0x189   : > { %48436 = vmatprep.subr.bf16.mxu1 %v53221_v63  ;;  %56272 = vst [vmem:[#allocation40_spill] sm:$0xff] %v53297_v31  ;;  %v2673_v55 = vand.u32 4294901760, %v2672_v0 }
 0x18a   : > { %v2680_v16 = vsub.f32 %v2598_v56, %v53291_v15  ;;  %v2707_v26 = vsub.f32 %v2705_v43, %v2706_v25  ;;  %v2715_v7 = vand.u32 4294901760, %v2714_v41 }
 0x18c   : > { %48438 = vmatpush3.bf16.msra.mxu1 %v53221_v63  ;;  %v2708_v33 = vand.u32 4294901760, %v2707_v26 }
 0x18d   : > { %48440 = vmatprep.subr.bf16.mxu1 %v53259_v48 }
 0x18f   : > { %43637 = vmatmul.mubr.f32.vlgmr.msra.gmra.mrb[8].mxu1 %v2141_v2  ;;  %v2699_v2 = vand.u32 4294901760, %v2698_v36 }
 0x190   : > { %48442 = vmatpush3.bf16.msra.mxu1 %v53259_v48  ;;  %43647 = vmatprep.mubr.f32.mxu1 %v53182_v45  ;;  %v2681_v48 = vand.u32 4294901760, %v2680_v16 }
 0x191   : > { %48444 = vmatprep.subr.bf16.mxu1 %v53271_v51  ;;  %v2700_v1 = vsub.f32 %v2698_v36, %v2699_v2 }
 0x192   : > { %v2682_v56 = vsub.f32 %v2680_v16, %v2681_v48 }
 0x194   : > { %48446 = vmatpush3.bf16.msra.mxu1 %v53271_v51  ;;  %v2694_v51 = vand.u32 4294901760, %v2693_v49  ;;  %v2683_v49 = vand.u32 4294901760, %v2682_v56 }
 0x195   : > { %48448 = vmatprep.subr.bf16.mxu1 %v53212_v32 }
 0x197   : > { %43648 = vmatmul.mubr.f32.vlgmr.msra.gmra.mrb[8].mxu1 %v53201_v37 }
 0x198   : > { %48450 = vmatpush3.bf16.msra.mxu1 %v53212_v32  ;;  %43658 = vmatprep.mubr.f32.mxu1 %v53182_v45  ;;  %v2701_v45 = vand.u32 4294901760, %v2700_v1  ;;  %v53313_v1 = vpack.c.bf16 %v2715_v7, %v2708_v33 }
 0x199   : > { %48452 = vmatprep.subr.bf16.mxu1 %v53221_v63 }
 0x19a   : > { %v53309_v61 = vpack.c.bf16 %v2701_v45, %v2694_v51  ;;  %56275 = vst [vmem:[#allocation43_spill] sm:$0xff] %v53313_v1  ;;  %v53332_v51 = vpack.c.bf16 %v2699_v2, %v2692_v60 }
 0x19c   : > { %48454 = vmatpush3.bf16.msra.mxu1 %v53221_v63  ;;  %56274 = vst [vmem:[#allocation42_spill] sm:$0xff] %v53309_v61  ;;  %56278 = vst [vmem:[#allocation46_spill] sm:$0xff] %v53332_v51 }
 0x19d   : > { %48456 = vmatprep.subr.bf16.mxu1 %v53297_v31 }
 0x19f   : > { %43659 = vmatmul.mubr.f32.vlgmr.msra.gmra.mrb[8].mxu1 %v53201_v37  ;;  %v53319_v37 = vpack.c.bf16 %v2698_v36, %v53283_v54  ;;  %v3130_v54 = vld [vmem:[%s55906_s2 + $0x60] sm:$0xff]  ;;  %v3131_v36 = vld [vmem:[%s55906_s2 + $0x68] sm:$0xff] }
 0x1a0   : > { %48458 = vmatpush3.bf16.msra.mxu1 %v53297_v31  ;;  %43669 = vmatprep.mubr.f32.mxu1 %v2673_v55  ;;  %v53323_v55 = vpack.c.bf16 %v2712_v12, %v2705_v43  ;;  %v53344_v43 = vpack.c.bf16 %v2713_v42, %v2706_v25  ;;  %v3141_v12 = vand.u32 4294901760, %v3130_v54  ;;  %v3144_v60 = vand.u32 4294901760, %v3131_v36 }
 0x1a1   : > { %48460 = vmatprep.subr.bf16.mxu1 %v53303_v38  ;;  %56276 = vst [vmem:[#allocation44_spill] sm:$0xff] %v53319_v37 }
 0x1a2   : > { %56277 = vst [vmem:[#allocation45_spill] sm:$0xff] %v53323_v55  ;;  %56279 = vst [vmem:[#allocation47_spill] sm:$0xff] %v53344_v43  ;;  %v3231_v0 = vsub.f32 %v3130_v54, %v3141_v12  ;;  %v3238_v45 = vsub.f32 %v3131_v36, %v3144_v60  ;;  %v53368_v54 = vpack.c.bf16 %v3144_v60, %v3141_v12 }
 0x1a4   : > { %48462 = vmatpush3.bf16.msra.mxu1 %v53303_v38  ;;  %56280 = vst [vmem:[#allocation48_spill] sm:$0xff] %v53368_v54 }
 0x1a5   : > { %48464 = vmatprep.subr.bf16.mxu1 %v53309_v61 }
 0x1a7   : > { %43670 = vmatmul.mubr.f32.vlgmr.msra.gmra.mrb[8].mxu1 %v2683_v49 }
 0x1a8   : > { %48466 = vmatpush3.bf16.msra.mxu1 %v53309_v61  ;;  %43680 = vmatprep.mubr.f32.mxu1 %v53273_v13 }
 0x1a9   : > { %48468 = vmatprep.subr.bf16.mxu1 %v53313_v1 }
 0x1ac   : > { %48470 = vmatpush3.bf16.msra.mxu1 %v53313_v1 }
 0x1ad   : > { %48472 = vmatprep.subr.bf16.mxu1 %v53319_v37 }
 0x1af   : > { %43681 = vmatmul.mubr.f32.vlgmr.msra.gmra.mrb[8].mxu1 %v53291_v15 }
 0x1b0   : > { %48474 = vmatpush3.bf16.msra.mxu1 %v53319_v37  ;;  %43691 = vmatprep.mubr.f32.mxu1 %v2670_v47  ;;  %v3135_v47 = vsel %vm973_vm1, %v53159_v34, 0  ;;  %v3138_v34 = vsel %vm973_vm1, %v53157_v39, 0  ;;  %v3239_v39 = vand.u32 4294901760, %v3238_v45 }
 0x1b1   : > { %48476 = vmatprep.subr.bf16.mxu1 %v53323_v55  ;;  %v53346_v2 = vand.u32 4294901760, %v3135_v47  ;;  %v53360_v41 = vand.u32 4294901760, %v3138_v34 }
 0x1b3   : > { %v3210_v26 = vsub.f32 %v3135_v47, %v53346_v2  ;;  %v3220_v49 = vsub.f32 %v3138_v34, %v53360_v41  ;;  %v3240_v47 = vsub.f32 %v3238_v45, %v3239_v39 }
 0x1b4   : > { %48478 = vmatpush3.bf16.msra.mxu1 %v53323_v55 }
 0x1b5   : > { %48480 = vmatprep.subr.bf16.mxu1 %v53297_v31  ;;  %v3211_v7 = vand.u32 4294901760, %v3210_v26  ;;  %v3241_v37 = vand.u32 4294901760, %v3240_v47 }
 0x1b7   : > { %43692 = vmatmul.mubr.f32.vlgmr.msra.gmra.mrb[8].mxu1 %v2680_v16  ;;  %v3133_v16 = vld [vmem:[%s55906_s2 + $0x78] sm:$0xff]  ;;  %v3212_v55 = vsub.f32 %v3210_v26, %v3211_v7 }
 0x1b8   : > { %48482 = vmatpush3.bf16.msra.mxu1 %v53297_v31  ;;  %43702 = vmatprep.mubr.f32.mxu1 %v2671_v40  ;;  %v3132_v40 = vld [vmem:[%s55906_s2 + $0x70] sm:$0xff]  ;;  %v3150_v42 = vand.u32 4294901760, %v3133_v16 }
 0x1b9   : > { %48484 = vmatprep.subr.bf16.mxu1 %v53303_v38  ;;  %v3147_v25 = vand.u32 4294901760, %v3132_v40  ;;  %v3213_v12 = vand.u32 4294901760, %v3212_v55  ;;  %v53421_v55 = vld [vmem:[%s55906_s2 + $0xa0] ss:$0 sm:$0xff] }
 0x1ba   : > { %v3252_v33 = vsub.f32 %v3133_v16, %v3150_v42  ;;  %56288 = vst [vmem:[#allocation56_spill] sm:$0xff] %v53421_v55 }
 0x1bb   : > { %v3245_v56 = vsub.f32 %v3132_v40, %v3147_v25  ;;  %v3221_v40 = vand.u32 4294901760, %v3220_v49  ;;  %v53372_v16 = vpack.c.bf16 %v3150_v42, %v3147_v25 }
 0x1bc   : > { %48486 = vmatpush3.bf16.msra.mxu1 %v53303_v38 }
 0x1bd   : > { %48488 = vmatprep.subr.bf16.mxu1 %v53332_v51  ;;  %56281 = vst [vmem:[#allocation49_spill] sm:$0xff] %v53372_v16  ;;  %v3222_v60 = vsub.f32 %v3220_v49, %v3221_v40 }
 0x1bf   : > { %43703 = vmatmul.mubr.f32.vlgmr.msra.gmra.mrb[8].mxu1 %v2681_v48  ;;  %v3232_v48 = vand.u32 4294901760, %v3231_v0  ;;  %v3223_v42 = vand.u32 4294901760, %v3222_v60  ;;  %v3692_v60 = vld [vmem:[%s55906_s2 + $0xb8] sm:$0xff] }
 0x1c0   : > { %48490 = vmatpush3.bf16.msra.mxu1 %v53332_v51  ;;  %43713 = vmatprep.mubr.f32.mxu1 %v53273_v13  ;;  %v3253_v51 = vand.u32 4294901760, %v3252_v33 }
 0x1c1   : > { %48492 = vmatprep.subr.bf16.mxu1 %v53344_v43  ;;  %v3233_v36 = vsub.f32 %v3231_v0, %v3232_v48 }
 0x1c3   : > { %v3234_v34 = vand.u32 4294901760, %v3233_v36 }
 0x1c4   : > { %48494 = vmatpush3.bf16.msra.mxu1 %v53344_v43  ;;  %v3246_v43 = vand.u32 4294901760, %v3245_v56 }
 0x1c5   : > { %48496 = vmatprep.subr.bf16.mxu1 %v53297_v31  ;;  %v53378_v61 = vpack.c.bf16 %v3241_v37, %v3234_v34 }
 0x1c6   : > { %v3247_v1 = vsub.f32 %v3245_v56, %v3246_v43  ;;  %v53404_v37 = vpack.c.bf16 %v3253_v51, %v3246_v43 }
 0x1c7   : > { %43714 = vmatmul.mubr.f32.vlgmr.msra.gmra.mrb[8].mxu1 %v53291_v15  ;;  %56282 = vst [vmem:[#allocation50_spill] sm:$0xff] %v53378_v61 }
 0x1c8   : > { %48498 = vmatpush3.bf16.msra.mxu1 %v53297_v31  ;;  %43724 = vmatprep.mubr.f32.mxu1 %v53273_v13  ;;  %v3254_v13 = vsub.f32 %v3252_v33, %v3253_v51  ;;  %56287 = vst [vmem:[#allocation55_spill] sm:$0xff] %v53404_v37 }
 0x1c9   : > { %48500 = vmatprep.subr.bf16.mxu1 %v53303_v38 }
 0x1ca   : > { %v3255_v25 = vand.u32 4294901760, %v3254_v13 }
 0x1cc   : > { %48502 = vmatpush3.bf16.msra.mxu1 %v53303_v38  ;;  %v3248_v38 = vand.u32 4294901760, %v3247_v1  ;;  %v53391_v1 = vpack.c.bf16 %v3252_v33, %v3245_v56  ;;  %v3690_v33 = vld [vmem:[%s55906_s2 + $0xa8] sm:$0xff] }
 0x1cd   : > { %48504 = vmatprep.subr.bf16.mxu1 %v53368_v54 }
 0x1ce   : > { %v53382_v36 = vpack.c.bf16 %v3255_v25, %v3248_v38  ;;  %56285 = vst [vmem:[#allocation53_spill] sm:$0xff] %v53391_v1  ;;  %v53400_v38 = vpack.c.bf16 %v3239_v39, %v3232_v48  ;;  %v3693_v25 = vld [vmem:[%s55906_s2 + $0xc0] sm:$0xff] }
 0x1cf   : > { %43725 = vmatmul.mubr.f32.vlgmr.msra.gmra.mrb[8].mxu1 %v53291_v15  ;;  %v53387_v15 = vpack.c.bf16 %v3238_v45, %v3231_v0 }
 0x1d0   : > { %48506 = vmatpush3.bf16.msra.mxu1 %v53368_v54  ;;  %43735 = vmatprep.mubr.f32.mxu1 %v3213_v12  ;;  %56283 = vst [vmem:[#allocation51_spill] sm:$0xff] %v53382_v36  ;;  %56286 = vst [vmem:[#allocation54_spill] sm:$0xff] %v53400_v38  ;;  %v3683_v12 = vpop.permute.xlu0 %3682 }
 0x1d1   : > { %48508 = vmatprep.subr.bf16.mxu1 %v53372_v16  ;;  %56284 = vst [vmem:[#allocation52_spill] sm:$0xff] %v53387_v15 }
 0x1d4   : > { %48510 = vmatpush3.bf16.msra.mxu1 %v53372_v16 }
 0x1d5   : > { %48512 = vmatprep.subr.bf16.mxu1 %v53378_v61 }
 0x1d7   : > { %43736 = vmatmul.mubr.f32.vlgmr.msra.gmra.mrb[8].mxu1 %v3223_v42  ;;  %v3711_v42 = vand.u32 4294901760, %v3692_v60 }
 0x1d8   : > { %48514 = vmatpush3.bf16.msra.mxu1 %v53378_v61  ;;  %43746 = vmatprep.mubr.f32.mxu1 %v53346_v2 }
 0x1d9   : > { %48516 = vmatprep.subr.bf16.mxu1 %v53382_v36 }
 0x1dc   : > { %48518 = vmatpush3.bf16.msra.mxu1 %v53382_v36 }
 0x1dd   : > { %48520 = vmatprep.subr.bf16.mxu1 %v53387_v15 }
 0x1df   : > { %43747 = vmatmul.mubr.f32.vlgmr.msra.gmra.mrb[8].mxu1 %v53360_v41 }
 0x1e0   : > { %48522 = vmatpush3.bf16.msra.mxu1 %v53387_v15  ;;  %43757 = vmatprep.mubr.f32.mxu1 %v3210_v26 }
 0x1e1   : > { %48524 = vmatprep.subr.bf16.mxu1 %v53391_v1 }
 0x1e4   : > { %48526 = vmatpush3.bf16.msra.mxu1 %v53391_v1 }
 0x1e5   : > { %48528 = vmatprep.subr.bf16.mxu1 %v53368_v54 }
 0x1e7   : > { %43758 = vmatmul.mubr.f32.vlgmr.msra.gmra.mrb[8].mxu1 %v3220_v49  ;;  %v3705_v49 = vand.u32 4294901760, %v3690_v33 }
 0x1e8   : > { %48530 = vmatpush3.bf16.msra.mxu1 %v53368_v54  ;;  %43768 = vmatprep.mubr.f32.mxu1 %v3211_v7  ;;  %v3691_v7 = vld [vmem:[%s55906_s2 + $0xb0] sm:$0xff] }
 0x1e9   : > { %48532 = vmatprep.subr.bf16.mxu1 %v53372_v16  ;;  %v3708_v47 = vand.u32 4294901760, %v3691_v7  ;;  %v3795_v34 = vsub.f32 %v3690_v33, %v3705_v49 }
 0x1eb   : > { %v3802_v13 = vsub.f32 %v3691_v7, %v3708_v47 }
 0x1ec   : > { %48534 = vmatpush3.bf16.msra.mxu1 %v53372_v16 }
 0x1ed   : > { %48536 = vmatprep.subr.bf16.mxu1 %v53400_v38  ;;  %v53464_v1 = vpack.c.bf16 %v3802_v13, %v3795_v34 }
 0x1ef   : > { %43769 = vmatmul.mubr.f32.vlgmr.msra.gmra.mrb[8].mxu1 %v3221_v40  ;;  %v53437_v40 = vpack.c.bf16 %v3708_v47, %v3705_v49 }
 0x1f0   : > { %48538 = vmatpush3.bf16.msra.mxu1 %v53400_v38  ;;  %43779 = vmatprep.mubr.f32.mxu1 %v53346_v2 }
 0x1f1   : > { %48540 = vmatprep.subr.bf16.mxu1 %v53404_v37  ;;  %48552 = vmatprep.subr.bf16.mxu0 %v53437_v40 }
 0x1f2   : > { %48554 = vmatpush3.bf16.msra.mxu0 %v53437_v40 }
 0x1f4   : > { %48542 = vmatpush3.bf16.msra.mxu1 %v53404_v37  ;;  %v3685_v37 = vpop.permute.xlu0 %3684 }
 0x1f5   : > { %48544 = vmatprep.subr.bf16.mxu1 %v53368_v54 }
 0x1f7   : > { %43780 = vmatmul.mubr.f32.vlgmr.msra.gmra.mrb[8].mxu1 %v53360_v41 }
 0x1f8   : > { %48546 = vmatpush3.bf16.msra.mxu1 %v53368_v54  ;;  %43790 = vmatprep.mubr.f32.mxu1 %v53346_v2 }
 0x1f9   : > { %48548 = vmatprep.subr.bf16.mxu1 %v53372_v16 }
 0x1fc   : > { %48550 = vmatpush3.bf16.msra.mxu1 %v53372_v16 }
 0x1ff   : > { %43791 = vmatmul.mubr.f32.vlgmr.msra.gmra.mrb[8].mxu1 %v53360_v41 }
 0x200   : > { %43863 = vmatprep.mubr.f32.mxu1 %v52924_v44 }
 0x2d2   : > { %v43792_v51 = vpop.f32.mrb[8].mxu1 }
 0x2d3   : > { %v53424_v43 = vadd.f32 %v43792_v51, %v53421_v55  ;;  %v3658_v0 = vpop.f32.mrb[9].mxu1  ;;  %v3714_v51 = vand.u32 4294901760, %v3693_v25 }
 0x2d4   : > { %v53427_v2 = vadd.f32 %v53421_v55, %v3658_v0  ;;  %v3796_v0 = vand.u32 4294901760, %v3795_v34 }
 0x2d5   : > { %v40581_v45 = vmul.f32 -1.442695, %v53424_v43  ;;  %v3816_v33 = vsub.f32 %v3693_v25, %v3714_v51 }
 0x2d6   : > { %v40580_v26 = vmul.f32 -1.442695, %v53427_v2 }
 0x2d7   : > { %52551 = vpow2.f32 %v40581_v45  ;;  %v3803_v45 = vand.u32 4294901760, %v3802_v13  ;;  %v3817_v38 = vand.u32 4294901760, %v3816_v33 }
 0x2d8   : > { %52553 = vpow2.f32 %v40580_v26  ;;  %v53447_v26 = vpack.c.bf16 %v3714_v51, %v3711_v42 }
 0x2d9   : > { %v3818_v25 = vsub.f32 %v3816_v33, %v3817_v38  ;;  %v53468_v36 = vpack.c.bf16 %v3803_v45, %v3796_v0 }
 0x2da   : > { %48556 = vmatprep.subr.bf16.mxu0 %v53447_v26 }
 0x2db   : > { %48558 = vmatpush3.bf16.msra.mxu0 %v53447_v26 }
 0x2e1   : > { %v52552_v41 = vpop.eup %52551 }
 0x2e2   : > { %v52554_v48 = vpop.eup %52553  ;;  %v3677_v39 = vadd.f32 1.0, %v52552_v41  ;;  %v3797_v41 = vsub.f32 %v3795_v34, %v3796_v0 }
 0x2e3   : > { %v3676_v56 = vadd.f32 1.0, %v52554_v48  ;;  %v3804_v48 = vsub.f32 %v3802_v13, %v3803_v45 }
 0x2e4   : > { %v3798_v49 = vand.u32 4294901760, %v3797_v41  ;;  %v3819_v41 = vand.u32 4294901760, %v3818_v25 }
 0x2e5   : > { %52555 = vrcp.f32 %v3676_v56  ;;  %v3805_v47 = vand.u32 4294901760, %v3804_v48 }
 0x2e6   : > { %52557 = vrcp.f32 %v3677_v39  ;;  %v3809_v39 = vsub.f32 %v3692_v60, %v3711_v42 }
 0x2e7   : > { %v53457_v60 = vpack.c.bf16 %v3805_v47, %v3798_v49 }
 0x2e8   : > { %v3810_v44 = vand.u32 4294901760, %v3809_v39  ;;  %v53466_v15 = vpack.c.bf16 %v3816_v33, %v3809_v39 }
 0x2e9   : > { %48560 = vmatprep.subr.bf16.mxu0 %v53457_v60 }
 0x2ea   : > { %v3811_v42 = vsub.f32 %v3809_v39, %v3810_v44 }
 0x2ec   : > { %v3812_v51 = vand.u32 4294901760, %v3811_v42 }
 0x2ee   : > { %v53462_v48 = vpack.c.bf16 %v3819_v41, %v3812_v51 }
 0x2ef   : > { %v53449_v56 = vpop.eup %52555 }
 0x2f0   : > { %v3688_v7 = vmul.f32 %v53449_v56, %v3683_v12  ;;  %v53453_v55 = vpop.eup %52557 }
 0x2f1   : > { %v3689_v12 = vmul.f32 %v53453_v55, %v3685_v37 }
 0x2f2   : > { %3696 = vrot.lane.b32.xlu1 %v3688_v7, %s52742_s28  ;;  %v53470_v7 = vpack.c.bf16 %v3817_v38, %v3810_v44 }
 0x2f6   : > { %3698 = vrot.lane.b32.xlu1 %v3689_v12, %s52742_s28 }
 0x364   : > { %v3697_v49 = vpop.permute.xlu1 %3696 }
 0x365   : > { %v3700_v47 = vsel %vm973_vm1, %v3697_v49, 0 }
 0x366   : > { %v3773_v37 = vand.u32 4294901760, %v3700_v47 }
 0x368   : > { %v3774_v61 = vsub.f32 %v3700_v47, %v3773_v37  ;;  %v3699_v16 = vpop.permute.xlu1 %3698 }
 0x369   : > { %v3702_v42 = vsel %vm973_vm1, %v3699_v16, 0 }
 0x36a   : > { %v3775_v25 = vand.u32 4294901760, %v3774_v61  ;;  %v3783_v12 = vand.u32 4294901760, %v3702_v42 }
 0x36c   : > { %v3784_v51 = vsub.f32 %v3702_v42, %v3783_v12  ;;  %v3776_v41 = vsub.f32 %v3774_v61, %v3775_v25  ;;  %v4244_v42 = vsub.f32 1.0, %v53449_v56 }
 0x36e   : > { %v3785_v34 = vand.u32 4294901760, %v3784_v51  ;;  %v3777_v13 = vand.u32 4294901760, %v3776_v41 }
 0x370   : > { %v3786_v39 = vsub.f32 %v3784_v51, %v3785_v34  ;;  %43801 = vmatprep.mubr.f32.mxu0 %v3777_v13 }
 0x372   : > { %v3787_v0 = vand.u32 4294901760, %v3786_v39 }
 0x374   : > { %43802 = vmatmul.mubr.f32.vlgmr.msra.gmra.mrb[8].mxu0 %v3787_v0 }
 0x375   : > { %48562 = vmatpush3.bf16.msra.mxu0 %v53457_v60  ;;  %43812 = vmatprep.mubr.f32.mxu0 %v3773_v37 }
 0x376   : > { %48564 = vmatprep.subr.bf16.mxu0 %v53462_v48 }
 0x379   : > { %48566 = vmatpush3.bf16.msra.mxu0 %v53462_v48 }
 0x37a   : > { %48568 = vmatprep.subr.bf16.mxu0 %v53464_v1 }
 0x37c   : > { %43813 = vmatmul.mubr.f32.vlgmr.msra.gmra.mrb[8].mxu0 %v3783_v12 }
 0x37d   : > { %48570 = vmatpush3.bf16.msra.mxu0 %v53464_v1  ;;  %43823 = vmatprep.mubr.f32.mxu0 %v3774_v61 }
 0x37e   : > { %48572 = vmatprep.subr.bf16.mxu0 %v53466_v15 }
 0x381   : > { %48574 = vmatpush3.bf16.msra.mxu0 %v53466_v15 }
 0x382   : > { %48576 = vmatprep.subr.bf16.mxu0 %v53437_v40 }
 0x384   : > { %43824 = vmatmul.mubr.f32.vlgmr.msra.gmra.mrb[8].mxu0 %v3784_v51 }
 0x385   : > { %48578 = vmatpush3.bf16.msra.mxu0 %v53437_v40  ;;  %43834 = vmatprep.mubr.f32.mxu0 %v3775_v25 }
 0x386   : > { %48580 = vmatprep.subr.bf16.mxu0 %v53447_v26 }
 0x389   : > { %48582 = vmatpush3.bf16.msra.mxu0 %v53447_v26 }
 0x38a   : > { %48584 = vmatprep.subr.bf16.mxu0 %v53468_v36 }
 0x38c   : > { %43835 = vmatmul.mubr.f32.vlgmr.msra.gmra.mrb[8].mxu0 %v3785_v34  ;;  %v52672_v34 = vld [vmem:[%s52868_s24] sm:$0xff] }
 0x38d   : > { %48586 = vmatpush3.bf16.msra.mxu0 %v53468_v36  ;;  %43845 = vmatprep.mubr.f32.mxu0 %v3773_v37 }
 0x38e   : > { %48588 = vmatprep.subr.bf16.mxu0 %v53470_v7 }
 0x391   : > { %48590 = vmatpush3.bf16.msra.mxu0 %v53470_v7 }
 0x392   : > { %48592 = vmatprep.subr.bf16.mxu0 %v53437_v40 }
 0x394   : > { %43846 = vmatmul.mubr.f32.vlgmr.msra.gmra.mrb[8].mxu0 %v3783_v12 }
 0x395   : > { %48594 = vmatpush3.bf16.msra.mxu0 %v53437_v40  ;;  %43856 = vmatprep.mubr.f32.mxu0 %v3773_v37  ;;  %v4245_v37 = vsub.f32 1.0, %v53453_v55 }
 0x396   : > { %48596 = vmatprep.subr.bf16.mxu0 %v53447_v26 }
 0x399   : > { %48598 = vmatpush3.bf16.msra.mxu0 %v53447_v26 }
 0x39c   : > { %43857 = vmatmul.mubr.f32.vlgmr.msra.gmra.mrb[8].mxu0 %v3783_v12  ;;  %v52671_v12 = vld [vmem:[%s52868_s24 + $0x8] sm:$0xff] }
 0x39d   : > { %43879 = vmatprep.mubr.f32.mxu0 %v52838_v9  ;;  %v4247_v51 = vmul.f32 %v52671_v12, %v4245_v37 }
 0x46f   : > { %v43858_v44 = vpop.f32.mrb[8].mxu0 }
 0x470   : > { %4236 = vrot.lane.b32.xlu1 %v43858_v44, %s52743_s29  ;;  %v4222_v61 = vpop.f32.mrb[9].mxu0 }
 0x471   : > { %4234 = vrot.lane.b32.xlu0 %v4222_v61, %s52743_s29 }
 0x4e2   : > { %v4237_v16 = vpop.permute.xlu1 %4236 }
 0x4e3   : > { %v4241_v38 = vadd.f32 %v53424_v43, %v4237_v16  ;;  %v4235_v45 = vpop.permute.xlu0 %4234 }
 0x4e4   : > { %v4240_v33 = vadd.f32 %v53427_v2, %v4235_v45  ;;  %v4246_v2 = vmul.f32 %v52672_v34, %v4244_v42  ;;  %v56292_v34 = vld [vmem:[#allocation16_spill] sm:$0xff] }
 0x4e5   : > { %52559 = vtanh.f32 %v4241_v38 }
 0x4e6   : > { %52561 = vtanh.f32 %v4240_v33 }
 0x4ef   : > { %v52560_v49 = vpop.eup %52559 }
 0x4f0   : > { %v52562_v47 = vpop.eup %52561  ;;  %4252 = vrot.lane.b32.xlu1 %v52560_v49, %s52743_s29 }
 0x4f1   : > { %4250 = vrot.lane.b32.xlu0 %v52562_v47, %s52743_s29 }
 0x562   : > { %v4253_v25 = vpop.permute.xlu1 %4252 }
 0x563   : > { %v4257_v43 = vmul.f32 %v53453_v55, %v4253_v25  ;;  %v4251_v41 = vpop.permute.xlu0 %4250 }
 0x564   : > { %v4256_v13 = vmul.f32 %v53449_v56, %v4251_v41  ;;  %v56291_v41 = vld [vmem:[#allocation14_spill] sm:$0xff] }
 0x565   : > { %v53506_v39 = vadd.f32 %v4257_v43, %v4247_v51  ;;  %v56289_v51 = vld [vmem:[#allocation10_spill] sm:$0xff]  ;;  %v56290_v43 = vld [vmem:[#allocation12_spill] sm:$0xff] }
 0x566   : > { %v53508_v0 = vadd.f32 %v4256_v13, %v4246_v2  ;;  %v56293_v2 = vld [vmem:[#allocation18_spill] sm:$0xff]  ;;  %v56294_v13 = vld [vmem:[#allocation19_spill] sm:$0xff] }
 0x567   : > { %v4264_v44 = vand.u32 4294901760, %v53506_v39  ;;  %7714 = vrot.lane.b32.xlu1 %v53506_v39, %s52741_s7 }
 0x568   : > { %v4261_v61 = vand.u32 4294901760, %v53508_v0  ;;  %7712 = vrot.lane.b32.xlu0 %v53508_v0, %s52741_s7 }
 0x569   : > { %v4416_v55 = vsub.f32 %v53506_v39, %v4264_v44 }
 0x56a   : > { %v48599_v16 = vpack.c.bf16 %v4264_v44, %v4261_v61  ;;  %v4409_v38 = vsub.f32 %v53508_v0, %v4261_v61  ;;  %v5021_v44 = vsel %vm973_vm1, %v53508_v0, 0  ;;  %v5024_v61 = vsel %vm973_vm1, %v53506_v39, 0 }
 0x56b   : > { %v4417_v56 = vand.u32 4294901760, %v4416_v55 }
 0x56c   : > { %48600 = vmatprep.subr.bf16.mxu1 %v48599_v16  ;;  %v4410_v45 = vand.u32 4294901760, %v4409_v38  ;;  %v48607_v25 = vpack.c.bf16 %v4416_v55, %v4409_v38 }
 0x56d   : > { %48602 = vmatpush3.bf16.msra.mxu1 %v48599_v16  ;;  %v4418_v33 = vsub.f32 %v4416_v55, %v4417_v56  ;;  %v5095_v55 = vand.u32 4294901760, %v5021_v44 }
 0x56e   : > { %v4411_v49 = vsub.f32 %v4409_v38, %v4410_v45  ;;  %48864 = vmatprep.subr.bf16.mxu1 %v53437_v40  ;;  %v48615_v12 = vpack.c.bf16 %v4417_v56, %v4410_v45  ;;  %v56295_v45 = vld [vmem:[#allocation20_spill] sm:$0xff] }
 0x56f   : > { %v4419_v47 = vand.u32 4294901760, %v4418_v33  ;;  %v5096_v38 = vsub.f32 %v5021_v44, %v5095_v55  ;;  %v56297_v44 = vld [vmem:[#allocation22_spill] sm:$0xff] }
 0x570   : > { %v4412_v37 = vand.u32 4294901760, %v4411_v49  ;;  %43864 = vmatmul.mubr.f32.vlgmr.msra.gmra.mrb[10].mxu1 %v52929_v46 }
 0x571   : > { %43866 = vmatprep.mubr.f32.mxu1 %v52939_v50  ;;  %48866 = vmatpush3.bf16.msra.mxu1 %v53437_v40  ;;  %v5097_v33 = vand.u32 4294901760, %v5096_v38 }
 0x572   : > { %v48603_v42 = vpack.c.bf16 %v4419_v47, %v4412_v37  ;;  %48868 = vmatprep.subr.bf16.mxu1 %v53447_v26  ;;  %v56296_v47 = vld [vmem:[#allocation21_spill] sm:$0xff] }
 0x573   : > { %v5098_v37 = vsub.f32 %v5096_v38, %v5097_v33 }
 0x574   : > { %48604 = vmatprep.subr.bf16.mxu0 %v48603_v42  ;;  %43867 = vmatmul.mubr.f32.gmra.mrb[12].mxu1 %v52958_v58 }
 0x575   : > { %48606 = vmatpush3.bf16.msra.mxu0 %v48603_v42  ;;  %43869 = vmatprep.mubr.f32.mxu1 %v52963_v62 }
 0x576   : > { %48608 = vmatprep.subr.bf16.mxu0 %v48607_v25  ;;  %48870 = vmatpush3.bf16.msra.mxu1 %v53447_v26 }
 0x577   : > { %48872 = vmatprep.subr.bf16.mxu1 %v53457_v60 }
 0x578   : > { %43880 = vmatmul.mubr.f32.vlgmr.msra.gmra.mrb[10].mxu0 %v52840_v10  ;;  %43870 = vmatmul.mubr.f32.gmra.mrb[14].mxu1 %v52975_v3 }
 0x579   : > { %48610 = vmatpush3.bf16.msra.mxu0 %v48607_v25  ;;  %43882 = vmatprep.mubr.f32.mxu0 %v52842_v11  ;;  %v5099_v25 = vand.u32 4294901760, %v5098_v37  ;;  %v56300_v37 = vld [vmem:[#allocation25_spill] sm:$0xff] }
 0x57a   : > { %48612 = vmatprep.subr.bf16.mxu0 %v48599_v16  ;;  %43872 = vmatprep.mubr.f32.mxu1 %v52980_v5 }
 0x57c   : > { %43883 = vmatmul.mubr.f32.gmra.mrb[12].mxu0 %v52848_v14  ;;  %43873 = vmatmul.mubr.f32.gmra.mrb[16].mxu1 %v52985_v6 }
 0x57d   : > { %43885 = vmatprep.mubr.f32.mxu0 %v52862_v21 }
 0x580   : > { %43886 = vmatmul.mubr.f32.gmra.mrb[14].mxu0 %v52873_v23 }
 0x581   : > { %43888 = vmatprep.mubr.f32.mxu0 %v52875_v24 }
 0x584   : > { %43889 = vmatmul.mubr.f32.gmra.mrb[16].mxu0 %v52946_v53 }
 0x585   : > { %43895 = vmatprep.mubr.f32.mxu0 %v52854_v18 }
 0x588   : > { %43896 = vmatmul.mubr.f32.vlgmr.msra.gmra.mrb[10].mxu0 %v52857_v19 }
 0x589   : > { %48614 = vmatpush3.bf16.msra.mxu0 %v48599_v16  ;;  %43898 = vmatprep.mubr.f32.mxu0 %v52860_v20 }
 0x58a   : > { %48616 = vmatprep.subr.bf16.mxu0 %v48615_v12 }
 0x58c   : > { %43899 = vmatmul.mubr.f32.gmra.mrb[12].mxu0 %v52871_v22 }
 0x58d   : > { %43901 = vmatprep.mubr.f32.mxu0 %v52893_v30 }
 0x590   : > { %43902 = vmatmul.mubr.f32.gmra.mrb[14].mxu0 %v52904_v35 }
 0x591   : > { %43904 = vmatprep.mubr.f32.mxu0 %v52944_v52 }
 0x594   : > { %43905 = vmatmul.mubr.f32.gmra.mrb[16].mxu0 %v52955_v57 }
 0x595   : > { %43911 = vmatprep.mubr.f32.mxu0 %v52884_v27 }
 0x598   : > { %43912 = vmatmul.mubr.f32.vlgmr.msra.gmra.mrb[10].mxu0 %v52887_v28 }
 0x599   : > { %48618 = vmatpush3.bf16.msra.mxu0 %v48615_v12  ;;  %43914 = vmatprep.mubr.f32.mxu0 %v52890_v29 }
 0x59a   : > { %48620 = vmatprep.subr.bf16.mxu0 %v48599_v16 }
 0x59c   : > { %43915 = vmatmul.mubr.f32.gmra.mrb[12].mxu0 %v56289_v51 }
 0x59d   : > { %43917 = vmatprep.mubr.f32.mxu0 %v56290_v43 }
 0x5a0   : > { %43918 = vmatmul.mubr.f32.gmra.mrb[14].mxu0 %v56291_v41 }
 0x5a1   : > { %43920 = vmatprep.mubr.f32.mxu0 %v56292_v34 }
 0x5a4   : > { %43921 = vmatmul.mubr.f32.gmra.mrb[16].mxu0 %v56293_v2  ;;  %v56299_v2 = vld [vmem:[#allocation24_spill] sm:$0xff] }
 0x5a5   : > { %43927 = vmatprep.mubr.f32.mxu0 %v52838_v9 }
 0x5a8   : > { %43928 = vmatmul.mubr.f32.vlgmr.msra.gmra.mrb[10].mxu0 %v52840_v10 }
 0x5a9   : > { %48622 = vmatpush3.bf16.msra.mxu0 %v48599_v16  ;;  %43930 = vmatprep.mubr.f32.mxu0 %v52842_v11  ;;  %v5105_v16 = vand.u32 4294901760, %v5024_v61 }
 0x5aa   : > { %48624 = vmatprep.subr.bf16.mxu0 %v56294_v13 }
 0x5ab   : > { %v5106_v56 = vsub.f32 %v5024_v61, %v5105_v16  ;;  %v56298_v61 = vld [vmem:[#allocation23_spill] sm:$0xff] }
 0x5ac   : > { %43931 = vmatmul.mubr.f32.gmra.mrb[12].mxu0 %v52848_v14 }
 0x5ad   : > { %43933 = vmatprep.mubr.f32.mxu0 %v52862_v21  ;;  %v5107_v49 = vand.u32 4294901760, %v5106_v56 }
 0x5af   : > { %v5108_v42 = vsub.f32 %v5106_v56, %v5107_v49 }
 0x5b0   : > { %43934 = vmatmul.mubr.f32.gmra.mrb[14].mxu0 %v52873_v23 }
 0x5b1   : > { %43936 = vmatprep.mubr.f32.mxu0 %v52875_v24  ;;  %v5109_v12 = vand.u32 4294901760, %v5108_v42 }
 0x5b4   : > { %43937 = vmatmul.mubr.f32.gmra.mrb[16].mxu0 %v52946_v53 }
 0x5b5   : > { %43943 = vmatprep.mubr.f32.mxu0 %v52838_v9 }
 0x5b8   : > { %43944 = vmatmul.mubr.f32.vlgmr.msra.gmra.mrb[10].mxu0 %v52840_v10 }
 0x5b9   : > { %43946 = vmatprep.mubr.f32.mxu0 %v52842_v11  ;;  %48626 = vmatpush3.bf16.msra.mxu0 %v56294_v13 }
 0x5ba   : > { %48628 = vmatprep.subr.bf16.mxu0 %v56295_v45 }
 0x5bc   : > { %43947 = vmatmul.mubr.f32.gmra.mrb[12].mxu0 %v52848_v14 }
 0x5bd   : > { %43949 = vmatprep.mubr.f32.mxu0 %v52862_v21  ;;  %48630 = vmatpush3.bf16.msra.mxu0 %v56295_v45 }
 0x5be   : > { %48632 = vmatprep.subr.bf16.mxu0 %v56296_v47 }
 0x5c0   : > { %43950 = vmatmul.mubr.f32.gmra.mrb[14].mxu0 %v52873_v23 }
 0x5c1   : > { %43952 = vmatprep.mubr.f32.mxu0 %v52875_v24 }
 0x5c4   : > { %43953 = vmatmul.mubr.f32.gmra.mrb[16].mxu0 %v52946_v53 }
 0x5c5   : > { %43963 = vmatprep.mubr.f32.mxu0 %v5099_v25 }
 0x5c8   : > { %43964 = vmatmul.mubr.f32.vlgmr.msra.gmra.mrb[18].mxu0 %v5109_v12 }
 0x5c9   : > { %48634 = vmatpush3.bf16.msra.mxu0 %v56296_v47  ;;  %43974 = vmatprep.mubr.f32.mxu0 %v5095_v55 }
 0x5ca   : > { %48636 = vmatprep.subr.bf16.mxu0 %v56297_v44 }
 0x5cd   : > { %48638 = vmatpush3.bf16.msra.mxu0 %v56297_v44 }
 0x5ce   : > { %48640 = vmatprep.subr.bf16.mxu0 %v56298_v61 }
 0x5d0   : > { %43975 = vmatmul.mubr.f32.vlgmr.msra.gmra.mrb[18].mxu0 %v5105_v16 }
 0x5d1   : > { %48642 = vmatpush3.bf16.msra.mxu0 %v56298_v61  ;;  %43985 = vmatprep.mubr.f32.mxu0 %v5096_v38  ;;  %v56301_v38 = vld [vmem:[#allocation26_spill] sm:$0xff] }
 0x5d2   : > { %48644 = vmatprep.subr.bf16.mxu0 %v56299_v2 }
 0x5d5   : > { %48646 = vmatpush3.bf16.msra.mxu0 %v56299_v2 }
 0x5d6   : > { %48648 = vmatprep.subr.bf16.mxu0 %v56294_v13 }
 0x5d8   : > { %43986 = vmatmul.mubr.f32.vlgmr.msra.gmra.mrb[18].mxu0 %v5106_v56  ;;  %v56302_v56 = vld [vmem:[#allocation27_spill] sm:$0xff] }
 0x5d9   : > { %48650 = vmatpush3.bf16.msra.mxu0 %v56294_v13  ;;  %43996 = vmatprep.mubr.f32.mxu0 %v5097_v33 }
 0x5da   : > { %48652 = vmatprep.subr.bf16.mxu0 %v56295_v45 }
 0x5dd   : > { %48654 = vmatpush3.bf16.msra.mxu0 %v56295_v45 }
 0x5de   : > { %48656 = vmatprep.subr.bf16.mxu0 %v56300_v37 }
 0x5e0   : > { %43997 = vmatmul.mubr.f32.vlgmr.msra.gmra.mrb[18].mxu0 %v5107_v49 }
 0x5e1   : > { %48658 = vmatpush3.bf16.msra.mxu0 %v56300_v37  ;;  %44007 = vmatprep.mubr.f32.mxu0 %v5095_v55 }
 0x5e2   : > { %48660 = vmatprep.subr.bf16.mxu0 %v56301_v38 }
 0x5e5   : > { %48662 = vmatpush3.bf16.msra.mxu0 %v56301_v38 }
 0x5e6   : > { %48664 = vmatprep.subr.bf16.mxu0 %v56294_v13 }
 0x5e8   : > { %44008 = vmatmul.mubr.f32.vlgmr.msra.gmra.mrb[18].mxu0 %v5105_v16 }
 0x5e9   : > { %48666 = vmatpush3.bf16.msra.mxu0 %v56294_v13  ;;  %44018 = vmatprep.mubr.f32.mxu0 %v5095_v55 }
 0x5ea   : > { %48668 = vmatprep.subr.bf16.mxu0 %v56295_v45 }
 0x5ed   : > { %48670 = vmatpush3.bf16.msra.mxu0 %v56295_v45 }
 0x5ee   : > { %48672 = vmatprep.subr.bf16.mxu0 %v53118_v59 }
 0x5f0   : > { %44019 = vmatmul.mubr.f32.vlgmr.msra.gmra.mrb[18].mxu0 %v5105_v16 }
 0x5f1   : > { %48674 = vmatpush3.bf16.msra.mxu0 %v53118_v59 }
 0x5f2   : > { %48676 = vmatprep.subr.bf16.mxu0 %v53128_v8 }
 0x5f5   : > { %48678 = vmatpush3.bf16.msra.mxu0 %v53128_v8 }
 0x5f6   : > { %48680 = vmatprep.subr.bf16.mxu0 %v56302_v56 }
 0x643   : > { %v43865_v33 = vpop.f32.mrb[10].mxu1 }
 0x644   : > { %v4333_v49 = vpop.f32.mrb[11].mxu1 }
 0x647   : > { %v43868_v42 = vpop.f32.mrb[12].mxu1 }
 0x648   : > { %v4353_v25 = vpop.f32.mrb[13].mxu1 }
 0x64b   : > { %v43871_v55 = vpop.f32.mrb[14].mxu1 }
 0x64c   : > { %v4373_v12 = vpop.f32.mrb[15].mxu1 }
 0x64f   : > { %v43874_v38 = vpop.f32.mrb[16].mxu1 }
 0x650   : > { %v4393_v37 = vpop.f32.mrb[17].mxu1 }
 0x68b   : > { %v43945_v2 = vpop.f32.mrb[10].mxu0 }
 0x68c   : > { %v51417_v61 = vadd.f32 %v43945_v2, %v43865_v33  ;;  %v4974_v44 = vpop.f32.mrb[11].mxu0 }
 0x68d   : > { %v51418_v16 = vadd.f32 %v4974_v44, %v4333_v49 }
 0x68e   : > { %v5560_v47 = vsel %vm973_vm1, %v51417_v61, 0 }
 0x68f   : > { %v53603_v45 = vand.u32 4294901760, %v5560_v47  ;;  %v5557_v13 = vsel %vm973_vm1, %v51418_v16, 0  ;;  %v43948_v34 = vpop.f32.mrb[12].mxu0 }
 0x690   : > { %v5631_v41 = vand.u32 4294901760, %v5557_v13  ;;  %v51419_v43 = vadd.f32 %v43948_v34, %v43868_v42  ;;  %v4986_v51 = vpop.f32.mrb[13].mxu0 }
 0x691   : > { %v5642_v29 = vsub.f32 %v5560_v47, %v53603_v45  ;;  %v51420_v28 = vadd.f32 %v4986_v51, %v4353_v25  ;;  %v56304_v51 = vld [vmem:[#allocation29_spill] sm:$0xff] }
 0x692   : > { %v5632_v27 = vsub.f32 %v5557_v13, %v5631_v41  ;;  %v56306_v13 = vld [vmem:[#allocation31_spill] sm:$0xff] }
 0x693   : > { %v5643_v57 = vand.u32 4294901760, %v5642_v29  ;;  %v43951_v52 = vpop.f32.mrb[14].mxu0 }
 0x694   : > { %v53607_v35 = vadd.f32 %v43951_v52, %v43871_v55  ;;  %v4998_v2 = vpop.f32.mrb[15].mxu0  ;;  %v5633_v44 = vand.u32 4294901760, %v5632_v27  ;;  %v56303_v52 = vld [vmem:[#allocation28_spill] sm:$0xff] }
 0x695   : > { %v53609_v33 = vadd.f32 %v4998_v2, %v4373_v12  ;;  %v5644_v61 = vsub.f32 %v5642_v29, %v5643_v57 }
 0x696   : > { %v5634_v49 = vsub.f32 %v5632_v27, %v5633_v44 }
 0x697   : > { %v43954_v30 = vpop.f32.mrb[16].mxu0  ;;  %v5645_v47 = vand.u32 4294901760, %v5644_v61  ;;  %v6629_v61 = vsel %vm973_vm1, %v53609_v33, 0 }
 0x698   : > { %v53611_v16 = vadd.f32 %v43954_v30, %v43874_v38  ;;  %v5010_v22 = vpop.f32.mrb[17].mxu0  ;;  %v5635_v34 = vand.u32 4294901760, %v5634_v49  ;;  %v56305_v30 = vld [vmem:[#allocation30_spill] sm:$0xff] }
 0x699   : > { %v53613_v42 = vadd.f32 %v5010_v22, %v4393_v37  ;;  %v6093_v22 = vsel %vm973_vm1, %v51420_v28, 0  ;;  %v56310_v49 = vld [vmem:[#allocation38_spill] sm:$0xff] }
 0x69a   : > { %44029 = vmatprep.mubr.f32.mxu0 %v5635_v34  ;;  %v6167_v37 = vand.u32 4294901760, %v6093_v22  ;;  %v6703_v34 = vand.u32 4294901760, %v6629_v61 }
 0x69b   : > { %44030 = vmatmul.mubr.f32.vlgmr.msra.gmra.mrb[18].mxu0 %v5645_v47  ;;  %v56311_v47 = vld [vmem:[#allocation39_spill] sm:$0xff] }
 0x69c   : > { %48682 = vmatpush3.bf16.msra.mxu0 %v56302_v56  ;;  %44040 = vmatprep.mubr.f32.mxu0 %v5631_v41  ;;  %v6168_v38 = vsub.f32 %v6093_v22, %v6167_v37  ;;  %v6632_v22 = vsel %vm973_vm1, %v53607_v35, 0 }
 0x69d   : > { %48684 = vmatprep.subr.bf16.mxu0 %v56303_v52 }
 0x69e   : > { %v6169_v28 = vand.u32 4294901760, %v6168_v38 }
 0x6a0   : > { %48686 = vmatpush3.bf16.msra.mxu0 %v56303_v52  ;;  %v6170_v55 = vsub.f32 %v6168_v38, %v6169_v28 }
 0x6a1   : > { %48688 = vmatprep.subr.bf16.mxu0 %v56304_v51 }
 0x6a3   : > { %44041 = vmatmul.mubr.f32.vlgmr.msra.gmra.mrb[18].mxu0 %v53603_v45 }
 0x6a4   : > { %48690 = vmatpush3.bf16.msra.mxu0 %v56304_v51  ;;  %44051 = vmatprep.mubr.f32.mxu0 %v5632_v27  ;;  %v56307_v27 = vld [vmem:[#allocation32_spill] sm:$0xff] }
 0x6a5   : > { %48692 = vmatprep.subr.bf16.mxu0 %v56305_v30 }
 0x6a8   : > { %48694 = vmatpush3.bf16.msra.mxu0 %v56305_v30 }
 0x6a9   : > { %48696 = vmatprep.subr.bf16.mxu0 %v53118_v59 }
 0x6ab   : > { %44052 = vmatmul.mubr.f32.vlgmr.msra.gmra.mrb[18].mxu0 %v5642_v29  ;;  %v6096_v29 = vsel %vm973_vm1, %v51419_v43, 0  ;;  %v6171_v43 = vand.u32 4294901760, %v6170_v55 }
 0x6ac   : > { %48698 = vmatpush3.bf16.msra.mxu0 %v53118_v59  ;;  %44062 = vmatprep.mubr.f32.mxu0 %v5633_v44  ;;  %v6177_v25 = vand.u32 4294901760, %v6096_v29  ;;  %v56309_v44 = vld [vmem:[#allocation37_spill] sm:$0xff] }
 0x6ad   : > { %48700 = vmatprep.subr.bf16.mxu0 %v53128_v8 }
 0x6b0   : > { %48702 = vmatpush3.bf16.msra.mxu0 %v53128_v8 }
 0x6b1   : > { %48704 = vmatprep.subr.bf16.mxu0 %v56306_v13 }
 0x6b3   : > { %44063 = vmatmul.mubr.f32.vlgmr.msra.gmra.mrb[18].mxu0 %v5643_v57  ;;  %v6178_v57 = vsub.f32 %v6096_v29, %v6177_v25  ;;  %v6704_v29 = vsub.f32 %v6629_v61, %v6703_v34  ;;  %v56316_v61 = vld [vmem:[#allocation45_spill] sm:$0xff] }
 0x6b4   : > { %48706 = vmatpush3.bf16.msra.mxu0 %v56306_v13  ;;  %44073 = vmatprep.mubr.f32.mxu0 %v5631_v41 }
 0x6b5   : > { %48708 = vmatprep.subr.bf16.mxu0 %v56307_v27  ;;  %v6179_v12 = vand.u32 4294901760, %v6178_v57  ;;  %v6705_v33 = vand.u32 4294901760, %v6704_v29 }
 0x6b7   : > { %v6180_v2 = vsub.f32 %v6178_v57, %v6179_v12 }
 0x6b8   : > { %48710 = vmatpush3.bf16.msra.mxu0 %v56307_v27 }
 0x6b9   : > { %48712 = vmatprep.subr.bf16.mxu0 %v53118_v59 }
 0x6bb   : > { %44074 = vmatmul.mubr.f32.vlgmr.msra.gmra.mrb[18].mxu0 %v53603_v45 }
 0x6bc   : > { %48714 = vmatpush3.bf16.msra.mxu0 %v53118_v59  ;;  %44084 = vmatprep.mubr.f32.mxu0 %v5631_v41  ;;  %v6181_v41 = vand.u32 4294901760, %v6180_v2  ;;  %v56313_v2 = vld [vmem:[#allocation42_spill] sm:$0xff] }
 0x6bd   : > { %48716 = vmatprep.subr.bf16.mxu0 %v53128_v8 }
 0x6c0   : > { %48718 = vmatpush3.bf16.msra.mxu0 %v53128_v8 }
 0x6c1   : > { %48720 = vmatprep.subr.bf16.mxu0 %v53212_v32 }
 0x6c3   : > { %44085 = vmatmul.mubr.f32.vlgmr.msra.gmra.mrb[18].mxu0 %v53603_v45  ;;  %v56308_v45 = vld [vmem:[#allocation36_spill] sm:$0xff] }
 0x6c4   : > { %48722 = vmatpush3.bf16.msra.mxu0 %v53212_v32  ;;  %44095 = vmatprep.mubr.f32.mxu0 %v6171_v43 }
 0x6c5   : > { %48724 = vmatprep.subr.bf16.mxu0 %v53221_v63 }
 0x6c8   : > { %48726 = vmatpush3.bf16.msra.mxu0 %v53221_v63 }
 0x6c9   : > { %48728 = vmatprep.subr.bf16.mxu0 %v53229_v4 }
 0x6cb   : > { %44096 = vmatmul.mubr.f32.vlgmr.msra.gmra.mrb[18].mxu0 %v6181_v41  ;;  %v56314_v41 = vld [vmem:[#allocation43_spill] sm:$0xff] }
 0x6cc   : > { %48730 = vmatpush3.bf16.msra.mxu0 %v53229_v4  ;;  %44106 = vmatprep.mubr.f32.mxu0 %v6167_v37 }
 0x6cd   : > { %48732 = vmatprep.subr.bf16.mxu0 %v53233_v17 }
 0x6d0   : > { %48734 = vmatpush3.bf16.msra.mxu0 %v53233_v17 }
 0x6d1   : > { %48736 = vmatprep.subr.bf16.mxu0 %v56308_v45 }
 0x6d3   : > { %44107 = vmatmul.mubr.f32.vlgmr.msra.gmra.mrb[18].mxu0 %v6177_v25 }
 0x6d4   : > { %48738 = vmatpush3.bf16.msra.mxu0 %v56308_v45  ;;  %44117 = vmatprep.mubr.f32.mxu0 %v6168_v38  ;;  %v6713_v38 = vand.u32 4294901760, %v6632_v22 }
 0x6d5   : > { %48740 = vmatprep.subr.bf16.mxu0 %v56309_v44 }
 0x6d8   : > { %48742 = vmatpush3.bf16.msra.mxu0 %v56309_v44 }
 0x6d9   : > { %48744 = vmatprep.subr.bf16.mxu0 %v53212_v32 }
 0x6db   : > { %44118 = vmatmul.mubr.f32.vlgmr.msra.gmra.mrb[18].mxu0 %v6178_v57  ;;  %v6706_v57 = vsub.f32 %v6704_v29, %v6705_v33 }
 0x6dc   : > { %48746 = vmatpush3.bf16.msra.mxu0 %v53212_v32  ;;  %44128 = vmatprep.mubr.f32.mxu0 %v6169_v28  ;;  %v6714_v28 = vsub.f32 %v6632_v22, %v6713_v38  ;;  %v7165_v22 = vsel %vm973_vm1, %v53613_v42, 0 }
 0x6dd   : > { %48748 = vmatprep.subr.bf16.mxu0 %v53221_v63  ;;  %v6707_v35 = vand.u32 4294901760, %v6706_v57  ;;  %v56317_v57 = vld [vmem:[#allocation46_spill] sm:$0xff] }
 0x6de   : > { %v6715_v55 = vand.u32 4294901760, %v6714_v28 }
 0x6e0   : > { %48750 = vmatpush3.bf16.msra.mxu0 %v53221_v63  ;;  %v6716_v43 = vsub.f32 %v6714_v28, %v6715_v55 }
 0x6e1   : > { %48752 = vmatprep.subr.bf16.mxu0 %v56310_v49 }
 0x6e3   : > { %44129 = vmatmul.mubr.f32.vlgmr.msra.gmra.mrb[18].mxu0 %v6179_v12  ;;  %v56312_v12 = vld [vmem:[#allocation41_spill] sm:$0xff] }
 0x6e4   : > { %48754 = vmatpush3.bf16.msra.mxu0 %v56310_v49  ;;  %44139 = vmatprep.mubr.f32.mxu0 %v6167_v37 }
 0x6e5   : > { %48756 = vmatprep.subr.bf16.mxu0 %v56311_v47 }
 0x6e8   : > { %48758 = vmatpush3.bf16.msra.mxu0 %v56311_v47 }
 0x6e9   : > { %48760 = vmatprep.subr.bf16.mxu0 %v53212_v32 }
 0x6eb   : > { %44140 = vmatmul.mubr.f32.vlgmr.msra.gmra.mrb[18].mxu0 %v6177_v25 }
 0x6ec   : > { %48762 = vmatpush3.bf16.msra.mxu0 %v53212_v32  ;;  %44150 = vmatprep.mubr.f32.mxu0 %v6167_v37  ;;  %v6717_v37 = vand.u32 4294901760, %v6716_v43 }
 0x6ed   : > { %48764 = vmatprep.subr.bf16.mxu0 %v53221_v63 }
 0x6f0   : > { %48766 = vmatpush3.bf16.msra.mxu0 %v53221_v63 }
 0x6f1   : > { %48768 = vmatprep.subr.bf16.mxu0 %v53297_v31 }
 0x6f3   : > { %44151 = vmatmul.mubr.f32.vlgmr.msra.gmra.mrb[18].mxu0 %v6177_v25  ;;  %v56315_v25 = vld [vmem:[#allocation44_spill] sm:$0xff] }
 0x6f4   : > { %48770 = vmatpush3.bf16.msra.mxu0 %v53297_v31  ;;  %44161 = vmatprep.mubr.f32.mxu0 %v6707_v35  ;;  %v56318_v35 = vld [vmem:[#allocation47_spill] sm:$0xff] }
 0x6f5   : > { %48772 = vmatprep.subr.bf16.mxu0 %v56312_v12 }
 0x6f8   : > { %48774 = vmatpush3.bf16.msra.mxu0 %v56312_v12 }
 0x6f9   : > { %48776 = vmatprep.subr.bf16.mxu0 %v56313_v2 }
 0x6fb   : > { %44162 = vmatmul.mubr.f32.vlgmr.msra.gmra.mrb[18].mxu0 %v6717_v37 }
 0x6fc   : > { %48778 = vmatpush3.bf16.msra.mxu0 %v56313_v2  ;;  %44172 = vmatprep.mubr.f32.mxu0 %v6703_v34 }
 0x6fd   : > { %48780 = vmatprep.subr.bf16.mxu0 %v56314_v41 }
 0x700   : > { %48782 = vmatpush3.bf16.msra.mxu0 %v56314_v41 }
 0x701   : > { %48784 = vmatprep.subr.bf16.mxu0 %v56315_v25 }
 0x703   : > { %44173 = vmatmul.mubr.f32.vlgmr.msra.gmra.mrb[18].mxu0 %v6713_v38 }
 0x704   : > { %48786 = vmatpush3.bf16.msra.mxu0 %v56315_v25  ;;  %44183 = vmatprep.mubr.f32.mxu0 %v6704_v29  ;;  %v7239_v29 = vand.u32 4294901760, %v7165_v22 }
 0x705   : > { %48788 = vmatprep.subr.bf16.mxu0 %v56316_v61 }
 0x708   : > { %48790 = vmatpush3.bf16.msra.mxu0 %v56316_v61  ;;  %v56321_v61 = vld [vmem:[#allocation51_spill] sm:$0xff] }
 0x709   : > { %48792 = vmatprep.subr.bf16.mxu0 %v53297_v31 }
 0x70b   : > { %44184 = vmatmul.mubr.f32.vlgmr.msra.gmra.mrb[18].mxu0 %v6714_v28  ;;  %v7168_v28 = vsel %vm973_vm1, %v53611_v16, 0 }
 0x70c   : > { %48794 = vmatpush3.bf16.msra.mxu0 %v53297_v31  ;;  %44194 = vmatprep.mubr.f32.mxu0 %v6705_v33  ;;  %v7240_v33 = vsub.f32 %v7165_v22, %v7239_v29  ;;  %v7249_v43 = vand.u32 4294901760, %v7168_v28  ;;  %v56319_v22 = vld [vmem:[#allocation49_spill] sm:$0xff] }
 0x70d   : > { %48796 = vmatprep.subr.bf16.mxu0 %v56312_v12 }
 0x70e   : > { %v7241_v42 = vand.u32 4294901760, %v7240_v33 }
 0x710   : > { %48798 = vmatpush3.bf16.msra.mxu0 %v56312_v12  ;;  %v7242_v37 = vsub.f32 %v7240_v33, %v7241_v42 }
 0x711   : > { %48800 = vmatprep.subr.bf16.mxu0 %v56317_v57 }
 0x712   : > { %v7243_v16 = vand.u32 4294901760, %v7242_v37  ;;  %v56323_v37 = vld [vmem:[#allocation53_spill] sm:$0xff] }
 0x713   : > { %44195 = vmatmul.mubr.f32.vlgmr.msra.gmra.mrb[18].mxu0 %v6715_v55  ;;  %v7250_v55 = vsub.f32 %v7168_v28, %v7249_v43  ;;  %v56320_v28 = vld [vmem:[#allocation50_spill] sm:$0xff] }
 0x714   : > { %48802 = vmatpush3.bf16.msra.mxu0 %v56317_v57  ;;  %44205 = vmatprep.mubr.f32.mxu0 %v6703_v34 }
 0x715   : > { %48804 = vmatprep.subr.bf16.mxu0 %v56318_v35  ;;  %v7251_v57 = vand.u32 4294901760, %v7250_v55 }
 0x718   : > { %48806 = vmatpush3.bf16.msra.mxu0 %v56318_v35  ;;  %v7252_v35 = vsub.f32 %v7250_v55, %v7251_v57 }
 0x719   : > { %48808 = vmatprep.subr.bf16.mxu0 %v53297_v31 }
 0x71b   : > { %44206 = vmatmul.mubr.f32.vlgmr.msra.gmra.mrb[18].mxu0 %v6713_v38 }
 0x71c   : > { %48810 = vmatpush3.bf16.msra.mxu0 %v53297_v31  ;;  %44216 = vmatprep.mubr.f32.mxu0 %v6703_v34  ;;  %v7253_v34 = vand.u32 4294901760, %v7252_v35  ;;  %v56324_v35 = vld [vmem:[#allocation54_spill] sm:$0xff] }
 0x71d   : > { %48812 = vmatprep.subr.bf16.mxu0 %v56312_v12 }
 0x720   : > { %48814 = vmatpush3.bf16.msra.mxu0 %v56312_v12 }
 0x721   : > { %48816 = vmatprep.subr.bf16.mxu0 %v53368_v54 }
 0x723   : > { %44217 = vmatmul.mubr.f32.vlgmr.msra.gmra.mrb[18].mxu0 %v6713_v38  ;;  %v56322_v38 = vld [vmem:[#allocation52_spill] sm:$0xff] }
 0x724   : > { %48818 = vmatpush3.bf16.msra.mxu0 %v53368_v54  ;;  %44227 = vmatprep.mubr.f32.mxu0 %v7243_v16 }
 0x725   : > { %48820 = vmatprep.subr.bf16.mxu0 %v56319_v22 }
 0x728   : > { %48822 = vmatpush3.bf16.msra.mxu0 %v56319_v22 }
 0x729   : > { %48824 = vmatprep.subr.bf16.mxu0 %v56320_v28 }
 0x72b   : > { %44228 = vmatmul.mubr.f32.vlgmr.msra.gmra.mrb[18].mxu0 %v7253_v34 }
 0x72c   : > { %48826 = vmatpush3.bf16.msra.mxu0 %v56320_v28  ;;  %44238 = vmatprep.mubr.f32.mxu0 %v7239_v29 }
 0x72d   : > { %48828 = vmatprep.subr.bf16.mxu0 %v56321_v61 }
 0x730   : > { %48830 = vmatpush3.bf16.msra.mxu0 %v56321_v61 }
 0x731   : > { %48832 = vmatprep.subr.bf16.mxu0 %v56322_v38 }
 0x733   : > { %44239 = vmatmul.mubr.f32.vlgmr.msra.gmra.mrb[18].mxu0 %v7249_v43 }
 0x734   : > { %48834 = vmatpush3.bf16.msra.mxu0 %v56322_v38  ;;  %44249 = vmatprep.mubr.f32.mxu0 %v7240_v33  ;;  %v56325_v33 = vld [vmem:[#allocation55_spill] sm:$0xff] }
 0x735   : > { %48836 = vmatprep.subr.bf16.mxu0 %v56323_v37 }
 0x738   : > { %48838 = vmatpush3.bf16.msra.mxu0 %v56323_v37 }
 0x739   : > { %48840 = vmatprep.subr.bf16.mxu0 %v53368_v54 }
 0x73b   : > { %44250 = vmatmul.mubr.f32.vlgmr.msra.gmra.mrb[18].mxu0 %v7250_v55 }
 0x73c   : > { %48842 = vmatpush3.bf16.msra.mxu0 %v53368_v54  ;;  %44260 = vmatprep.mubr.f32.mxu0 %v7241_v42  ;;  %v56326_v42 = vld [vmem:[#allocation56_spill] sm:$0xff] }
 0x73d   : > { %48844 = vmatprep.subr.bf16.mxu0 %v56319_v22 }
 0x740   : > { %48846 = vmatpush3.bf16.msra.mxu0 %v56319_v22 }
 0x741   : > { %48848 = vmatprep.subr.bf16.mxu0 %v56324_v35 }
 0x743   : > { %44261 = vmatmul.mubr.f32.vlgmr.msra.gmra.mrb[18].mxu0 %v7251_v57 }
 0x744   : > { %48850 = vmatpush3.bf16.msra.mxu0 %v56324_v35  ;;  %44271 = vmatprep.mubr.f32.mxu0 %v7239_v29 }
 0x745   : > { %48852 = vmatprep.subr.bf16.mxu0 %v56325_v33 }
 0x748   : > { %48854 = vmatpush3.bf16.msra.mxu0 %v56325_v33 }
 0x749   : > { %48856 = vmatprep.subr.bf16.mxu0 %v53368_v54 }
 0x74b   : > { %44272 = vmatmul.mubr.f32.vlgmr.msra.gmra.mrb[18].mxu0 %v7249_v43 }
 0x74c   : > { %48858 = vmatpush3.bf16.msra.mxu0 %v53368_v54  ;;  %44282 = vmatprep.mubr.f32.mxu0 %v7239_v29 }
 0x74d   : > { %48860 = vmatprep.subr.bf16.mxu0 %v56319_v22 }
 0x750   : > { %48862 = vmatpush3.bf16.msra.mxu0 %v56319_v22  ;;  %v7713_v22 = vpop.permute.xlu0 %7712 }
 0x751   : > { %49176 = vmatprep.subr.bf16.mxu0 %v53437_v40 }
 0x753   : > { %44283 = vmatmul.mubr.f32.vlgmr.msra.gmra.mrb[18].mxu0 %v7249_v43 }
 0x754   : > { %49178 = vmatpush3.bf16.msra.mxu0 %v53437_v40 }
 0x755   : > { %49180 = vmatprep.subr.bf16.mxu0 %v53447_v26 }
 0x758   : > { %49182 = vmatpush3.bf16.msra.mxu0 %v53447_v26 }
 0x759   : > { %49184 = vmatprep.subr.bf16.mxu0 %v53457_v60 }
 0x826   : > { %v44284_v57 = vpop.f32.mrb[18].mxu0 }
 0x827   : > { %v53725_v55 = vadd.f32 %v44284_v57, %v56326_v42  ;;  %v7688_v29 = vpop.f32.mrb[19].mxu0  ;;  %v7715_v57 = vpop.permute.xlu1 %7714 }
 0x828   : > { %v53728_v16 = vadd.f32 %v56326_v42, %v7688_v29 }
 0x829   : > { %v40583_v34 = vmul.f32 -1.442695, %v53725_v55 }
 0x82a   : > { %v40582_v43 = vmul.f32 -1.442695, %v53728_v16 }
 0x82b   : > { %52563 = vpow2.f32 %v40583_v34 }
 0x82c   : > { %52565 = vpow2.f32 %v40582_v43 }
 0x835   : > { %v52564_v33 = vpop.eup %52563 }
 0x836   : > { %v52566_v35 = vpop.eup %52565  ;;  %v7707_v37 = vadd.f32 1.0, %v52564_v33 }
 0x837   : > { %v7706_v38 = vadd.f32 1.0, %v52566_v35 }
 0x838   : > { %52567 = vrcp.f32 %v7707_v37 }
 0x839   : > { %52569 = vrcp.f32 %v7706_v38 }
 0x842   : > { %v53732_v61 = vpop.eup %52567 }
 0x843   : > { %v53734_v28 = vpop.eup %52569  ;;  %v7719_v42 = vmul.f32 %v53732_v61, %v7715_v57 }
 0x844   : > { %v7718_v29 = vmul.f32 %v53734_v28, %v7713_v22 }
 0x845   : > { %7724 = vrot.lane.b32.xlu1 %v7719_v42, %s52742_s28 }
 0x846   : > { %7722 = vrot.lane.b32.xlu0 %v7718_v29, %s52742_s28 }
 0x8b7   : > { %v7725_v34 = vpop.permute.xlu1 %7724 }
 0x8b8   : > { %v7728_v33 = vsel %vm973_vm1, %v7725_v34, 0  ;;  %v7723_v35 = vpop.permute.xlu0 %7722 }
 0x8b9   : > { %v7809_v37 = vand.u32 4294901760, %v7728_v33  ;;  %v7726_v38 = vsel %vm973_vm1, %v7723_v35, 0  ;;  %v8270_v35 = vsub.f32 1.0, %v53734_v28 }
 0x8ba   : > { %v7799_v43 = vand.u32 4294901760, %v7726_v38 }
 0x8bb   : > { %v7810_v54 = vsub.f32 %v7728_v33, %v7809_v37  ;;  %v8271_v33 = vsub.f32 1.0, %v53732_v61 }
 0x8bc   : > { %v7800_v25 = vsub.f32 %v7726_v38, %v7799_v43 }
 0x8bd   : > { %v7811_v41 = vand.u32 4294901760, %v7810_v54  ;;  %v8273_v38 = vmul.f32 %v8271_v33, %v53506_v39 }
 0x8be   : > { %v7801_v2 = vand.u32 4294901760, %v7800_v25 }
 0x8bf   : > { %v7812_v12 = vsub.f32 %v7810_v54, %v7811_v41 }
 0x8c0   : > { %v7802_v57 = vsub.f32 %v7800_v25, %v7801_v2 }
 0x8c1   : > { %v7813_v22 = vand.u32 4294901760, %v7812_v12 }
 0x8c2   : > { %v7803_v31 = vand.u32 4294901760, %v7802_v57 }
 0x8c4   : > { %44293 = vmatprep.mubr.f32.mxu1 %v7803_v31  ;;  %v56327_v31 = vld [vmem:[#allocation13_spill] sm:$0xff] }
 0x8c5   : > { %44294 = vmatmul.mubr.f32.vlgmr.msra.gmra.mrb[18].mxu1 %v7813_v22 }
 0x8c6   : > { %48874 = vmatpush3.bf16.msra.mxu1 %v53457_v60  ;;  %44304 = vmatprep.mubr.f32.mxu1 %v7799_v43 }
 0x8c7   : > { %48876 = vmatprep.subr.bf16.mxu1 %v53462_v48 }
 0x8ca   : > { %48878 = vmatpush3.bf16.msra.mxu1 %v53462_v48 }
 0x8cb   : > { %48880 = vmatprep.subr.bf16.mxu1 %v53464_v1 }
 0x8cd   : > { %44305 = vmatmul.mubr.f32.vlgmr.msra.gmra.mrb[18].mxu1 %v7809_v37 }
 0x8ce   : > { %48882 = vmatpush3.bf16.msra.mxu1 %v53464_v1  ;;  %44315 = vmatprep.mubr.f32.mxu1 %v7800_v25 }
 0x8cf   : > { %48884 = vmatprep.subr.bf16.mxu1 %v53466_v15 }
 0x8d2   : > { %48886 = vmatpush3.bf16.msra.mxu1 %v53466_v15 }
 0x8d3   : > { %48888 = vmatprep.subr.bf16.mxu1 %v53437_v40 }
 0x8d5   : > { %44316 = vmatmul.mubr.f32.vlgmr.msra.gmra.mrb[18].mxu1 %v7810_v54 }
 0x8d6   : > { %48890 = vmatpush3.bf16.msra.mxu1 %v53437_v40  ;;  %44326 = vmatprep.mubr.f32.mxu1 %v7801_v2 }
 0x8d7   : > { %48892 = vmatprep.subr.bf16.mxu1 %v53447_v26 }
 0x8da   : > { %48894 = vmatpush3.bf16.msra.mxu1 %v53447_v26 }
 0x8db   : > { %48896 = vmatprep.subr.bf16.mxu1 %v53468_v36 }
 0x8dd   : > { %44327 = vmatmul.mubr.f32.vlgmr.msra.gmra.mrb[18].mxu1 %v7811_v41 }
 0x8de   : > { %48898 = vmatpush3.bf16.msra.mxu1 %v53468_v36  ;;  %44337 = vmatprep.mubr.f32.mxu1 %v7799_v43 }
 0x8df   : > { %48900 = vmatprep.subr.bf16.mxu1 %v53470_v7 }
 0x8e2   : > { %48902 = vmatpush3.bf16.msra.mxu1 %v53470_v7 }
 0x8e3   : > { %48904 = vmatprep.subr.bf16.mxu1 %v53437_v40 }
 0x8e5   : > { %44338 = vmatmul.mubr.f32.vlgmr.msra.gmra.mrb[18].mxu1 %v7809_v37 }
 0x8e6   : > { %48906 = vmatpush3.bf16.msra.mxu1 %v53437_v40  ;;  %44348 = vmatprep.mubr.f32.mxu1 %v7799_v43 }
 0x8e7   : > { %48908 = vmatprep.subr.bf16.mxu1 %v53447_v26 }
 0x8ea   : > { %48910 = vmatpush3.bf16.msra.mxu1 %v53447_v26 }
 0x8ed   : > { %44349 = vmatmul.mubr.f32.vlgmr.msra.gmra.mrb[18].mxu1 %v7809_v37 }
 0x8ee   : > { %44355 = vmatprep.mubr.f32.mxu1 %v56327_v31 }
 0x9c0   : > { %v44350_v54 = vpop.f32.mrb[18].mxu1 }
 0x9c1   : > { %8262 = vrot.lane.b32.xlu1 %v44350_v54, %s52743_s29  ;;  %v8248_v12 = vpop.f32.mrb[19].mxu1 }
 0x9c2   : > { %8260 = vrot.lane.b32.xlu0 %v8248_v12, %s52743_s29 }
 0xa33   : > { %v8263_v2 = vpop.permute.xlu1 %8262 }
 0xa34   : > { %v8267_v41 = vadd.f32 %v53725_v55, %v8263_v2  ;;  %v8261_v25 = vpop.permute.xlu0 %8260 }
 0xa35   : > { %v8266_v42 = vadd.f32 %v53728_v16, %v8261_v25  ;;  %v8272_v16 = vmul.f32 %v8270_v35, %v53508_v0 }
 0xa36   : > { %52571 = vtanh.f32 %v8267_v41 }
 0xa37   : > { %52573 = vtanh.f32 %v8266_v42 }
 0xa40   : > { %v52572_v29 = vpop.eup %52571 }
 0xa41   : > { %v52574_v34 = vpop.eup %52573  ;;  %8278 = vrot.lane.b32.xlu1 %v52572_v29, %s52743_s29 }
 0xa42   : > { %8276 = vrot.lane.b32.xlu0 %v52574_v34, %s52743_s29 }
 0xab3   : > { %v8279_v37 = vpop.permute.xlu1 %8278 }
 0xab4   : > { %v8283_v55 = vmul.f32 %v53732_v61, %v8279_v37  ;;  %v8277_v43 = vpop.permute.xlu0 %8276 }
 0xab5   : > { %v8282_v57 = vmul.f32 %v53734_v28, %v8277_v43  ;;  %v56330_v43 = vld [vmem:[#allocation11_spill] sm:$0xff] }
 0xab6   : > { %v53774_v22 = vadd.f32 %v8283_v55, %v8273_v38  ;;  %v56328_v38 = vld [vmem:[#allocation5_spill] sm:$0xff] }
 0xab7   : > { %v53776_v54 = vadd.f32 %v8282_v57, %v8272_v16  ;;  %v56329_v55 = vld [vmem:[#allocation9_spill] sm:$0xff]  ;;  %v56331_v16 = vld [vmem:[#allocation15_spill] sm:$0xff] }
 0xab8   : > { %v8290_v12 = vand.u32 4294901760, %v53774_v22  ;;  %11740 = vrot.lane.b32.xlu1 %v53774_v22, %s52741_s7  ;;  %v56332_v57 = vld [vmem:[#allocation17_spill] sm:$0xff] }
 0xab9   : > { %v8287_v2 = vand.u32 4294901760, %v53776_v54  ;;  %11738 = vrot.lane.b32.xlu0 %v53776_v54, %s52741_s7 }
 0xaba   : > { %v8442_v39 = vsub.f32 %v53774_v22, %v8290_v12 }
 0xabb   : > { %v48911_v61 = vpack.c.bf16 %v8290_v12, %v8287_v2  ;;  %v8435_v0 = vsub.f32 %v53776_v54, %v8287_v2  ;;  %v56333_v12 = vld [vmem:[#allocation6_spill] sm:$0xff]  ;;  %v56334_v2 = vld [vmem:[#allocation7_spill] sm:$0xff] }
 0xabc   : > { %v8443_v28 = vand.u32 4294901760, %v8442_v39 }
 0xabd   : > { %48912 = vmatprep.subr.bf16.mxu1 %v48911_v61  ;;  %v8436_v41 = vand.u32 4294901760, %v8435_v0  ;;  %v48919_v35 = vpack.c.bf16 %v8442_v39, %v8435_v0 }
 0xabe   : > { %48914 = vmatpush3.bf16.msra.mxu1 %v48911_v61  ;;  %v8444_v25 = vsub.f32 %v8442_v39, %v8443_v28  ;;  %v56335_v39 = vld [vmem:[#allocation8_spill] sm:$0xff] }
 0xabf   : > { %v8437_v42 = vsub.f32 %v8435_v0, %v8436_v41  ;;  %v48927_v37 = vpack.c.bf16 %v8443_v28, %v8436_v41  ;;  %v56336_v0 = vld [vmem:[#allocation10_spill] sm:$0xff]  ;;  %v56337_v28 = vld [vmem:[#allocation12_spill] sm:$0xff] }
 0xac0   : > { %v8445_v29 = vand.u32 4294901760, %v8444_v25  ;;  %v56338_v41 = vld [vmem:[#allocation14_spill] sm:$0xff]  ;;  %v56339_v25 = vld [vmem:[#allocation16_spill] sm:$0xff] }
 0xac1   : > { %44356 = vmatmul.mubr.f32.vlgmr.msra.gmra.mrb[20].mxu1 %v52929_v46  ;;  %v8438_v34 = vand.u32 4294901760, %v8437_v42  ;;  %v56340_v42 = vld [vmem:[#allocation18_spill] sm:$0xff] }
 0xac2   : > { %44358 = vmatprep.mubr.f32.mxu1 %v52939_v50 }
 0xac3   : > { %v48915_v33 = vpack.c.bf16 %v8445_v29, %v8438_v34  ;;  %v56341_v29 = vld [vmem:[#allocation19_spill] sm:$0xff]  ;;  %v9047_v34 = vsel %vm973_vm1, %v53776_v54, 0 }
 0xac5   : > { %44359 = vmatmul.mubr.f32.gmra.mrb[22].mxu1 %v52958_v58  ;;  %48916 = vmatprep.subr.bf16.mxu1 %v48915_v33 }
 0xac6   : > { %48918 = vmatpush3.bf16.msra.mxu1 %v48915_v33  ;;  %44361 = vmatprep.mubr.f32.mxu1 %v52963_v62  ;;  %v9050_v33 = vsel %vm973_vm1, %v53774_v22, 0 }
 0xac7   : > { %48920 = vmatprep.subr.bf16.mxu1 %v48919_v35 }
 0xac9   : > { %44362 = vmatmul.mubr.f32.gmra.mrb[24].mxu1 %v52975_v3 }
 0xaca   : > { %44364 = vmatprep.mubr.f32.mxu1 %v52980_v5 }
 0xacd   : > { %44365 = vmatmul.mubr.f32.gmra.mrb[26].mxu1 %v52985_v6 }
 0xace   : > { %44371 = vmatprep.mubr.f32.mxu1 %v52838_v9 }
 0xad1   : > { %44372 = vmatmul.mubr.f32.vlgmr.msra.gmra.mrb[20].mxu1 %v52840_v10 }
 0xad2   : > { %48922 = vmatpush3.bf16.msra.mxu1 %v48919_v35  ;;  %44374 = vmatprep.mubr.f32.mxu1 %v52842_v11  ;;  %v9121_v35 = vand.u32 4294901760, %v9047_v34 }
 0xad3   : > { %48924 = vmatprep.subr.bf16.mxu1 %v48911_v61 }
 0xad5   : > { %44375 = vmatmul.mubr.f32.gmra.mrb[22].mxu1 %v52848_v14 }
 0xad6   : > { %44377 = vmatprep.mubr.f32.mxu1 %v52862_v21 }
 0xad9   : > { %44378 = vmatmul.mubr.f32.gmra.mrb[24].mxu1 %v52873_v23 }
 0xada   : > { %44380 = vmatprep.mubr.f32.mxu1 %v52875_v24 }
 0xadd   : > { %44381 = vmatmul.mubr.f32.gmra.mrb[26].mxu1 %v52946_v53 }
 0xade   : > { %44387 = vmatprep.mubr.f32.mxu1 %v52854_v18 }
 0xae1   : > { %44388 = vmatmul.mubr.f32.vlgmr.msra.gmra.mrb[20].mxu1 %v52857_v19 }
 0xae2   : > { %48926 = vmatpush3.bf16.msra.mxu1 %v48911_v61  ;;  %44390 = vmatprep.mubr.f32.mxu1 %v52860_v20 }
 0xae3   : > { %48928 = vmatprep.subr.bf16.mxu1 %v48927_v37 }
 0xae5   : > { %44391 = vmatmul.mubr.f32.gmra.mrb[22].mxu1 %v56328_v38 }
 0xae6   : > { %44393 = vmatprep.mubr.f32.mxu1 %v56329_v55 }
 0xae9   : > { %44394 = vmatmul.mubr.f32.gmra.mrb[24].mxu1 %v56330_v43 }
 0xaea   : > { %44396 = vmatprep.mubr.f32.mxu1 %v56331_v16  ;;  %v56346_v16 = vld [vmem:[#allocation24_spill] sm:$0xff] }
 0xaed   : > { %44397 = vmatmul.mubr.f32.gmra.mrb[26].mxu1 %v56332_v57  ;;  %v56345_v57 = vld [vmem:[#allocation23_spill] sm:$0xff] }
 0xaee   : > { %44403 = vmatprep.mubr.f32.mxu1 %v56333_v12  ;;  %v56344_v12 = vld [vmem:[#allocation22_spill] sm:$0xff] }
 0xaf1   : > { %44404 = vmatmul.mubr.f32.vlgmr.msra.gmra.mrb[20].mxu1 %v56334_v2 }
 0xaf2   : > { %48930 = vmatpush3.bf16.msra.mxu1 %v48927_v37  ;;  %44406 = vmatprep.mubr.f32.mxu1 %v56335_v39  ;;  %v9122_v37 = vsub.f32 %v9047_v34, %v9121_v35 }
 0xaf3   : > { %48932 = vmatprep.subr.bf16.mxu1 %v48911_v61 }
 0xaf5   : > { %44407 = vmatmul.mubr.f32.gmra.mrb[22].mxu1 %v56336_v0  ;;  %v56343_v0 = vld [vmem:[#allocation21_spill] sm:$0xff] }
 0xaf6   : > { %44409 = vmatprep.mubr.f32.mxu1 %v56337_v28 }
 0xaf9   : > { %44410 = vmatmul.mubr.f32.gmra.mrb[24].mxu1 %v56338_v41  ;;  %v9123_v41 = vand.u32 4294901760, %v9122_v37 }
 0xafa   : > { %44412 = vmatprep.mubr.f32.mxu1 %v56339_v25  ;;  %v56342_v25 = vld [vmem:[#allocation20_spill] sm:$0xff] }
 0xafb   : > { %v9124_v34 = vsub.f32 %v9122_v37, %v9123_v41 }
 0xafd   : > { %44413 = vmatmul.mubr.f32.gmra.mrb[26].mxu1 %v56340_v42  ;;  %v9125_v2 = vand.u32 4294901760, %v9124_v34 }
 0xafe   : > { %44419 = vmatprep.mubr.f32.mxu1 %v52838_v9 }
 0xb01   : > { %44420 = vmatmul.mubr.f32.vlgmr.msra.gmra.mrb[20].mxu1 %v52840_v10 }
 0xb02   : > { %48934 = vmatpush3.bf16.msra.mxu1 %v48911_v61  ;;  %44422 = vmatprep.mubr.f32.mxu1 %v52842_v11  ;;  %v9131_v61 = vand.u32 4294901760, %v9050_v33 }
 0xb03   : > { %48936 = vmatprep.subr.bf16.mxu1 %v56341_v29 }
 0xb04   : > { %v9132_v42 = vsub.f32 %v9050_v33, %v9131_v61 }
 0xb05   : > { %44423 = vmatmul.mubr.f32.gmra.mrb[22].mxu1 %v52848_v14 }
 0xb06   : > { %44425 = vmatprep.mubr.f32.mxu1 %v52862_v21  ;;  %v9133_v28 = vand.u32 4294901760, %v9132_v42 }
 0xb08   : > { %v9134_v39 = vsub.f32 %v9132_v42, %v9133_v28 }
 0xb09   : > { %44426 = vmatmul.mubr.f32.gmra.mrb[24].mxu1 %v52873_v23 }
 0xb0a   : > { %44428 = vmatprep.mubr.f32.mxu1 %v52875_v24  ;;  %v9135_v33 = vand.u32 4294901760, %v9134_v39  ;;  %v56348_v39 = vld [vmem:[#allocation26_spill] sm:$0xff] }
 0xb0d   : > { %44429 = vmatmul.mubr.f32.gmra.mrb[26].mxu1 %v52946_v53 }
 0xb0e   : > { %44435 = vmatprep.mubr.f32.mxu1 %v52838_v9 }
 0xb11   : > { %44436 = vmatmul.mubr.f32.vlgmr.msra.gmra.mrb[20].mxu1 %v52840_v10 }
 0xb12   : > { %44438 = vmatprep.mubr.f32.mxu1 %v52842_v11  ;;  %48938 = vmatpush3.bf16.msra.mxu1 %v56341_v29 }
 0xb13   : > { %48940 = vmatprep.subr.bf16.mxu1 %v56342_v25 }
 0xb15   : > { %44439 = vmatmul.mubr.f32.gmra.mrb[22].mxu1 %v52848_v14 }
 0xb16   : > { %44441 = vmatprep.mubr.f32.mxu1 %v52862_v21  ;;  %48942 = vmatpush3.bf16.msra.mxu1 %v56342_v25 }
 0xb17   : > { %48944 = vmatprep.subr.bf16.mxu1 %v56343_v0 }
 0xb19   : > { %44442 = vmatmul.mubr.f32.gmra.mrb[24].mxu1 %v52873_v23 }
 0xb1a   : > { %44444 = vmatprep.mubr.f32.mxu1 %v52875_v24 }
 0xb1d   : > { %44445 = vmatmul.mubr.f32.gmra.mrb[26].mxu1 %v52946_v53 }
 0xb1e   : > { %44455 = vmatprep.mubr.f32.mxu1 %v9125_v2  ;;  %v56347_v2 = vld [vmem:[#allocation25_spill] sm:$0xff] }
 0xb21   : > { %44456 = vmatmul.mubr.f32.vlgmr.msra.gmra.mrb[28].mxu1 %v9135_v33 }
 0xb22   : > { %48946 = vmatpush3.bf16.msra.mxu1 %v56343_v0  ;;  %44466 = vmatprep.mubr.f32.mxu1 %v9121_v35 }
 0xb23   : > { %48948 = vmatprep.subr.bf16.mxu1 %v56344_v12 }
 0xb26   : > { %48950 = vmatpush3.bf16.msra.mxu1 %v56344_v12 }
 0xb27   : > { %48952 = vmatprep.subr.bf16.mxu1 %v56345_v57 }
 0xb29   : > { %44467 = vmatmul.mubr.f32.vlgmr.msra.gmra.mrb[28].mxu1 %v9131_v61 }
 0xb2a   : > { %48954 = vmatpush3.bf16.msra.mxu1 %v56345_v57  ;;  %44477 = vmatprep.mubr.f32.mxu1 %v9122_v37 }
 0xb2b   : > { %48956 = vmatprep.subr.bf16.mxu1 %v56346_v16 }
 0xb2e   : > { %48958 = vmatpush3.bf16.msra.mxu1 %v56346_v16 }
 0xb2f   : > { %48960 = vmatprep.subr.bf16.mxu1 %v56341_v29 }
 0xb31   : > { %44478 = vmatmul.mubr.f32.vlgmr.msra.gmra.mrb[28].mxu1 %v9132_v42 }
 0xb32   : > { %48962 = vmatpush3.bf16.msra.mxu1 %v56341_v29  ;;  %44488 = vmatprep.mubr.f32.mxu1 %v9123_v41 }
 0xb33   : > { %48964 = vmatprep.subr.bf16.mxu1 %v56342_v25 }
 0xb36   : > { %48966 = vmatpush3.bf16.msra.mxu1 %v56342_v25 }
 0xb37   : > { %48968 = vmatprep.subr.bf16.mxu1 %v56347_v2 }
 0xb39   : > { %44489 = vmatmul.mubr.f32.vlgmr.msra.gmra.mrb[28].mxu1 %v9133_v28 }
 0xb3a   : > { %48970 = vmatpush3.bf16.msra.mxu1 %v56347_v2  ;;  %44499 = vmatprep.mubr.f32.mxu1 %v9121_v35 }
 0xb3b   : > { %48972 = vmatprep.subr.bf16.mxu1 %v56348_v39 }
 0xb3e   : > { %48974 = vmatpush3.bf16.msra.mxu1 %v56348_v39 }
 0xb3f   : > { %48976 = vmatprep.subr.bf16.mxu1 %v56341_v29 }
 0xb41   : > { %44500 = vmatmul.mubr.f32.vlgmr.msra.gmra.mrb[28].mxu1 %v9131_v61 }
 0xb42   : > { %48978 = vmatpush3.bf16.msra.mxu1 %v56341_v29  ;;  %44510 = vmatprep.mubr.f32.mxu1 %v9121_v35 }
 0xb43   : > { %48980 = vmatprep.subr.bf16.mxu1 %v56342_v25 }
 0xb46   : > { %48982 = vmatpush3.bf16.msra.mxu1 %v56342_v25 }
 0xb47   : > { %48984 = vmatprep.subr.bf16.mxu1 %v53118_v59 }
 0xb49   : > { %44511 = vmatmul.mubr.f32.vlgmr.msra.gmra.mrb[28].mxu1 %v9131_v61 }
 0xb4a   : > { %48986 = vmatpush3.bf16.msra.mxu1 %v53118_v59 }
 0xb4b   : > { %48988 = vmatprep.subr.bf16.mxu1 %v53128_v8 }
 0xb4e   : > { %48990 = vmatpush3.bf16.msra.mxu1 %v53128_v8 }
 0xb4f   : > { %48992 = vmatprep.subr.bf16.mxu1 %v56302_v56 }
 0xbe4   : > { %v44437_v28 = vpop.f32.mrb[20].mxu1 }
 0xbe5   : > { %v9586_v41 = vsel %vm973_vm1, %v44437_v28, 0  ;;  %v9000_v42 = vpop.f32.mrb[21].mxu1 }
 0xbe6   : > { %v9667_v35 = vand.u32 4294901760, %v9586_v41  ;;  %v9583_v37 = vsel %vm973_vm1, %v9000_v42, 0 }
 0xbe7   : > { %v9657_v34 = vand.u32 4294901760, %v9583_v37 }
 0xbe8   : > { %v9668_v33 = vsub.f32 %v9586_v41, %v9667_v35  ;;  %v44440_v39 = vpop.f32.mrb[22].mxu1 }
 0xbe9   : > { %v9658_v2 = vsub.f32 %v9583_v37, %v9657_v34  ;;  %v9012_v61 = vpop.f32.mrb[23].mxu1 }
 0xbea   : > { %v9669_v16 = vand.u32 4294901760, %v9668_v33 }
 0xbeb   : > { %v9659_v57 = vand.u32 4294901760, %v9658_v2 }
 0xbec   : > { %v9670_v12 = vsub.f32 %v9668_v33, %v9669_v16  ;;  %v53868_v0 = vpop.f32.mrb[24].mxu1 }
 0xbed   : > { %v53870_v25 = vpop.f32.mrb[25].mxu1  ;;  %v9660_v29 = vsub.f32 %v9658_v2, %v9659_v57 }
 0xbee   : > { %v9671_v55 = vand.u32 4294901760, %v9670_v12  ;;  %v10122_v12 = vsel %vm973_vm1, %v44440_v39, 0 }
 0xbef   : > { %v9661_v43 = vand.u32 4294901760, %v9660_v29 }
 0xbf0   : > { %v53872_v28 = vpop.f32.mrb[26].mxu1 }
 0xbf1   : > { %v53874_v38 = vpop.f32.mrb[27].mxu1  ;;  %44521 = vmatprep.mubr.f32.mxu1 %v9661_v43 }
 0xbf2   : > { %44522 = vmatmul.mubr.f32.vlgmr.msra.gmra.mrb[28].mxu1 %v9671_v55  ;;  %v10119_v55 = vsel %vm973_vm1, %v9012_v61, 0  ;;  %v10658_v61 = vsel %vm973_vm1, %v53868_v0, 0 }
 0xbf3   : > { %48994 = vmatpush3.bf16.msra.mxu1 %v56302_v56  ;;  %44532 = vmatprep.mubr.f32.mxu1 %v9657_v34  ;;  %v10193_v43 = vand.u32 4294901760, %v10119_v55 }
 0xbf4   : > { %48996 = vmatprep.subr.bf16.mxu1 %v56303_v52 }
 0xbf5   : > { %v10194_v29 = vsub.f32 %v10119_v55, %v10193_v43 }
 0xbf7   : > { %48998 = vmatpush3.bf16.msra.mxu1 %v56303_v52 }
 0xbf8   : > { %49000 = vmatprep.subr.bf16.mxu1 %v56304_v51 }
 0xbfa   : > { %44533 = vmatmul.mubr.f32.vlgmr.msra.gmra.mrb[28].mxu1 %v9667_v35 }
 0xbfb   : > { %49002 = vmatpush3.bf16.msra.mxu1 %v56304_v51  ;;  %44543 = vmatprep.mubr.f32.mxu1 %v9658_v2  ;;  %v10195_v2 = vand.u32 4294901760, %v10194_v29 }
 0xbfc   : > { %49004 = vmatprep.subr.bf16.mxu1 %v56305_v30 }
 0xbff   : > { %49006 = vmatpush3.bf16.msra.mxu1 %v56305_v30 }
 0xc00   : > { %49008 = vmatprep.subr.bf16.mxu1 %v53118_v59 }
 0xc02   : > { %44544 = vmatmul.mubr.f32.vlgmr.msra.gmra.mrb[28].mxu1 %v9668_v33 }
 0xc03   : > { %49010 = vmatpush3.bf16.msra.mxu1 %v53118_v59  ;;  %44554 = vmatprep.mubr.f32.mxu1 %v9659_v57  ;;  %v10203_v57 = vand.u32 4294901760, %v10122_v12 }
 0xc04   : > { %49012 = vmatprep.subr.bf16.mxu1 %v53128_v8 }
 0xc05   : > { %v10204_v41 = vsub.f32 %v10122_v12, %v10203_v57  ;;  %v10739_v12 = vand.u32 4294901760, %v10658_v61 }
 0xc07   : > { %49014 = vmatpush3.bf16.msra.mxu1 %v53128_v8  ;;  %v10205_v42 = vand.u32 4294901760, %v10204_v41 }
 0xc08   : > { %49016 = vmatprep.subr.bf16.mxu1 %v56306_v13 }
 0xc09   : > { %v10206_v37 = vsub.f32 %v10204_v41, %v10205_v42 }
 0xc0a   : > { %44555 = vmatmul.mubr.f32.vlgmr.msra.gmra.mrb[28].mxu1 %v9669_v16  ;;  %v10196_v16 = vsub.f32 %v10194_v29, %v10195_v2 }
 0xc0b   : > { %49018 = vmatpush3.bf16.msra.mxu1 %v56306_v13  ;;  %44565 = vmatprep.mubr.f32.mxu1 %v9657_v34 }
 0xc0c   : > { %49020 = vmatprep.subr.bf16.mxu1 %v56307_v27  ;;  %v10197_v39 = vand.u32 4294901760, %v10196_v16  ;;  %v56349_v16 = vld [vmem:[#allocation40_spill] sm:$0xff] }
 0xc0f   : > { %49022 = vmatpush3.bf16.msra.mxu1 %v56307_v27 }
 0xc10   : > { %49024 = vmatprep.subr.bf16.mxu1 %v53118_v59 }
 0xc12   : > { %44566 = vmatmul.mubr.f32.vlgmr.msra.gmra.mrb[28].mxu1 %v9667_v35 }
 0xc13   : > { %49026 = vmatpush3.bf16.msra.mxu1 %v53118_v59  ;;  %44576 = vmatprep.mubr.f32.mxu1 %v9657_v34  ;;  %v10207_v34 = vand.u32 4294901760, %v10206_v37  ;;  %v56351_v37 = vld [vmem:[#allocation42_spill] sm:$0xff] }
 0xc14   : > { %49028 = vmatprep.subr.bf16.mxu1 %v53128_v8 }
 0xc17   : > { %49030 = vmatpush3.bf16.msra.mxu1 %v53128_v8 }
 0xc18   : > { %49032 = vmatprep.subr.bf16.mxu1 %v53212_v32 }
 0xc1a   : > { %44577 = vmatmul.mubr.f32.vlgmr.msra.gmra.mrb[28].mxu1 %v9667_v35  ;;  %v10655_v35 = vsel %vm973_vm1, %v53870_v25, 0 }
 0xc1b   : > { %49034 = vmatpush3.bf16.msra.mxu1 %v53212_v32  ;;  %44587 = vmatprep.mubr.f32.mxu1 %v10197_v39  ;;  %v10729_v33 = vand.u32 4294901760, %v10655_v35  ;;  %v56350_v39 = vld [vmem:[#allocation41_spill] sm:$0xff] }
 0xc1c   : > { %49036 = vmatprep.subr.bf16.mxu1 %v53221_v63 }
 0xc1d   : > { %v10730_v55 = vsub.f32 %v10655_v35, %v10729_v33  ;;  %v56354_v35 = vld [vmem:[#allocation45_spill] sm:$0xff] }
 0xc1f   : > { %49038 = vmatpush3.bf16.msra.mxu1 %v53221_v63  ;;  %v10731_v25 = vand.u32 4294901760, %v10730_v55 }
 0xc20   : > { %49040 = vmatprep.subr.bf16.mxu1 %v53229_v4 }
 0xc22   : > { %44588 = vmatmul.mubr.f32.vlgmr.msra.gmra.mrb[28].mxu1 %v10207_v34  ;;  %v56352_v34 = vld [vmem:[#allocation43_spill] sm:$0xff] }
 0xc23   : > { %49042 = vmatpush3.bf16.msra.mxu1 %v53229_v4  ;;  %44598 = vmatprep.mubr.f32.mxu1 %v10193_v43 }
 0xc24   : > { %49044 = vmatprep.subr.bf16.mxu1 %v53233_v17 }
 0xc27   : > { %49046 = vmatpush3.bf16.msra.mxu1 %v53233_v17 }
 0xc28   : > { %49048 = vmatprep.subr.bf16.mxu1 %v56308_v45 }
 0xc2a   : > { %44599 = vmatmul.mubr.f32.vlgmr.msra.gmra.mrb[28].mxu1 %v10203_v57 }
 0xc2b   : > { %49050 = vmatpush3.bf16.msra.mxu1 %v56308_v45  ;;  %44609 = vmatprep.mubr.f32.mxu1 %v10194_v29  ;;  %v10740_v29 = vsub.f32 %v10658_v61, %v10739_v12  ;;  %v11191_v61 = vsel %vm973_vm1, %v53874_v38, 0 }
 0xc2c   : > { %49052 = vmatprep.subr.bf16.mxu1 %v56309_v44 }
 0xc2f   : > { %49054 = vmatpush3.bf16.msra.mxu1 %v56309_v44 }
 0xc30   : > { %49056 = vmatprep.subr.bf16.mxu1 %v53212_v32 }
 0xc32   : > { %44610 = vmatmul.mubr.f32.vlgmr.msra.gmra.mrb[28].mxu1 %v10204_v41  ;;  %v10741_v41 = vand.u32 4294901760, %v10740_v29 }
 0xc33   : > { %49058 = vmatpush3.bf16.msra.mxu1 %v53212_v32  ;;  %44620 = vmatprep.mubr.f32.mxu1 %v10195_v2  ;;  %v10732_v2 = vsub.f32 %v10730_v55, %v10731_v25 }
 0xc34   : > { %49060 = vmatprep.subr.bf16.mxu1 %v53221_v63 }
 0xc35   : > { %v10733_v0 = vand.u32 4294901760, %v10732_v2  ;;  %v56355_v2 = vld [vmem:[#allocation46_spill] sm:$0xff] }
 0xc37   : > { %49062 = vmatpush3.bf16.msra.mxu1 %v53221_v63 }
 0xc38   : > { %49064 = vmatprep.subr.bf16.mxu1 %v56310_v49 }
 0xc3a   : > { %44621 = vmatmul.mubr.f32.vlgmr.msra.gmra.mrb[28].mxu1 %v10205_v42  ;;  %v10742_v42 = vsub.f32 %v10740_v29, %v10741_v41 }
 0xc3b   : > { %49066 = vmatpush3.bf16.msra.mxu1 %v56310_v49  ;;  %44631 = vmatprep.mubr.f32.mxu1 %v10193_v43 }
 0xc3c   : > { %49068 = vmatprep.subr.bf16.mxu1 %v56311_v47 }
 0xc3f   : > { %49070 = vmatpush3.bf16.msra.mxu1 %v56311_v47 }
 0xc40   : > { %49072 = vmatprep.subr.bf16.mxu1 %v53212_v32 }
 0xc42   : > { %44632 = vmatmul.mubr.f32.vlgmr.msra.gmra.mrb[28].mxu1 %v10203_v57 }
 0xc43   : > { %49074 = vmatpush3.bf16.msra.mxu1 %v53212_v32  ;;  %44642 = vmatprep.mubr.f32.mxu1 %v10193_v43  ;;  %v10743_v43 = vand.u32 4294901760, %v10742_v42 }
 0xc44   : > { %49076 = vmatprep.subr.bf16.mxu1 %v53221_v63 }
 0xc47   : > { %49078 = vmatpush3.bf16.msra.mxu1 %v53221_v63 }
 0xc48   : > { %49080 = vmatprep.subr.bf16.mxu1 %v56349_v16 }
 0xc4a   : > { %44643 = vmatmul.mubr.f32.vlgmr.msra.gmra.mrb[28].mxu1 %v10203_v57  ;;  %v56353_v57 = vld [vmem:[#allocation44_spill] sm:$0xff] }
 0xc4b   : > { %49082 = vmatpush3.bf16.msra.mxu1 %v56349_v16  ;;  %44653 = vmatprep.mubr.f32.mxu1 %v10733_v0  ;;  %v56356_v0 = vld [vmem:[#allocation47_spill] sm:$0xff] }
 0xc4c   : > { %49084 = vmatprep.subr.bf16.mxu1 %v56350_v39 }
 0xc4f   : > { %49086 = vmatpush3.bf16.msra.mxu1 %v56350_v39 }
 0xc50   : > { %49088 = vmatprep.subr.bf16.mxu1 %v56351_v37 }
 0xc52   : > { %44654 = vmatmul.mubr.f32.vlgmr.msra.gmra.mrb[28].mxu1 %v10743_v43 }
 0xc53   : > { %49090 = vmatpush3.bf16.msra.mxu1 %v56351_v37  ;;  %44664 = vmatprep.mubr.f32.mxu1 %v10729_v33 }
 0xc54   : > { %49092 = vmatprep.subr.bf16.mxu1 %v56352_v34 }
 0xc57   : > { %49094 = vmatpush3.bf16.msra.mxu1 %v56352_v34 }
 0xc58   : > { %49096 = vmatprep.subr.bf16.mxu1 %v56353_v57 }
 0xc5a   : > { %44665 = vmatmul.mubr.f32.vlgmr.msra.gmra.mrb[28].mxu1 %v10739_v12 }
 0xc5b   : > { %49098 = vmatpush3.bf16.msra.mxu1 %v56353_v57  ;;  %44675 = vmatprep.mubr.f32.mxu1 %v10730_v55  ;;  %v11265_v55 = vand.u32 4294901760, %v11191_v61  ;;  %v56360_v57 = vld [vmem:[#allocation51_spill] sm:$0xff] }
 0xc5c   : > { %49100 = vmatprep.subr.bf16.mxu1 %v56354_v35 }
 0xc5f   : > { %49102 = vmatpush3.bf16.msra.mxu1 %v56354_v35  ;;  %v56357_v35 = vld [vmem:[#allocation48_spill] sm:$0xff] }
 0xc60   : > { %49104 = vmatprep.subr.bf16.mxu1 %v56349_v16 }
 0xc62   : > { %44676 = vmatmul.mubr.f32.vlgmr.msra.gmra.mrb[28].mxu1 %v10740_v29  ;;  %v11194_v29 = vsel %vm973_vm1, %v53872_v28, 0 }
 0xc63   : > { %49106 = vmatpush3.bf16.msra.mxu1 %v56349_v16  ;;  %44686 = vmatprep.mubr.f32.mxu1 %v10731_v25  ;;  %v11266_v25 = vsub.f32 %v11191_v61, %v11265_v55  ;;  %v11275_v42 = vand.u32 4294901760, %v11194_v29 }
 0xc64   : > { %49108 = vmatprep.subr.bf16.mxu1 %v56350_v39 }
 0xc65   : > { %v11267_v38 = vand.u32 4294901760, %v11266_v25 }
 0xc67   : > { %49110 = vmatpush3.bf16.msra.mxu1 %v56350_v39  ;;  %v11268_v43 = vsub.f32 %v11266_v25, %v11267_v38 }
 0xc68   : > { %49112 = vmatprep.subr.bf16.mxu1 %v56355_v2 }
 0xc69   : > { %v11269_v28 = vand.u32 4294901760, %v11268_v43  ;;  %v56362_v43 = vld [vmem:[#allocation53_spill] sm:$0xff] }
 0xc6a   : > { %44687 = vmatmul.mubr.f32.vlgmr.msra.gmra.mrb[28].mxu1 %v10741_v41  ;;  %v11276_v41 = vsub.f32 %v11194_v29, %v11275_v42  ;;  %v56359_v29 = vld [vmem:[#allocation50_spill] sm:$0xff] }
 0xc6b   : > { %49114 = vmatpush3.bf16.msra.mxu1 %v56355_v2  ;;  %44697 = vmatprep.mubr.f32.mxu1 %v10729_v33 }
 0xc6c   : > { %49116 = vmatprep.subr.bf16.mxu1 %v56356_v0  ;;  %v11277_v2 = vand.u32 4294901760, %v11276_v41 }
 0xc6e   : > { %v11278_v61 = vsub.f32 %v11276_v41, %v11277_v2 }
 0xc6f   : > { %49118 = vmatpush3.bf16.msra.mxu1 %v56356_v0  ;;  %v56358_v0 = vld [vmem:[#allocation49_spill] sm:$0xff] }
 0xc70   : > { %49120 = vmatprep.subr.bf16.mxu1 %v56349_v16 }
 0xc72   : > { %44698 = vmatmul.mubr.f32.vlgmr.msra.gmra.mrb[28].mxu1 %v10739_v12 }
 0xc73   : > { %49122 = vmatpush3.bf16.msra.mxu1 %v56349_v16  ;;  %44708 = vmatprep.mubr.f32.mxu1 %v10729_v33  ;;  %v11279_v33 = vand.u32 4294901760, %v11278_v61 }
 0xc74   : > { %49124 = vmatprep.subr.bf16.mxu1 %v56350_v39 }
 0xc77   : > { %49126 = vmatpush3.bf16.msra.mxu1 %v56350_v39 }
 0xc78   : > { %49128 = vmatprep.subr.bf16.mxu1 %v56357_v35 }
 0xc7a   : > { %44709 = vmatmul.mubr.f32.vlgmr.msra.gmra.mrb[28].mxu1 %v10739_v12  ;;  %v56361_v12 = vld [vmem:[#allocation52_spill] sm:$0xff] }
 0xc7b   : > { %49130 = vmatpush3.bf16.msra.mxu1 %v56357_v35  ;;  %44719 = vmatprep.mubr.f32.mxu1 %v11269_v28  ;;  %v56363_v28 = vld [vmem:[#allocation54_spill] sm:$0xff] }
 0xc7c   : > { %49132 = vmatprep.subr.bf16.mxu1 %v56358_v0 }
 0xc7f   : > { %49134 = vmatpush3.bf16.msra.mxu1 %v56358_v0 }
 0xc80   : > { %49136 = vmatprep.subr.bf16.mxu1 %v56359_v29 }
 0xc82   : > { %44720 = vmatmul.mubr.f32.vlgmr.msra.gmra.mrb[28].mxu1 %v11279_v33 }
 0xc83   : > { %49138 = vmatpush3.bf16.msra.mxu1 %v56359_v29  ;;  %44730 = vmatprep.mubr.f32.mxu1 %v11265_v55 }
 0xc84   : > { %49140 = vmatprep.subr.bf16.mxu1 %v56360_v57 }
 0xc87   : > { %49142 = vmatpush3.bf16.msra.mxu1 %v56360_v57 }
 0xc88   : > { %49144 = vmatprep.subr.bf16.mxu1 %v56361_v12 }
 0xc8a   : > { %44731 = vmatmul.mubr.f32.vlgmr.msra.gmra.mrb[28].mxu1 %v11275_v42 }
 0xc8b   : > { %49146 = vmatpush3.bf16.msra.mxu1 %v56361_v12  ;;  %44741 = vmatprep.mubr.f32.mxu1 %v11266_v25  ;;  %v56364_v25 = vld [vmem:[#allocation55_spill] sm:$0xff] }
 0xc8c   : > { %49148 = vmatprep.subr.bf16.mxu1 %v56362_v43 }
 0xc8f   : > { %49150 = vmatpush3.bf16.msra.mxu1 %v56362_v43 }
 0xc90   : > { %49152 = vmatprep.subr.bf16.mxu1 %v56357_v35 }
 0xc92   : > { %44742 = vmatmul.mubr.f32.vlgmr.msra.gmra.mrb[28].mxu1 %v11276_v41 }
 0xc93   : > { %49154 = vmatpush3.bf16.msra.mxu1 %v56357_v35  ;;  %44752 = vmatprep.mubr.f32.mxu1 %v11267_v38 }
 0xc94   : > { %49156 = vmatprep.subr.bf16.mxu1 %v56358_v0 }
 0xc97   : > { %49158 = vmatpush3.bf16.msra.mxu1 %v56358_v0 }
 0xc98   : > { %49160 = vmatprep.subr.bf16.mxu1 %v56363_v28 }
 0xc9a   : > { %44753 = vmatmul.mubr.f32.vlgmr.msra.gmra.mrb[28].mxu1 %v11277_v2 }
 0xc9b   : > { %49162 = vmatpush3.bf16.msra.mxu1 %v56363_v28  ;;  %44763 = vmatprep.mubr.f32.mxu1 %v11265_v55 }
 0xc9c   : > { %49164 = vmatprep.subr.bf16.mxu1 %v56364_v25 }
 0xc9f   : > { %49166 = vmatpush3.bf16.msra.mxu1 %v56364_v25 }
 0xca0   : > { %49168 = vmatprep.subr.bf16.mxu1 %v56357_v35 }
 0xca2   : > { %44764 = vmatmul.mubr.f32.vlgmr.msra.gmra.mrb[28].mxu1 %v11275_v42 }
 0xca3   : > { %49170 = vmatpush3.bf16.msra.mxu1 %v56357_v35  ;;  %44774 = vmatprep.mubr.f32.mxu1 %v11265_v55  ;;  %v53985_v55 = vld [vmem:[%s55906_s2 + $0xa0] ss:$0 sm:$0xff] }
 0xca4   : > { %49172 = vmatprep.subr.bf16.mxu1 %v56358_v0  ;;  %56365 = vst [vmem:[#allocation27_spill] sm:$0xff] %v53985_v55 }
 0xca7   : > { %49174 = vmatpush3.bf16.msra.mxu1 %v56358_v0  ;;  %v11739_v0 = vpop.permute.xlu0 %11738 }
 0xca8   : > { %49488 = vmatprep.subr.bf16.mxu1 %v53437_v40 }
 0xcaa   : > { %44775 = vmatmul.mubr.f32.vlgmr.msra.gmra.mrb[28].mxu1 %v11275_v42 }
 0xcab   : > { %49490 = vmatpush3.bf16.msra.mxu1 %v53437_v40 }
 0xcac   : > { %49492 = vmatprep.subr.bf16.mxu1 %v53447_v26 }
 0xcaf   : > { %49494 = vmatpush3.bf16.msra.mxu1 %v53447_v26 }
 0xcb0   : > { %49496 = vmatprep.subr.bf16.mxu1 %v53457_v60 }
 0xd7d   : > { %v44776_v2 = vpop.f32.mrb[28].mxu1 }
 0xd7e   : > { %v53988_v38 = vadd.f32 %v53985_v55, %v44776_v2  ;;  %v11714_v41 = vpop.f32.mrb[29].mxu1  ;;  %v11741_v2 = vpop.permute.xlu1 %11740 }
 0xd7f   : > { %v53991_v42 = vadd.f32 %v53985_v55, %v11714_v41 }
 0xd80   : > { %v40585_v61 = vmul.f32 -1.442695, %v53988_v38 }
 0xd81   : > { %v40584_v33 = vmul.f32 -1.442695, %v53991_v42 }
 0xd82   : > { %52575 = vpow2.f32 %v40585_v61 }
 0xd83   : > { %52577 = vpow2.f32 %v40584_v33 }
 0xd8c   : > { %v52576_v25 = vpop.eup %52575 }
 0xd8d   : > { %v52578_v28 = vpop.eup %52577  ;;  %v11733_v43 = vadd.f32 1.0, %v52576_v25 }
 0xd8e   : > { %v11732_v12 = vadd.f32 1.0, %v52578_v28 }
 0xd8f   : > { %52579 = vrcp.f32 %v11733_v43 }
 0xd90   : > { %52581 = vrcp.f32 %v11732_v12 }
 0xd99   : > { %v53995_v57 = vpop.eup %52579 }
 0xd9a   : > { %v53997_v29 = vpop.eup %52581  ;;  %v11745_v41 = vmul.f32 %v53995_v57, %v11741_v2 }
 0xd9b   : > { %v11744_v55 = vmul.f32 %v53997_v29, %v11739_v0 }
 0xd9c   : > { %11750 = vrot.lane.b32.xlu1 %v11745_v41, %s52742_s28 }
 0xd9d   : > { %11748 = vrot.lane.b32.xlu0 %v11744_v55, %s52742_s28 }
 0xe0e   : > { %v11751_v61 = vpop.permute.xlu1 %11750 }
 0xe0f   : > { %v11754_v25 = vsel %vm973_vm1, %v11751_v61, 0  ;;  %v11749_v28 = vpop.permute.xlu0 %11748  ;;  %v12297_v61 = vsub.f32 1.0, %v53995_v57 }
 0xe10   : > { %v11835_v43 = vand.u32 4294901760, %v11754_v25  ;;  %v11752_v12 = vsel %vm973_vm1, %v11749_v28, 0 }
 0xe11   : > { %v11825_v33 = vand.u32 4294901760, %v11752_v12 }
 0xe12   : > { %v11836_v35 = vsub.f32 %v11754_v25, %v11835_v43  ;;  %v12296_v25 = vsub.f32 1.0, %v53997_v29 }
 0xe13   : > { %v11826_v34 = vsub.f32 %v11752_v12, %v11825_v33 }
 0xe14   : > { %v11837_v37 = vand.u32 4294901760, %v11836_v35 }
 0xe15   : > { %v11827_v39 = vand.u32 4294901760, %v11826_v34 }
 0xe16   : > { %v11838_v16 = vsub.f32 %v11836_v35, %v11837_v37 }
 0xe17   : > { %v11828_v2 = vsub.f32 %v11826_v34, %v11827_v39 }
 0xe18   : > { %v11839_v0 = vand.u32 4294901760, %v11838_v16 }
 0xe19   : > { %v11829_v47 = vand.u32 4294901760, %v11828_v2 }
 0xe1b   : > { %44785 = vmatprep.mubr.f32.mxu0 %v11829_v47 }
 0xe1c   : > { %44786 = vmatmul.mubr.f32.vlgmr.msra.gmra.mrb[20].mxu0 %v11839_v0 }
 0xe1d   : > { %49186 = vmatpush3.bf16.msra.mxu0 %v53457_v60  ;;  %44796 = vmatprep.mubr.f32.mxu0 %v11825_v33 }
 0xe1e   : > { %49188 = vmatprep.subr.bf16.mxu0 %v53462_v48 }
 0xe21   : > { %49190 = vmatpush3.bf16.msra.mxu0 %v53462_v48 }
 0xe22   : > { %49192 = vmatprep.subr.bf16.mxu0 %v53464_v1 }
 0xe24   : > { %44797 = vmatmul.mubr.f32.vlgmr.msra.gmra.mrb[20].mxu0 %v11835_v43 }
 0xe25   : > { %49194 = vmatpush3.bf16.msra.mxu0 %v53464_v1  ;;  %44807 = vmatprep.mubr.f32.mxu0 %v11826_v34 }
 0xe26   : > { %49196 = vmatprep.subr.bf16.mxu0 %v53466_v15 }
 0xe29   : > { %49198 = vmatpush3.bf16.msra.mxu0 %v53466_v15 }
 0xe2a   : > { %49200 = vmatprep.subr.bf16.mxu0 %v53437_v40 }
 0xe2c   : > { %44808 = vmatmul.mubr.f32.vlgmr.msra.gmra.mrb[20].mxu0 %v11836_v35 }
 0xe2d   : > { %49202 = vmatpush3.bf16.msra.mxu0 %v53437_v40  ;;  %44818 = vmatprep.mubr.f32.mxu0 %v11827_v39 }
 0xe2e   : > { %49204 = vmatprep.subr.bf16.mxu0 %v53447_v26 }
 0xe31   : > { %49206 = vmatpush3.bf16.msra.mxu0 %v53447_v26 }
 0xe32   : > { %49208 = vmatprep.subr.bf16.mxu0 %v53468_v36 }
 0xe34   : > { %44819 = vmatmul.mubr.f32.vlgmr.msra.gmra.mrb[20].mxu0 %v11837_v37 }
 0xe35   : > { %49210 = vmatpush3.bf16.msra.mxu0 %v53468_v36  ;;  %44829 = vmatprep.mubr.f32.mxu0 %v11825_v33 }
 0xe36   : > { %49212 = vmatprep.subr.bf16.mxu0 %v53470_v7 }
 0xe39   : > { %49214 = vmatpush3.bf16.msra.mxu0 %v53470_v7 }
 0xe3a   : > { %49216 = vmatprep.subr.bf16.mxu0 %v53437_v40 }
 0xe3c   : > { %44830 = vmatmul.mubr.f32.vlgmr.msra.gmra.mrb[20].mxu0 %v11835_v43 }
 0xe3d   : > { %49218 = vmatpush3.bf16.msra.mxu0 %v53437_v40  ;;  %44840 = vmatprep.mubr.f32.mxu0 %v11825_v33 }
 0xe3e   : > { %49220 = vmatprep.subr.bf16.mxu0 %v53447_v26 }
 0xe41   : > { %49222 = vmatpush3.bf16.msra.mxu0 %v53447_v26 }
 0xe44   : > { %44841 = vmatmul.mubr.f32.vlgmr.msra.gmra.mrb[20].mxu0 %v11835_v43  ;;  %v12299_v43 = vmul.f32 %v12297_v61, %v53774_v22 }
 0xe45   : > { %44847 = vmatprep.mubr.f32.mxu0 %v56327_v31 }
 0xf17   : > { %v44842_v47 = vpop.f32.mrb[20].mxu0 }
 0xf18   : > { %12288 = vrot.lane.b32.xlu1 %v44842_v47, %s52743_s29  ;;  %v12274_v16 = vpop.f32.mrb[21].mxu0 }
 0xf19   : > { %12286 = vrot.lane.b32.xlu0 %v12274_v16, %s52743_s29 }
 0xf8a   : > { %v12289_v39 = vpop.permute.xlu1 %12288 }
 0xf8b   : > { %v12293_v37 = vadd.f32 %v53988_v38, %v12289_v39  ;;  %v12287_v34 = vpop.permute.xlu0 %12286 }
 0xf8c   : > { %v12292_v35 = vadd.f32 %v53991_v42, %v12287_v34  ;;  %v12298_v42 = vmul.f32 %v12296_v25, %v53776_v54 }
 0xf8d   : > { %52583 = vtanh.f32 %v12293_v37 }
 0xf8e   : > { %52585 = vtanh.f32 %v12292_v35 }
 0xf97   : > { %v52584_v55 = vpop.eup %52583 }
 0xf98   : > { %v52586_v41 = vpop.eup %52585  ;;  %12304 = vrot.lane.b32.xlu1 %v52584_v55, %s52743_s29 }
 0xf99   : > { %12302 = vrot.lane.b32.xlu0 %v52586_v41, %s52743_s29 }
0x100a   : > { %v12305_v28 = vpop.permute.xlu1 %12304 }
0x100b   : > { %v12309_v38 = vmul.f32 %v53995_v57, %v12305_v28  ;;  %v12303_v12 = vpop.permute.xlu0 %12302  ;;  %v56366_v28 = vld [vmem:[#allocation5_spill] sm:$0xff] }
0x100c   : > { %v12308_v33 = vmul.f32 %v53997_v29, %v12303_v12  ;;  %v56369_v12 = vld [vmem:[#allocation15_spill] sm:$0xff] }
0x100d   : > { %v54037_v2 = vadd.f32 %v12309_v38, %v12299_v43  ;;  %v56367_v43 = vld [vmem:[#allocation9_spill] sm:$0xff]  ;;  %v56368_v38 = vld [vmem:[#allocation11_spill] sm:$0xff] }
0x100e   : > { %v54039_v0 = vadd.f32 %v12308_v33, %v12298_v42  ;;  %v56370_v42 = vld [vmem:[#allocation17_spill] sm:$0xff]  ;;  %v56371_v33 = vld [vmem:[#allocation6_spill] sm:$0xff] }
0x100f   : > { %v12316_v47 = vand.u32 4294901760, %v54037_v2  ;;  %15766 = vrot.lane.b32.xlu1 %v54037_v2, %s52741_s7 }
0x1010   : > { %v12313_v16 = vand.u32 4294901760, %v54039_v0  ;;  %15764 = vrot.lane.b32.xlu0 %v54039_v0, %s52741_s7 }
0x1011   : > { %v12468_v22 = vsub.f32 %v54037_v2, %v12316_v47 }
0x1012   : > { %v49223_v57 = vpack.c.bf16 %v12316_v47, %v12313_v16  ;;  %v12461_v54 = vsub.f32 %v54039_v0, %v12313_v16  ;;  %v56372_v47 = vld [vmem:[#allocation7_spill] sm:$0xff]  ;;  %v56373_v16 = vld [vmem:[#allocation8_spill] sm:$0xff] }
0x1013   : > { %v12469_v29 = vand.u32 4294901760, %v12468_v22 }
0x1014   : > { %49224 = vmatprep.subr.bf16.mxu0 %v49223_v57  ;;  %v12462_v39 = vand.u32 4294901760, %v12461_v54  ;;  %v49231_v61 = vpack.c.bf16 %v12468_v22, %v12461_v54 }
0x1015   : > { %49226 = vmatpush3.bf16.msra.mxu0 %v49223_v57  ;;  %v12470_v37 = vsub.f32 %v12468_v22, %v12469_v29  ;;  %v56374_v22 = vld [vmem:[#allocation10_spill] sm:$0xff] }
0x1016   : > { %v12463_v34 = vsub.f32 %v12461_v54, %v12462_v39  ;;  %v49239_v25 = vpack.c.bf16 %v12469_v29, %v12462_v39  ;;  %v56375_v54 = vld [vmem:[#allocation12_spill] sm:$0xff]  ;;  %v56376_v29 = vld [vmem:[#allocation14_spill] sm:$0xff] }
0x1017   : > { %v12471_v35 = vand.u32 4294901760, %v12470_v37  ;;  %v56377_v39 = vld [vmem:[#allocation16_spill] sm:$0xff]  ;;  %v56378_v37 = vld [vmem:[#allocation18_spill] sm:$0xff] }
0x1018   : > { %44848 = vmatmul.mubr.f32.vlgmr.msra.gmra.mrb[22].mxu0 %v52929_v46  ;;  %v12464_v55 = vand.u32 4294901760, %v12463_v34  ;;  %v56379_v34 = vld [vmem:[#allocation19_spill] sm:$0xff] }
0x1019   : > { %44850 = vmatprep.mubr.f32.mxu0 %v52939_v50 }
0x101a   : > { %v49227_v41 = vpack.c.bf16 %v12471_v35, %v12464_v55  ;;  %v13073_v35 = vsel %vm973_vm1, %v54039_v0, 0  ;;  %v13076_v55 = vsel %vm973_vm1, %v54037_v2, 0 }
0x101c   : > { %44851 = vmatmul.mubr.f32.gmra.mrb[24].mxu0 %v52958_v58  ;;  %49228 = vmatprep.subr.bf16.mxu0 %v49227_v41 }
0x101d   : > { %49230 = vmatpush3.bf16.msra.mxu0 %v49227_v41  ;;  %44853 = vmatprep.mubr.f32.mxu0 %v52963_v62  ;;  %v13147_v41 = vand.u32 4294901760, %v13073_v35 }
0x101e   : > { %49232 = vmatprep.subr.bf16.mxu0 %v49231_v61 }
0x1020   : > { %44854 = vmatmul.mubr.f32.gmra.mrb[26].mxu0 %v52975_v3 }
0x1021   : > { %44856 = vmatprep.mubr.f32.mxu0 %v52980_v5 }
0x1024   : > { %44857 = vmatmul.mubr.f32.gmra.mrb[28].mxu0 %v52985_v6 }
0x1025   : > { %44863 = vmatprep.mubr.f32.mxu0 %v52838_v9 }
0x1028   : > { %44864 = vmatmul.mubr.f32.vlgmr.msra.gmra.mrb[22].mxu0 %v52840_v10 }
0x1029   : > { %49234 = vmatpush3.bf16.msra.mxu0 %v49231_v61  ;;  %44866 = vmatprep.mubr.f32.mxu0 %v52842_v11  ;;  %v13148_v61 = vsub.f32 %v13073_v35, %v13147_v41 }
0x102a   : > { %49236 = vmatprep.subr.bf16.mxu0 %v49223_v57 }
0x102c   : > { %44867 = vmatmul.mubr.f32.gmra.mrb[24].mxu0 %v52848_v14 }
0x102d   : > { %44869 = vmatprep.mubr.f32.mxu0 %v52862_v21 }
0x1030   : > { %44870 = vmatmul.mubr.f32.gmra.mrb[26].mxu0 %v52873_v23 }
0x1031   : > { %44872 = vmatprep.mubr.f32.mxu0 %v52875_v24 }
0x1034   : > { %44873 = vmatmul.mubr.f32.gmra.mrb[28].mxu0 %v52946_v53 }
0x1035   : > { %44879 = vmatprep.mubr.f32.mxu0 %v52854_v18 }
0x1038   : > { %44880 = vmatmul.mubr.f32.vlgmr.msra.gmra.mrb[22].mxu0 %v52857_v19 }
0x1039   : > { %49238 = vmatpush3.bf16.msra.mxu0 %v49223_v57  ;;  %44882 = vmatprep.mubr.f32.mxu0 %v52860_v20 }
0x103a   : > { %49240 = vmatprep.subr.bf16.mxu0 %v49239_v25 }
0x103c   : > { %44883 = vmatmul.mubr.f32.gmra.mrb[24].mxu0 %v56366_v28 }
0x103d   : > { %44885 = vmatprep.mubr.f32.mxu0 %v56367_v43 }
0x1040   : > { %44886 = vmatmul.mubr.f32.gmra.mrb[26].mxu0 %v56368_v38 }
0x1041   : > { %44888 = vmatprep.mubr.f32.mxu0 %v56369_v12 }
0x1044   : > { %44889 = vmatmul.mubr.f32.gmra.mrb[28].mxu0 %v56370_v42  ;;  %v56384_v42 = vld [vmem:[#allocation24_spill] sm:$0xff] }
0x1045   : > { %44895 = vmatprep.mubr.f32.mxu0 %v56371_v33  ;;  %v56383_v33 = vld [vmem:[#allocation23_spill] sm:$0xff] }
0x1048   : > { %44896 = vmatmul.mubr.f32.vlgmr.msra.gmra.mrb[22].mxu0 %v56372_v47  ;;  %v56382_v47 = vld [vmem:[#allocation22_spill] sm:$0xff] }
0x1049   : > { %49242 = vmatpush3.bf16.msra.mxu0 %v49239_v25  ;;  %44898 = vmatprep.mubr.f32.mxu0 %v56373_v16 }
0x104a   : > { %49244 = vmatprep.subr.bf16.mxu0 %v49223_v57 }
0x104c   : > { %44899 = vmatmul.mubr.f32.gmra.mrb[24].mxu0 %v56374_v22 }
0x104d   : > { %44901 = vmatprep.mubr.f32.mxu0 %v56375_v54  ;;  %v56381_v54 = vld [vmem:[#allocation21_spill] sm:$0xff] }
0x1050   : > { %44902 = vmatmul.mubr.f32.gmra.mrb[26].mxu0 %v56376_v29 }
0x1051   : > { %44904 = vmatprep.mubr.f32.mxu0 %v56377_v39  ;;  %v13149_v39 = vand.u32 4294901760, %v13148_v61 }
0x1053   : > { %v13150_v35 = vsub.f32 %v13148_v61, %v13149_v39 }
0x1054   : > { %44905 = vmatmul.mubr.f32.gmra.mrb[28].mxu0 %v56378_v37  ;;  %v56380_v37 = vld [vmem:[#allocation20_spill] sm:$0xff] }
0x1055   : > { %44911 = vmatprep.mubr.f32.mxu0 %v52838_v9  ;;  %v13151_v16 = vand.u32 4294901760, %v13150_v35 }
0x1058   : > { %44912 = vmatmul.mubr.f32.vlgmr.msra.gmra.mrb[22].mxu0 %v52840_v10 }
0x1059   : > { %49246 = vmatpush3.bf16.msra.mxu0 %v49223_v57  ;;  %44914 = vmatprep.mubr.f32.mxu0 %v52842_v11  ;;  %v13157_v57 = vand.u32 4294901760, %v13076_v55 }
0x105a   : > { %49248 = vmatprep.subr.bf16.mxu0 %v56379_v34 }
0x105b   : > { %v13158_v25 = vsub.f32 %v13076_v55, %v13157_v57 }
0x105c   : > { %44915 = vmatmul.mubr.f32.gmra.mrb[24].mxu0 %v52848_v14 }
0x105d   : > { %44917 = vmatprep.mubr.f32.mxu0 %v52862_v21  ;;  %v13159_v29 = vand.u32 4294901760, %v13158_v25 }
0x105f   : > { %v13160_v22 = vsub.f32 %v13158_v25, %v13159_v29 }
0x1060   : > { %44918 = vmatmul.mubr.f32.gmra.mrb[26].mxu0 %v52873_v23 }
0x1061   : > { %44920 = vmatprep.mubr.f32.mxu0 %v52875_v24  ;;  %v13161_v55 = vand.u32 4294901760, %v13160_v22  ;;  %v56386_v22 = vld [vmem:[#allocation26_spill] sm:$0xff] }
0x1064   : > { %44921 = vmatmul.mubr.f32.gmra.mrb[28].mxu0 %v52946_v53 }
0x1065   : > { %44927 = vmatprep.mubr.f32.mxu0 %v52838_v9 }
0x1068   : > { %44928 = vmatmul.mubr.f32.vlgmr.msra.gmra.mrb[22].mxu0 %v52840_v10 }
0x1069   : > { %44930 = vmatprep.mubr.f32.mxu0 %v52842_v11  ;;  %49250 = vmatpush3.bf16.msra.mxu0 %v56379_v34 }
0x106a   : > { %49252 = vmatprep.subr.bf16.mxu0 %v56380_v37 }
0x106c   : > { %44931 = vmatmul.mubr.f32.gmra.mrb[24].mxu0 %v52848_v14 }
0x106d   : > { %44933 = vmatprep.mubr.f32.mxu0 %v52862_v21  ;;  %49254 = vmatpush3.bf16.msra.mxu0 %v56380_v37 }
0x106e   : > { %49256 = vmatprep.subr.bf16.mxu0 %v56381_v54 }
0x1070   : > { %44934 = vmatmul.mubr.f32.gmra.mrb[26].mxu0 %v52873_v23 }
0x1071   : > { %44936 = vmatprep.mubr.f32.mxu0 %v52875_v24 }
0x1074   : > { %44937 = vmatmul.mubr.f32.gmra.mrb[28].mxu0 %v52946_v53 }
0x1075   : > { %44947 = vmatprep.mubr.f32.mxu0 %v13151_v16  ;;  %v56385_v16 = vld [vmem:[#allocation25_spill] sm:$0xff] }
0x1078   : > { %44948 = vmatmul.mubr.f32.vlgmr.msra.gmra.mrb[30].mxu0 %v13161_v55 }
0x1079   : > { %49258 = vmatpush3.bf16.msra.mxu0 %v56381_v54  ;;  %44958 = vmatprep.mubr.f32.mxu0 %v13147_v41 }
0x107a   : > { %49260 = vmatprep.subr.bf16.mxu0 %v56382_v47 }
0x107d   : > { %49262 = vmatpush3.bf16.msra.mxu0 %v56382_v47 }
0x107e   : > { %49264 = vmatprep.subr.bf16.mxu0 %v56383_v33 }
0x1080   : > { %44959 = vmatmul.mubr.f32.vlgmr.msra.gmra.mrb[30].mxu0 %v13157_v57 }
0x1081   : > { %49266 = vmatpush3.bf16.msra.mxu0 %v56383_v33  ;;  %44969 = vmatprep.mubr.f32.mxu0 %v13148_v61 }
0x1082   : > { %49268 = vmatprep.subr.bf16.mxu0 %v56384_v42 }
0x1085   : > { %49270 = vmatpush3.bf16.msra.mxu0 %v56384_v42 }
0x1086   : > { %49272 = vmatprep.subr.bf16.mxu0 %v56379_v34 }
0x1088   : > { %44970 = vmatmul.mubr.f32.vlgmr.msra.gmra.mrb[30].mxu0 %v13158_v25 }
0x1089   : > { %49274 = vmatpush3.bf16.msra.mxu0 %v56379_v34  ;;  %44980 = vmatprep.mubr.f32.mxu0 %v13149_v39 }
0x108a   : > { %49276 = vmatprep.subr.bf16.mxu0 %v56380_v37 }
0x108d   : > { %49278 = vmatpush3.bf16.msra.mxu0 %v56380_v37 }
0x108e   : > { %49280 = vmatprep.subr.bf16.mxu0 %v56385_v16 }
0x1090   : > { %44981 = vmatmul.mubr.f32.vlgmr.msra.gmra.mrb[30].mxu0 %v13159_v29 }
0x1091   : > { %49282 = vmatpush3.bf16.msra.mxu0 %v56385_v16  ;;  %44991 = vmatprep.mubr.f32.mxu0 %v13147_v41 }
0x1092   : > { %49284 = vmatprep.subr.bf16.mxu0 %v56386_v22 }
0x1095   : > { %49286 = vmatpush3.bf16.msra.mxu0 %v56386_v22 }
0x1096   : > { %49288 = vmatprep.subr.bf16.mxu0 %v56379_v34 }
0x1098   : > { %44992 = vmatmul.mubr.f32.vlgmr.msra.gmra.mrb[30].mxu0 %v13157_v57 }
0x1099   : > { %49290 = vmatpush3.bf16.msra.mxu0 %v56379_v34  ;;  %45002 = vmatprep.mubr.f32.mxu0 %v13147_v41 }
0x109a   : > { %49292 = vmatprep.subr.bf16.mxu0 %v56380_v37 }
0x109d   : > { %49294 = vmatpush3.bf16.msra.mxu0 %v56380_v37 }
0x109e   : > { %49296 = vmatprep.subr.bf16.mxu0 %v53118_v59 }
0x10a0   : > { %45003 = vmatmul.mubr.f32.vlgmr.msra.gmra.mrb[30].mxu0 %v13157_v57 }
0x10a1   : > { %49298 = vmatpush3.bf16.msra.mxu0 %v53118_v59 }
0x10a2   : > { %49300 = vmatprep.subr.bf16.mxu0 %v53128_v8 }
0x10a5   : > { %49302 = vmatpush3.bf16.msra.mxu0 %v53128_v8 }
0x10a6   : > { %49304 = vmatprep.subr.bf16.mxu0 %v56302_v56 }
0x113b   : > { %v44929_v29 = vpop.f32.mrb[22].mxu0 }
0x113c   : > { %v13612_v39 = vsel %vm973_vm1, %v44929_v29, 0  ;;  %v13026_v61 = vpop.f32.mrb[23].mxu0 }
0x113d   : > { %v13693_v41 = vand.u32 4294901760, %v13612_v39  ;;  %v13609_v25 = vsel %vm973_vm1, %v13026_v61, 0 }
0x113e   : > { %v13683_v35 = vand.u32 4294901760, %v13609_v25 }
0x113f   : > { %v13694_v55 = vsub.f32 %v13612_v39, %v13693_v41  ;;  %v44932_v22 = vpop.f32.mrb[24].mxu0 }
0x1140   : > { %v13684_v16 = vsub.f32 %v13609_v25, %v13683_v35  ;;  %v13038_v57 = vpop.f32.mrb[25].mxu0 }
0x1141   : > { %v13695_v42 = vand.u32 4294901760, %v13694_v55 }
0x1142   : > { %v13685_v33 = vand.u32 4294901760, %v13684_v16 }
0x1143   : > { %v13696_v47 = vsub.f32 %v13694_v55, %v13695_v42  ;;  %v54131_v54 = vpop.f32.mrb[26].mxu0 }
0x1144   : > { %v54133_v37 = vpop.f32.mrb[27].mxu0  ;;  %v13686_v34 = vsub.f32 %v13684_v16, %v13685_v33 }
0x1145   : > { %v13697_v38 = vand.u32 4294901760, %v13696_v47  ;;  %v14148_v47 = vsel %vm973_vm1, %v44932_v22, 0 }
0x1146   : > { %v13687_v12 = vand.u32 4294901760, %v13686_v34 }
0x1147   : > { %v54135_v29 = vpop.f32.mrb[28].mxu0 }
0x1148   : > { %v54137_v43 = vpop.f32.mrb[29].mxu0  ;;  %45013 = vmatprep.mubr.f32.mxu0 %v13687_v12 }
0x1149   : > { %45014 = vmatmul.mubr.f32.vlgmr.msra.gmra.mrb[30].mxu0 %v13697_v38  ;;  %v14145_v38 = vsel %vm973_vm1, %v13038_v57, 0  ;;  %v56387_v57 = vld [vmem:[#allocation39_spill] sm:$0xff] }
0x114a   : > { %49306 = vmatpush3.bf16.msra.mxu0 %v56302_v56  ;;  %45024 = vmatprep.mubr.f32.mxu0 %v13683_v35  ;;  %v14219_v12 = vand.u32 4294901760, %v14145_v38 }
0x114b   : > { %49308 = vmatprep.subr.bf16.mxu0 %v56303_v52 }
0x114c   : > { %v14220_v34 = vsub.f32 %v14145_v38, %v14219_v12  ;;  %v14684_v38 = vsel %vm973_vm1, %v54131_v54, 0 }
0x114e   : > { %49310 = vmatpush3.bf16.msra.mxu0 %v56303_v52 }
0x114f   : > { %49312 = vmatprep.subr.bf16.mxu0 %v56304_v51 }
0x1151   : > { %45025 = vmatmul.mubr.f32.vlgmr.msra.gmra.mrb[30].mxu0 %v13693_v41 }
0x1152   : > { %49314 = vmatpush3.bf16.msra.mxu0 %v56304_v51  ;;  %45035 = vmatprep.mubr.f32.mxu0 %v13684_v16  ;;  %v14221_v16 = vand.u32 4294901760, %v14220_v34 }
0x1153   : > { %49316 = vmatprep.subr.bf16.mxu0 %v56305_v30 }
0x1156   : > { %49318 = vmatpush3.bf16.msra.mxu0 %v56305_v30 }
0x1157   : > { %49320 = vmatprep.subr.bf16.mxu0 %v53118_v59 }
0x1159   : > { %45036 = vmatmul.mubr.f32.vlgmr.msra.gmra.mrb[30].mxu0 %v13694_v55 }
0x115a   : > { %49322 = vmatpush3.bf16.msra.mxu0 %v53118_v59  ;;  %45046 = vmatprep.mubr.f32.mxu0 %v13685_v33  ;;  %v14229_v33 = vand.u32 4294901760, %v14148_v47 }
0x115b   : > { %49324 = vmatprep.subr.bf16.mxu0 %v53128_v8 }
0x115c   : > { %v14230_v39 = vsub.f32 %v14148_v47, %v14229_v33 }
0x115e   : > { %49326 = vmatpush3.bf16.msra.mxu0 %v53128_v8  ;;  %v14231_v61 = vand.u32 4294901760, %v14230_v39 }
0x115f   : > { %49328 = vmatprep.subr.bf16.mxu0 %v56306_v13 }
0x1160   : > { %v14232_v25 = vsub.f32 %v14230_v39, %v14231_v61 }
0x1161   : > { %45047 = vmatmul.mubr.f32.vlgmr.msra.gmra.mrb[30].mxu0 %v13695_v42  ;;  %v14222_v42 = vsub.f32 %v14220_v34, %v14221_v16 }
0x1162   : > { %49330 = vmatpush3.bf16.msra.mxu0 %v56306_v13  ;;  %45057 = vmatprep.mubr.f32.mxu0 %v13683_v35 }
0x1163   : > { %49332 = vmatprep.subr.bf16.mxu0 %v56307_v27  ;;  %v14223_v22 = vand.u32 4294901760, %v14222_v42 }
0x1166   : > { %49334 = vmatpush3.bf16.msra.mxu0 %v56307_v27 }
0x1167   : > { %49336 = vmatprep.subr.bf16.mxu0 %v53118_v59 }
0x1169   : > { %45058 = vmatmul.mubr.f32.vlgmr.msra.gmra.mrb[30].mxu0 %v13693_v41 }
0x116a   : > { %49338 = vmatpush3.bf16.msra.mxu0 %v53118_v59  ;;  %45068 = vmatprep.mubr.f32.mxu0 %v13683_v35  ;;  %v14233_v35 = vand.u32 4294901760, %v14232_v25  ;;  %v56389_v25 = vld [vmem:[#allocation41_spill] sm:$0xff] }
0x116b   : > { %49340 = vmatprep.subr.bf16.mxu0 %v53128_v8 }
0x116e   : > { %49342 = vmatpush3.bf16.msra.mxu0 %v53128_v8 }
0x116f   : > { %49344 = vmatprep.subr.bf16.mxu0 %v53212_v32 }
0x1171   : > { %45069 = vmatmul.mubr.f32.vlgmr.msra.gmra.mrb[30].mxu0 %v13693_v41  ;;  %v14681_v41 = vsel %vm973_vm1, %v54133_v37, 0 }
0x1172   : > { %49346 = vmatpush3.bf16.msra.mxu0 %v53212_v32  ;;  %45079 = vmatprep.mubr.f32.mxu0 %v14223_v22  ;;  %v14755_v55 = vand.u32 4294901760, %v14681_v41 }
0x1173   : > { %49348 = vmatprep.subr.bf16.mxu0 %v53221_v63 }
0x1174   : > { %v14756_v47 = vsub.f32 %v14681_v41, %v14755_v55  ;;  %v56391_v41 = vld [vmem:[#allocation43_spill] sm:$0xff] }
0x1176   : > { %49350 = vmatpush3.bf16.msra.mxu0 %v53221_v63  ;;  %v14757_v37 = vand.u32 4294901760, %v14756_v47 }
0x1177   : > { %49352 = vmatprep.subr.bf16.mxu0 %v53229_v4 }
0x1179   : > { %45080 = vmatmul.mubr.f32.vlgmr.msra.gmra.mrb[30].mxu0 %v14233_v35  ;;  %v56390_v35 = vld [vmem:[#allocation42_spill] sm:$0xff] }
0x117a   : > { %49354 = vmatpush3.bf16.msra.mxu0 %v53229_v4  ;;  %45090 = vmatprep.mubr.f32.mxu0 %v14219_v12 }
0x117b   : > { %49356 = vmatprep.subr.bf16.mxu0 %v53233_v17 }
0x117e   : > { %49358 = vmatpush3.bf16.msra.mxu0 %v53233_v17 }
0x117f   : > { %49360 = vmatprep.subr.bf16.mxu0 %v56308_v45 }
0x1181   : > { %45091 = vmatmul.mubr.f32.vlgmr.msra.gmra.mrb[30].mxu0 %v14229_v33 }
0x1182   : > { %49362 = vmatpush3.bf16.msra.mxu0 %v56308_v45  ;;  %45101 = vmatprep.mubr.f32.mxu0 %v14220_v34  ;;  %v14765_v34 = vand.u32 4294901760, %v14684_v38 }
0x1183   : > { %49364 = vmatprep.subr.bf16.mxu0 %v56309_v44 }
0x1186   : > { %49366 = vmatpush3.bf16.msra.mxu0 %v56309_v44 }
0x1187   : > { %49368 = vmatprep.subr.bf16.mxu0 %v53212_v32 }
0x1189   : > { %45102 = vmatmul.mubr.f32.vlgmr.msra.gmra.mrb[30].mxu0 %v14230_v39  ;;  %v14758_v39 = vsub.f32 %v14756_v47, %v14757_v37 }
0x118a   : > { %49370 = vmatpush3.bf16.msra.mxu0 %v53212_v32  ;;  %45112 = vmatprep.mubr.f32.mxu0 %v14221_v16  ;;  %v14766_v16 = vsub.f32 %v14684_v38, %v14765_v34  ;;  %v56393_v38 = vld [vmem:[#allocation45_spill] sm:$0xff] }
0x118b   : > { %49372 = vmatprep.subr.bf16.mxu0 %v53221_v63  ;;  %v14759_v54 = vand.u32 4294901760, %v14758_v39  ;;  %v15217_v39 = vsel %vm973_vm1, %v54137_v43, 0 }
0x118c   : > { %v14767_v42 = vand.u32 4294901760, %v14766_v16 }
0x118e   : > { %49374 = vmatpush3.bf16.msra.mxu0 %v53221_v63  ;;  %v14768_v22 = vsub.f32 %v14766_v16, %v14767_v42 }
0x118f   : > { %49376 = vmatprep.subr.bf16.mxu0 %v56310_v49 }
0x1191   : > { %45113 = vmatmul.mubr.f32.vlgmr.msra.gmra.mrb[30].mxu0 %v14231_v61  ;;  %v56388_v61 = vld [vmem:[#allocation40_spill] sm:$0xff] }
0x1192   : > { %49378 = vmatpush3.bf16.msra.mxu0 %v56310_v49  ;;  %45123 = vmatprep.mubr.f32.mxu0 %v14219_v12 }
0x1193   : > { %49380 = vmatprep.subr.bf16.mxu0 %v56387_v57 }
0x1196   : > { %49382 = vmatpush3.bf16.msra.mxu0 %v56387_v57 }
0x1197   : > { %49384 = vmatprep.subr.bf16.mxu0 %v53212_v32 }
0x1199   : > { %45124 = vmatmul.mubr.f32.vlgmr.msra.gmra.mrb[30].mxu0 %v14229_v33 }
0x119a   : > { %49386 = vmatpush3.bf16.msra.mxu0 %v53212_v32  ;;  %45134 = vmatprep.mubr.f32.mxu0 %v14219_v12  ;;  %v14769_v12 = vand.u32 4294901760, %v14768_v22  ;;  %v56395_v22 = vld [vmem:[#allocation47_spill] sm:$0xff] }
0x119b   : > { %49388 = vmatprep.subr.bf16.mxu0 %v53221_v63 }
0x119e   : > { %49390 = vmatpush3.bf16.msra.mxu0 %v53221_v63 }
0x119f   : > { %49392 = vmatprep.subr.bf16.mxu0 %v56388_v61 }
0x11a1   : > { %45135 = vmatmul.mubr.f32.vlgmr.msra.gmra.mrb[30].mxu0 %v14229_v33  ;;  %v56392_v33 = vld [vmem:[#allocation44_spill] sm:$0xff] }
0x11a2   : > { %49394 = vmatpush3.bf16.msra.mxu0 %v56388_v61  ;;  %45145 = vmatprep.mubr.f32.mxu0 %v14759_v54  ;;  %v56394_v54 = vld [vmem:[#allocation46_spill] sm:$0xff] }
0x11a3   : > { %49396 = vmatprep.subr.bf16.mxu0 %v56389_v25 }
0x11a6   : > { %49398 = vmatpush3.bf16.msra.mxu0 %v56389_v25 }
0x11a7   : > { %49400 = vmatprep.subr.bf16.mxu0 %v56390_v35 }
0x11a9   : > { %45146 = vmatmul.mubr.f32.vlgmr.msra.gmra.mrb[30].mxu0 %v14769_v12 }
0x11aa   : > { %49402 = vmatpush3.bf16.msra.mxu0 %v56390_v35  ;;  %45156 = vmatprep.mubr.f32.mxu0 %v14755_v55 }
0x11ab   : > { %49404 = vmatprep.subr.bf16.mxu0 %v56391_v41 }
0x11ae   : > { %49406 = vmatpush3.bf16.msra.mxu0 %v56391_v41  ;;  %v56399_v41 = vld [vmem:[#allocation51_spill] sm:$0xff] }
0x11af   : > { %49408 = vmatprep.subr.bf16.mxu0 %v56392_v33 }
0x11b1   : > { %45157 = vmatmul.mubr.f32.vlgmr.msra.gmra.mrb[30].mxu0 %v14765_v34 }
0x11b2   : > { %49410 = vmatpush3.bf16.msra.mxu0 %v56392_v33  ;;  %45167 = vmatprep.mubr.f32.mxu0 %v14756_v47  ;;  %v15291_v47 = vand.u32 4294901760, %v15217_v39  ;;  %v56396_v33 = vld [vmem:[#allocation48_spill] sm:$0xff] }
0x11b3   : > { %49412 = vmatprep.subr.bf16.mxu0 %v56393_v38 }
0x11b6   : > { %49414 = vmatpush3.bf16.msra.mxu0 %v56393_v38 }
0x11b7   : > { %49416 = vmatprep.subr.bf16.mxu0 %v56388_v61 }
0x11b9   : > { %45168 = vmatmul.mubr.f32.vlgmr.msra.gmra.mrb[30].mxu0 %v14766_v16  ;;  %v15220_v16 = vsel %vm973_vm1, %v54135_v29, 0 }
0x11ba   : > { %49418 = vmatpush3.bf16.msra.mxu0 %v56388_v61  ;;  %45178 = vmatprep.mubr.f32.mxu0 %v14757_v37  ;;  %v15292_v37 = vsub.f32 %v15217_v39, %v15291_v47  ;;  %v15301_v12 = vand.u32 4294901760, %v15220_v16 }
0x11bb   : > { %49420 = vmatprep.subr.bf16.mxu0 %v56389_v25 }
0x11bc   : > { %v15293_v43 = vand.u32 4294901760, %v15292_v37 }
0x11be   : > { %49422 = vmatpush3.bf16.msra.mxu0 %v56389_v25 }
0x11bf   : > { %49424 = vmatprep.subr.bf16.mxu0 %v56394_v54 }
0x11c1   : > { %45179 = vmatmul.mubr.f32.vlgmr.msra.gmra.mrb[30].mxu0 %v14767_v42  ;;  %v15302_v42 = vsub.f32 %v15220_v16, %v15301_v12  ;;  %v56398_v16 = vld [vmem:[#allocation50_spill] sm:$0xff] }
0x11c2   : > { %49426 = vmatpush3.bf16.msra.mxu0 %v56394_v54  ;;  %45189 = vmatprep.mubr.f32.mxu0 %v14755_v55  ;;  %v15294_v54 = vsub.f32 %v15292_v37, %v15293_v43 }
0x11c3   : > { %49428 = vmatprep.subr.bf16.mxu0 %v56395_v22  ;;  %v15303_v38 = vand.u32 4294901760, %v15302_v42 }
0x11c4   : > { %v15295_v29 = vand.u32 4294901760, %v15294_v54  ;;  %v56401_v54 = vld [vmem:[#allocation53_spill] sm:$0xff] }
0x11c5   : > { %v15304_v39 = vsub.f32 %v15302_v42, %v15303_v38 }
0x11c6   : > { %49430 = vmatpush3.bf16.msra.mxu0 %v56395_v22  ;;  %v56397_v22 = vld [vmem:[#allocation49_spill] sm:$0xff] }
0x11c7   : > { %49432 = vmatprep.subr.bf16.mxu0 %v56388_v61 }
0x11c9   : > { %45190 = vmatmul.mubr.f32.vlgmr.msra.gmra.mrb[30].mxu0 %v14765_v34 }
0x11ca   : > { %49434 = vmatpush3.bf16.msra.mxu0 %v56388_v61  ;;  %45200 = vmatprep.mubr.f32.mxu0 %v14755_v55  ;;  %v15305_v55 = vand.u32 4294901760, %v15304_v39 }
0x11cb   : > { %49436 = vmatprep.subr.bf16.mxu0 %v56389_v25 }
0x11ce   : > { %49438 = vmatpush3.bf16.msra.mxu0 %v56389_v25 }
0x11cf   : > { %49440 = vmatprep.subr.bf16.mxu0 %v56396_v33 }
0x11d1   : > { %45201 = vmatmul.mubr.f32.vlgmr.msra.gmra.mrb[30].mxu0 %v14765_v34  ;;  %v56400_v34 = vld [vmem:[#allocation52_spill] sm:$0xff] }
0x11d2   : > { %49442 = vmatpush3.bf16.msra.mxu0 %v56396_v33  ;;  %45211 = vmatprep.mubr.f32.mxu0 %v15295_v29  ;;  %v56402_v29 = vld [vmem:[#allocation54_spill] sm:$0xff] }
0x11d3   : > { %49444 = vmatprep.subr.bf16.mxu0 %v56397_v22 }
0x11d6   : > { %49446 = vmatpush3.bf16.msra.mxu0 %v56397_v22 }
0x11d7   : > { %49448 = vmatprep.subr.bf16.mxu0 %v56398_v16 }
0x11d9   : > { %45212 = vmatmul.mubr.f32.vlgmr.msra.gmra.mrb[30].mxu0 %v15305_v55 }
0x11da   : > { %49450 = vmatpush3.bf16.msra.mxu0 %v56398_v16  ;;  %45222 = vmatprep.mubr.f32.mxu0 %v15291_v47 }
0x11db   : > { %49452 = vmatprep.subr.bf16.mxu0 %v56399_v41 }
0x11de   : > { %49454 = vmatpush3.bf16.msra.mxu0 %v56399_v41 }
0x11df   : > { %49456 = vmatprep.subr.bf16.mxu0 %v56400_v34 }
0x11e1   : > { %45223 = vmatmul.mubr.f32.vlgmr.msra.gmra.mrb[30].mxu0 %v15301_v12 }
0x11e2   : > { %49458 = vmatpush3.bf16.msra.mxu0 %v56400_v34  ;;  %45233 = vmatprep.mubr.f32.mxu0 %v15292_v37  ;;  %v56403_v37 = vld [vmem:[#allocation55_spill] sm:$0xff] }
0x11e3   : > { %49460 = vmatprep.subr.bf16.mxu0 %v56401_v54 }
0x11e6   : > { %49462 = vmatpush3.bf16.msra.mxu0 %v56401_v54 }
0x11e7   : > { %49464 = vmatprep.subr.bf16.mxu0 %v56396_v33 }
0x11e9   : > { %45234 = vmatmul.mubr.f32.vlgmr.msra.gmra.mrb[30].mxu0 %v15302_v42 }
0x11ea   : > { %49466 = vmatpush3.bf16.msra.mxu0 %v56396_v33  ;;  %45244 = vmatprep.mubr.f32.mxu0 %v15293_v43  ;;  %v56404_v43 = vld [vmem:[#allocation27_spill] sm:$0xff] }
0x11eb   : > { %49468 = vmatprep.subr.bf16.mxu0 %v56397_v22 }
0x11ee   : > { %49470 = vmatpush3.bf16.msra.mxu0 %v56397_v22 }
0x11ef   : > { %49472 = vmatprep.subr.bf16.mxu0 %v56402_v29 }
0x11f1   : > { %45245 = vmatmul.mubr.f32.vlgmr.msra.gmra.mrb[30].mxu0 %v15303_v38 }
0x11f2   : > { %49474 = vmatpush3.bf16.msra.mxu0 %v56402_v29  ;;  %45255 = vmatprep.mubr.f32.mxu0 %v15291_v47 }
0x11f3   : > { %49476 = vmatprep.subr.bf16.mxu0 %v56403_v37 }
0x11f6   : > { %49478 = vmatpush3.bf16.msra.mxu0 %v56403_v37 }
0x11f7   : > { %49480 = vmatprep.subr.bf16.mxu0 %v56396_v33 }
0x11f9   : > { %45256 = vmatmul.mubr.f32.vlgmr.msra.gmra.mrb[30].mxu0 %v15301_v12 }
0x11fa   : > { %49482 = vmatpush3.bf16.msra.mxu0 %v56396_v33  ;;  %45266 = vmatprep.mubr.f32.mxu0 %v15291_v47 }
0x11fb   : > { %49484 = vmatprep.subr.bf16.mxu0 %v56397_v22 }
0x11fe   : > { %49486 = vmatpush3.bf16.msra.mxu0 %v56397_v22  ;;  %v15765_v22 = vpop.permute.xlu0 %15764 }
0x11ff   : > { %49800 = vmatprep.subr.bf16.mxu0 %v53437_v40 }
0x1201   : > { %45267 = vmatmul.mubr.f32.vlgmr.msra.gmra.mrb[30].mxu0 %v15301_v12 }
0x1202   : > { %49802 = vmatpush3.bf16.msra.mxu0 %v53437_v40 }
0x1203   : > { %49804 = vmatprep.subr.bf16.mxu0 %v53447_v26 }
0x1206   : > { %49806 = vmatpush3.bf16.msra.mxu0 %v53447_v26 }
0x1207   : > { %49808 = vmatprep.subr.bf16.mxu0 %v53457_v60 }
0x12d4   : > { %v45268_v38 = vpop.f32.mrb[30].mxu0 }
0x12d5   : > { %v54246_v42 = vadd.f32 %v56404_v43, %v45268_v38  ;;  %v15740_v47 = vpop.f32.mrb[31].mxu0  ;;  %v15767_v38 = vpop.permute.xlu1 %15766 }
0x12d6   : > { %v54249_v39 = vadd.f32 %v56404_v43, %v15740_v47 }
0x12d7   : > { %v40587_v55 = vmul.f32 -1.442695, %v54246_v42 }
0x12d8   : > { %v40586_v12 = vmul.f32 -1.442695, %v54249_v39 }
0x12d9   : > { %52587 = vpow2.f32 %v40587_v55 }
0x12da   : > { %52589 = vpow2.f32 %v40586_v12 }
0x12e3   : > { %v52588_v37 = vpop.eup %52587 }
0x12e4   : > { %v52590_v29 = vpop.eup %52589  ;;  %v15759_v54 = vadd.f32 1.0, %v52588_v37 }
0x12e5   : > { %v15758_v34 = vadd.f32 1.0, %v52590_v29 }
0x12e6   : > { %52591 = vrcp.f32 %v15759_v54 }
0x12e7   : > { %52593 = vrcp.f32 %v15758_v34 }
0x12f0   : > { %v54253_v41 = vpop.eup %52591 }
0x12f1   : > { %v54255_v16 = vpop.eup %52593  ;;  %v15771_v43 = vmul.f32 %v54253_v41, %v15767_v38 }
0x12f2   : > { %v15770_v47 = vmul.f32 %v54255_v16, %v15765_v22 }
0x12f3   : > { %15776 = vrot.lane.b32.xlu1 %v15771_v43, %s52742_s28 }
0x12f4   : > { %15774 = vrot.lane.b32.xlu0 %v15770_v47, %s52742_s28 }
0x1365   : > { %v15777_v55 = vpop.permute.xlu1 %15776 }
0x1366   : > { %v15780_v37 = vsel %vm973_vm1, %v15777_v55, 0  ;;  %v15775_v29 = vpop.permute.xlu0 %15774  ;;  %v16323_v55 = vsub.f32 1.0, %v54253_v41 }
0x1367   : > { %v15861_v54 = vand.u32 4294901760, %v15780_v37  ;;  %v15778_v34 = vsel %vm973_vm1, %v15775_v29, 0 }
0x1368   : > { %v15851_v12 = vand.u32 4294901760, %v15778_v34 }
0x1369   : > { %v15862_v33 = vsub.f32 %v15780_v37, %v15861_v54  ;;  %v16322_v37 = vsub.f32 1.0, %v54255_v16 }
0x136a   : > { %v15852_v35 = vsub.f32 %v15778_v34, %v15851_v12 }
0x136b   : > { %v15863_v25 = vand.u32 4294901760, %v15862_v33 }
0x136c   : > { %v15853_v61 = vand.u32 4294901760, %v15852_v35 }
0x136d   : > { %v15864_v57 = vsub.f32 %v15862_v33, %v15863_v25 }
0x136e   : > { %v15854_v38 = vsub.f32 %v15852_v35, %v15853_v61 }
0x136f   : > { %v15865_v22 = vand.u32 4294901760, %v15864_v57 }
0x1370   : > { %v15855_v49 = vand.u32 4294901760, %v15854_v38 }
0x1372   : > { %45277 = vmatprep.mubr.f32.mxu1 %v15855_v49 }
0x1373   : > { %45278 = vmatmul.mubr.f32.vlgmr.msra.gmra.mrb[30].mxu1 %v15865_v22 }
0x1374   : > { %49498 = vmatpush3.bf16.msra.mxu1 %v53457_v60  ;;  %45288 = vmatprep.mubr.f32.mxu1 %v15851_v12 }
0x1375   : > { %49500 = vmatprep.subr.bf16.mxu1 %v53462_v48 }
0x1378   : > { %49502 = vmatpush3.bf16.msra.mxu1 %v53462_v48 }
0x1379   : > { %49504 = vmatprep.subr.bf16.mxu1 %v53464_v1 }
0x137b   : > { %45289 = vmatmul.mubr.f32.vlgmr.msra.gmra.mrb[30].mxu1 %v15861_v54 }
0x137c   : > { %49506 = vmatpush3.bf16.msra.mxu1 %v53464_v1  ;;  %45299 = vmatprep.mubr.f32.mxu1 %v15852_v35 }
0x137d   : > { %49508 = vmatprep.subr.bf16.mxu1 %v53466_v15 }
0x1380   : > { %49510 = vmatpush3.bf16.msra.mxu1 %v53466_v15 }
0x1381   : > { %49512 = vmatprep.subr.bf16.mxu1 %v53437_v40 }
0x1383   : > { %45300 = vmatmul.mubr.f32.vlgmr.msra.gmra.mrb[30].mxu1 %v15862_v33 }
0x1384   : > { %49514 = vmatpush3.bf16.msra.mxu1 %v53437_v40  ;;  %45310 = vmatprep.mubr.f32.mxu1 %v15853_v61 }
0x1385   : > { %49516 = vmatprep.subr.bf16.mxu1 %v53447_v26 }
0x1388   : > { %49518 = vmatpush3.bf16.msra.mxu1 %v53447_v26 }
0x1389   : > { %49520 = vmatprep.subr.bf16.mxu1 %v53468_v36 }
0x138b   : > { %45311 = vmatmul.mubr.f32.vlgmr.msra.gmra.mrb[30].mxu1 %v15863_v25 }
0x138c   : > { %49522 = vmatpush3.bf16.msra.mxu1 %v53468_v36  ;;  %45321 = vmatprep.mubr.f32.mxu1 %v15851_v12 }
0x138d   : > { %49524 = vmatprep.subr.bf16.mxu1 %v53470_v7 }
0x1390   : > { %49526 = vmatpush3.bf16.msra.mxu1 %v53470_v7 }
0x1391   : > { %49528 = vmatprep.subr.bf16.mxu1 %v53437_v40 }
0x1393   : > { %45322 = vmatmul.mubr.f32.vlgmr.msra.gmra.mrb[30].mxu1 %v15861_v54 }
0x1394   : > { %49530 = vmatpush3.bf16.msra.mxu1 %v53437_v40  ;;  %45332 = vmatprep.mubr.f32.mxu1 %v15851_v12 }
0x1395   : > { %49532 = vmatprep.subr.bf16.mxu1 %v53447_v26 }
0x1398   : > { %49534 = vmatpush3.bf16.msra.mxu1 %v53447_v26 }
0x139b   : > { %45333 = vmatmul.mubr.f32.vlgmr.msra.gmra.mrb[30].mxu1 %v15861_v54  ;;  %v16325_v54 = vmul.f32 %v16323_v55, %v54037_v2 }
0x139c   : > { %45339 = vmatprep.mubr.f32.mxu1 %v56327_v31 }
0x146e   : > { %v45334_v49 = vpop.f32.mrb[30].mxu1 }
0x146f   : > { %16314 = vrot.lane.b32.xlu1 %v45334_v49, %s52743_s29  ;;  %v16300_v57 = vpop.f32.mrb[31].mxu1 }
0x1470   : > { %16312 = vrot.lane.b32.xlu0 %v16300_v57, %s52743_s29 }
0x14e1   : > { %v16315_v61 = vpop.permute.xlu1 %16314 }
0x14e2   : > { %v16319_v25 = vadd.f32 %v54246_v42, %v16315_v61  ;;  %v16313_v35 = vpop.permute.xlu0 %16312 }
0x14e3   : > { %v16318_v33 = vadd.f32 %v54249_v39, %v16313_v35  ;;  %v16324_v39 = vmul.f32 %v16322_v37, %v54039_v0 }
0x14e4   : > { %52595 = vtanh.f32 %v16319_v25 }
0x14e5   : > { %52597 = vtanh.f32 %v16318_v33 }
0x14ee   : > { %v52596_v43 = vpop.eup %52595 }
0x14ef   : > { %v52598_v47 = vpop.eup %52597  ;;  %16330 = vrot.lane.b32.xlu1 %v52596_v43, %s52743_s29 }
0x14f0   : > { %16328 = vrot.lane.b32.xlu0 %v52598_v47, %s52743_s29 }
0x1561   : > { %v16331_v29 = vpop.permute.xlu1 %16330 }
0x1562   : > { %v16335_v42 = vmul.f32 %v54253_v41, %v16331_v29  ;;  %v16329_v34 = vpop.permute.xlu0 %16328  ;;  %v56405_v29 = vld [vmem:[#allocation9_spill] sm:$0xff] }
0x1563   : > { %v16334_v12 = vmul.f32 %v54255_v16, %v16329_v34  ;;  %v56408_v34 = vld [vmem:[#allocation17_spill] sm:$0xff] }
0x1564   : > { %v54295_v38 = vadd.f32 %v16335_v42, %v16325_v54  ;;  %v56406_v54 = vld [vmem:[#allocation11_spill] sm:$0xff] }
0x1565   : > { %v54297_v22 = vadd.f32 %v16334_v12, %v16324_v39  ;;  %v56407_v42 = vld [vmem:[#allocation15_spill] sm:$0xff]  ;;  %v56409_v39 = vld [vmem:[#allocation6_spill] sm:$0xff] }
0x1566   : > { %v16342_v49 = vand.u32 4294901760, %v54295_v38  ;;  %19792 = vrot.lane.b32.xlu1 %v54295_v38, %s52741_s7  ;;  %v56410_v12 = vld [vmem:[#allocation7_spill] sm:$0xff] }
0x1567   : > { %v16339_v57 = vand.u32 4294901760, %v54297_v22  ;;  %19790 = vrot.lane.b32.xlu0 %v54297_v22, %s52741_s7 }
0x1568   : > { %v16494_v2 = vsub.f32 %v54295_v38, %v16342_v49 }
0x1569   : > { %v49535_v41 = vpack.c.bf16 %v16342_v49, %v16339_v57  ;;  %v16487_v0 = vsub.f32 %v54297_v22, %v16339_v57  ;;  %v56411_v49 = vld [vmem:[#allocation8_spill] sm:$0xff]  ;;  %v56412_v57 = vld [vmem:[#allocation10_spill] sm:$0xff] }
0x156a   : > { %v16495_v16 = vand.u32 4294901760, %v16494_v2 }
0x156b   : > { %49536 = vmatprep.subr.bf16.mxu1 %v49535_v41  ;;  %v16488_v61 = vand.u32 4294901760, %v16487_v0  ;;  %v49543_v55 = vpack.c.bf16 %v16494_v2, %v16487_v0 }
0x156c   : > { %49538 = vmatpush3.bf16.msra.mxu1 %v49535_v41  ;;  %v16496_v25 = vsub.f32 %v16494_v2, %v16495_v16  ;;  %v56413_v2 = vld [vmem:[#allocation12_spill] sm:$0xff] }
0x156d   : > { %v16489_v35 = vsub.f32 %v16487_v0, %v16488_v61  ;;  %v49551_v37 = vpack.c.bf16 %v16495_v16, %v16488_v61  ;;  %v56414_v0 = vld [vmem:[#allocation14_spill] sm:$0xff]  ;;  %v56415_v16 = vld [vmem:[#allocation16_spill] sm:$0xff] }
0x156e   : > { %v16497_v33 = vand.u32 4294901760, %v16496_v25  ;;  %v56416_v61 = vld [vmem:[#allocation18_spill] sm:$0xff]  ;;  %v56417_v25 = vld [vmem:[#allocation19_spill] sm:$0xff] }
0x156f   : > { %45340 = vmatmul.mubr.f32.vlgmr.msra.gmra.mrb[32].mxu1 %v52929_v46  ;;  %v16490_v43 = vand.u32 4294901760, %v16489_v35  ;;  %v17099_v35 = vsel %vm973_vm1, %v54297_v22, 0 }
0x1570   : > { %45342 = vmatprep.mubr.f32.mxu1 %v52939_v50 }
0x1571   : > { %v49539_v47 = vpack.c.bf16 %v16497_v33, %v16490_v43  ;;  %v17102_v33 = vsel %vm973_vm1, %v54295_v38, 0  ;;  %v17173_v43 = vand.u32 4294901760, %v17099_v35 }
0x1573   : > { %45343 = vmatmul.mubr.f32.gmra.mrb[34].mxu1 %v52958_v58  ;;  %49540 = vmatprep.subr.bf16.mxu1 %v49539_v47 }
0x1574   : > { %49542 = vmatpush3.bf16.msra.mxu1 %v49539_v47  ;;  %45345 = vmatprep.mubr.f32.mxu1 %v52963_v62  ;;  %v17174_v47 = vsub.f32 %v17099_v35, %v17173_v43 }
0x1575   : > { %49544 = vmatprep.subr.bf16.mxu1 %v49543_v55 }
0x1577   : > { %45346 = vmatmul.mubr.f32.gmra.mrb[36].mxu1 %v52975_v3 }
0x1578   : > { %45348 = vmatprep.mubr.f32.mxu1 %v52980_v5 }
0x157b   : > { %45349 = vmatmul.mubr.f32.gmra.mrb[38].mxu1 %v52985_v6 }
0x157c   : > { %45355 = vmatprep.mubr.f32.mxu1 %v52838_v9 }
0x157f   : > { %45356 = vmatmul.mubr.f32.vlgmr.msra.gmra.mrb[32].mxu1 %v52840_v10 }
0x1580   : > { %49546 = vmatpush3.bf16.msra.mxu1 %v49543_v55  ;;  %45358 = vmatprep.mubr.f32.mxu1 %v52842_v11 }
0x1581   : > { %49548 = vmatprep.subr.bf16.mxu1 %v49535_v41 }
0x1583   : > { %45359 = vmatmul.mubr.f32.gmra.mrb[34].mxu1 %v52848_v14 }
0x1584   : > { %45361 = vmatprep.mubr.f32.mxu1 %v52862_v21 }
0x1587   : > { %45362 = vmatmul.mubr.f32.gmra.mrb[36].mxu1 %v52873_v23 }
0x1588   : > { %45364 = vmatprep.mubr.f32.mxu1 %v52875_v24 }
0x158b   : > { %45365 = vmatmul.mubr.f32.gmra.mrb[38].mxu1 %v52946_v53 }
0x158c   : > { %45371 = vmatprep.mubr.f32.mxu1 %v52854_v18 }
0x158f   : > { %45372 = vmatmul.mubr.f32.vlgmr.msra.gmra.mrb[32].mxu1 %v52857_v19 }
0x1590   : > { %49550 = vmatpush3.bf16.msra.mxu1 %v49535_v41  ;;  %45374 = vmatprep.mubr.f32.mxu1 %v52860_v20 }
0x1591   : > { %49552 = vmatprep.subr.bf16.mxu1 %v49551_v37 }
0x1593   : > { %45375 = vmatmul.mubr.f32.gmra.mrb[34].mxu1 %v56366_v28 }
0x1594   : > { %45377 = vmatprep.mubr.f32.mxu1 %v56405_v29 }
0x1597   : > { %45378 = vmatmul.mubr.f32.gmra.mrb[36].mxu1 %v56406_v54 }
0x1598   : > { %45380 = vmatprep.mubr.f32.mxu1 %v56407_v42 }
0x159b   : > { %45381 = vmatmul.mubr.f32.gmra.mrb[38].mxu1 %v56408_v34 }
0x159c   : > { %45387 = vmatprep.mubr.f32.mxu1 %v56409_v39  ;;  %v56422_v39 = vld [vmem:[#allocation24_spill] sm:$0xff] }
0x159f   : > { %45388 = vmatmul.mubr.f32.vlgmr.msra.gmra.mrb[32].mxu1 %v56410_v12  ;;  %v56421_v12 = vld [vmem:[#allocation23_spill] sm:$0xff] }
0x15a0   : > { %49554 = vmatpush3.bf16.msra.mxu1 %v49551_v37  ;;  %45390 = vmatprep.mubr.f32.mxu1 %v56411_v49  ;;  %v56418_v37 = vld [vmem:[#allocation20_spill] sm:$0xff]  ;;  %v56420_v49 = vld [vmem:[#allocation22_spill] sm:$0xff] }
0x15a1   : > { %49556 = vmatprep.subr.bf16.mxu1 %v49535_v41 }
0x15a3   : > { %45391 = vmatmul.mubr.f32.gmra.mrb[34].mxu1 %v56412_v57 }
0x15a4   : > { %45393 = vmatprep.mubr.f32.mxu1 %v56413_v2 }
0x15a7   : > { %45394 = vmatmul.mubr.f32.gmra.mrb[36].mxu1 %v56414_v0  ;;  %v56419_v0 = vld [vmem:[#allocation21_spill] sm:$0xff] }
0x15a8   : > { %45396 = vmatprep.mubr.f32.mxu1 %v56415_v16 }
0x15ab   : > { %45397 = vmatmul.mubr.f32.gmra.mrb[38].mxu1 %v56416_v61  ;;  %v17175_v61 = vand.u32 4294901760, %v17174_v47 }
0x15ac   : > { %45403 = vmatprep.mubr.f32.mxu1 %v52838_v9 }
0x15ad   : > { %v17176_v35 = vsub.f32 %v17174_v47, %v17175_v61 }
0x15af   : > { %45404 = vmatmul.mubr.f32.vlgmr.msra.gmra.mrb[32].mxu1 %v52840_v10  ;;  %v17177_v57 = vand.u32 4294901760, %v17176_v35 }
0x15b0   : > { %49558 = vmatpush3.bf16.msra.mxu1 %v49535_v41  ;;  %45406 = vmatprep.mubr.f32.mxu1 %v52842_v11  ;;  %v17183_v41 = vand.u32 4294901760, %v17102_v33 }
0x15b1   : > { %49560 = vmatprep.subr.bf16.mxu1 %v56417_v25 }
0x15b2   : > { %v17184_v55 = vsub.f32 %v17102_v33, %v17183_v41 }
0x15b3   : > { %45407 = vmatmul.mubr.f32.gmra.mrb[34].mxu1 %v52848_v14 }
0x15b4   : > { %45409 = vmatprep.mubr.f32.mxu1 %v52862_v21  ;;  %v17185_v16 = vand.u32 4294901760, %v17184_v55 }
0x15b6   : > { %v17186_v2 = vsub.f32 %v17184_v55, %v17185_v16 }
0x15b7   : > { %45410 = vmatmul.mubr.f32.gmra.mrb[36].mxu1 %v52873_v23 }
0x15b8   : > { %45412 = vmatprep.mubr.f32.mxu1 %v52875_v24  ;;  %v17187_v33 = vand.u32 4294901760, %v17186_v2  ;;  %v56424_v2 = vld [vmem:[#allocation26_spill] sm:$0xff] }
0x15bb   : > { %45413 = vmatmul.mubr.f32.gmra.mrb[38].mxu1 %v52946_v53 }
0x15bc   : > { %45419 = vmatprep.mubr.f32.mxu1 %v52838_v9 }
0x15bf   : > { %45420 = vmatmul.mubr.f32.vlgmr.msra.gmra.mrb[32].mxu1 %v52840_v10 }
0x15c0   : > { %45422 = vmatprep.mubr.f32.mxu1 %v52842_v11  ;;  %49562 = vmatpush3.bf16.msra.mxu1 %v56417_v25 }
0x15c1   : > { %49564 = vmatprep.subr.bf16.mxu1 %v56418_v37 }
0x15c3   : > { %45423 = vmatmul.mubr.f32.gmra.mrb[34].mxu1 %v52848_v14 }
0x15c4   : > { %45425 = vmatprep.mubr.f32.mxu1 %v52862_v21  ;;  %49566 = vmatpush3.bf16.msra.mxu1 %v56418_v37 }
0x15c5   : > { %49568 = vmatprep.subr.bf16.mxu1 %v56419_v0 }
0x15c7   : > { %45426 = vmatmul.mubr.f32.gmra.mrb[36].mxu1 %v52873_v23 }
0x15c8   : > { %45428 = vmatprep.mubr.f32.mxu1 %v52875_v24 }
0x15cb   : > { %45429 = vmatmul.mubr.f32.gmra.mrb[38].mxu1 %v52946_v53 }
0x15cc   : > { %45439 = vmatprep.mubr.f32.mxu1 %v17177_v57  ;;  %v56423_v57 = vld [vmem:[#allocation25_spill] sm:$0xff] }
0x15cf   : > { %45440 = vmatmul.mubr.f32.vlgmr.msra.gmra.mrb[40].mxu1 %v17187_v33 }
0x15d0   : > { %49570 = vmatpush3.bf16.msra.mxu1 %v56419_v0  ;;  %45450 = vmatprep.mubr.f32.mxu1 %v17173_v43 }
0x15d1   : > { %49572 = vmatprep.subr.bf16.mxu1 %v56420_v49 }
0x15d4   : > { %49574 = vmatpush3.bf16.msra.mxu1 %v56420_v49 }
0x15d5   : > { %49576 = vmatprep.subr.bf16.mxu1 %v56421_v12 }
0x15d7   : > { %45451 = vmatmul.mubr.f32.vlgmr.msra.gmra.mrb[40].mxu1 %v17183_v41 }
0x15d8   : > { %49578 = vmatpush3.bf16.msra.mxu1 %v56421_v12  ;;  %45461 = vmatprep.mubr.f32.mxu1 %v17174_v47 }
0x15d9   : > { %49580 = vmatprep.subr.bf16.mxu1 %v56422_v39 }
0x15dc   : > { %49582 = vmatpush3.bf16.msra.mxu1 %v56422_v39 }
0x15dd   : > { %49584 = vmatprep.subr.bf16.mxu1 %v56417_v25 }
0x15df   : > { %45462 = vmatmul.mubr.f32.vlgmr.msra.gmra.mrb[40].mxu1 %v17184_v55 }
0x15e0   : > { %49586 = vmatpush3.bf16.msra.mxu1 %v56417_v25  ;;  %45472 = vmatprep.mubr.f32.mxu1 %v17175_v61 }
0x15e1   : > { %49588 = vmatprep.subr.bf16.mxu1 %v56418_v37 }
0x15e4   : > { %49590 = vmatpush3.bf16.msra.mxu1 %v56418_v37 }
0x15e5   : > { %49592 = vmatprep.subr.bf16.mxu1 %v56423_v57 }
0x15e7   : > { %45473 = vmatmul.mubr.f32.vlgmr.msra.gmra.mrb[40].mxu1 %v17185_v16 }
0x15e8   : > { %49594 = vmatpush3.bf16.msra.mxu1 %v56423_v57  ;;  %45483 = vmatprep.mubr.f32.mxu1 %v17173_v43 }
0x15e9   : > { %49596 = vmatprep.subr.bf16.mxu1 %v56424_v2 }
0x15ec   : > { %49598 = vmatpush3.bf16.msra.mxu1 %v56424_v2 }
0x15ed   : > { %49600 = vmatprep.subr.bf16.mxu1 %v56417_v25 }
0x15ef   : > { %45484 = vmatmul.mubr.f32.vlgmr.msra.gmra.mrb[40].mxu1 %v17183_v41 }
0x15f0   : > { %49602 = vmatpush3.bf16.msra.mxu1 %v56417_v25  ;;  %45494 = vmatprep.mubr.f32.mxu1 %v17173_v43 }
0x15f1   : > { %49604 = vmatprep.subr.bf16.mxu1 %v56418_v37 }
0x15f4   : > { %49606 = vmatpush3.bf16.msra.mxu1 %v56418_v37 }
0x15f5   : > { %49608 = vmatprep.subr.bf16.mxu1 %v53118_v59 }
0x15f7   : > { %45495 = vmatmul.mubr.f32.vlgmr.msra.gmra.mrb[40].mxu1 %v17183_v41 }
0x15f8   : > { %49610 = vmatpush3.bf16.msra.mxu1 %v53118_v59 }
0x15f9   : > { %49612 = vmatprep.subr.bf16.mxu1 %v53128_v8 }
0x15fc   : > { %49614 = vmatpush3.bf16.msra.mxu1 %v53128_v8 }
0x15fd   : > { %49616 = vmatprep.subr.bf16.mxu1 %v56302_v56 }
0x1692   : > { %v45421_v16 = vpop.f32.mrb[32].mxu1 }
0x1693   : > { %v17638_v61 = vsel %vm973_vm1, %v45421_v16, 0  ;;  %v17052_v47 = vpop.f32.mrb[33].mxu1 }
0x1694   : > { %v17719_v43 = vand.u32 4294901760, %v17638_v61  ;;  %v17635_v55 = vsel %vm973_vm1, %v17052_v47, 0 }
0x1695   : > { %v17709_v35 = vand.u32 4294901760, %v17635_v55 }
0x1696   : > { %v17720_v33 = vsub.f32 %v17638_v61, %v17719_v43  ;;  %v45424_v2 = vpop.f32.mrb[34].mxu1 }
0x1697   : > { %v17710_v57 = vsub.f32 %v17635_v55, %v17709_v35  ;;  %v17064_v41 = vpop.f32.mrb[35].mxu1 }
0x1698   : > { %v17721_v39 = vand.u32 4294901760, %v17720_v33 }
0x1699   : > { %v17711_v12 = vand.u32 4294901760, %v17710_v57 }
0x169a   : > { %v17722_v49 = vsub.f32 %v17720_v33, %v17721_v39  ;;  %v54389_v0 = vpop.f32.mrb[36].mxu1 }
0x169b   : > { %v54391_v37 = vpop.f32.mrb[37].mxu1  ;;  %v17712_v25 = vsub.f32 %v17710_v57, %v17711_v12 }
0x169c   : > { %v17723_v42 = vand.u32 4294901760, %v17722_v49  ;;  %v18174_v49 = vsel %vm973_vm1, %v45424_v2, 0 }
0x169d   : > { %v17713_v34 = vand.u32 4294901760, %v17712_v25 }
0x169e   : > { %v54393_v16 = vpop.f32.mrb[38].mxu1 }
0x169f   : > { %v54395_v54 = vpop.f32.mrb[39].mxu1  ;;  %45505 = vmatprep.mubr.f32.mxu1 %v17713_v34 }
0x16a0   : > { %45506 = vmatmul.mubr.f32.vlgmr.msra.gmra.mrb[40].mxu1 %v17723_v42  ;;  %v18171_v42 = vsel %vm973_vm1, %v17064_v41, 0 }
0x16a1   : > { %49618 = vmatpush3.bf16.msra.mxu1 %v56302_v56  ;;  %45516 = vmatprep.mubr.f32.mxu1 %v17709_v35  ;;  %v18245_v34 = vand.u32 4294901760, %v18171_v42 }
0x16a2   : > { %49620 = vmatprep.subr.bf16.mxu1 %v56303_v52 }
0x16a3   : > { %v18246_v25 = vsub.f32 %v18171_v42, %v18245_v34  ;;  %v56426_v42 = vld [vmem:[#allocation39_spill] sm:$0xff] }
0x16a5   : > { %49622 = vmatpush3.bf16.msra.mxu1 %v56303_v52 }
0x16a6   : > { %49624 = vmatprep.subr.bf16.mxu1 %v56304_v51 }
0x16a8   : > { %45517 = vmatmul.mubr.f32.vlgmr.msra.gmra.mrb[40].mxu1 %v17719_v43 }
0x16a9   : > { %49626 = vmatpush3.bf16.msra.mxu1 %v56304_v51  ;;  %45527 = vmatprep.mubr.f32.mxu1 %v17710_v57  ;;  %v18247_v57 = vand.u32 4294901760, %v18246_v25 }
0x16aa   : > { %49628 = vmatprep.subr.bf16.mxu1 %v56305_v30 }
0x16ad   : > { %49630 = vmatpush3.bf16.msra.mxu1 %v56305_v30 }
0x16ae   : > { %49632 = vmatprep.subr.bf16.mxu1 %v53118_v59 }
0x16b0   : > { %45528 = vmatmul.mubr.f32.vlgmr.msra.gmra.mrb[40].mxu1 %v17720_v33  ;;  %v56425_v33 = vld [vmem:[#allocation38_spill] sm:$0xff] }
0x16b1   : > { %49634 = vmatpush3.bf16.msra.mxu1 %v53118_v59  ;;  %45538 = vmatprep.mubr.f32.mxu1 %v17711_v12  ;;  %v18255_v12 = vand.u32 4294901760, %v18174_v49 }
0x16b2   : > { %49636 = vmatprep.subr.bf16.mxu1 %v53128_v8 }
0x16b3   : > { %v18256_v61 = vsub.f32 %v18174_v49, %v18255_v12  ;;  %v18710_v49 = vsel %vm973_vm1, %v54389_v0, 0 }
0x16b5   : > { %49638 = vmatpush3.bf16.msra.mxu1 %v53128_v8  ;;  %v18257_v47 = vand.u32 4294901760, %v18256_v61 }
0x16b6   : > { %49640 = vmatprep.subr.bf16.mxu1 %v56306_v13 }
0x16b7   : > { %v18258_v55 = vsub.f32 %v18256_v61, %v18257_v47 }
0x16b8   : > { %45539 = vmatmul.mubr.f32.vlgmr.msra.gmra.mrb[40].mxu1 %v17721_v39  ;;  %v18248_v39 = vsub.f32 %v18246_v25, %v18247_v57 }
0x16b9   : > { %49642 = vmatpush3.bf16.msra.mxu1 %v56306_v13  ;;  %45549 = vmatprep.mubr.f32.mxu1 %v17709_v35 }
0x16ba   : > { %49644 = vmatprep.subr.bf16.mxu1 %v56307_v27  ;;  %v18249_v2 = vand.u32 4294901760, %v18248_v39 }
0x16bd   : > { %49646 = vmatpush3.bf16.msra.mxu1 %v56307_v27 }
0x16be   : > { %49648 = vmatprep.subr.bf16.mxu1 %v53118_v59 }
0x16c0   : > { %45550 = vmatmul.mubr.f32.vlgmr.msra.gmra.mrb[40].mxu1 %v17719_v43 }
0x16c1   : > { %49650 = vmatpush3.bf16.msra.mxu1 %v53118_v59  ;;  %45560 = vmatprep.mubr.f32.mxu1 %v17709_v35  ;;  %v18259_v35 = vand.u32 4294901760, %v18258_v55 }
0x16c2   : > { %49652 = vmatprep.subr.bf16.mxu1 %v53128_v8 }
0x16c5   : > { %49654 = vmatpush3.bf16.msra.mxu1 %v53128_v8 }
0x16c6   : > { %49656 = vmatprep.subr.bf16.mxu1 %v53212_v32 }
0x16c8   : > { %45561 = vmatmul.mubr.f32.vlgmr.msra.gmra.mrb[40].mxu1 %v17719_v43  ;;  %v18707_v43 = vsel %vm973_vm1, %v54391_v37, 0 }
0x16c9   : > { %49658 = vmatpush3.bf16.msra.mxu1 %v53212_v32  ;;  %45571 = vmatprep.mubr.f32.mxu1 %v18249_v2  ;;  %v18781_v41 = vand.u32 4294901760, %v18707_v43  ;;  %v56427_v2 = vld [vmem:[#allocation40_spill] sm:$0xff] }
0x16ca   : > { %49660 = vmatprep.subr.bf16.mxu1 %v53221_v63 }
0x16cd   : > { %49662 = vmatpush3.bf16.msra.mxu1 %v53221_v63 }
0x16ce   : > { %49664 = vmatprep.subr.bf16.mxu1 %v53229_v4 }
0x16d0   : > { %45572 = vmatmul.mubr.f32.vlgmr.msra.gmra.mrb[40].mxu1 %v18259_v35  ;;  %v56428_v35 = vld [vmem:[#allocation41_spill] sm:$0xff] }
0x16d1   : > { %49666 = vmatpush3.bf16.msra.mxu1 %v53229_v4  ;;  %45582 = vmatprep.mubr.f32.mxu1 %v18245_v34 }
0x16d2   : > { %49668 = vmatprep.subr.bf16.mxu1 %v53233_v17 }
0x16d5   : > { %49670 = vmatpush3.bf16.msra.mxu1 %v53233_v17 }
0x16d6   : > { %49672 = vmatprep.subr.bf16.mxu1 %v56308_v45 }
0x16d8   : > { %45583 = vmatmul.mubr.f32.vlgmr.msra.gmra.mrb[40].mxu1 %v18255_v12 }
0x16d9   : > { %49674 = vmatpush3.bf16.msra.mxu1 %v56308_v45  ;;  %45593 = vmatprep.mubr.f32.mxu1 %v18246_v25  ;;  %v18782_v25 = vsub.f32 %v18707_v43, %v18781_v41  ;;  %v56429_v43 = vld [vmem:[#allocation42_spill] sm:$0xff] }
0x16da   : > { %49676 = vmatprep.subr.bf16.mxu1 %v56309_v44 }
0x16db   : > { %v18783_v37 = vand.u32 4294901760, %v18782_v25 }
0x16dd   : > { %49678 = vmatpush3.bf16.msra.mxu1 %v56309_v44  ;;  %v18784_v39 = vsub.f32 %v18782_v25, %v18783_v37 }
0x16de   : > { %49680 = vmatprep.subr.bf16.mxu1 %v53212_v32 }
0x16df   : > { %v18785_v0 = vand.u32 4294901760, %v18784_v39  ;;  %v56432_v39 = vld [vmem:[#allocation45_spill] sm:$0xff] }
0x16e0   : > { %45594 = vmatmul.mubr.f32.vlgmr.msra.gmra.mrb[40].mxu1 %v18256_v61 }
0x16e1   : > { %49682 = vmatpush3.bf16.msra.mxu1 %v53212_v32  ;;  %45604 = vmatprep.mubr.f32.mxu1 %v18247_v57  ;;  %v18791_v57 = vand.u32 4294901760, %v18710_v49 }
0x16e2   : > { %49684 = vmatprep.subr.bf16.mxu1 %v53221_v63 }
0x16e3   : > { %v18792_v61 = vsub.f32 %v18710_v49, %v18791_v57  ;;  %v56430_v49 = vld [vmem:[#allocation43_spill] sm:$0xff] }
0x16e5   : > { %49686 = vmatpush3.bf16.msra.mxu1 %v53221_v63 }
0x16e6   : > { %49688 = vmatprep.subr.bf16.mxu1 %v56425_v33 }
0x16e8   : > { %45605 = vmatmul.mubr.f32.vlgmr.msra.gmra.mrb[40].mxu1 %v18257_v47  ;;  %v18793_v47 = vand.u32 4294901760, %v18792_v61 }
0x16e9   : > { %49690 = vmatpush3.bf16.msra.mxu1 %v56425_v33  ;;  %45615 = vmatprep.mubr.f32.mxu1 %v18245_v34 }
0x16ea   : > { %49692 = vmatprep.subr.bf16.mxu1 %v56426_v42  ;;  %v18794_v55 = vsub.f32 %v18792_v61, %v18793_v47 }
0x16ed   : > { %49694 = vmatpush3.bf16.msra.mxu1 %v56426_v42 }
0x16ee   : > { %49696 = vmatprep.subr.bf16.mxu1 %v53212_v32 }
0x16f0   : > { %45616 = vmatmul.mubr.f32.vlgmr.msra.gmra.mrb[40].mxu1 %v18255_v12 }
0x16f1   : > { %49698 = vmatpush3.bf16.msra.mxu1 %v53212_v32  ;;  %45626 = vmatprep.mubr.f32.mxu1 %v18245_v34  ;;  %v18795_v34 = vand.u32 4294901760, %v18794_v55  ;;  %v56433_v55 = vld [vmem:[#allocation46_spill] sm:$0xff] }
0x16f2   : > { %49700 = vmatprep.subr.bf16.mxu1 %v53221_v63 }
0x16f5   : > { %49702 = vmatpush3.bf16.msra.mxu1 %v53221_v63 }
0x16f6   : > { %49704 = vmatprep.subr.bf16.mxu1 %v56427_v2 }
0x16f8   : > { %45627 = vmatmul.mubr.f32.vlgmr.msra.gmra.mrb[40].mxu1 %v18255_v12  ;;  %v56431_v12 = vld [vmem:[#allocation44_spill] sm:$0xff] }
0x16f9   : > { %49706 = vmatpush3.bf16.msra.mxu1 %v56427_v2  ;;  %45637 = vmatprep.mubr.f32.mxu1 %v18785_v0  ;;  %v19243_v0 = vsel %vm973_vm1, %v54395_v54, 0 }
0x16fa   : > { %49708 = vmatprep.subr.bf16.mxu1 %v56428_v35 }
0x16fd   : > { %49710 = vmatpush3.bf16.msra.mxu1 %v56428_v35 }
0x16fe   : > { %49712 = vmatprep.subr.bf16.mxu1 %v56429_v43 }
0x1700   : > { %45638 = vmatmul.mubr.f32.vlgmr.msra.gmra.mrb[40].mxu1 %v18795_v34  ;;  %v56434_v34 = vld [vmem:[#allocation47_spill] sm:$0xff] }
0x1701   : > { %49714 = vmatpush3.bf16.msra.mxu1 %v56429_v43  ;;  %45648 = vmatprep.mubr.f32.mxu1 %v18781_v41  ;;  %v56438_v43 = vld [vmem:[#allocation51_spill] sm:$0xff] }
0x1702   : > { %49716 = vmatprep.subr.bf16.mxu1 %v56430_v49 }
0x1705   : > { %49718 = vmatpush3.bf16.msra.mxu1 %v56430_v49  ;;  %v56435_v49 = vld [vmem:[#allocation48_spill] sm:$0xff] }
0x1706   : > { %49720 = vmatprep.subr.bf16.mxu1 %v56431_v12 }
0x1708   : > { %45649 = vmatmul.mubr.f32.vlgmr.msra.gmra.mrb[40].mxu1 %v18791_v57 }
0x1709   : > { %49722 = vmatpush3.bf16.msra.mxu1 %v56431_v12  ;;  %45659 = vmatprep.mubr.f32.mxu1 %v18782_v25  ;;  %v19317_v25 = vand.u32 4294901760, %v19243_v0 }
0x170a   : > { %49724 = vmatprep.subr.bf16.mxu1 %v56432_v39 }
0x170d   : > { %49726 = vmatpush3.bf16.msra.mxu1 %v56432_v39 }
0x170e   : > { %49728 = vmatprep.subr.bf16.mxu1 %v56427_v2 }
0x1710   : > { %45660 = vmatmul.mubr.f32.vlgmr.msra.gmra.mrb[40].mxu1 %v18792_v61  ;;  %v19246_v61 = vsel %vm973_vm1, %v54393_v16, 0 }
0x1711   : > { %49730 = vmatpush3.bf16.msra.mxu1 %v56427_v2  ;;  %45670 = vmatprep.mubr.f32.mxu1 %v18783_v37  ;;  %v19318_v37 = vsub.f32 %v19243_v0, %v19317_v25  ;;  %v19327_v39 = vand.u32 4294901760, %v19246_v61 }
0x1712   : > { %49732 = vmatprep.subr.bf16.mxu1 %v56428_v35 }
0x1713   : > { %v19319_v54 = vand.u32 4294901760, %v19318_v37 }
0x1715   : > { %49734 = vmatpush3.bf16.msra.mxu1 %v56428_v35 }
0x1716   : > { %49736 = vmatprep.subr.bf16.mxu1 %v56433_v55 }
0x1718   : > { %45671 = vmatmul.mubr.f32.vlgmr.msra.gmra.mrb[40].mxu1 %v18793_v47  ;;  %v19328_v47 = vsub.f32 %v19246_v61, %v19327_v39  ;;  %v56437_v61 = vld [vmem:[#allocation50_spill] sm:$0xff] }
0x1719   : > { %49738 = vmatpush3.bf16.msra.mxu1 %v56433_v55  ;;  %45681 = vmatprep.mubr.f32.mxu1 %v18781_v41  ;;  %v19320_v55 = vsub.f32 %v19318_v37, %v19319_v54 }
0x171a   : > { %49740 = vmatprep.subr.bf16.mxu1 %v56434_v34  ;;  %v19329_v12 = vand.u32 4294901760, %v19328_v47 }
0x171b   : > { %v19321_v16 = vand.u32 4294901760, %v19320_v55  ;;  %v56440_v55 = vld [vmem:[#allocation53_spill] sm:$0xff] }
0x171c   : > { %v19330_v0 = vsub.f32 %v19328_v47, %v19329_v12 }
0x171d   : > { %49742 = vmatpush3.bf16.msra.mxu1 %v56434_v34  ;;  %v56436_v34 = vld [vmem:[#allocation49_spill] sm:$0xff] }
0x171e   : > { %49744 = vmatprep.subr.bf16.mxu1 %v56427_v2 }
0x1720   : > { %45682 = vmatmul.mubr.f32.vlgmr.msra.gmra.mrb[40].mxu1 %v18791_v57 }
0x1721   : > { %49746 = vmatpush3.bf16.msra.mxu1 %v56427_v2  ;;  %45692 = vmatprep.mubr.f32.mxu1 %v18781_v41  ;;  %v19331_v41 = vand.u32 4294901760, %v19330_v0 }
0x1722   : > { %49748 = vmatprep.subr.bf16.mxu1 %v56428_v35 }
0x1725   : > { %49750 = vmatpush3.bf16.msra.mxu1 %v56428_v35 }
0x1726   : > { %49752 = vmatprep.subr.bf16.mxu1 %v56435_v49 }
0x1728   : > { %45693 = vmatmul.mubr.f32.vlgmr.msra.gmra.mrb[40].mxu1 %v18791_v57  ;;  %v56439_v57 = vld [vmem:[#allocation52_spill] sm:$0xff] }
0x1729   : > { %49754 = vmatpush3.bf16.msra.mxu1 %v56435_v49  ;;  %45703 = vmatprep.mubr.f32.mxu1 %v19321_v16  ;;  %v56441_v16 = vld [vmem:[#allocation54_spill] sm:$0xff] }
0x172a   : > { %49756 = vmatprep.subr.bf16.mxu1 %v56436_v34 }
0x172d   : > { %49758 = vmatpush3.bf16.msra.mxu1 %v56436_v34 }
0x172e   : > { %49760 = vmatprep.subr.bf16.mxu1 %v56437_v61 }
0x1730   : > { %45704 = vmatmul.mubr.f32.vlgmr.msra.gmra.mrb[40].mxu1 %v19331_v41 }
0x1731   : > { %49762 = vmatpush3.bf16.msra.mxu1 %v56437_v61  ;;  %45714 = vmatprep.mubr.f32.mxu1 %v19317_v25 }
0x1732   : > { %49764 = vmatprep.subr.bf16.mxu1 %v56438_v43 }
0x1735   : > { %49766 = vmatpush3.bf16.msra.mxu1 %v56438_v43 }
0x1736   : > { %49768 = vmatprep.subr.bf16.mxu1 %v56439_v57 }
0x1738   : > { %45715 = vmatmul.mubr.f32.vlgmr.msra.gmra.mrb[40].mxu1 %v19327_v39 }
0x1739   : > { %49770 = vmatpush3.bf16.msra.mxu1 %v56439_v57  ;;  %45725 = vmatprep.mubr.f32.mxu1 %v19318_v37  ;;  %v56442_v37 = vld [vmem:[#allocation55_spill] sm:$0xff] }
0x173a   : > { %49772 = vmatprep.subr.bf16.mxu1 %v56440_v55 }
0x173d   : > { %49774 = vmatpush3.bf16.msra.mxu1 %v56440_v55 }
0x173e   : > { %49776 = vmatprep.subr.bf16.mxu1 %v56435_v49 }
0x1740   : > { %45726 = vmatmul.mubr.f32.vlgmr.msra.gmra.mrb[40].mxu1 %v19328_v47 }
0x1741   : > { %49778 = vmatpush3.bf16.msra.mxu1 %v56435_v49  ;;  %45736 = vmatprep.mubr.f32.mxu1 %v19319_v54 }
0x1742   : > { %49780 = vmatprep.subr.bf16.mxu1 %v56436_v34 }
0x1745   : > { %49782 = vmatpush3.bf16.msra.mxu1 %v56436_v34 }
0x1746   : > { %49784 = vmatprep.subr.bf16.mxu1 %v56441_v16 }
0x1748   : > { %45737 = vmatmul.mubr.f32.vlgmr.msra.gmra.mrb[40].mxu1 %v19329_v12 }
0x1749   : > { %49786 = vmatpush3.bf16.msra.mxu1 %v56441_v16  ;;  %45747 = vmatprep.mubr.f32.mxu1 %v19317_v25 }
0x174a   : > { %49788 = vmatprep.subr.bf16.mxu1 %v56442_v37 }
0x174d   : > { %49790 = vmatpush3.bf16.msra.mxu1 %v56442_v37 }
0x174e   : > { %49792 = vmatprep.subr.bf16.mxu1 %v56435_v49 }
0x1750   : > { %45748 = vmatmul.mubr.f32.vlgmr.msra.gmra.mrb[40].mxu1 %v19327_v39 }
0x1751   : > { %49794 = vmatpush3.bf16.msra.mxu1 %v56435_v49  ;;  %45758 = vmatprep.mubr.f32.mxu1 %v19317_v25  ;;  %v54506_v25 = vld [vmem:[%s55906_s2 + $0xa0] ss:$0 sm:$0xff] }
0x1752   : > { %49796 = vmatprep.subr.bf16.mxu1 %v56436_v34  ;;  %56443 = vst [vmem:[#allocation28_spill] sm:$0xff] %v54506_v25 }
0x1755   : > { %49798 = vmatpush3.bf16.msra.mxu1 %v56436_v34  ;;  %v19791_v34 = vpop.permute.xlu0 %19790 }
0x1756   : > { %50112 = vmatprep.subr.bf16.mxu1 %v53437_v40 }
0x1758   : > { %45759 = vmatmul.mubr.f32.vlgmr.msra.gmra.mrb[40].mxu1 %v19327_v39 }
0x1759   : > { %50114 = vmatpush3.bf16.msra.mxu1 %v53437_v40 }
0x175a   : > { %50116 = vmatprep.subr.bf16.mxu1 %v53447_v26 }
0x175d   : > { %50118 = vmatpush3.bf16.msra.mxu1 %v53447_v26 }
0x175e   : > { %50120 = vmatprep.subr.bf16.mxu1 %v53457_v60 }
0x182b   : > { %v45760_v12 = vpop.f32.mrb[40].mxu1 }
0x182c   : > { %v54509_v54 = vadd.f32 %v54506_v25, %v45760_v12  ;;  %v19766_v47 = vpop.f32.mrb[41].mxu1  ;;  %v19793_v12 = vpop.permute.xlu1 %19792 }
0x182d   : > { %v54512_v39 = vadd.f32 %v54506_v25, %v19766_v47 }
0x182e   : > { %v40589_v0 = vmul.f32 -1.442695, %v54509_v54 }
0x182f   : > { %v40588_v41 = vmul.f32 -1.442695, %v54512_v39 }
0x1830   : > { %52599 = vpow2.f32 %v40589_v0 }
0x1831   : > { %52601 = vpow2.f32 %v40588_v41 }
0x183a   : > { %v52600_v37 = vpop.eup %52599 }
0x183b   : > { %v52602_v16 = vpop.eup %52601  ;;  %v19785_v55 = vadd.f32 1.0, %v52600_v37 }
0x183c   : > { %v19784_v57 = vadd.f32 1.0, %v52602_v16 }
0x183d   : > { %52603 = vrcp.f32 %v19785_v55 }
0x183e   : > { %52605 = vrcp.f32 %v19784_v57 }
0x1847   : > { %v54516_v43 = vpop.eup %52603 }
0x1848   : > { %v54518_v61 = vpop.eup %52605  ;;  %v19797_v47 = vmul.f32 %v54516_v43, %v19793_v12 }
0x1849   : > { %v19796_v25 = vmul.f32 %v54518_v61, %v19791_v34 }
0x184a   : > { %19802 = vrot.lane.b32.xlu1 %v19797_v47, %s52742_s28 }
0x184b   : > { %19800 = vrot.lane.b32.xlu0 %v19796_v25, %s52742_s28 }
0x18bc   : > { %v19803_v0 = vpop.permute.xlu1 %19802 }
0x18bd   : > { %v19806_v37 = vsel %vm973_vm1, %v19803_v0, 0  ;;  %v19801_v16 = vpop.permute.xlu0 %19800  ;;  %v20349_v0 = vsub.f32 1.0, %v54516_v43 }
0x18be   : > { %v19887_v55 = vand.u32 4294901760, %v19806_v37  ;;  %v19804_v57 = vsel %vm973_vm1, %v19801_v16, 0 }
0x18bf   : > { %v19877_v41 = vand.u32 4294901760, %v19804_v57 }
0x18c0   : > { %v19888_v49 = vsub.f32 %v19806_v37, %v19887_v55  ;;  %v20348_v37 = vsub.f32 1.0, %v54518_v61 }
0x18c1   : > { %v19878_v35 = vsub.f32 %v19804_v57, %v19877_v41 }
0x18c2   : > { %v19889_v2 = vand.u32 4294901760, %v19888_v49 }
0x18c3   : > { %v19879_v42 = vand.u32 4294901760, %v19878_v35 }
0x18c4   : > { %v19890_v33 = vsub.f32 %v19888_v49, %v19889_v2 }
0x18c5   : > { %v19880_v12 = vsub.f32 %v19878_v35, %v19879_v42 }
0x18c6   : > { %v19891_v34 = vand.u32 4294901760, %v19890_v33 }
0x18c7   : > { %v19881_v44 = vand.u32 4294901760, %v19880_v12 }
0x18c9   : > { %45769 = vmatprep.mubr.f32.mxu0 %v19881_v44 }
0x18ca   : > { %45770 = vmatmul.mubr.f32.vlgmr.msra.gmra.mrb[32].mxu0 %v19891_v34 }
0x18cb   : > { %49810 = vmatpush3.bf16.msra.mxu0 %v53457_v60  ;;  %45780 = vmatprep.mubr.f32.mxu0 %v19877_v41 }
0x18cc   : > { %49812 = vmatprep.subr.bf16.mxu0 %v53462_v48 }
0x18cf   : > { %49814 = vmatpush3.bf16.msra.mxu0 %v53462_v48 }
0x18d0   : > { %49816 = vmatprep.subr.bf16.mxu0 %v53464_v1 }
0x18d2   : > { %45781 = vmatmul.mubr.f32.vlgmr.msra.gmra.mrb[32].mxu0 %v19887_v55 }
0x18d3   : > { %49818 = vmatpush3.bf16.msra.mxu0 %v53464_v1  ;;  %45791 = vmatprep.mubr.f32.mxu0 %v19878_v35 }
0x18d4   : > { %49820 = vmatprep.subr.bf16.mxu0 %v53466_v15 }
0x18d7   : > { %49822 = vmatpush3.bf16.msra.mxu0 %v53466_v15 }
0x18d8   : > { %49824 = vmatprep.subr.bf16.mxu0 %v53437_v40 }
0x18da   : > { %45792 = vmatmul.mubr.f32.vlgmr.msra.gmra.mrb[32].mxu0 %v19888_v49 }
0x18db   : > { %49826 = vmatpush3.bf16.msra.mxu0 %v53437_v40  ;;  %45802 = vmatprep.mubr.f32.mxu0 %v19879_v42 }
0x18dc   : > { %49828 = vmatprep.subr.bf16.mxu0 %v53447_v26 }
0x18df   : > { %49830 = vmatpush3.bf16.msra.mxu0 %v53447_v26 }
0x18e0   : > { %49832 = vmatprep.subr.bf16.mxu0 %v53468_v36 }
0x18e2   : > { %45803 = vmatmul.mubr.f32.vlgmr.msra.gmra.mrb[32].mxu0 %v19889_v2 }
0x18e3   : > { %49834 = vmatpush3.bf16.msra.mxu0 %v53468_v36  ;;  %45813 = vmatprep.mubr.f32.mxu0 %v19877_v41 }
0x18e4   : > { %49836 = vmatprep.subr.bf16.mxu0 %v53470_v7 }
0x18e7   : > { %49838 = vmatpush3.bf16.msra.mxu0 %v53470_v7 }
0x18e8   : > { %49840 = vmatprep.subr.bf16.mxu0 %v53437_v40 }
0x18ea   : > { %45814 = vmatmul.mubr.f32.vlgmr.msra.gmra.mrb[32].mxu0 %v19887_v55 }
0x18eb   : > { %49842 = vmatpush3.bf16.msra.mxu0 %v53437_v40  ;;  %45824 = vmatprep.mubr.f32.mxu0 %v19877_v41 }
0x18ec   : > { %49844 = vmatprep.subr.bf16.mxu0 %v53447_v26 }
0x18ef   : > { %49846 = vmatpush3.bf16.msra.mxu0 %v53447_v26 }
0x18f2   : > { %45825 = vmatmul.mubr.f32.vlgmr.msra.gmra.mrb[32].mxu0 %v19887_v55  ;;  %v20351_v55 = vmul.f32 %v20349_v0, %v54295_v38 }
0x18f3   : > { %45831 = vmatprep.mubr.f32.mxu0 %v56327_v31 }
0x19c5   : > { %v45826_v44 = vpop.f32.mrb[32].mxu0 }
0x19c6   : > { %20340 = vrot.lane.b32.xlu1 %v45826_v44, %s52743_s29  ;;  %v20326_v33 = vpop.f32.mrb[33].mxu0 }
0x19c7   : > { %20338 = vrot.lane.b32.xlu0 %v20326_v33, %s52743_s29 }
0x1a38   : > { %v20341_v42 = vpop.permute.xlu1 %20340 }
0x1a39   : > { %v20345_v2 = vadd.f32 %v54509_v54, %v20341_v42  ;;  %v20339_v35 = vpop.permute.xlu0 %20338 }
0x1a3a   : > { %v20344_v49 = vadd.f32 %v54512_v39, %v20339_v35  ;;  %v20350_v39 = vmul.f32 %v20348_v37, %v54297_v22 }
0x1a3b   : > { %52607 = vtanh.f32 %v20345_v2 }
0x1a3c   : > { %52609 = vtanh.f32 %v20344_v49 }
0x1a45   : > { %v52608_v25 = vpop.eup %52607 }
0x1a46   : > { %v52610_v47 = vpop.eup %52609  ;;  %20356 = vrot.lane.b32.xlu1 %v52608_v25, %s52743_s29 }
0x1a47   : > { %20354 = vrot.lane.b32.xlu0 %v52610_v47, %s52743_s29 }
0x1ab8   : > { %v20357_v16 = vpop.permute.xlu1 %20356 }
0x1ab9   : > { %v20361_v54 = vmul.f32 %v54516_v43, %v20357_v16  ;;  %v20355_v57 = vpop.permute.xlu0 %20354  ;;  %v56444_v16 = vld [vmem:[#allocation11_spill] sm:$0xff] }
0x1aba   : > { %v20360_v41 = vmul.f32 %v54518_v61, %v20355_v57  ;;  %v56447_v57 = vld [vmem:[#allocation6_spill] sm:$0xff] }
0x1abb   : > { %v54558_v12 = vadd.f32 %v20361_v54, %v20351_v55  ;;  %v56445_v55 = vld [vmem:[#allocation15_spill] sm:$0xff]  ;;  %v56446_v54 = vld [vmem:[#allocation17_spill] sm:$0xff] }
0x1abc   : > { %v54560_v34 = vadd.f32 %v20360_v41, %v20350_v39  ;;  %v56448_v39 = vld [vmem:[#allocation7_spill] sm:$0xff]  ;;  %v56449_v41 = vld [vmem:[#allocation8_spill] sm:$0xff] }
0x1abd   : > { %v20368_v44 = vand.u32 4294901760, %v54558_v12  ;;  %23818 = vrot.lane.b32.xlu1 %v54558_v12, %s52741_s7 }
0x1abe   : > { %v20365_v33 = vand.u32 4294901760, %v54560_v34  ;;  %23816 = vrot.lane.b32.xlu0 %v54560_v34, %s52741_s7 }
0x1abf   : > { %v20520_v38 = vsub.f32 %v54558_v12, %v20368_v44 }
0x1ac0   : > { %v49847_v43 = vpack.c.bf16 %v20368_v44, %v20365_v33  ;;  %v20513_v22 = vsub.f32 %v54560_v34, %v20365_v33  ;;  %v56450_v44 = vld [vmem:[#allocation10_spill] sm:$0xff]  ;;  %v56451_v33 = vld [vmem:[#allocation12_spill] sm:$0xff] }
0x1ac1   : > { %v20521_v61 = vand.u32 4294901760, %v20520_v38 }
0x1ac2   : > { %49848 = vmatprep.subr.bf16.mxu0 %v49847_v43  ;;  %v20514_v42 = vand.u32 4294901760, %v20513_v22  ;;  %v49855_v0 = vpack.c.bf16 %v20520_v38, %v20513_v22 }
0x1ac3   : > { %49850 = vmatpush3.bf16.msra.mxu0 %v49847_v43  ;;  %v20522_v2 = vsub.f32 %v20520_v38, %v20521_v61  ;;  %v56452_v38 = vld [vmem:[#allocation14_spill] sm:$0xff] }
0x1ac4   : > { %v20515_v35 = vsub.f32 %v20513_v22, %v20514_v42  ;;  %v49863_v37 = vpack.c.bf16 %v20521_v61, %v20514_v42  ;;  %v56453_v22 = vld [vmem:[#allocation16_spill] sm:$0xff]  ;;  %v56454_v61 = vld [vmem:[#allocation18_spill] sm:$0xff]  ;;  %v56455_v42 = vld [vmem:[#allocation19_spill] sm:$0xff] }
0x1ac5   : > { %v20523_v49 = vand.u32 4294901760, %v20522_v2  ;;  %v21125_v2 = vsel %vm973_vm1, %v54560_v34, 0 }
0x1ac6   : > { %45832 = vmatmul.mubr.f32.vlgmr.msra.gmra.mrb[34].mxu0 %v52929_v46  ;;  %v20516_v25 = vand.u32 4294901760, %v20515_v35  ;;  %v21128_v35 = vsel %vm973_vm1, %v54558_v12, 0 }
0x1ac7   : > { %45834 = vmatprep.mubr.f32.mxu0 %v52939_v50 }
0x1ac8   : > { %v49851_v47 = vpack.c.bf16 %v20523_v49, %v20516_v25  ;;  %v21199_v49 = vand.u32 4294901760, %v21125_v2 }
0x1aca   : > { %45835 = vmatmul.mubr.f32.gmra.mrb[36].mxu0 %v52958_v58  ;;  %49852 = vmatprep.subr.bf16.mxu0 %v49851_v47  ;;  %v21200_v25 = vsub.f32 %v21125_v2, %v21199_v49 }
0x1acb   : > { %49854 = vmatpush3.bf16.msra.mxu0 %v49851_v47  ;;  %45837 = vmatprep.mubr.f32.mxu0 %v52963_v62 }
0x1acc   : > { %49856 = vmatprep.subr.bf16.mxu0 %v49855_v0 }
0x1ace   : > { %45838 = vmatmul.mubr.f32.gmra.mrb[38].mxu0 %v52975_v3 }
0x1acf   : > { %45840 = vmatprep.mubr.f32.mxu0 %v52980_v5 }
0x1ad2   : > { %45841 = vmatmul.mubr.f32.gmra.mrb[40].mxu0 %v52985_v6 }
0x1ad3   : > { %45847 = vmatprep.mubr.f32.mxu0 %v52838_v9 }
0x1ad6   : > { %45848 = vmatmul.mubr.f32.vlgmr.msra.gmra.mrb[34].mxu0 %v52840_v10 }
0x1ad7   : > { %49858 = vmatpush3.bf16.msra.mxu0 %v49855_v0  ;;  %45850 = vmatprep.mubr.f32.mxu0 %v52842_v11  ;;  %v56456_v0 = vld [vmem:[#allocation20_spill] sm:$0xff] }
0x1ad8   : > { %49860 = vmatprep.subr.bf16.mxu0 %v49847_v43 }
0x1ada   : > { %45851 = vmatmul.mubr.f32.gmra.mrb[36].mxu0 %v52848_v14 }
0x1adb   : > { %45853 = vmatprep.mubr.f32.mxu0 %v52862_v21 }
0x1ade   : > { %45854 = vmatmul.mubr.f32.gmra.mrb[38].mxu0 %v52873_v23 }
0x1adf   : > { %45856 = vmatprep.mubr.f32.mxu0 %v52875_v24 }
0x1ae2   : > { %45857 = vmatmul.mubr.f32.gmra.mrb[40].mxu0 %v52946_v53 }
0x1ae3   : > { %45863 = vmatprep.mubr.f32.mxu0 %v52854_v18 }
0x1ae6   : > { %45864 = vmatmul.mubr.f32.vlgmr.msra.gmra.mrb[34].mxu0 %v52857_v19 }
0x1ae7   : > { %49862 = vmatpush3.bf16.msra.mxu0 %v49847_v43  ;;  %45866 = vmatprep.mubr.f32.mxu0 %v52860_v20 }
0x1ae8   : > { %49864 = vmatprep.subr.bf16.mxu0 %v49863_v37 }
0x1aea   : > { %45867 = vmatmul.mubr.f32.gmra.mrb[36].mxu0 %v56366_v28 }
0x1aeb   : > { %45869 = vmatprep.mubr.f32.mxu0 %v56405_v29 }
0x1aee   : > { %45870 = vmatmul.mubr.f32.gmra.mrb[38].mxu0 %v56444_v16 }
0x1aef   : > { %45872 = vmatprep.mubr.f32.mxu0 %v56445_v55 }
0x1af2   : > { %45873 = vmatmul.mubr.f32.gmra.mrb[40].mxu0 %v56446_v54 }
0x1af3   : > { %45879 = vmatprep.mubr.f32.mxu0 %v56447_v57 }
0x1af6   : > { %45880 = vmatmul.mubr.f32.vlgmr.msra.gmra.mrb[34].mxu0 %v56448_v39  ;;  %v56460_v39 = vld [vmem:[#allocation24_spill] sm:$0xff] }
0x1af7   : > { %49866 = vmatpush3.bf16.msra.mxu0 %v49863_v37  ;;  %45882 = vmatprep.mubr.f32.mxu0 %v56449_v41  ;;  %v21201_v37 = vand.u32 4294901760, %v21200_v25  ;;  %v56459_v41 = vld [vmem:[#allocation23_spill] sm:$0xff] }
0x1af8   : > { %49868 = vmatprep.subr.bf16.mxu0 %v49847_v43 }
0x1af9   : > { %v21202_v2 = vsub.f32 %v21200_v25, %v21201_v37 }
0x1afa   : > { %45883 = vmatmul.mubr.f32.gmra.mrb[36].mxu0 %v56450_v44  ;;  %v56458_v44 = vld [vmem:[#allocation22_spill] sm:$0xff] }
0x1afb   : > { %45885 = vmatprep.mubr.f32.mxu0 %v56451_v33  ;;  %v21203_v33 = vand.u32 4294901760, %v21202_v2 }
0x1afe   : > { %45886 = vmatmul.mubr.f32.gmra.mrb[38].mxu0 %v56452_v38 }
0x1aff   : > { %45888 = vmatprep.mubr.f32.mxu0 %v56453_v22  ;;  %v56457_v22 = vld [vmem:[#allocation21_spill] sm:$0xff] }
0x1b02   : > { %45889 = vmatmul.mubr.f32.gmra.mrb[40].mxu0 %v56454_v61 }
0x1b03   : > { %45895 = vmatprep.mubr.f32.mxu0 %v52838_v9 }
0x1b06   : > { %45896 = vmatmul.mubr.f32.vlgmr.msra.gmra.mrb[34].mxu0 %v52840_v10 }
0x1b07   : > { %49870 = vmatpush3.bf16.msra.mxu0 %v49847_v43  ;;  %45898 = vmatprep.mubr.f32.mxu0 %v52842_v11  ;;  %v21209_v43 = vand.u32 4294901760, %v21128_v35 }
0x1b08   : > { %49872 = vmatprep.subr.bf16.mxu0 %v56455_v42 }
0x1b09   : > { %v21210_v47 = vsub.f32 %v21128_v35, %v21209_v43 }
0x1b0a   : > { %45899 = vmatmul.mubr.f32.gmra.mrb[36].mxu0 %v52848_v14 }
0x1b0b   : > { %45901 = vmatprep.mubr.f32.mxu0 %v52862_v21  ;;  %v21211_v61 = vand.u32 4294901760, %v21210_v47 }
0x1b0d   : > { %v21212_v38 = vsub.f32 %v21210_v47, %v21211_v61 }
0x1b0e   : > { %45902 = vmatmul.mubr.f32.gmra.mrb[38].mxu0 %v52873_v23 }
0x1b0f   : > { %45904 = vmatprep.mubr.f32.mxu0 %v52875_v24  ;;  %v21213_v35 = vand.u32 4294901760, %v21212_v38  ;;  %v56462_v38 = vld [vmem:[#allocation26_spill] sm:$0xff] }
0x1b12   : > { %45905 = vmatmul.mubr.f32.gmra.mrb[40].mxu0 %v52946_v53 }
0x1b13   : > { %45911 = vmatprep.mubr.f32.mxu0 %v52838_v9 }
0x1b16   : > { %45912 = vmatmul.mubr.f32.vlgmr.msra.gmra.mrb[34].mxu0 %v52840_v10 }
0x1b17   : > { %45914 = vmatprep.mubr.f32.mxu0 %v52842_v11  ;;  %49874 = vmatpush3.bf16.msra.mxu0 %v56455_v42 }
0x1b18   : > { %49876 = vmatprep.subr.bf16.mxu0 %v56456_v0 }
0x1b1a   : > { %45915 = vmatmul.mubr.f32.gmra.mrb[36].mxu0 %v52848_v14 }
0x1b1b   : > { %45917 = vmatprep.mubr.f32.mxu0 %v52862_v21  ;;  %49878 = vmatpush3.bf16.msra.mxu0 %v56456_v0 }
0x1b1c   : > { %49880 = vmatprep.subr.bf16.mxu0 %v56457_v22 }
0x1b1e   : > { %45918 = vmatmul.mubr.f32.gmra.mrb[38].mxu0 %v52873_v23 }
0x1b1f   : > { %45920 = vmatprep.mubr.f32.mxu0 %v52875_v24 }
0x1b22   : > { %45921 = vmatmul.mubr.f32.gmra.mrb[40].mxu0 %v52946_v53 }
0x1b23   : > { %45931 = vmatprep.mubr.f32.mxu0 %v21203_v33  ;;  %v56461_v33 = vld [vmem:[#allocation25_spill] sm:$0xff] }
0x1b26   : > { %45932 = vmatmul.mubr.f32.vlgmr.msra.gmra.mrb[42].mxu0 %v21213_v35 }
0x1b27   : > { %49882 = vmatpush3.bf16.msra.mxu0 %v56457_v22  ;;  %45942 = vmatprep.mubr.f32.mxu0 %v21199_v49 }
0x1b28   : > { %49884 = vmatprep.subr.bf16.mxu0 %v56458_v44 }
0x1b2b   : > { %49886 = vmatpush3.bf16.msra.mxu0 %v56458_v44 }
0x1b2c   : > { %49888 = vmatprep.subr.bf16.mxu0 %v56459_v41 }
0x1b2e   : > { %45943 = vmatmul.mubr.f32.vlgmr.msra.gmra.mrb[42].mxu0 %v21209_v43 }
0x1b2f   : > { %49890 = vmatpush3.bf16.msra.mxu0 %v56459_v41  ;;  %45953 = vmatprep.mubr.f32.mxu0 %v21200_v25 }
0x1b30   : > { %49892 = vmatprep.subr.bf16.mxu0 %v56460_v39 }
0x1b33   : > { %49894 = vmatpush3.bf16.msra.mxu0 %v56460_v39 }
0x1b34   : > { %49896 = vmatprep.subr.bf16.mxu0 %v56455_v42 }
0x1b36   : > { %45954 = vmatmul.mubr.f32.vlgmr.msra.gmra.mrb[42].mxu0 %v21210_v47 }
0x1b37   : > { %49898 = vmatpush3.bf16.msra.mxu0 %v56455_v42  ;;  %45964 = vmatprep.mubr.f32.mxu0 %v21201_v37 }
0x1b38   : > { %49900 = vmatprep.subr.bf16.mxu0 %v56456_v0 }
0x1b3b   : > { %49902 = vmatpush3.bf16.msra.mxu0 %v56456_v0 }
0x1b3c   : > { %49904 = vmatprep.subr.bf16.mxu0 %v56461_v33 }
0x1b3e   : > { %45965 = vmatmul.mubr.f32.vlgmr.msra.gmra.mrb[42].mxu0 %v21211_v61 }
0x1b3f   : > { %49906 = vmatpush3.bf16.msra.mxu0 %v56461_v33  ;;  %45975 = vmatprep.mubr.f32.mxu0 %v21199_v49 }
0x1b40   : > { %49908 = vmatprep.subr.bf16.mxu0 %v56462_v38 }
0x1b43   : > { %49910 = vmatpush3.bf16.msra.mxu0 %v56462_v38 }
0x1b44   : > { %49912 = vmatprep.subr.bf16.mxu0 %v56455_v42 }
0x1b46   : > { %45976 = vmatmul.mubr.f32.vlgmr.msra.gmra.mrb[42].mxu0 %v21209_v43 }
0x1b47   : > { %49914 = vmatpush3.bf16.msra.mxu0 %v56455_v42  ;;  %45986 = vmatprep.mubr.f32.mxu0 %v21199_v49 }
0x1b48   : > { %49916 = vmatprep.subr.bf16.mxu0 %v56456_v0 }
0x1b4b   : > { %49918 = vmatpush3.bf16.msra.mxu0 %v56456_v0 }
0x1b4c   : > { %49920 = vmatprep.subr.bf16.mxu0 %v53118_v59 }
0x1b4e   : > { %45987 = vmatmul.mubr.f32.vlgmr.msra.gmra.mrb[42].mxu0 %v21209_v43 }
0x1b4f   : > { %49922 = vmatpush3.bf16.msra.mxu0 %v53118_v59 }
0x1b50   : > { %49924 = vmatprep.subr.bf16.mxu0 %v53128_v8 }
0x1b53   : > { %49926 = vmatpush3.bf16.msra.mxu0 %v53128_v8 }
0x1b54   : > { %49928 = vmatprep.subr.bf16.mxu0 %v56302_v56 }
0x1be9   : > { %v45913_v61 = vpop.f32.mrb[34].mxu0 }
0x1bea   : > { %v21664_v25 = vsel %vm973_vm1, %v45913_v61, 0  ;;  %v21078_v47 = vpop.f32.mrb[35].mxu0 }
0x1beb   : > { %v21745_v49 = vand.u32 4294901760, %v21664_v25  ;;  %v21661_v37 = vsel %vm973_vm1, %v21078_v47, 0 }
0x1bec   : > { %v21735_v2 = vand.u32 4294901760, %v21661_v37 }
0x1bed   : > { %v21746_v35 = vsub.f32 %v21664_v25, %v21745_v49  ;;  %v45916_v38 = vpop.f32.mrb[36].mxu0 }
0x1bee   : > { %v21736_v33 = vsub.f32 %v21661_v37, %v21735_v2  ;;  %v21090_v43 = vpop.f32.mrb[37].mxu0 }
0x1bef   : > { %v21747_v39 = vand.u32 4294901760, %v21746_v35 }
0x1bf0   : > { %v21737_v41 = vand.u32 4294901760, %v21736_v33 }
0x1bf1   : > { %v21748_v44 = vsub.f32 %v21746_v35, %v21747_v39  ;;  %v54652_v22 = vpop.f32.mrb[38].mxu0 }
0x1bf2   : > { %v54654_v0 = vpop.f32.mrb[39].mxu0  ;;  %v21738_v42 = vsub.f32 %v21736_v33, %v21737_v41 }
0x1bf3   : > { %v21749_v54 = vand.u32 4294901760, %v21748_v44  ;;  %v22200_v44 = vsel %vm973_vm1, %v45916_v38, 0 }
0x1bf4   : > { %v21739_v57 = vand.u32 4294901760, %v21738_v42 }
0x1bf5   : > { %v54656_v61 = vpop.f32.mrb[40].mxu0 }
0x1bf6   : > { %v54658_v55 = vpop.f32.mrb[41].mxu0  ;;  %45997 = vmatprep.mubr.f32.mxu0 %v21739_v57 }
0x1bf7   : > { %45998 = vmatmul.mubr.f32.vlgmr.msra.gmra.mrb[42].mxu0 %v21749_v54  ;;  %v22197_v54 = vsel %vm973_vm1, %v21090_v43, 0  ;;  %v56464_v43 = vld [vmem:[#allocation38_spill] sm:$0xff] }
0x1bf8   : > { %49930 = vmatpush3.bf16.msra.mxu0 %v56302_v56  ;;  %46008 = vmatprep.mubr.f32.mxu0 %v21735_v2  ;;  %v22271_v57 = vand.u32 4294901760, %v22197_v54 }
0x1bf9   : > { %49932 = vmatprep.subr.bf16.mxu0 %v56303_v52 }
0x1bfa   : > { %v22272_v42 = vsub.f32 %v22197_v54, %v22271_v57 }
0x1bfc   : > { %49934 = vmatpush3.bf16.msra.mxu0 %v56303_v52 }
0x1bfd   : > { %49936 = vmatprep.subr.bf16.mxu0 %v56304_v51 }
0x1bff   : > { %46009 = vmatmul.mubr.f32.vlgmr.msra.gmra.mrb[42].mxu0 %v21745_v49 }
0x1c00   : > { %49938 = vmatpush3.bf16.msra.mxu0 %v56304_v51  ;;  %46019 = vmatprep.mubr.f32.mxu0 %v21736_v33  ;;  %v22273_v33 = vand.u32 4294901760, %v22272_v42 }
0x1c01   : > { %49940 = vmatprep.subr.bf16.mxu0 %v56305_v30 }
0x1c04   : > { %49942 = vmatpush3.bf16.msra.mxu0 %v56305_v30 }
0x1c05   : > { %49944 = vmatprep.subr.bf16.mxu0 %v53118_v59 }
0x1c07   : > { %46020 = vmatmul.mubr.f32.vlgmr.msra.gmra.mrb[42].mxu0 %v21746_v35  ;;  %v22733_v35 = vsel %vm973_vm1, %v54654_v0, 0 }
0x1c08   : > { %49946 = vmatpush3.bf16.msra.mxu0 %v53118_v59  ;;  %46030 = vmatprep.mubr.f32.mxu0 %v21737_v41  ;;  %v22281_v41 = vand.u32 4294901760, %v22200_v44  ;;  %v22807_v54 = vand.u32 4294901760, %v22733_v35 }
0x1c09   : > { %49948 = vmatprep.subr.bf16.mxu0 %v53128_v8 }
0x1c0a   : > { %v22282_v25 = vsub.f32 %v22200_v44, %v22281_v41  ;;  %v56465_v44 = vld [vmem:[#allocation39_spill] sm:$0xff] }
0x1c0c   : > { %49950 = vmatpush3.bf16.msra.mxu0 %v53128_v8  ;;  %v22283_v47 = vand.u32 4294901760, %v22282_v25 }
0x1c0d   : > { %49952 = vmatprep.subr.bf16.mxu0 %v56306_v13 }
0x1c0e   : > { %v22284_v37 = vsub.f32 %v22282_v25, %v22283_v47 }
0x1c0f   : > { %46031 = vmatmul.mubr.f32.vlgmr.msra.gmra.mrb[42].mxu0 %v21747_v39  ;;  %v22274_v39 = vsub.f32 %v22272_v42, %v22273_v33 }
0x1c10   : > { %49954 = vmatpush3.bf16.msra.mxu0 %v56306_v13  ;;  %46041 = vmatprep.mubr.f32.mxu0 %v21735_v2 }
0x1c11   : > { %49956 = vmatprep.subr.bf16.mxu0 %v56307_v27  ;;  %v22275_v38 = vand.u32 4294901760, %v22274_v39 }
0x1c14   : > { %49958 = vmatpush3.bf16.msra.mxu0 %v56307_v27 }
0x1c15   : > { %49960 = vmatprep.subr.bf16.mxu0 %v53118_v59 }
0x1c17   : > { %46042 = vmatmul.mubr.f32.vlgmr.msra.gmra.mrb[42].mxu0 %v21745_v49 }
0x1c18   : > { %49962 = vmatpush3.bf16.msra.mxu0 %v53118_v59  ;;  %46052 = vmatprep.mubr.f32.mxu0 %v21735_v2  ;;  %v22285_v2 = vand.u32 4294901760, %v22284_v37  ;;  %v56466_v37 = vld [vmem:[#allocation40_spill] sm:$0xff] }
0x1c19   : > { %49964 = vmatprep.subr.bf16.mxu0 %v53128_v8 }
0x1c1c   : > { %49966 = vmatpush3.bf16.msra.mxu0 %v53128_v8 }
0x1c1d   : > { %49968 = vmatprep.subr.bf16.mxu0 %v53212_v32 }
0x1c1f   : > { %46053 = vmatmul.mubr.f32.vlgmr.msra.gmra.mrb[42].mxu0 %v21745_v49  ;;  %v56463_v49 = vld [vmem:[#allocation37_spill] sm:$0xff] }
0x1c20   : > { %49970 = vmatpush3.bf16.msra.mxu0 %v53212_v32  ;;  %46063 = vmatprep.mubr.f32.mxu0 %v22275_v38 }
0x1c21   : > { %49972 = vmatprep.subr.bf16.mxu0 %v53221_v63 }
0x1c24   : > { %49974 = vmatpush3.bf16.msra.mxu0 %v53221_v63 }
0x1c25   : > { %49976 = vmatprep.subr.bf16.mxu0 %v53229_v4 }
0x1c27   : > { %46064 = vmatmul.mubr.f32.vlgmr.msra.gmra.mrb[42].mxu0 %v22285_v2 }
0x1c28   : > { %49978 = vmatpush3.bf16.msra.mxu0 %v53229_v4  ;;  %46074 = vmatprep.mubr.f32.mxu0 %v22271_v57 }
0x1c29   : > { %49980 = vmatprep.subr.bf16.mxu0 %v53233_v17 }
0x1c2c   : > { %49982 = vmatpush3.bf16.msra.mxu0 %v53233_v17 }
0x1c2d   : > { %49984 = vmatprep.subr.bf16.mxu0 %v56308_v45 }
0x1c2f   : > { %46075 = vmatmul.mubr.f32.vlgmr.msra.gmra.mrb[42].mxu0 %v22281_v41 }
0x1c30   : > { %49986 = vmatpush3.bf16.msra.mxu0 %v56308_v45  ;;  %46085 = vmatprep.mubr.f32.mxu0 %v22272_v42  ;;  %v22736_v42 = vsel %vm973_vm1, %v54652_v22, 0 }
0x1c31   : > { %49988 = vmatprep.subr.bf16.mxu0 %v56463_v49 }
0x1c34   : > { %49990 = vmatpush3.bf16.msra.mxu0 %v56463_v49 }
0x1c35   : > { %49992 = vmatprep.subr.bf16.mxu0 %v53212_v32 }
0x1c37   : > { %46086 = vmatmul.mubr.f32.vlgmr.msra.gmra.mrb[42].mxu0 %v22282_v25  ;;  %v22817_v25 = vand.u32 4294901760, %v22736_v42 }
0x1c38   : > { %49994 = vmatpush3.bf16.msra.mxu0 %v53212_v32  ;;  %46096 = vmatprep.mubr.f32.mxu0 %v22273_v33  ;;  %v22808_v33 = vsub.f32 %v22733_v35, %v22807_v54  ;;  %v56467_v35 = vld [vmem:[#allocation41_spill] sm:$0xff] }
0x1c39   : > { %49996 = vmatprep.subr.bf16.mxu0 %v53221_v63  ;;  %v22818_v39 = vsub.f32 %v22736_v42, %v22817_v25  ;;  %v56468_v42 = vld [vmem:[#allocation42_spill] sm:$0xff] }
0x1c3a   : > { %v22809_v0 = vand.u32 4294901760, %v22808_v33 }
0x1c3b   : > { %v22819_v38 = vand.u32 4294901760, %v22818_v39 }
0x1c3c   : > { %49998 = vmatpush3.bf16.msra.mxu0 %v53221_v63 }
0x1c3d   : > { %50000 = vmatprep.subr.bf16.mxu0 %v56464_v43  ;;  %v22820_v2 = vsub.f32 %v22818_v39, %v22819_v38 }
0x1c3f   : > { %46097 = vmatmul.mubr.f32.vlgmr.msra.gmra.mrb[42].mxu0 %v22283_v47  ;;  %v22810_v47 = vsub.f32 %v22808_v33, %v22809_v0 }
0x1c40   : > { %50002 = vmatpush3.bf16.msra.mxu0 %v56464_v43  ;;  %46107 = vmatprep.mubr.f32.mxu0 %v22271_v57 }
0x1c41   : > { %50004 = vmatprep.subr.bf16.mxu0 %v56465_v44  ;;  %v22811_v22 = vand.u32 4294901760, %v22810_v47  ;;  %v56471_v47 = vld [vmem:[#allocation45_spill] sm:$0xff] }
0x1c44   : > { %50006 = vmatpush3.bf16.msra.mxu0 %v56465_v44  ;;  %v56469_v44 = vld [vmem:[#allocation43_spill] sm:$0xff] }
0x1c45   : > { %50008 = vmatprep.subr.bf16.mxu0 %v53212_v32 }
0x1c47   : > { %46108 = vmatmul.mubr.f32.vlgmr.msra.gmra.mrb[42].mxu0 %v22281_v41 }
0x1c48   : > { %50010 = vmatpush3.bf16.msra.mxu0 %v53212_v32  ;;  %46118 = vmatprep.mubr.f32.mxu0 %v22271_v57  ;;  %v22821_v57 = vand.u32 4294901760, %v22820_v2  ;;  %v56472_v2 = vld [vmem:[#allocation46_spill] sm:$0xff] }
0x1c49   : > { %50012 = vmatprep.subr.bf16.mxu0 %v53221_v63 }
0x1c4c   : > { %50014 = vmatpush3.bf16.msra.mxu0 %v53221_v63 }
0x1c4d   : > { %50016 = vmatprep.subr.bf16.mxu0 %v56466_v37 }
0x1c4f   : > { %46119 = vmatmul.mubr.f32.vlgmr.msra.gmra.mrb[42].mxu0 %v22281_v41  ;;  %v56470_v41 = vld [vmem:[#allocation44_spill] sm:$0xff] }
0x1c50   : > { %50018 = vmatpush3.bf16.msra.mxu0 %v56466_v37  ;;  %46129 = vmatprep.mubr.f32.mxu0 %v22811_v22  ;;  %v23269_v22 = vsel %vm973_vm1, %v54658_v55, 0 }
0x1c51   : > { %50020 = vmatprep.subr.bf16.mxu0 %v56467_v35 }
0x1c54   : > { %50022 = vmatpush3.bf16.msra.mxu0 %v56467_v35 }
0x1c55   : > { %50024 = vmatprep.subr.bf16.mxu0 %v56468_v42 }
0x1c57   : > { %46130 = vmatmul.mubr.f32.vlgmr.msra.gmra.mrb[42].mxu0 %v22821_v57  ;;  %v56473_v57 = vld [vmem:[#allocation47_spill] sm:$0xff] }
0x1c58   : > { %50026 = vmatpush3.bf16.msra.mxu0 %v56468_v42  ;;  %46140 = vmatprep.mubr.f32.mxu0 %v22807_v54  ;;  %v56477_v42 = vld [vmem:[#allocation51_spill] sm:$0xff] }
0x1c59   : > { %50028 = vmatprep.subr.bf16.mxu0 %v56469_v44 }
0x1c5c   : > { %50030 = vmatpush3.bf16.msra.mxu0 %v56469_v44  ;;  %v56474_v44 = vld [vmem:[#allocation48_spill] sm:$0xff] }
0x1c5d   : > { %50032 = vmatprep.subr.bf16.mxu0 %v56470_v41 }
0x1c5f   : > { %46141 = vmatmul.mubr.f32.vlgmr.msra.gmra.mrb[42].mxu0 %v22817_v25 }
0x1c60   : > { %50034 = vmatpush3.bf16.msra.mxu0 %v56470_v41  ;;  %46151 = vmatprep.mubr.f32.mxu0 %v22808_v33  ;;  %v23343_v33 = vand.u32 4294901760, %v23269_v22 }
0x1c61   : > { %50036 = vmatprep.subr.bf16.mxu0 %v56471_v47 }
0x1c64   : > { %50038 = vmatpush3.bf16.msra.mxu0 %v56471_v47 }
0x1c65   : > { %50040 = vmatprep.subr.bf16.mxu0 %v56466_v37 }
0x1c67   : > { %46152 = vmatmul.mubr.f32.vlgmr.msra.gmra.mrb[42].mxu0 %v22818_v39  ;;  %v23272_v39 = vsel %vm973_vm1, %v54656_v61, 0 }
0x1c68   : > { %50042 = vmatpush3.bf16.msra.mxu0 %v56466_v37  ;;  %46162 = vmatprep.mubr.f32.mxu0 %v22809_v0  ;;  %v23344_v0 = vsub.f32 %v23269_v22, %v23343_v33  ;;  %v23353_v47 = vand.u32 4294901760, %v23272_v39 }
0x1c69   : > { %50044 = vmatprep.subr.bf16.mxu0 %v56467_v35 }
0x1c6a   : > { %v23345_v55 = vand.u32 4294901760, %v23344_v0 }
0x1c6c   : > { %50046 = vmatpush3.bf16.msra.mxu0 %v56467_v35 }
0x1c6d   : > { %50048 = vmatprep.subr.bf16.mxu0 %v56472_v2 }
0x1c6f   : > { %46163 = vmatmul.mubr.f32.vlgmr.msra.gmra.mrb[42].mxu0 %v22819_v38  ;;  %v23354_v38 = vsub.f32 %v23272_v39, %v23353_v47  ;;  %v56476_v39 = vld [vmem:[#allocation50_spill] sm:$0xff] }
0x1c70   : > { %50050 = vmatpush3.bf16.msra.mxu0 %v56472_v2  ;;  %46173 = vmatprep.mubr.f32.mxu0 %v22807_v54  ;;  %v23346_v2 = vsub.f32 %v23344_v0, %v23345_v55 }
0x1c71   : > { %50052 = vmatprep.subr.bf16.mxu0 %v56473_v57  ;;  %v23355_v41 = vand.u32 4294901760, %v23354_v38 }
0x1c72   : > { %v23347_v61 = vand.u32 4294901760, %v23346_v2  ;;  %v56479_v2 = vld [vmem:[#allocation53_spill] sm:$0xff] }
0x1c73   : > { %v23356_v22 = vsub.f32 %v23354_v38, %v23355_v41 }
0x1c74   : > { %50054 = vmatpush3.bf16.msra.mxu0 %v56473_v57  ;;  %v56475_v57 = vld [vmem:[#allocation49_spill] sm:$0xff] }
0x1c75   : > { %50056 = vmatprep.subr.bf16.mxu0 %v56466_v37 }
0x1c77   : > { %46174 = vmatmul.mubr.f32.vlgmr.msra.gmra.mrb[42].mxu0 %v22817_v25 }
0x1c78   : > { %50058 = vmatpush3.bf16.msra.mxu0 %v56466_v37  ;;  %46184 = vmatprep.mubr.f32.mxu0 %v22807_v54  ;;  %v23357_v54 = vand.u32 4294901760, %v23356_v22 }
0x1c79   : > { %50060 = vmatprep.subr.bf16.mxu0 %v56467_v35 }
0x1c7c   : > { %50062 = vmatpush3.bf16.msra.mxu0 %v56467_v35 }
0x1c7d   : > { %50064 = vmatprep.subr.bf16.mxu0 %v56474_v44 }
0x1c7f   : > { %46185 = vmatmul.mubr.f32.vlgmr.msra.gmra.mrb[42].mxu0 %v22817_v25  ;;  %v56478_v25 = vld [vmem:[#allocation52_spill] sm:$0xff] }
0x1c80   : > { %50066 = vmatpush3.bf16.msra.mxu0 %v56474_v44  ;;  %46195 = vmatprep.mubr.f32.mxu0 %v23347_v61  ;;  %v56480_v61 = vld [vmem:[#allocation54_spill] sm:$0xff] }
0x1c81   : > { %50068 = vmatprep.subr.bf16.mxu0 %v56475_v57 }
0x1c84   : > { %50070 = vmatpush3.bf16.msra.mxu0 %v56475_v57 }
0x1c85   : > { %50072 = vmatprep.subr.bf16.mxu0 %v56476_v39 }
0x1c87   : > { %46196 = vmatmul.mubr.f32.vlgmr.msra.gmra.mrb[42].mxu0 %v23357_v54 }
0x1c88   : > { %50074 = vmatpush3.bf16.msra.mxu0 %v56476_v39  ;;  %46206 = vmatprep.mubr.f32.mxu0 %v23343_v33 }
0x1c89   : > { %50076 = vmatprep.subr.bf16.mxu0 %v56477_v42 }
0x1c8c   : > { %50078 = vmatpush3.bf16.msra.mxu0 %v56477_v42 }
0x1c8d   : > { %50080 = vmatprep.subr.bf16.mxu0 %v56478_v25 }
0x1c8f   : > { %46207 = vmatmul.mubr.f32.vlgmr.msra.gmra.mrb[42].mxu0 %v23353_v47 }
0x1c90   : > { %50082 = vmatpush3.bf16.msra.mxu0 %v56478_v25  ;;  %46217 = vmatprep.mubr.f32.mxu0 %v23344_v0  ;;  %v56481_v0 = vld [vmem:[#allocation55_spill] sm:$0xff] }
0x1c91   : > { %50084 = vmatprep.subr.bf16.mxu0 %v56479_v2 }
0x1c94   : > { %50086 = vmatpush3.bf16.msra.mxu0 %v56479_v2 }
0x1c95   : > { %50088 = vmatprep.subr.bf16.mxu0 %v56474_v44 }
0x1c97   : > { %46218 = vmatmul.mubr.f32.vlgmr.msra.gmra.mrb[42].mxu0 %v23354_v38 }
0x1c98   : > { %50090 = vmatpush3.bf16.msra.mxu0 %v56474_v44  ;;  %46228 = vmatprep.mubr.f32.mxu0 %v23345_v55  ;;  %v56482_v55 = vld [vmem:[#allocation28_spill] sm:$0xff] }
0x1c99   : > { %50092 = vmatprep.subr.bf16.mxu0 %v56475_v57 }
0x1c9c   : > { %50094 = vmatpush3.bf16.msra.mxu0 %v56475_v57 }
0x1c9d   : > { %50096 = vmatprep.subr.bf16.mxu0 %v56480_v61 }
0x1c9f   : > { %46229 = vmatmul.mubr.f32.vlgmr.msra.gmra.mrb[42].mxu0 %v23355_v41 }
0x1ca0   : > { %50098 = vmatpush3.bf16.msra.mxu0 %v56480_v61  ;;  %46239 = vmatprep.mubr.f32.mxu0 %v23343_v33 }
0x1ca1   : > { %50100 = vmatprep.subr.bf16.mxu0 %v56481_v0 }
0x1ca4   : > { %50102 = vmatpush3.bf16.msra.mxu0 %v56481_v0 }
0x1ca5   : > { %50104 = vmatprep.subr.bf16.mxu0 %v56474_v44 }
0x1ca7   : > { %46240 = vmatmul.mubr.f32.vlgmr.msra.gmra.mrb[42].mxu0 %v23353_v47 }
0x1ca8   : > { %50106 = vmatpush3.bf16.msra.mxu0 %v56474_v44  ;;  %46250 = vmatprep.mubr.f32.mxu0 %v23343_v33 }
0x1ca9   : > { %50108 = vmatprep.subr.bf16.mxu0 %v56475_v57 }
0x1cac   : > { %50110 = vmatpush3.bf16.msra.mxu0 %v56475_v57  ;;  %v23817_v57 = vpop.permute.xlu0 %23816 }
0x1cad   : > { %50424 = vmatprep.subr.bf16.mxu0 %v53437_v40 }
0x1caf   : > { %46251 = vmatmul.mubr.f32.vlgmr.msra.gmra.mrb[42].mxu0 %v23353_v47 }
0x1cb0   : > { %50426 = vmatpush3.bf16.msra.mxu0 %v53437_v40 }
0x1cb1   : > { %50428 = vmatprep.subr.bf16.mxu0 %v53447_v26 }
0x1cb4   : > { %50430 = vmatpush3.bf16.msra.mxu0 %v53447_v26 }
0x1cb5   : > { %50432 = vmatprep.subr.bf16.mxu0 %v53457_v60 }
0x1d82   : > { %v46252_v41 = vpop.f32.mrb[42].mxu0 }
0x1d83   : > { %v54767_v38 = vadd.f32 %v56482_v55, %v46252_v41  ;;  %v23792_v33 = vpop.f32.mrb[43].mxu0  ;;  %v23819_v41 = vpop.permute.xlu1 %23818 }
0x1d84   : > { %v54770_v22 = vadd.f32 %v56482_v55, %v23792_v33 }
0x1d85   : > { %v40591_v54 = vmul.f32 -1.442695, %v54767_v38 }
0x1d86   : > { %v40590_v47 = vmul.f32 -1.442695, %v54770_v22 }
0x1d87   : > { %52611 = vpow2.f32 %v40591_v54 }
0x1d88   : > { %52613 = vpow2.f32 %v40590_v47 }
0x1d91   : > { %v52612_v0 = vpop.eup %52611 }
0x1d92   : > { %v52614_v61 = vpop.eup %52613  ;;  %v23811_v2 = vadd.f32 1.0, %v52612_v0 }
0x1d93   : > { %v23810_v25 = vadd.f32 1.0, %v52614_v61 }
0x1d94   : > { %52615 = vrcp.f32 %v23811_v2 }
0x1d95   : > { %52617 = vrcp.f32 %v23810_v25 }
0x1d9e   : > { %v54774_v42 = vpop.eup %52615 }
0x1d9f   : > { %v54776_v39 = vpop.eup %52617  ;;  %v23823_v55 = vmul.f32 %v54774_v42, %v23819_v41 }
0x1da0   : > { %v23822_v33 = vmul.f32 %v54776_v39, %v23817_v57 }
0x1da1   : > { %23828 = vrot.lane.b32.xlu1 %v23823_v55, %s52742_s28 }
0x1da2   : > { %23826 = vrot.lane.b32.xlu0 %v23822_v33, %s52742_s28 }
0x1e13   : > { %v23829_v54 = vpop.permute.xlu1 %23828 }
0x1e14   : > { %v23832_v0 = vsel %vm973_vm1, %v23829_v54, 0  ;;  %v23827_v61 = vpop.permute.xlu0 %23826  ;;  %v24375_v54 = vsub.f32 1.0, %v54774_v42 }
0x1e15   : > { %v23913_v2 = vand.u32 4294901760, %v23832_v0  ;;  %v23830_v25 = vsel %vm973_vm1, %v23827_v61, 0 }
0x1e16   : > { %v23903_v47 = vand.u32 4294901760, %v23830_v25 }
0x1e17   : > { %v23914_v44 = vsub.f32 %v23832_v0, %v23913_v2  ;;  %v24374_v0 = vsub.f32 1.0, %v54776_v39 }
0x1e18   : > { %v23904_v35 = vsub.f32 %v23830_v25, %v23903_v47 }
0x1e19   : > { %v23915_v37 = vand.u32 4294901760, %v23914_v44 }
0x1e1a   : > { %v23905_v43 = vand.u32 4294901760, %v23904_v35 }
0x1e1b   : > { %v23916_v49 = vsub.f32 %v23914_v44, %v23915_v37 }
0x1e1c   : > { %v23906_v41 = vsub.f32 %v23904_v35, %v23905_v43 }
0x1e1d   : > { %v23917_v57 = vand.u32 4294901760, %v23916_v49 }
0x1e1e   : > { %v23907_v45 = vand.u32 4294901760, %v23906_v41 }
0x1e20   : > { %46261 = vmatprep.mubr.f32.mxu1 %v23907_v45 }
0x1e21   : > { %46262 = vmatmul.mubr.f32.vlgmr.msra.gmra.mrb[42].mxu1 %v23917_v57 }
0x1e22   : > { %50122 = vmatpush3.bf16.msra.mxu1 %v53457_v60  ;;  %46272 = vmatprep.mubr.f32.mxu1 %v23903_v47 }
0x1e23   : > { %50124 = vmatprep.subr.bf16.mxu1 %v53462_v48 }
0x1e26   : > { %50126 = vmatpush3.bf16.msra.mxu1 %v53462_v48 }
0x1e27   : > { %50128 = vmatprep.subr.bf16.mxu1 %v53464_v1 }
0x1e29   : > { %46273 = vmatmul.mubr.f32.vlgmr.msra.gmra.mrb[42].mxu1 %v23913_v2 }
0x1e2a   : > { %50130 = vmatpush3.bf16.msra.mxu1 %v53464_v1  ;;  %46283 = vmatprep.mubr.f32.mxu1 %v23904_v35 }
0x1e2b   : > { %50132 = vmatprep.subr.bf16.mxu1 %v53466_v15 }
0x1e2e   : > { %50134 = vmatpush3.bf16.msra.mxu1 %v53466_v15 }
0x1e2f   : > { %50136 = vmatprep.subr.bf16.mxu1 %v53437_v40 }
0x1e31   : > { %46284 = vmatmul.mubr.f32.vlgmr.msra.gmra.mrb[42].mxu1 %v23914_v44 }
0x1e32   : > { %50138 = vmatpush3.bf16.msra.mxu1 %v53437_v40  ;;  %46294 = vmatprep.mubr.f32.mxu1 %v23905_v43 }
0x1e33   : > { %50140 = vmatprep.subr.bf16.mxu1 %v53447_v26 }
0x1e36   : > { %50142 = vmatpush3.bf16.msra.mxu1 %v53447_v26 }
0x1e37   : > { %50144 = vmatprep.subr.bf16.mxu1 %v53468_v36 }
0x1e39   : > { %46295 = vmatmul.mubr.f32.vlgmr.msra.gmra.mrb[42].mxu1 %v23915_v37 }
0x1e3a   : > { %50146 = vmatpush3.bf16.msra.mxu1 %v53468_v36  ;;  %46305 = vmatprep.mubr.f32.mxu1 %v23903_v47 }
0x1e3b   : > { %50148 = vmatprep.subr.bf16.mxu1 %v53470_v7 }
0x1e3e   : > { %50150 = vmatpush3.bf16.msra.mxu1 %v53470_v7 }
0x1e3f   : > { %50152 = vmatprep.subr.bf16.mxu1 %v53437_v40 }
0x1e41   : > { %46306 = vmatmul.mubr.f32.vlgmr.msra.gmra.mrb[42].mxu1 %v23913_v2 }
0x1e42   : > { %50154 = vmatpush3.bf16.msra.mxu1 %v53437_v40  ;;  %46316 = vmatprep.mubr.f32.mxu1 %v23903_v47 }
0x1e43   : > { %50156 = vmatprep.subr.bf16.mxu1 %v53447_v26 }
0x1e46   : > { %50158 = vmatpush3.bf16.msra.mxu1 %v53447_v26 }
0x1e49   : > { %46317 = vmatmul.mubr.f32.vlgmr.msra.gmra.mrb[42].mxu1 %v23913_v2  ;;  %v24377_v2 = vmul.f32 %v24375_v54, %v54558_v12 }
0x1e4a   : > { %46323 = vmatprep.mubr.f32.mxu1 %v56327_v31 }
0x1f1c   : > { %v46318_v45 = vpop.f32.mrb[42].mxu1 }
0x1f1d   : > { %24366 = vrot.lane.b32.xlu1 %v46318_v45, %s52743_s29  ;;  %v24352_v49 = vpop.f32.mrb[43].mxu1 }
0x1f1e   : > { %24364 = vrot.lane.b32.xlu0 %v24352_v49, %s52743_s29 }
0x1f8f   : > { %v24367_v43 = vpop.permute.xlu1 %24366 }
0x1f90   : > { %v24371_v44 = vadd.f32 %v54767_v38, %v24367_v43  ;;  %v24365_v37 = vpop.permute.xlu0 %24364 }
0x1f91   : > { %v24370_v35 = vadd.f32 %v54770_v22, %v24365_v37  ;;  %v24376_v22 = vmul.f32 %v24374_v0, %v54560_v34 }
0x1f92   : > { %52619 = vtanh.f32 %v24371_v44 }
0x1f93   : > { %52621 = vtanh.f32 %v24370_v35 }
0x1f9c   : > { %v52620_v55 = vpop.eup %52619 }
0x1f9d   : > { %v52622_v33 = vpop.eup %52621  ;;  %24382 = vrot.lane.b32.xlu1 %v52620_v55, %s52743_s29 }
0x1f9e   : > { %24380 = vrot.lane.b32.xlu0 %v52622_v33, %s52743_s29 }
0x200f   : > { %v24383_v61 = vpop.permute.xlu1 %24382 }
0x2010   : > { %v24387_v38 = vmul.f32 %v54774_v42, %v24383_v61  ;;  %v24381_v25 = vpop.permute.xlu0 %24380  ;;  %v56483_v61 = vld [vmem:[#allocation15_spill] sm:$0xff] }
0x2011   : > { %v24386_v47 = vmul.f32 %v54776_v39, %v24381_v25  ;;  %v56486_v25 = vld [vmem:[#allocation7_spill] sm:$0xff] }
0x2012   : > { %v54816_v41 = vadd.f32 %v24387_v38, %v24377_v2  ;;  %v56484_v2 = vld [vmem:[#allocation17_spill] sm:$0xff]  ;;  %v56485_v38 = vld [vmem:[#allocation6_spill] sm:$0xff] }
0x2013   : > { %v54818_v57 = vadd.f32 %v24386_v47, %v24376_v22  ;;  %v56487_v22 = vld [vmem:[#allocation8_spill] sm:$0xff]  ;;  %v56488_v47 = vld [vmem:[#allocation10_spill] sm:$0xff] }
0x2014   : > { %v24394_v45 = vand.u32 4294901760, %v54816_v41  ;;  %27844 = vrot.lane.b32.xlu1 %v54816_v41, %s52741_s7 }
0x2015   : > { %v24391_v49 = vand.u32 4294901760, %v54818_v57  ;;  %27842 = vrot.lane.b32.xlu0 %v54818_v57, %s52741_s7 }
0x2016   : > { %v24546_v12 = vsub.f32 %v54816_v41, %v24394_v45 }
0x2017   : > { %v50159_v42 = vpack.c.bf16 %v24394_v45, %v24391_v49  ;;  %v24539_v34 = vsub.f32 %v54818_v57, %v24391_v49  ;;  %v56489_v45 = vld [vmem:[#allocation12_spill] sm:$0xff]  ;;  %v56490_v49 = vld [vmem:[#allocation14_spill] sm:$0xff] }
0x2018   : > { %v24547_v39 = vand.u32 4294901760, %v24546_v12 }
0x2019   : > { %50160 = vmatprep.subr.bf16.mxu1 %v50159_v42  ;;  %v24540_v43 = vand.u32 4294901760, %v24539_v34  ;;  %v50167_v54 = vpack.c.bf16 %v24546_v12, %v24539_v34 }
0x201a   : > { %50162 = vmatpush3.bf16.msra.mxu1 %v50159_v42  ;;  %v24548_v44 = vsub.f32 %v24546_v12, %v24547_v39  ;;  %v56491_v12 = vld [vmem:[#allocation16_spill] sm:$0xff] }
0x201b   : > { %v24541_v37 = vsub.f32 %v24539_v34, %v24540_v43  ;;  %v50175_v0 = vpack.c.bf16 %v24547_v39, %v24540_v43  ;;  %v56492_v34 = vld [vmem:[#allocation18_spill] sm:$0xff]  ;;  %v56493_v39 = vld [vmem:[#allocation19_spill] sm:$0xff]  ;;  %v25151_v43 = vsel %vm973_vm1, %v54818_v57, 0 }
0x201c   : > { %v24549_v35 = vand.u32 4294901760, %v24548_v44  ;;  %v25154_v44 = vsel %vm973_vm1, %v54816_v41, 0 }
0x201d   : > { %46324 = vmatmul.mubr.f32.vlgmr.msra.gmra.mrb[44].mxu1 %v52929_v46  ;;  %v24542_v55 = vand.u32 4294901760, %v24541_v37  ;;  %v25225_v37 = vand.u32 4294901760, %v25151_v43 }
0x201e   : > { %46326 = vmatprep.mubr.f32.mxu1 %v52939_v50 }
0x201f   : > { %v50163_v33 = vpack.c.bf16 %v24549_v35, %v24542_v55  ;;  %v25226_v35 = vsub.f32 %v25151_v43, %v25225_v37 }
0x2021   : > { %46327 = vmatmul.mubr.f32.gmra.mrb[46].mxu1 %v52958_v58  ;;  %50164 = vmatprep.subr.bf16.mxu1 %v50163_v33 }
0x2022   : > { %50166 = vmatpush3.bf16.msra.mxu1 %v50163_v33  ;;  %46329 = vmatprep.mubr.f32.mxu1 %v52963_v62  ;;  %v56494_v33 = vld [vmem:[#allocation20_spill] sm:$0xff] }
0x2023   : > { %50168 = vmatprep.subr.bf16.mxu1 %v50167_v54 }
0x2025   : > { %46330 = vmatmul.mubr.f32.gmra.mrb[48].mxu1 %v52975_v3 }
0x2026   : > { %46332 = vmatprep.mubr.f32.mxu1 %v52980_v5 }
0x2029   : > { %46333 = vmatmul.mubr.f32.gmra.mrb[50].mxu1 %v52985_v6 }
0x202a   : > { %46339 = vmatprep.mubr.f32.mxu1 %v52838_v9 }
0x202d   : > { %46340 = vmatmul.mubr.f32.vlgmr.msra.gmra.mrb[44].mxu1 %v52840_v10 }
0x202e   : > { %50170 = vmatpush3.bf16.msra.mxu1 %v50167_v54  ;;  %46342 = vmatprep.mubr.f32.mxu1 %v52842_v11  ;;  %v25227_v54 = vand.u32 4294901760, %v25226_v35 }
0x202f   : > { %50172 = vmatprep.subr.bf16.mxu1 %v50159_v42 }
0x2030   : > { %v25228_v43 = vsub.f32 %v25226_v35, %v25227_v54 }
0x2031   : > { %46343 = vmatmul.mubr.f32.gmra.mrb[46].mxu1 %v52848_v14 }
0x2032   : > { %46345 = vmatprep.mubr.f32.mxu1 %v52862_v21 }
0x2035   : > { %46346 = vmatmul.mubr.f32.gmra.mrb[48].mxu1 %v52873_v23 }
0x2036   : > { %46348 = vmatprep.mubr.f32.mxu1 %v52875_v24 }
0x2039   : > { %46349 = vmatmul.mubr.f32.gmra.mrb[50].mxu1 %v52946_v53 }
0x203a   : > { %46355 = vmatprep.mubr.f32.mxu1 %v52854_v18 }
0x203d   : > { %46356 = vmatmul.mubr.f32.vlgmr.msra.gmra.mrb[44].mxu1 %v52857_v19 }
0x203e   : > { %50174 = vmatpush3.bf16.msra.mxu1 %v50159_v42  ;;  %46358 = vmatprep.mubr.f32.mxu1 %v52860_v20 }
0x203f   : > { %50176 = vmatprep.subr.bf16.mxu1 %v50175_v0 }
0x2041   : > { %46359 = vmatmul.mubr.f32.gmra.mrb[46].mxu1 %v56366_v28 }
0x2042   : > { %46361 = vmatprep.mubr.f32.mxu1 %v56405_v29 }
0x2045   : > { %46362 = vmatmul.mubr.f32.gmra.mrb[48].mxu1 %v56444_v16 }
0x2046   : > { %46364 = vmatprep.mubr.f32.mxu1 %v56483_v61 }
0x2049   : > { %46365 = vmatmul.mubr.f32.gmra.mrb[50].mxu1 %v56484_v2 }
0x204a   : > { %46371 = vmatprep.mubr.f32.mxu1 %v56485_v38 }
0x204d   : > { %46372 = vmatmul.mubr.f32.vlgmr.msra.gmra.mrb[44].mxu1 %v56486_v25 }
0x204e   : > { %50178 = vmatpush3.bf16.msra.mxu1 %v50175_v0  ;;  %46374 = vmatprep.mubr.f32.mxu1 %v56487_v22  ;;  %v56498_v22 = vld [vmem:[#allocation24_spill] sm:$0xff] }
0x204f   : > { %50180 = vmatprep.subr.bf16.mxu1 %v50159_v42 }
0x2051   : > { %46375 = vmatmul.mubr.f32.gmra.mrb[46].mxu1 %v56488_v47  ;;  %v56497_v47 = vld [vmem:[#allocation23_spill] sm:$0xff] }
0x2052   : > { %46377 = vmatprep.mubr.f32.mxu1 %v56489_v45  ;;  %v56496_v45 = vld [vmem:[#allocation22_spill] sm:$0xff] }
0x2055   : > { %46378 = vmatmul.mubr.f32.gmra.mrb[48].mxu1 %v56490_v49  ;;  %v25229_v49 = vand.u32 4294901760, %v25228_v43 }
0x2056   : > { %46380 = vmatprep.mubr.f32.mxu1 %v56491_v12 }
0x2059   : > { %46381 = vmatmul.mubr.f32.gmra.mrb[50].mxu1 %v56492_v34  ;;  %v56495_v34 = vld [vmem:[#allocation21_spill] sm:$0xff] }
0x205a   : > { %46387 = vmatprep.mubr.f32.mxu1 %v52838_v9 }
0x205d   : > { %46388 = vmatmul.mubr.f32.vlgmr.msra.gmra.mrb[44].mxu1 %v52840_v10 }
0x205e   : > { %50182 = vmatpush3.bf16.msra.mxu1 %v50159_v42  ;;  %46390 = vmatprep.mubr.f32.mxu1 %v52842_v11  ;;  %v25235_v42 = vand.u32 4294901760, %v25154_v44 }
0x205f   : > { %50184 = vmatprep.subr.bf16.mxu1 %v56493_v39 }
0x2060   : > { %v25236_v55 = vsub.f32 %v25154_v44, %v25235_v42 }
0x2061   : > { %46391 = vmatmul.mubr.f32.gmra.mrb[46].mxu1 %v52848_v14 }
0x2062   : > { %46393 = vmatprep.mubr.f32.mxu1 %v52862_v21  ;;  %v25237_v0 = vand.u32 4294901760, %v25236_v55 }
0x2064   : > { %v25238_v12 = vsub.f32 %v25236_v55, %v25237_v0 }
0x2065   : > { %46394 = vmatmul.mubr.f32.gmra.mrb[48].mxu1 %v52873_v23 }
0x2066   : > { %46396 = vmatprep.mubr.f32.mxu1 %v52875_v24  ;;  %v25239_v44 = vand.u32 4294901760, %v25238_v12  ;;  %v56500_v12 = vld [vmem:[#allocation26_spill] sm:$0xff] }
0x2069   : > { %46397 = vmatmul.mubr.f32.gmra.mrb[50].mxu1 %v52946_v53 }
0x206a   : > { %46403 = vmatprep.mubr.f32.mxu1 %v52838_v9 }
0x206d   : > { %46404 = vmatmul.mubr.f32.vlgmr.msra.gmra.mrb[44].mxu1 %v52840_v10 }
0x206e   : > { %46406 = vmatprep.mubr.f32.mxu1 %v52842_v11  ;;  %50186 = vmatpush3.bf16.msra.mxu1 %v56493_v39 }
0x206f   : > { %50188 = vmatprep.subr.bf16.mxu1 %v56494_v33 }
0x2071   : > { %46407 = vmatmul.mubr.f32.gmra.mrb[46].mxu1 %v52848_v14 }
0x2072   : > { %46409 = vmatprep.mubr.f32.mxu1 %v52862_v21  ;;  %50190 = vmatpush3.bf16.msra.mxu1 %v56494_v33 }
0x2073   : > { %50192 = vmatprep.subr.bf16.mxu1 %v56495_v34 }
0x2075   : > { %46410 = vmatmul.mubr.f32.gmra.mrb[48].mxu1 %v52873_v23 }
0x2076   : > { %46412 = vmatprep.mubr.f32.mxu1 %v52875_v24 }
0x2079   : > { %46413 = vmatmul.mubr.f32.gmra.mrb[50].mxu1 %v52946_v53 }
0x207a   : > { %46423 = vmatprep.mubr.f32.mxu1 %v25229_v49  ;;  %v56499_v49 = vld [vmem:[#allocation25_spill] sm:$0xff] }
0x207d   : > { %46424 = vmatmul.mubr.f32.vlgmr.msra.gmra.mrb[52].mxu1 %v25239_v44 }
0x207e   : > { %50194 = vmatpush3.bf16.msra.mxu1 %v56495_v34  ;;  %46434 = vmatprep.mubr.f32.mxu1 %v25225_v37 }
0x207f   : > { %50196 = vmatprep.subr.bf16.mxu1 %v56496_v45 }
0x2082   : > { %50198 = vmatpush3.bf16.msra.mxu1 %v56496_v45 }
0x2083   : > { %50200 = vmatprep.subr.bf16.mxu1 %v56497_v47 }
0x2085   : > { %46435 = vmatmul.mubr.f32.vlgmr.msra.gmra.mrb[52].mxu1 %v25235_v42 }
0x2086   : > { %50202 = vmatpush3.bf16.msra.mxu1 %v56497_v47  ;;  %46445 = vmatprep.mubr.f32.mxu1 %v25226_v35 }
0x2087   : > { %50204 = vmatprep.subr.bf16.mxu1 %v56498_v22 }
0x208a   : > { %50206 = vmatpush3.bf16.msra.mxu1 %v56498_v22 }
0x208b   : > { %50208 = vmatprep.subr.bf16.mxu1 %v56493_v39 }
0x208d   : > { %46446 = vmatmul.mubr.f32.vlgmr.msra.gmra.mrb[52].mxu1 %v25236_v55 }
0x208e   : > { %50210 = vmatpush3.bf16.msra.mxu1 %v56493_v39  ;;  %46456 = vmatprep.mubr.f32.mxu1 %v25227_v54 }
0x208f   : > { %50212 = vmatprep.subr.bf16.mxu1 %v56494_v33 }
0x2092   : > { %50214 = vmatpush3.bf16.msra.mxu1 %v56494_v33 }
0x2093   : > { %50216 = vmatprep.subr.bf16.mxu1 %v56499_v49 }
0x2095   : > { %46457 = vmatmul.mubr.f32.vlgmr.msra.gmra.mrb[52].mxu1 %v25237_v0 }
0x2096   : > { %50218 = vmatpush3.bf16.msra.mxu1 %v56499_v49  ;;  %46467 = vmatprep.mubr.f32.mxu1 %v25225_v37 }
0x2097   : > { %50220 = vmatprep.subr.bf16.mxu1 %v56500_v12 }
0x209a   : > { %50222 = vmatpush3.bf16.msra.mxu1 %v56500_v12 }
0x209b   : > { %50224 = vmatprep.subr.bf16.mxu1 %v56493_v39 }
0x209d   : > { %46468 = vmatmul.mubr.f32.vlgmr.msra.gmra.mrb[52].mxu1 %v25235_v42 }
0x209e   : > { %50226 = vmatpush3.bf16.msra.mxu1 %v56493_v39  ;;  %46478 = vmatprep.mubr.f32.mxu1 %v25225_v37 }
0x209f   : > { %50228 = vmatprep.subr.bf16.mxu1 %v56494_v33 }
0x20a2   : > { %50230 = vmatpush3.bf16.msra.mxu1 %v56494_v33 }
0x20a3   : > { %50232 = vmatprep.subr.bf16.mxu1 %v53118_v59 }
0x20a5   : > { %46479 = vmatmul.mubr.f32.vlgmr.msra.gmra.mrb[52].mxu1 %v25235_v42 }
0x20a6   : > { %50234 = vmatpush3.bf16.msra.mxu1 %v53118_v59 }
0x20a7   : > { %50236 = vmatprep.subr.bf16.mxu1 %v53128_v8 }
0x20aa   : > { %50238 = vmatpush3.bf16.msra.mxu1 %v53128_v8 }
0x20ab   : > { %50240 = vmatprep.subr.bf16.mxu1 %v56302_v56 }
0x2140   : > { %v46405_v35 = vpop.f32.mrb[44].mxu1 }
0x2141   : > { %v25690_v55 = vsel %vm973_vm1, %v46405_v35, 0  ;;  %v25104_v54 = vpop.f32.mrb[45].mxu1 }
0x2142   : > { %v25771_v37 = vand.u32 4294901760, %v25690_v55  ;;  %v25687_v0 = vsel %vm973_vm1, %v25104_v54, 0 }
0x2143   : > { %v25761_v43 = vand.u32 4294901760, %v25687_v0 }
0x2144   : > { %v25772_v44 = vsub.f32 %v25690_v55, %v25771_v37  ;;  %v46408_v12 = vpop.f32.mrb[46].mxu1 }
0x2145   : > { %v25762_v49 = vsub.f32 %v25687_v0, %v25761_v43  ;;  %v25116_v42 = vpop.f32.mrb[47].mxu1 }
0x2146   : > { %v25773_v22 = vand.u32 4294901760, %v25772_v44 }
0x2147   : > { %v25763_v47 = vand.u32 4294901760, %v25762_v49 }
0x2148   : > { %v25774_v45 = vsub.f32 %v25772_v44, %v25773_v22  ;;  %v54910_v34 = vpop.f32.mrb[48].mxu1 }
0x2149   : > { %v54912_v33 = vpop.f32.mrb[49].mxu1  ;;  %v25764_v39 = vsub.f32 %v25762_v49, %v25763_v47 }
0x214a   : > { %v25775_v38 = vand.u32 4294901760, %v25774_v45  ;;  %v26226_v45 = vsel %vm973_vm1, %v46408_v12, 0 }
0x214b   : > { %v25765_v25 = vand.u32 4294901760, %v25764_v39 }
0x214c   : > { %v54914_v35 = vpop.f32.mrb[50].mxu1 }
0x214d   : > { %v54916_v2 = vpop.f32.mrb[51].mxu1  ;;  %46489 = vmatprep.mubr.f32.mxu1 %v25765_v25 }
0x214e   : > { %46490 = vmatmul.mubr.f32.vlgmr.msra.gmra.mrb[52].mxu1 %v25775_v38  ;;  %v26223_v38 = vsel %vm973_vm1, %v25116_v42, 0  ;;  %v26759_v42 = vsel %vm973_vm1, %v54912_v33, 0 }
0x214f   : > { %50242 = vmatpush3.bf16.msra.mxu1 %v56302_v56  ;;  %46500 = vmatprep.mubr.f32.mxu1 %v25761_v43  ;;  %v26297_v25 = vand.u32 4294901760, %v26223_v38 }
0x2150   : > { %50244 = vmatprep.subr.bf16.mxu1 %v56303_v52 }
0x2151   : > { %v26298_v39 = vsub.f32 %v26223_v38, %v26297_v25  ;;  %v56503_v38 = vld [vmem:[#allocation38_spill] sm:$0xff] }
0x2153   : > { %50246 = vmatpush3.bf16.msra.mxu1 %v56303_v52 }
0x2154   : > { %50248 = vmatprep.subr.bf16.mxu1 %v56304_v51 }
0x2156   : > { %46501 = vmatmul.mubr.f32.vlgmr.msra.gmra.mrb[52].mxu1 %v25771_v37 }
0x2157   : > { %50250 = vmatpush3.bf16.msra.mxu1 %v56304_v51  ;;  %46511 = vmatprep.mubr.f32.mxu1 %v25762_v49  ;;  %v26299_v49 = vand.u32 4294901760, %v26298_v39 }
0x2158   : > { %50252 = vmatprep.subr.bf16.mxu1 %v56305_v30 }
0x215b   : > { %50254 = vmatpush3.bf16.msra.mxu1 %v56305_v30 }
0x215c   : > { %50256 = vmatprep.subr.bf16.mxu1 %v53118_v59 }
0x215e   : > { %46512 = vmatmul.mubr.f32.vlgmr.msra.gmra.mrb[52].mxu1 %v25772_v44  ;;  %v56502_v44 = vld [vmem:[#allocation37_spill] sm:$0xff] }
0x215f   : > { %50258 = vmatpush3.bf16.msra.mxu1 %v53118_v59  ;;  %46522 = vmatprep.mubr.f32.mxu1 %v25763_v47  ;;  %v26307_v47 = vand.u32 4294901760, %v26226_v45 }
0x2160   : > { %50260 = vmatprep.subr.bf16.mxu1 %v53128_v8 }
0x2161   : > { %v26308_v55 = vsub.f32 %v26226_v45, %v26307_v47  ;;  %v26833_v45 = vand.u32 4294901760, %v26759_v42 }
0x2163   : > { %50262 = vmatpush3.bf16.msra.mxu1 %v53128_v8  ;;  %v26309_v54 = vand.u32 4294901760, %v26308_v55 }
0x2164   : > { %50264 = vmatprep.subr.bf16.mxu1 %v56306_v13 }
0x2165   : > { %v26310_v0 = vsub.f32 %v26308_v55, %v26309_v54 }
0x2166   : > { %46523 = vmatmul.mubr.f32.vlgmr.msra.gmra.mrb[52].mxu1 %v25773_v22  ;;  %v26300_v22 = vsub.f32 %v26298_v39, %v26299_v49 }
0x2167   : > { %50266 = vmatpush3.bf16.msra.mxu1 %v56306_v13  ;;  %46533 = vmatprep.mubr.f32.mxu1 %v25761_v43 }
0x2168   : > { %50268 = vmatprep.subr.bf16.mxu1 %v56307_v27  ;;  %v26301_v12 = vand.u32 4294901760, %v26300_v22 }
0x216b   : > { %50270 = vmatpush3.bf16.msra.mxu1 %v56307_v27 }
0x216c   : > { %50272 = vmatprep.subr.bf16.mxu1 %v53118_v59 }
0x216e   : > { %46534 = vmatmul.mubr.f32.vlgmr.msra.gmra.mrb[52].mxu1 %v25771_v37 }
0x216f   : > { %50274 = vmatpush3.bf16.msra.mxu1 %v53118_v59  ;;  %46544 = vmatprep.mubr.f32.mxu1 %v25761_v43  ;;  %v26311_v43 = vand.u32 4294901760, %v26310_v0 }
0x2170   : > { %50276 = vmatprep.subr.bf16.mxu1 %v53128_v8 }
0x2173   : > { %50278 = vmatpush3.bf16.msra.mxu1 %v53128_v8 }
0x2174   : > { %50280 = vmatprep.subr.bf16.mxu1 %v53212_v32 }
0x2176   : > { %46545 = vmatmul.mubr.f32.vlgmr.msra.gmra.mrb[52].mxu1 %v25771_v37  ;;  %v56501_v37 = vld [vmem:[#allocation36_spill] sm:$0xff] }
0x2177   : > { %50282 = vmatpush3.bf16.msra.mxu1 %v53212_v32  ;;  %46555 = vmatprep.mubr.f32.mxu1 %v26301_v12 }
0x2178   : > { %50284 = vmatprep.subr.bf16.mxu1 %v53221_v63 }
0x217b   : > { %50286 = vmatpush3.bf16.msra.mxu1 %v53221_v63 }
0x217c   : > { %50288 = vmatprep.subr.bf16.mxu1 %v53229_v4 }
0x217e   : > { %46556 = vmatmul.mubr.f32.vlgmr.msra.gmra.mrb[52].mxu1 %v26311_v43  ;;  %v56505_v43 = vld [vmem:[#allocation40_spill] sm:$0xff] }
0x217f   : > { %50290 = vmatpush3.bf16.msra.mxu1 %v53229_v4  ;;  %46566 = vmatprep.mubr.f32.mxu1 %v26297_v25 }
0x2180   : > { %50292 = vmatprep.subr.bf16.mxu1 %v53233_v17 }
0x2183   : > { %50294 = vmatpush3.bf16.msra.mxu1 %v53233_v17 }
0x2184   : > { %50296 = vmatprep.subr.bf16.mxu1 %v56501_v37 }
0x2186   : > { %46567 = vmatmul.mubr.f32.vlgmr.msra.gmra.mrb[52].mxu1 %v26307_v47 }
0x2187   : > { %50298 = vmatpush3.bf16.msra.mxu1 %v56501_v37  ;;  %46577 = vmatprep.mubr.f32.mxu1 %v26298_v39  ;;  %v56504_v39 = vld [vmem:[#allocation39_spill] sm:$0xff] }
0x2188   : > { %50300 = vmatprep.subr.bf16.mxu1 %v56502_v44 }
0x218b   : > { %50302 = vmatpush3.bf16.msra.mxu1 %v56502_v44 }
0x218c   : > { %50304 = vmatprep.subr.bf16.mxu1 %v53212_v32 }
0x218e   : > { %46578 = vmatmul.mubr.f32.vlgmr.msra.gmra.mrb[52].mxu1 %v26308_v55  ;;  %v26762_v55 = vsel %vm973_vm1, %v54910_v34, 0 }
0x218f   : > { %50306 = vmatpush3.bf16.msra.mxu1 %v53212_v32  ;;  %46588 = vmatprep.mubr.f32.mxu1 %v26299_v49  ;;  %v26834_v49 = vsub.f32 %v26759_v42, %v26833_v45  ;;  %v26843_v22 = vand.u32 4294901760, %v26762_v55 }
0x2190   : > { %50308 = vmatprep.subr.bf16.mxu1 %v53221_v63 }
0x2191   : > { %v26835_v33 = vand.u32 4294901760, %v26834_v49 }
0x2193   : > { %50310 = vmatpush3.bf16.msra.mxu1 %v53221_v63  ;;  %v26836_v12 = vsub.f32 %v26834_v49, %v26835_v33 }
0x2194   : > { %50312 = vmatprep.subr.bf16.mxu1 %v56503_v38 }
0x2195   : > { %v26837_v34 = vand.u32 4294901760, %v26836_v12  ;;  %v56510_v12 = vld [vmem:[#allocation45_spill] sm:$0xff] }
0x2196   : > { %46589 = vmatmul.mubr.f32.vlgmr.msra.gmra.mrb[52].mxu1 %v26309_v54  ;;  %v26844_v54 = vsub.f32 %v26762_v55, %v26843_v22  ;;  %v56507_v55 = vld [vmem:[#allocation42_spill] sm:$0xff] }
0x2197   : > { %50314 = vmatpush3.bf16.msra.mxu1 %v56503_v38  ;;  %46599 = vmatprep.mubr.f32.mxu1 %v26297_v25  ;;  %v56508_v38 = vld [vmem:[#allocation43_spill] sm:$0xff] }
0x2198   : > { %50316 = vmatprep.subr.bf16.mxu1 %v56504_v39  ;;  %v26845_v0 = vand.u32 4294901760, %v26844_v54 }
0x219a   : > { %v26846_v42 = vsub.f32 %v26844_v54, %v26845_v0 }
0x219b   : > { %50318 = vmatpush3.bf16.msra.mxu1 %v56504_v39  ;;  %v56506_v39 = vld [vmem:[#allocation41_spill] sm:$0xff] }
0x219c   : > { %50320 = vmatprep.subr.bf16.mxu1 %v53212_v32 }
0x219e   : > { %46600 = vmatmul.mubr.f32.vlgmr.msra.gmra.mrb[52].mxu1 %v26307_v47 }
0x219f   : > { %50322 = vmatpush3.bf16.msra.mxu1 %v53212_v32  ;;  %46610 = vmatprep.mubr.f32.mxu1 %v26297_v25  ;;  %v26847_v25 = vand.u32 4294901760, %v26846_v42  ;;  %v56511_v42 = vld [vmem:[#allocation46_spill] sm:$0xff] }
0x21a0   : > { %50324 = vmatprep.subr.bf16.mxu1 %v53221_v63 }
0x21a3   : > { %50326 = vmatpush3.bf16.msra.mxu1 %v53221_v63 }
0x21a4   : > { %50328 = vmatprep.subr.bf16.mxu1 %v56505_v43 }
0x21a6   : > { %46611 = vmatmul.mubr.f32.vlgmr.msra.gmra.mrb[52].mxu1 %v26307_v47  ;;  %v56509_v47 = vld [vmem:[#allocation44_spill] sm:$0xff] }
0x21a7   : > { %50330 = vmatpush3.bf16.msra.mxu1 %v56505_v43  ;;  %46621 = vmatprep.mubr.f32.mxu1 %v26837_v34  ;;  %v27295_v34 = vsel %vm973_vm1, %v54916_v2, 0 }
0x21a8   : > { %50332 = vmatprep.subr.bf16.mxu1 %v56506_v39 }
0x21ab   : > { %50334 = vmatpush3.bf16.msra.mxu1 %v56506_v39 }
0x21ac   : > { %50336 = vmatprep.subr.bf16.mxu1 %v56507_v55 }
0x21ae   : > { %46622 = vmatmul.mubr.f32.vlgmr.msra.gmra.mrb[52].mxu1 %v26847_v25  ;;  %v56512_v25 = vld [vmem:[#allocation47_spill] sm:$0xff] }
0x21af   : > { %50338 = vmatpush3.bf16.msra.mxu1 %v56507_v55  ;;  %46632 = vmatprep.mubr.f32.mxu1 %v26833_v45  ;;  %v56516_v55 = vld [vmem:[#allocation51_spill] sm:$0xff] }
0x21b0   : > { %50340 = vmatprep.subr.bf16.mxu1 %v56508_v38 }
0x21b3   : > { %50342 = vmatpush3.bf16.msra.mxu1 %v56508_v38  ;;  %v56513_v38 = vld [vmem:[#allocation48_spill] sm:$0xff] }
0x21b4   : > { %50344 = vmatprep.subr.bf16.mxu1 %v56509_v47 }
0x21b6   : > { %46633 = vmatmul.mubr.f32.vlgmr.msra.gmra.mrb[52].mxu1 %v26843_v22 }
0x21b7   : > { %50346 = vmatpush3.bf16.msra.mxu1 %v56509_v47  ;;  %46643 = vmatprep.mubr.f32.mxu1 %v26834_v49  ;;  %v27369_v49 = vand.u32 4294901760, %v27295_v34 }
0x21b8   : > { %50348 = vmatprep.subr.bf16.mxu1 %v56510_v12 }
0x21bb   : > { %50350 = vmatpush3.bf16.msra.mxu1 %v56510_v12 }
0x21bc   : > { %50352 = vmatprep.subr.bf16.mxu1 %v56505_v43 }
0x21be   : > { %46644 = vmatmul.mubr.f32.vlgmr.msra.gmra.mrb[52].mxu1 %v26844_v54  ;;  %v27298_v54 = vsel %vm973_vm1, %v54914_v35, 0 }
0x21bf   : > { %50354 = vmatpush3.bf16.msra.mxu1 %v56505_v43  ;;  %46654 = vmatprep.mubr.f32.mxu1 %v26835_v33  ;;  %v27370_v33 = vsub.f32 %v27295_v34, %v27369_v49  ;;  %v27379_v12 = vand.u32 4294901760, %v27298_v54 }
0x21c0   : > { %50356 = vmatprep.subr.bf16.mxu1 %v56506_v39 }
0x21c1   : > { %v27371_v2 = vand.u32 4294901760, %v27370_v33 }
0x21c3   : > { %50358 = vmatpush3.bf16.msra.mxu1 %v56506_v39 }
0x21c4   : > { %50360 = vmatprep.subr.bf16.mxu1 %v56511_v42 }
0x21c6   : > { %46655 = vmatmul.mubr.f32.vlgmr.msra.gmra.mrb[52].mxu1 %v26845_v0  ;;  %v27380_v0 = vsub.f32 %v27298_v54, %v27379_v12  ;;  %v56515_v54 = vld [vmem:[#allocation50_spill] sm:$0xff] }
0x21c7   : > { %50362 = vmatpush3.bf16.msra.mxu1 %v56511_v42  ;;  %46665 = vmatprep.mubr.f32.mxu1 %v26833_v45  ;;  %v27372_v42 = vsub.f32 %v27370_v33, %v27371_v2 }
0x21c8   : > { %50364 = vmatprep.subr.bf16.mxu1 %v56512_v25  ;;  %v27381_v47 = vand.u32 4294901760, %v27380_v0 }
0x21c9   : > { %v27373_v35 = vand.u32 4294901760, %v27372_v42  ;;  %v56518_v42 = vld [vmem:[#allocation53_spill] sm:$0xff] }
0x21ca   : > { %v27382_v34 = vsub.f32 %v27380_v0, %v27381_v47 }
0x21cb   : > { %50366 = vmatpush3.bf16.msra.mxu1 %v56512_v25  ;;  %v56514_v25 = vld [vmem:[#allocation49_spill] sm:$0xff] }
0x21cc   : > { %50368 = vmatprep.subr.bf16.mxu1 %v56505_v43 }
0x21ce   : > { %46666 = vmatmul.mubr.f32.vlgmr.msra.gmra.mrb[52].mxu1 %v26843_v22 }
0x21cf   : > { %50370 = vmatpush3.bf16.msra.mxu1 %v56505_v43  ;;  %46676 = vmatprep.mubr.f32.mxu1 %v26833_v45  ;;  %v27383_v45 = vand.u32 4294901760, %v27382_v34 }
0x21d0   : > { %50372 = vmatprep.subr.bf16.mxu1 %v56506_v39 }
0x21d3   : > { %50374 = vmatpush3.bf16.msra.mxu1 %v56506_v39 }
0x21d4   : > { %50376 = vmatprep.subr.bf16.mxu1 %v56513_v38 }
0x21d6   : > { %46677 = vmatmul.mubr.f32.vlgmr.msra.gmra.mrb[52].mxu1 %v26843_v22  ;;  %v56517_v22 = vld [vmem:[#allocation52_spill] sm:$0xff] }
0x21d7   : > { %50378 = vmatpush3.bf16.msra.mxu1 %v56513_v38  ;;  %46687 = vmatprep.mubr.f32.mxu1 %v27373_v35  ;;  %v56519_v35 = vld [vmem:[#allocation54_spill] sm:$0xff] }
0x21d8   : > { %50380 = vmatprep.subr.bf16.mxu1 %v56514_v25 }
0x21db   : > { %50382 = vmatpush3.bf16.msra.mxu1 %v56514_v25 }
0x21dc   : > { %50384 = vmatprep.subr.bf16.mxu1 %v56515_v54 }
0x21de   : > { %46688 = vmatmul.mubr.f32.vlgmr.msra.gmra.mrb[52].mxu1 %v27383_v45 }
0x21df   : > { %50386 = vmatpush3.bf16.msra.mxu1 %v56515_v54  ;;  %46698 = vmatprep.mubr.f32.mxu1 %v27369_v49 }
0x21e0   : > { %50388 = vmatprep.subr.bf16.mxu1 %v56516_v55 }
0x21e3   : > { %50390 = vmatpush3.bf16.msra.mxu1 %v56516_v55 }
0x21e4   : > { %50392 = vmatprep.subr.bf16.mxu1 %v56517_v22 }
0x21e6   : > { %46699 = vmatmul.mubr.f32.vlgmr.msra.gmra.mrb[52].mxu1 %v27379_v12 }
0x21e7   : > { %50394 = vmatpush3.bf16.msra.mxu1 %v56517_v22  ;;  %46709 = vmatprep.mubr.f32.mxu1 %v27370_v33  ;;  %v56520_v33 = vld [vmem:[#allocation55_spill] sm:$0xff] }
0x21e8   : > { %50396 = vmatprep.subr.bf16.mxu1 %v56518_v42 }
0x21eb   : > { %50398 = vmatpush3.bf16.msra.mxu1 %v56518_v42 }
0x21ec   : > { %50400 = vmatprep.subr.bf16.mxu1 %v56513_v38 }
0x21ee   : > { %46710 = vmatmul.mubr.f32.vlgmr.msra.gmra.mrb[52].mxu1 %v27380_v0 }
0x21ef   : > { %50402 = vmatpush3.bf16.msra.mxu1 %v56513_v38  ;;  %46720 = vmatprep.mubr.f32.mxu1 %v27371_v2 }
0x21f0   : > { %50404 = vmatprep.subr.bf16.mxu1 %v56514_v25 }
0x21f3   : > { %50406 = vmatpush3.bf16.msra.mxu1 %v56514_v25 }
0x21f4   : > { %50408 = vmatprep.subr.bf16.mxu1 %v56519_v35 }
0x21f6   : > { %46721 = vmatmul.mubr.f32.vlgmr.msra.gmra.mrb[52].mxu1 %v27381_v47 }
0x21f7   : > { %50410 = vmatpush3.bf16.msra.mxu1 %v56519_v35  ;;  %46731 = vmatprep.mubr.f32.mxu1 %v27369_v49 }
0x21f8   : > { %50412 = vmatprep.subr.bf16.mxu1 %v56520_v33 }
0x21fb   : > { %50414 = vmatpush3.bf16.msra.mxu1 %v56520_v33 }
0x21fc   : > { %50416 = vmatprep.subr.bf16.mxu1 %v56513_v38 }
0x21fe   : > { %46732 = vmatmul.mubr.f32.vlgmr.msra.gmra.mrb[52].mxu1 %v27379_v12 }
0x21ff   : > { %50418 = vmatpush3.bf16.msra.mxu1 %v56513_v38  ;;  %46742 = vmatprep.mubr.f32.mxu1 %v27369_v49  ;;  %v55027_v49 = vld [vmem:[%s55906_s2 + $0xa0] ss:$0 sm:$0xff] }
0x2200   : > { %50420 = vmatprep.subr.bf16.mxu1 %v56514_v25  ;;  %56521 = vst [vmem:[#allocation29_spill] sm:$0xff] %v55027_v49 }
0x2203   : > { %50422 = vmatpush3.bf16.msra.mxu1 %v56514_v25  ;;  %v27843_v25 = vpop.permute.xlu0 %27842 }
0x2204   : > { %50736 = vmatprep.subr.bf16.mxu1 %v53437_v40 }
0x2206   : > { %46743 = vmatmul.mubr.f32.vlgmr.msra.gmra.mrb[52].mxu1 %v27379_v12 }
0x2207   : > { %50738 = vmatpush3.bf16.msra.mxu1 %v53437_v40 }
0x2208   : > { %50740 = vmatprep.subr.bf16.mxu1 %v53447_v26 }
0x220b   : > { %50742 = vmatpush3.bf16.msra.mxu1 %v53447_v26 }
0x220c   : > { %50744 = vmatprep.subr.bf16.mxu1 %v53457_v60 }
0x22d9   : > { %v46744_v47 = vpop.f32.mrb[52].mxu1 }
0x22da   : > { %v55030_v2 = vadd.f32 %v55027_v49, %v46744_v47  ;;  %v27818_v0 = vpop.f32.mrb[53].mxu1  ;;  %v27845_v47 = vpop.permute.xlu1 %27844 }
0x22db   : > { %v55033_v12 = vadd.f32 %v55027_v49, %v27818_v0 }
0x22dc   : > { %v40593_v34 = vmul.f32 -1.442695, %v55030_v2 }
0x22dd   : > { %v40592_v45 = vmul.f32 -1.442695, %v55033_v12 }
0x22de   : > { %52623 = vpow2.f32 %v40593_v34 }
0x22df   : > { %52625 = vpow2.f32 %v40592_v45 }
0x22e8   : > { %v52624_v33 = vpop.eup %52623 }
0x22e9   : > { %v52626_v35 = vpop.eup %52625  ;;  %v27837_v42 = vadd.f32 1.0, %v52624_v33 }
0x22ea   : > { %v27836_v22 = vadd.f32 1.0, %v52626_v35 }
0x22eb   : > { %52627 = vrcp.f32 %v27837_v42 }
0x22ec   : > { %52629 = vrcp.f32 %v27836_v22 }
0x22f5   : > { %v55037_v55 = vpop.eup %52627 }
0x22f6   : > { %v55039_v54 = vpop.eup %52629  ;;  %v27849_v0 = vmul.f32 %v55037_v55, %v27845_v47 }
0x22f7   : > { %v27848_v49 = vmul.f32 %v55039_v54, %v27843_v25 }
0x22f8   : > { %27854 = vrot.lane.b32.xlu1 %v27849_v0, %s52742_s28 }
0x22f9   : > { %27852 = vrot.lane.b32.xlu0 %v27848_v49, %s52742_s28 }
0x236a   : > { %v27855_v34 = vpop.permute.xlu1 %27854 }
0x236b   : > { %v27858_v33 = vsel %vm973_vm1, %v27855_v34, 0  ;;  %v27853_v35 = vpop.permute.xlu0 %27852  ;;  %v28401_v34 = vsub.f32 1.0, %v55037_v55 }
0x236c   : > { %v27939_v42 = vand.u32 4294901760, %v27858_v33  ;;  %v27856_v22 = vsel %vm973_vm1, %v27853_v35, 0 }
0x236d   : > { %v27929_v45 = vand.u32 4294901760, %v27856_v22 }
0x236e   : > { %v27940_v38 = vsub.f32 %v27858_v33, %v27939_v42  ;;  %v28400_v33 = vsub.f32 1.0, %v55039_v54 }
0x236f   : > { %v27930_v39 = vsub.f32 %v27856_v22, %v27929_v45 }
0x2370   : > { %v27941_v43 = vand.u32 4294901760, %v27940_v38 }
0x2371   : > { %v27931_v44 = vand.u32 4294901760, %v27930_v39 }
0x2372   : > { %v27942_v37 = vsub.f32 %v27940_v38, %v27941_v43 }
0x2373   : > { %v27932_v47 = vsub.f32 %v27930_v39, %v27931_v44 }
0x2374   : > { %v27943_v25 = vand.u32 4294901760, %v27942_v37 }
0x2375   : > { %v27933_v17 = vand.u32 4294901760, %v27932_v47 }
0x2377   : > { %46753 = vmatprep.mubr.f32.mxu0 %v27933_v17 }
0x2378   : > { %46754 = vmatmul.mubr.f32.vlgmr.msra.gmra.mrb[44].mxu0 %v27943_v25 }
0x2379   : > { %50434 = vmatpush3.bf16.msra.mxu0 %v53457_v60  ;;  %46764 = vmatprep.mubr.f32.mxu0 %v27929_v45 }
0x237a   : > { %50436 = vmatprep.subr.bf16.mxu0 %v53462_v48 }
0x237d   : > { %50438 = vmatpush3.bf16.msra.mxu0 %v53462_v48 }
0x237e   : > { %50440 = vmatprep.subr.bf16.mxu0 %v53464_v1 }
0x2380   : > { %46765 = vmatmul.mubr.f32.vlgmr.msra.gmra.mrb[44].mxu0 %v27939_v42 }
0x2381   : > { %50442 = vmatpush3.bf16.msra.mxu0 %v53464_v1  ;;  %46775 = vmatprep.mubr.f32.mxu0 %v27930_v39 }
0x2382   : > { %50444 = vmatprep.subr.bf16.mxu0 %v53466_v15 }
0x2385   : > { %50446 = vmatpush3.bf16.msra.mxu0 %v53466_v15 }
0x2386   : > { %50448 = vmatprep.subr.bf16.mxu0 %v53437_v40 }
0x2388   : > { %46776 = vmatmul.mubr.f32.vlgmr.msra.gmra.mrb[44].mxu0 %v27940_v38 }
0x2389   : > { %50450 = vmatpush3.bf16.msra.mxu0 %v53437_v40  ;;  %46786 = vmatprep.mubr.f32.mxu0 %v27931_v44 }
0x238a   : > { %50452 = vmatprep.subr.bf16.mxu0 %v53447_v26 }
0x238d   : > { %50454 = vmatpush3.bf16.msra.mxu0 %v53447_v26 }
0x238e   : > { %50456 = vmatprep.subr.bf16.mxu0 %v53468_v36 }
0x2390   : > { %46787 = vmatmul.mubr.f32.vlgmr.msra.gmra.mrb[44].mxu0 %v27941_v43 }
0x2391   : > { %50458 = vmatpush3.bf16.msra.mxu0 %v53468_v36  ;;  %46797 = vmatprep.mubr.f32.mxu0 %v27929_v45 }
0x2392   : > { %50460 = vmatprep.subr.bf16.mxu0 %v53470_v7 }
0x2395   : > { %50462 = vmatpush3.bf16.msra.mxu0 %v53470_v7 }
0x2396   : > { %50464 = vmatprep.subr.bf16.mxu0 %v53437_v40 }
0x2398   : > { %46798 = vmatmul.mubr.f32.vlgmr.msra.gmra.mrb[44].mxu0 %v27939_v42 }
0x2399   : > { %50466 = vmatpush3.bf16.msra.mxu0 %v53437_v40  ;;  %46808 = vmatprep.mubr.f32.mxu0 %v27929_v45 }
0x239a   : > { %50468 = vmatprep.subr.bf16.mxu0 %v53447_v26 }
0x239d   : > { %50470 = vmatpush3.bf16.msra.mxu0 %v53447_v26 }
0x23a0   : > { %46809 = vmatmul.mubr.f32.vlgmr.msra.gmra.mrb[44].mxu0 %v27939_v42  ;;  %v28403_v42 = vmul.f32 %v28401_v34, %v54816_v41 }
0x23a1   : > { %46815 = vmatprep.mubr.f32.mxu0 %v56327_v31 }
0x2473   : > { %v46810_v17 = vpop.f32.mrb[44].mxu0 }
0x2474   : > { %28392 = vrot.lane.b32.xlu1 %v46810_v17, %s52743_s29  ;;  %v28378_v37 = vpop.f32.mrb[45].mxu0 }
0x2475   : > { %28390 = vrot.lane.b32.xlu0 %v28378_v37, %s52743_s29 }
0x24e6   : > { %v28393_v44 = vpop.permute.xlu1 %28392 }
0x24e7   : > { %v28397_v38 = vadd.f32 %v55030_v2, %v28393_v44  ;;  %v28391_v39 = vpop.permute.xlu0 %28390 }
0x24e8   : > { %v28396_v43 = vadd.f32 %v55033_v12, %v28391_v39  ;;  %v28402_v12 = vmul.f32 %v28400_v33, %v54818_v57 }
0x24e9   : > { %52631 = vtanh.f32 %v28397_v38 }
0x24ea   : > { %52633 = vtanh.f32 %v28396_v43 }
0x24f3   : > { %v52632_v49 = vpop.eup %52631 }
0x24f4   : > { %v52634_v0 = vpop.eup %52633  ;;  %28408 = vrot.lane.b32.xlu1 %v52632_v49, %s52743_s29 }
0x24f5   : > { %28406 = vrot.lane.b32.xlu0 %v52634_v0, %s52743_s29 }
0x2566   : > { %v28409_v35 = vpop.permute.xlu1 %28408 }
0x2567   : > { %v28413_v2 = vmul.f32 %v55037_v55, %v28409_v35  ;;  %v28407_v22 = vpop.permute.xlu0 %28406  ;;  %v56522_v35 = vld [vmem:[#allocation17_spill] sm:$0xff] }
0x2568   : > { %v28412_v45 = vmul.f32 %v55039_v54, %v28407_v22  ;;  %v56525_v22 = vld [vmem:[#allocation8_spill] sm:$0xff] }
0x2569   : > { %v55079_v47 = vadd.f32 %v28413_v2, %v28403_v42  ;;  %v56523_v42 = vld [vmem:[#allocation6_spill] sm:$0xff]  ;;  %v56524_v2 = vld [vmem:[#allocation7_spill] sm:$0xff] }
0x256a   : > { %v55081_v25 = vadd.f32 %v28412_v45, %v28402_v12  ;;  %v56526_v12 = vld [vmem:[#allocation10_spill] sm:$0xff]  ;;  %v56527_v45 = vld [vmem:[#allocation12_spill] sm:$0xff] }
0x256b   : > { %v28420_v17 = vand.u32 4294901760, %v55079_v47  ;;  %31870 = vrot.lane.b32.xlu1 %v55079_v47, %s52741_s7 }
0x256c   : > { %v28417_v37 = vand.u32 4294901760, %v55081_v25  ;;  %31868 = vrot.lane.b32.xlu0 %v55081_v25, %s52741_s7 }
0x256d   : > { %v28572_v41 = vsub.f32 %v55079_v47, %v28420_v17 }
0x256e   : > { %v50471_v55 = vpack.c.bf16 %v28420_v17, %v28417_v37  ;;  %v28565_v57 = vsub.f32 %v55081_v25, %v28417_v37  ;;  %v56528_v17 = vld [vmem:[#allocation14_spill] sm:$0xff]  ;;  %v56529_v37 = vld [vmem:[#allocation16_spill] sm:$0xff] }
0x256f   : > { %v28573_v54 = vand.u32 4294901760, %v28572_v41 }
0x2570   : > { %50472 = vmatprep.subr.bf16.mxu0 %v50471_v55  ;;  %v28566_v44 = vand.u32 4294901760, %v28565_v57  ;;  %v50479_v34 = vpack.c.bf16 %v28572_v41, %v28565_v57 }
0x2571   : > { %50474 = vmatpush3.bf16.msra.mxu0 %v50471_v55  ;;  %v28574_v38 = vsub.f32 %v28572_v41, %v28573_v54  ;;  %v56530_v41 = vld [vmem:[#allocation18_spill] sm:$0xff] }
0x2572   : > { %v28567_v39 = vsub.f32 %v28565_v57, %v28566_v44  ;;  %v50487_v33 = vpack.c.bf16 %v28573_v54, %v28566_v44  ;;  %v56531_v57 = vld [vmem:[#allocation19_spill] sm:$0xff]  ;;  %v29177_v54 = vsel %vm973_vm1, %v55081_v25, 0  ;;  %v29180_v44 = vsel %vm973_vm1, %v55079_v47, 0 }
0x2573   : > { %v28575_v43 = vand.u32 4294901760, %v28574_v38  ;;  %v29251_v38 = vand.u32 4294901760, %v29177_v54 }
0x2574   : > { %46816 = vmatmul.mubr.f32.vlgmr.msra.gmra.mrb[46].mxu0 %v52929_v46  ;;  %v28568_v49 = vand.u32 4294901760, %v28567_v39 }
0x2575   : > { %46818 = vmatprep.mubr.f32.mxu0 %v52939_v50  ;;  %v29252_v39 = vsub.f32 %v29177_v54, %v29251_v38 }
0x2576   : > { %v50475_v0 = vpack.c.bf16 %v28575_v43, %v28568_v49  ;;  %v56532_v49 = vld [vmem:[#allocation20_spill] sm:$0xff] }
0x2578   : > { %46819 = vmatmul.mubr.f32.gmra.mrb[48].mxu0 %v52958_v58  ;;  %50476 = vmatprep.subr.bf16.mxu0 %v50475_v0 }
0x2579   : > { %50478 = vmatpush3.bf16.msra.mxu0 %v50475_v0  ;;  %46821 = vmatprep.mubr.f32.mxu0 %v52963_v62  ;;  %v29253_v0 = vand.u32 4294901760, %v29252_v39 }
0x257a   : > { %50480 = vmatprep.subr.bf16.mxu0 %v50479_v34 }
0x257b   : > { %v29254_v54 = vsub.f32 %v29252_v39, %v29253_v0 }
0x257c   : > { %46822 = vmatmul.mubr.f32.gmra.mrb[50].mxu0 %v52975_v3 }
0x257d   : > { %46824 = vmatprep.mubr.f32.mxu0 %v52980_v5 }
0x2580   : > { %46825 = vmatmul.mubr.f32.gmra.mrb[52].mxu0 %v52985_v6 }
0x2581   : > { %46831 = vmatprep.mubr.f32.mxu0 %v52838_v9 }
0x2584   : > { %46832 = vmatmul.mubr.f32.vlgmr.msra.gmra.mrb[46].mxu0 %v52840_v10 }
0x2585   : > { %50482 = vmatpush3.bf16.msra.mxu0 %v50479_v34  ;;  %46834 = vmatprep.mubr.f32.mxu0 %v52842_v11 }
0x2586   : > { %50484 = vmatprep.subr.bf16.mxu0 %v50471_v55 }
0x2588   : > { %46835 = vmatmul.mubr.f32.gmra.mrb[48].mxu0 %v52848_v14 }
0x2589   : > { %46837 = vmatprep.mubr.f32.mxu0 %v52862_v21 }
0x258c   : > { %46838 = vmatmul.mubr.f32.gmra.mrb[50].mxu0 %v52873_v23 }
0x258d   : > { %46840 = vmatprep.mubr.f32.mxu0 %v52875_v24 }
0x2590   : > { %46841 = vmatmul.mubr.f32.gmra.mrb[52].mxu0 %v52946_v53 }
0x2591   : > { %46847 = vmatprep.mubr.f32.mxu0 %v52854_v18 }
0x2594   : > { %46848 = vmatmul.mubr.f32.vlgmr.msra.gmra.mrb[46].mxu0 %v52857_v19 }
0x2595   : > { %50486 = vmatpush3.bf16.msra.mxu0 %v50471_v55  ;;  %46850 = vmatprep.mubr.f32.mxu0 %v52860_v20 }
0x2596   : > { %50488 = vmatprep.subr.bf16.mxu0 %v50487_v33 }
0x2598   : > { %46851 = vmatmul.mubr.f32.gmra.mrb[48].mxu0 %v56366_v28 }
0x2599   : > { %46853 = vmatprep.mubr.f32.mxu0 %v56405_v29 }
0x259c   : > { %46854 = vmatmul.mubr.f32.gmra.mrb[50].mxu0 %v56444_v16 }
0x259d   : > { %46856 = vmatprep.mubr.f32.mxu0 %v56483_v61 }
0x25a0   : > { %46857 = vmatmul.mubr.f32.gmra.mrb[52].mxu0 %v56522_v35 }
0x25a1   : > { %46863 = vmatprep.mubr.f32.mxu0 %v56523_v42 }
0x25a4   : > { %46864 = vmatmul.mubr.f32.vlgmr.msra.gmra.mrb[46].mxu0 %v56524_v2 }
0x25a5   : > { %50490 = vmatpush3.bf16.msra.mxu0 %v50487_v33  ;;  %46866 = vmatprep.mubr.f32.mxu0 %v56525_v22  ;;  %v56533_v33 = vld [vmem:[#allocation21_spill] sm:$0xff] }
0x25a6   : > { %50492 = vmatprep.subr.bf16.mxu0 %v50471_v55 }
0x25a8   : > { %46867 = vmatmul.mubr.f32.gmra.mrb[48].mxu0 %v56526_v12  ;;  %v56536_v12 = vld [vmem:[#allocation24_spill] sm:$0xff] }
0x25a9   : > { %46869 = vmatprep.mubr.f32.mxu0 %v56527_v45  ;;  %v56535_v45 = vld [vmem:[#allocation23_spill] sm:$0xff] }
0x25ac   : > { %46870 = vmatmul.mubr.f32.gmra.mrb[50].mxu0 %v56528_v17  ;;  %v56534_v17 = vld [vmem:[#allocation22_spill] sm:$0xff] }
0x25ad   : > { %46872 = vmatprep.mubr.f32.mxu0 %v56529_v37  ;;  %v29255_v37 = vand.u32 4294901760, %v29254_v54 }
0x25b0   : > { %46873 = vmatmul.mubr.f32.gmra.mrb[52].mxu0 %v56530_v41 }
0x25b1   : > { %46879 = vmatprep.mubr.f32.mxu0 %v52838_v9 }
0x25b4   : > { %46880 = vmatmul.mubr.f32.vlgmr.msra.gmra.mrb[46].mxu0 %v52840_v10 }
0x25b5   : > { %50494 = vmatpush3.bf16.msra.mxu0 %v50471_v55  ;;  %46882 = vmatprep.mubr.f32.mxu0 %v52842_v11  ;;  %v29261_v55 = vand.u32 4294901760, %v29180_v44 }
0x25b6   : > { %50496 = vmatprep.subr.bf16.mxu0 %v56531_v57 }
0x25b7   : > { %v29262_v43 = vsub.f32 %v29180_v44, %v29261_v55 }
0x25b8   : > { %46883 = vmatmul.mubr.f32.gmra.mrb[48].mxu0 %v52848_v14 }
0x25b9   : > { %46885 = vmatprep.mubr.f32.mxu0 %v52862_v21  ;;  %v29263_v34 = vand.u32 4294901760, %v29262_v43 }
0x25bb   : > { %v29264_v41 = vsub.f32 %v29262_v43, %v29263_v34 }
0x25bc   : > { %46886 = vmatmul.mubr.f32.gmra.mrb[50].mxu0 %v52873_v23 }
0x25bd   : > { %46888 = vmatprep.mubr.f32.mxu0 %v52875_v24  ;;  %v29265_v44 = vand.u32 4294901760, %v29264_v41  ;;  %v56538_v41 = vld [vmem:[#allocation26_spill] sm:$0xff] }
0x25c0   : > { %46889 = vmatmul.mubr.f32.gmra.mrb[52].mxu0 %v52946_v53 }
0x25c1   : > { %46895 = vmatprep.mubr.f32.mxu0 %v52838_v9 }
0x25c4   : > { %46896 = vmatmul.mubr.f32.vlgmr.msra.gmra.mrb[46].mxu0 %v52840_v10 }
0x25c5   : > { %46898 = vmatprep.mubr.f32.mxu0 %v52842_v11  ;;  %50498 = vmatpush3.bf16.msra.mxu0 %v56531_v57 }
0x25c6   : > { %50500 = vmatprep.subr.bf16.mxu0 %v56532_v49 }
0x25c8   : > { %46899 = vmatmul.mubr.f32.gmra.mrb[48].mxu0 %v52848_v14 }
0x25c9   : > { %46901 = vmatprep.mubr.f32.mxu0 %v52862_v21  ;;  %50502 = vmatpush3.bf16.msra.mxu0 %v56532_v49 }
0x25ca   : > { %50504 = vmatprep.subr.bf16.mxu0 %v56533_v33 }
0x25cc   : > { %46902 = vmatmul.mubr.f32.gmra.mrb[50].mxu0 %v52873_v23 }
0x25cd   : > { %46904 = vmatprep.mubr.f32.mxu0 %v52875_v24 }
0x25d0   : > { %46905 = vmatmul.mubr.f32.gmra.mrb[52].mxu0 %v52946_v53 }
0x25d1   : > { %46915 = vmatprep.mubr.f32.mxu0 %v29255_v37  ;;  %v56537_v37 = vld [vmem:[#allocation25_spill] sm:$0xff] }
0x25d4   : > { %46916 = vmatmul.mubr.f32.vlgmr.msra.gmra.mrb[54].mxu0 %v29265_v44 }
0x25d5   : > { %50506 = vmatpush3.bf16.msra.mxu0 %v56533_v33  ;;  %46926 = vmatprep.mubr.f32.mxu0 %v29251_v38 }
0x25d6   : > { %50508 = vmatprep.subr.bf16.mxu0 %v56534_v17 }
0x25d9   : > { %50510 = vmatpush3.bf16.msra.mxu0 %v56534_v17 }
0x25da   : > { %50512 = vmatprep.subr.bf16.mxu0 %v56535_v45 }
0x25dc   : > { %46927 = vmatmul.mubr.f32.vlgmr.msra.gmra.mrb[54].mxu0 %v29261_v55 }
0x25dd   : > { %50514 = vmatpush3.bf16.msra.mxu0 %v56535_v45  ;;  %46937 = vmatprep.mubr.f32.mxu0 %v29252_v39 }
0x25de   : > { %50516 = vmatprep.subr.bf16.mxu0 %v56536_v12 }
0x25e1   : > { %50518 = vmatpush3.bf16.msra.mxu0 %v56536_v12 }
0x25e2   : > { %50520 = vmatprep.subr.bf16.mxu0 %v56531_v57 }
0x25e4   : > { %46938 = vmatmul.mubr.f32.vlgmr.msra.gmra.mrb[54].mxu0 %v29262_v43 }
0x25e5   : > { %50522 = vmatpush3.bf16.msra.mxu0 %v56531_v57  ;;  %46948 = vmatprep.mubr.f32.mxu0 %v29253_v0 }
0x25e6   : > { %50524 = vmatprep.subr.bf16.mxu0 %v56532_v49 }
0x25e9   : > { %50526 = vmatpush3.bf16.msra.mxu0 %v56532_v49 }
0x25ea   : > { %50528 = vmatprep.subr.bf16.mxu0 %v56537_v37 }
0x25ec   : > { %46949 = vmatmul.mubr.f32.vlgmr.msra.gmra.mrb[54].mxu0 %v29263_v34 }
0x25ed   : > { %50530 = vmatpush3.bf16.msra.mxu0 %v56537_v37  ;;  %46959 = vmatprep.mubr.f32.mxu0 %v29251_v38 }
0x25ee   : > { %50532 = vmatprep.subr.bf16.mxu0 %v56538_v41 }
0x25f1   : > { %50534 = vmatpush3.bf16.msra.mxu0 %v56538_v41 }
0x25f2   : > { %50536 = vmatprep.subr.bf16.mxu0 %v56531_v57 }
0x25f4   : > { %46960 = vmatmul.mubr.f32.vlgmr.msra.gmra.mrb[54].mxu0 %v29261_v55 }
0x25f5   : > { %50538 = vmatpush3.bf16.msra.mxu0 %v56531_v57  ;;  %46970 = vmatprep.mubr.f32.mxu0 %v29251_v38 }
0x25f6   : > { %50540 = vmatprep.subr.bf16.mxu0 %v56532_v49 }
0x25f9   : > { %50542 = vmatpush3.bf16.msra.mxu0 %v56532_v49 }
0x25fa   : > { %50544 = vmatprep.subr.bf16.mxu0 %v53118_v59 }
0x25fc   : > { %46971 = vmatmul.mubr.f32.vlgmr.msra.gmra.mrb[54].mxu0 %v29261_v55 }
0x25fd   : > { %50546 = vmatpush3.bf16.msra.mxu0 %v53118_v59 }
0x25fe   : > { %50548 = vmatprep.subr.bf16.mxu0 %v53128_v8 }
0x2601   : > { %50550 = vmatpush3.bf16.msra.mxu0 %v53128_v8 }
0x2602   : > { %50552 = vmatprep.subr.bf16.mxu0 %v56302_v56 }
0x2697   : > { %v46897_v39 = vpop.f32.mrb[46].mxu0 }
0x2698   : > { %v29716_v43 = vsel %vm973_vm1, %v46897_v39, 0  ;;  %v29130_v0 = vpop.f32.mrb[47].mxu0 }
0x2699   : > { %v29797_v38 = vand.u32 4294901760, %v29716_v43  ;;  %v29713_v34 = vsel %vm973_vm1, %v29130_v0, 0 }
0x269a   : > { %v29787_v54 = vand.u32 4294901760, %v29713_v34 }
0x269b   : > { %v29798_v44 = vsub.f32 %v29716_v43, %v29797_v38  ;;  %v46900_v41 = vpop.f32.mrb[48].mxu0 }
0x269c   : > { %v29788_v37 = vsub.f32 %v29713_v34, %v29787_v54  ;;  %v29142_v55 = vpop.f32.mrb[49].mxu0 }
0x269d   : > { %v29799_v12 = vand.u32 4294901760, %v29798_v44 }
0x269e   : > { %v29789_v45 = vand.u32 4294901760, %v29788_v37 }
0x269f   : > { %v29800_v17 = vsub.f32 %v29798_v44, %v29799_v12  ;;  %v55173_v33 = vpop.f32.mrb[50].mxu0 }
0x26a0   : > { %v55175_v49 = vpop.f32.mrb[51].mxu0  ;;  %v29790_v57 = vsub.f32 %v29788_v37, %v29789_v45 }
0x26a1   : > { %v29801_v2 = vand.u32 4294901760, %v29800_v17  ;;  %v30252_v17 = vsel %vm973_vm1, %v46900_v41, 0 }
0x26a2   : > { %v29791_v22 = vand.u32 4294901760, %v29790_v57 }
0x26a3   : > { %v55177_v39 = vpop.f32.mrb[52].mxu0 }
0x26a4   : > { %v55179_v42 = vpop.f32.mrb[53].mxu0  ;;  %46981 = vmatprep.mubr.f32.mxu0 %v29791_v22 }
0x26a5   : > { %46982 = vmatmul.mubr.f32.vlgmr.msra.gmra.mrb[54].mxu0 %v29801_v2  ;;  %v30249_v2 = vsel %vm973_vm1, %v29142_v55, 0  ;;  %v56541_v55 = vld [vmem:[#allocation37_spill] sm:$0xff] }
0x26a6   : > { %50554 = vmatpush3.bf16.msra.mxu0 %v56302_v56  ;;  %46992 = vmatprep.mubr.f32.mxu0 %v29787_v54  ;;  %v30323_v22 = vand.u32 4294901760, %v30249_v2 }
0x26a7   : > { %50556 = vmatprep.subr.bf16.mxu0 %v56303_v52 }
0x26a8   : > { %v30324_v57 = vsub.f32 %v30249_v2, %v30323_v22  ;;  %v30785_v2 = vsel %vm973_vm1, %v55175_v49, 0 }
0x26aa   : > { %50558 = vmatpush3.bf16.msra.mxu0 %v56303_v52 }
0x26ab   : > { %50560 = vmatprep.subr.bf16.mxu0 %v56304_v51 }
0x26ad   : > { %46993 = vmatmul.mubr.f32.vlgmr.msra.gmra.mrb[54].mxu0 %v29797_v38 }
0x26ae   : > { %50562 = vmatpush3.bf16.msra.mxu0 %v56304_v51  ;;  %47003 = vmatprep.mubr.f32.mxu0 %v29788_v37  ;;  %v30325_v37 = vand.u32 4294901760, %v30324_v57 }
0x26af   : > { %50564 = vmatprep.subr.bf16.mxu0 %v56305_v30 }
0x26b2   : > { %50566 = vmatpush3.bf16.msra.mxu0 %v56305_v30 }
0x26b3   : > { %50568 = vmatprep.subr.bf16.mxu0 %v53118_v59 }
0x26b5   : > { %47004 = vmatmul.mubr.f32.vlgmr.msra.gmra.mrb[54].mxu0 %v29798_v44  ;;  %v56539_v44 = vld [vmem:[#allocation35_spill] sm:$0xff] }
0x26b6   : > { %50570 = vmatpush3.bf16.msra.mxu0 %v53118_v59  ;;  %47014 = vmatprep.mubr.f32.mxu0 %v29789_v45  ;;  %v30333_v45 = vand.u32 4294901760, %v30252_v17 }
0x26b7   : > { %50572 = vmatprep.subr.bf16.mxu0 %v53128_v8 }
0x26b8   : > { %v30334_v43 = vsub.f32 %v30252_v17, %v30333_v45  ;;  %v56542_v17 = vld [vmem:[#allocation38_spill] sm:$0xff] }
0x26ba   : > { %50574 = vmatpush3.bf16.msra.mxu0 %v53128_v8  ;;  %v30335_v0 = vand.u32 4294901760, %v30334_v43 }
0x26bb   : > { %50576 = vmatprep.subr.bf16.mxu0 %v56306_v13 }
0x26bc   : > { %v30336_v34 = vsub.f32 %v30334_v43, %v30335_v0 }
0x26bd   : > { %47015 = vmatmul.mubr.f32.vlgmr.msra.gmra.mrb[54].mxu0 %v29799_v12  ;;  %v30326_v12 = vsub.f32 %v30324_v57, %v30325_v37 }
0x26be   : > { %50578 = vmatpush3.bf16.msra.mxu0 %v56306_v13  ;;  %47025 = vmatprep.mubr.f32.mxu0 %v29787_v54 }
0x26bf   : > { %50580 = vmatprep.subr.bf16.mxu0 %v56307_v27  ;;  %v30327_v41 = vand.u32 4294901760, %v30326_v12  ;;  %v56543_v12 = vld [vmem:[#allocation39_spill] sm:$0xff] }
0x26c2   : > { %50582 = vmatpush3.bf16.msra.mxu0 %v56307_v27 }
0x26c3   : > { %50584 = vmatprep.subr.bf16.mxu0 %v53118_v59 }
0x26c5   : > { %47026 = vmatmul.mubr.f32.vlgmr.msra.gmra.mrb[54].mxu0 %v29797_v38 }
0x26c6   : > { %50586 = vmatpush3.bf16.msra.mxu0 %v53118_v59  ;;  %47036 = vmatprep.mubr.f32.mxu0 %v29787_v54  ;;  %v30337_v54 = vand.u32 4294901760, %v30336_v34 }
0x26c7   : > { %50588 = vmatprep.subr.bf16.mxu0 %v53128_v8 }
0x26ca   : > { %50590 = vmatpush3.bf16.msra.mxu0 %v53128_v8 }
0x26cb   : > { %50592 = vmatprep.subr.bf16.mxu0 %v53212_v32 }
0x26cd   : > { %47037 = vmatmul.mubr.f32.vlgmr.msra.gmra.mrb[54].mxu0 %v29797_v38  ;;  %v56540_v38 = vld [vmem:[#allocation36_spill] sm:$0xff] }
0x26ce   : > { %50594 = vmatpush3.bf16.msra.mxu0 %v53212_v32  ;;  %47047 = vmatprep.mubr.f32.mxu0 %v30327_v41 }
0x26cf   : > { %50596 = vmatprep.subr.bf16.mxu0 %v53221_v63 }
0x26d2   : > { %50598 = vmatpush3.bf16.msra.mxu0 %v53221_v63 }
0x26d3   : > { %50600 = vmatprep.subr.bf16.mxu0 %v53229_v4 }
0x26d5   : > { %47048 = vmatmul.mubr.f32.vlgmr.msra.gmra.mrb[54].mxu0 %v30337_v54 }
0x26d6   : > { %50602 = vmatpush3.bf16.msra.mxu0 %v53229_v4  ;;  %47058 = vmatprep.mubr.f32.mxu0 %v30323_v22 }
0x26d7   : > { %50604 = vmatprep.subr.bf16.mxu0 %v56539_v44 }
0x26da   : > { %50606 = vmatpush3.bf16.msra.mxu0 %v56539_v44 }
0x26db   : > { %50608 = vmatprep.subr.bf16.mxu0 %v56540_v38 }
0x26dd   : > { %47059 = vmatmul.mubr.f32.vlgmr.msra.gmra.mrb[54].mxu0 %v30333_v45 }
0x26de   : > { %50610 = vmatpush3.bf16.msra.mxu0 %v56540_v38  ;;  %47069 = vmatprep.mubr.f32.mxu0 %v30324_v57  ;;  %v30859_v57 = vand.u32 4294901760, %v30785_v2 }
0x26df   : > { %50612 = vmatprep.subr.bf16.mxu0 %v56541_v55 }
0x26e2   : > { %50614 = vmatpush3.bf16.msra.mxu0 %v56541_v55  ;;  %v56547_v55 = vld [vmem:[#allocation43_spill] sm:$0xff] }
0x26e3   : > { %50616 = vmatprep.subr.bf16.mxu0 %v53212_v32 }
0x26e5   : > { %47070 = vmatmul.mubr.f32.vlgmr.msra.gmra.mrb[54].mxu0 %v30334_v43  ;;  %v30788_v43 = vsel %vm973_vm1, %v55173_v33, 0 }
0x26e6   : > { %50618 = vmatpush3.bf16.msra.mxu0 %v53212_v32  ;;  %47080 = vmatprep.mubr.f32.mxu0 %v30325_v37  ;;  %v30860_v37 = vsub.f32 %v30785_v2, %v30859_v57  ;;  %v30869_v41 = vand.u32 4294901760, %v30788_v43 }
0x26e7   : > { %50620 = vmatprep.subr.bf16.mxu0 %v53221_v63 }
0x26e8   : > { %v30861_v49 = vand.u32 4294901760, %v30860_v37 }
0x26ea   : > { %50622 = vmatpush3.bf16.msra.mxu0 %v53221_v63  ;;  %v30862_v34 = vsub.f32 %v30860_v37, %v30861_v49 }
0x26eb   : > { %50624 = vmatprep.subr.bf16.mxu0 %v56542_v17 }
0x26ec   : > { %v30863_v33 = vand.u32 4294901760, %v30862_v34  ;;  %v56549_v34 = vld [vmem:[#allocation45_spill] sm:$0xff] }
0x26ed   : > { %47081 = vmatmul.mubr.f32.vlgmr.msra.gmra.mrb[54].mxu0 %v30335_v0  ;;  %v30870_v0 = vsub.f32 %v30788_v43, %v30869_v41  ;;  %v56546_v43 = vld [vmem:[#allocation42_spill] sm:$0xff] }
0x26ee   : > { %50626 = vmatpush3.bf16.msra.mxu0 %v56542_v17  ;;  %47091 = vmatprep.mubr.f32.mxu0 %v30323_v22  ;;  %v56544_v17 = vld [vmem:[#allocation40_spill] sm:$0xff] }
0x26ef   : > { %50628 = vmatprep.subr.bf16.mxu0 %v56543_v12  ;;  %v30871_v54 = vand.u32 4294901760, %v30870_v0 }
0x26f1   : > { %v30872_v2 = vsub.f32 %v30870_v0, %v30871_v54 }
0x26f2   : > { %50630 = vmatpush3.bf16.msra.mxu0 %v56543_v12  ;;  %v56545_v12 = vld [vmem:[#allocation41_spill] sm:$0xff] }
0x26f3   : > { %50632 = vmatprep.subr.bf16.mxu0 %v53212_v32 }
0x26f5   : > { %47092 = vmatmul.mubr.f32.vlgmr.msra.gmra.mrb[54].mxu0 %v30333_v45 }
0x26f6   : > { %50634 = vmatpush3.bf16.msra.mxu0 %v53212_v32  ;;  %47102 = vmatprep.mubr.f32.mxu0 %v30323_v22  ;;  %v30873_v22 = vand.u32 4294901760, %v30872_v2  ;;  %v56550_v2 = vld [vmem:[#allocation46_spill] sm:$0xff] }
0x26f7   : > { %50636 = vmatprep.subr.bf16.mxu0 %v53221_v63 }
0x26fa   : > { %50638 = vmatpush3.bf16.msra.mxu0 %v53221_v63 }
0x26fb   : > { %50640 = vmatprep.subr.bf16.mxu0 %v56544_v17 }
0x26fd   : > { %47103 = vmatmul.mubr.f32.vlgmr.msra.gmra.mrb[54].mxu0 %v30333_v45  ;;  %v56548_v45 = vld [vmem:[#allocation44_spill] sm:$0xff] }
0x26fe   : > { %50642 = vmatpush3.bf16.msra.mxu0 %v56544_v17  ;;  %47113 = vmatprep.mubr.f32.mxu0 %v30863_v33  ;;  %v31321_v33 = vsel %vm973_vm1, %v55179_v42, 0 }
0x26ff   : > { %50644 = vmatprep.subr.bf16.mxu0 %v56545_v12 }
0x2702   : > { %50646 = vmatpush3.bf16.msra.mxu0 %v56545_v12 }
0x2703   : > { %50648 = vmatprep.subr.bf16.mxu0 %v56546_v43 }
0x2705   : > { %47114 = vmatmul.mubr.f32.vlgmr.msra.gmra.mrb[54].mxu0 %v30873_v22  ;;  %v56551_v22 = vld [vmem:[#allocation47_spill] sm:$0xff] }
0x2706   : > { %50650 = vmatpush3.bf16.msra.mxu0 %v56546_v43  ;;  %47124 = vmatprep.mubr.f32.mxu0 %v30859_v57  ;;  %v56555_v43 = vld [vmem:[#allocation51_spill] sm:$0xff] }
0x2707   : > { %50652 = vmatprep.subr.bf16.mxu0 %v56547_v55 }
0x270a   : > { %50654 = vmatpush3.bf16.msra.mxu0 %v56547_v55  ;;  %v56552_v55 = vld [vmem:[#allocation48_spill] sm:$0xff] }
0x270b   : > { %50656 = vmatprep.subr.bf16.mxu0 %v56548_v45 }
0x270d   : > { %47125 = vmatmul.mubr.f32.vlgmr.msra.gmra.mrb[54].mxu0 %v30869_v41 }
0x270e   : > { %50658 = vmatpush3.bf16.msra.mxu0 %v56548_v45  ;;  %47135 = vmatprep.mubr.f32.mxu0 %v30860_v37  ;;  %v31395_v37 = vand.u32 4294901760, %v31321_v33 }
0x270f   : > { %50660 = vmatprep.subr.bf16.mxu0 %v56549_v34 }
0x2712   : > { %50662 = vmatpush3.bf16.msra.mxu0 %v56549_v34 }
0x2713   : > { %50664 = vmatprep.subr.bf16.mxu0 %v56544_v17 }
0x2715   : > { %47136 = vmatmul.mubr.f32.vlgmr.msra.gmra.mrb[54].mxu0 %v30870_v0  ;;  %v31324_v0 = vsel %vm973_vm1, %v55177_v39, 0 }
0x2716   : > { %50666 = vmatpush3.bf16.msra.mxu0 %v56544_v17  ;;  %47146 = vmatprep.mubr.f32.mxu0 %v30861_v49  ;;  %v31396_v49 = vsub.f32 %v31321_v33, %v31395_v37  ;;  %v31405_v34 = vand.u32 4294901760, %v31324_v0 }
0x2717   : > { %50668 = vmatprep.subr.bf16.mxu0 %v56545_v12 }
0x2718   : > { %v31397_v42 = vand.u32 4294901760, %v31396_v49 }
0x271a   : > { %50670 = vmatpush3.bf16.msra.mxu0 %v56545_v12 }
0x271b   : > { %50672 = vmatprep.subr.bf16.mxu0 %v56550_v2 }
0x271d   : > { %47147 = vmatmul.mubr.f32.vlgmr.msra.gmra.mrb[54].mxu0 %v30871_v54  ;;  %v31406_v54 = vsub.f32 %v31324_v0, %v31405_v34  ;;  %v56554_v0 = vld [vmem:[#allocation50_spill] sm:$0xff] }
0x271e   : > { %50674 = vmatpush3.bf16.msra.mxu0 %v56550_v2  ;;  %47157 = vmatprep.mubr.f32.mxu0 %v30859_v57  ;;  %v31398_v2 = vsub.f32 %v31396_v49, %v31397_v42 }
0x271f   : > { %50676 = vmatprep.subr.bf16.mxu0 %v56551_v22  ;;  %v31407_v45 = vand.u32 4294901760, %v31406_v54 }
0x2720   : > { %v31399_v39 = vand.u32 4294901760, %v31398_v2  ;;  %v56557_v2 = vld [vmem:[#allocation53_spill] sm:$0xff] }
0x2721   : > { %v31408_v33 = vsub.f32 %v31406_v54, %v31407_v45 }
0x2722   : > { %50678 = vmatpush3.bf16.msra.mxu0 %v56551_v22  ;;  %v56553_v22 = vld [vmem:[#allocation49_spill] sm:$0xff] }
0x2723   : > { %50680 = vmatprep.subr.bf16.mxu0 %v56544_v17 }
0x2725   : > { %47158 = vmatmul.mubr.f32.vlgmr.msra.gmra.mrb[54].mxu0 %v30869_v41 }
0x2726   : > { %50682 = vmatpush3.bf16.msra.mxu0 %v56544_v17  ;;  %47168 = vmatprep.mubr.f32.mxu0 %v30859_v57  ;;  %v31409_v57 = vand.u32 4294901760, %v31408_v33 }
0x2727   : > { %50684 = vmatprep.subr.bf16.mxu0 %v56545_v12 }
0x272a   : > { %50686 = vmatpush3.bf16.msra.mxu0 %v56545_v12 }
0x272b   : > { %50688 = vmatprep.subr.bf16.mxu0 %v56552_v55 }
0x272d   : > { %47169 = vmatmul.mubr.f32.vlgmr.msra.gmra.mrb[54].mxu0 %v30869_v41  ;;  %v56556_v41 = vld [vmem:[#allocation52_spill] sm:$0xff] }
0x272e   : > { %50690 = vmatpush3.bf16.msra.mxu0 %v56552_v55  ;;  %47179 = vmatprep.mubr.f32.mxu0 %v31399_v39  ;;  %v56558_v39 = vld [vmem:[#allocation54_spill] sm:$0xff] }
0x272f   : > { %50692 = vmatprep.subr.bf16.mxu0 %v56553_v22 }
0x2732   : > { %50694 = vmatpush3.bf16.msra.mxu0 %v56553_v22 }
0x2733   : > { %50696 = vmatprep.subr.bf16.mxu0 %v56554_v0 }
0x2735   : > { %47180 = vmatmul.mubr.f32.vlgmr.msra.gmra.mrb[54].mxu0 %v31409_v57 }
0x2736   : > { %50698 = vmatpush3.bf16.msra.mxu0 %v56554_v0  ;;  %47190 = vmatprep.mubr.f32.mxu0 %v31395_v37 }
0x2737   : > { %50700 = vmatprep.subr.bf16.mxu0 %v56555_v43 }
0x273a   : > { %50702 = vmatpush3.bf16.msra.mxu0 %v56555_v43 }
0x273b   : > { %50704 = vmatprep.subr.bf16.mxu0 %v56556_v41 }
0x273d   : > { %47191 = vmatmul.mubr.f32.vlgmr.msra.gmra.mrb[54].mxu0 %v31405_v34 }
0x273e   : > { %50706 = vmatpush3.bf16.msra.mxu0 %v56556_v41  ;;  %47201 = vmatprep.mubr.f32.mxu0 %v31396_v49  ;;  %v56559_v49 = vld [vmem:[#allocation55_spill] sm:$0xff] }
0x273f   : > { %50708 = vmatprep.subr.bf16.mxu0 %v56557_v2 }
0x2742   : > { %50710 = vmatpush3.bf16.msra.mxu0 %v56557_v2 }
0x2743   : > { %50712 = vmatprep.subr.bf16.mxu0 %v56552_v55 }
0x2745   : > { %47202 = vmatmul.mubr.f32.vlgmr.msra.gmra.mrb[54].mxu0 %v31406_v54 }
0x2746   : > { %50714 = vmatpush3.bf16.msra.mxu0 %v56552_v55  ;;  %47212 = vmatprep.mubr.f32.mxu0 %v31397_v42  ;;  %v56560_v42 = vld [vmem:[#allocation29_spill] sm:$0xff] }
0x2747   : > { %50716 = vmatprep.subr.bf16.mxu0 %v56553_v22 }
0x274a   : > { %50718 = vmatpush3.bf16.msra.mxu0 %v56553_v22 }
0x274b   : > { %50720 = vmatprep.subr.bf16.mxu0 %v56558_v39 }
0x274d   : > { %47213 = vmatmul.mubr.f32.vlgmr.msra.gmra.mrb[54].mxu0 %v31407_v45 }
0x274e   : > { %50722 = vmatpush3.bf16.msra.mxu0 %v56558_v39  ;;  %47223 = vmatprep.mubr.f32.mxu0 %v31395_v37 }
0x274f   : > { %50724 = vmatprep.subr.bf16.mxu0 %v56559_v49 }
0x2752   : > { %50726 = vmatpush3.bf16.msra.mxu0 %v56559_v49 }
0x2753   : > { %50728 = vmatprep.subr.bf16.mxu0 %v56552_v55 }
0x2755   : > { %47224 = vmatmul.mubr.f32.vlgmr.msra.gmra.mrb[54].mxu0 %v31405_v34 }
0x2756   : > { %50730 = vmatpush3.bf16.msra.mxu0 %v56552_v55  ;;  %47234 = vmatprep.mubr.f32.mxu0 %v31395_v37 }
0x2757   : > { %50732 = vmatprep.subr.bf16.mxu0 %v56553_v22 }
0x275a   : > { %50734 = vmatpush3.bf16.msra.mxu0 %v56553_v22  ;;  %v31869_v22 = vpop.permute.xlu0 %31868 }
0x275b   : > { %51048 = vmatprep.subr.bf16.mxu0 %v53437_v40 }
0x275d   : > { %47235 = vmatmul.mubr.f32.vlgmr.msra.gmra.mrb[54].mxu0 %v31405_v34 }
0x275e   : > { %51050 = vmatpush3.bf16.msra.mxu0 %v53437_v40 }
0x275f   : > { %51052 = vmatprep.subr.bf16.mxu0 %v53447_v26 }
0x2762   : > { %51054 = vmatpush3.bf16.msra.mxu0 %v53447_v26 }
0x2763   : > { %51056 = vmatprep.subr.bf16.mxu0 %v53457_v60 }
0x2830   : > { %v47236_v45 = vpop.f32.mrb[54].mxu0 }
0x2831   : > { %v55288_v54 = vadd.f32 %v56560_v42, %v47236_v45  ;;  %v31844_v37 = vpop.f32.mrb[55].mxu0  ;;  %v31871_v45 = vpop.permute.xlu1 %31870 }
0x2832   : > { %v55291_v33 = vadd.f32 %v56560_v42, %v31844_v37 }
0x2833   : > { %v40595_v57 = vmul.f32 -1.442695, %v55288_v54 }
0x2834   : > { %v40594_v34 = vmul.f32 -1.442695, %v55291_v33 }
0x2835   : > { %52635 = vpow2.f32 %v40595_v57 }
0x2836   : > { %52637 = vpow2.f32 %v40594_v34 }
0x283f   : > { %v52636_v49 = vpop.eup %52635 }
0x2840   : > { %v52638_v39 = vpop.eup %52637  ;;  %v31863_v2 = vadd.f32 1.0, %v52636_v49 }
0x2841   : > { %v31862_v41 = vadd.f32 1.0, %v52638_v39 }
0x2842   : > { %52639 = vrcp.f32 %v31863_v2 }
0x2843   : > { %52641 = vrcp.f32 %v31862_v41 }
0x284c   : > { %v55295_v43 = vpop.eup %52639 }
0x284d   : > { %v55297_v0 = vpop.eup %52641  ;;  %v31875_v42 = vmul.f32 %v55295_v43, %v31871_v45 }
0x284e   : > { %v31874_v37 = vmul.f32 %v55297_v0, %v31869_v22 }
0x284f   : > { %31880 = vrot.lane.b32.xlu1 %v31875_v42, %s52742_s28 }
0x2850   : > { %31878 = vrot.lane.b32.xlu0 %v31874_v37, %s52742_s28 }
0x28c1   : > { %v31881_v57 = vpop.permute.xlu1 %31880 }
0x28c2   : > { %v31884_v49 = vsel %vm973_vm1, %v31881_v57, 0  ;;  %v31879_v39 = vpop.permute.xlu0 %31878  ;;  %v32427_v57 = vsub.f32 1.0, %v55295_v43 }
0x28c3   : > { %v31965_v2 = vand.u32 4294901760, %v31884_v49  ;;  %v31882_v41 = vsel %vm973_vm1, %v31879_v39, 0 }
0x28c4   : > { %v31955_v34 = vand.u32 4294901760, %v31882_v41 }
0x28c5   : > { %v31966_v55 = vsub.f32 %v31884_v49, %v31965_v2  ;;  %v32426_v49 = vsub.f32 1.0, %v55297_v0 }
0x28c6   : > { %v31956_v12 = vsub.f32 %v31882_v41, %v31955_v34 }
0x28c7   : > { %v31967_v17 = vand.u32 4294901760, %v31966_v55 }
0x28c8   : > { %v31957_v38 = vand.u32 4294901760, %v31956_v12 }
0x28c9   : > { %v31968_v44 = vsub.f32 %v31966_v55, %v31967_v17 }
0x28ca   : > { %v31958_v45 = vsub.f32 %v31956_v12, %v31957_v38 }
0x28cb   : > { %v31969_v22 = vand.u32 4294901760, %v31968_v44 }
0x28cc   : > { %v31959_v4 = vand.u32 4294901760, %v31958_v45 }
0x28ce   : > { %47245 = vmatprep.mubr.f32.mxu1 %v31959_v4 }
0x28cf   : > { %47246 = vmatmul.mubr.f32.vlgmr.msra.gmra.mrb[54].mxu1 %v31969_v22 }
0x28d0   : > { %50746 = vmatpush3.bf16.msra.mxu1 %v53457_v60  ;;  %47256 = vmatprep.mubr.f32.mxu1 %v31955_v34 }
0x28d1   : > { %50748 = vmatprep.subr.bf16.mxu1 %v53462_v48 }
0x28d4   : > { %50750 = vmatpush3.bf16.msra.mxu1 %v53462_v48 }
0x28d5   : > { %50752 = vmatprep.subr.bf16.mxu1 %v53464_v1 }
0x28d7   : > { %47257 = vmatmul.mubr.f32.vlgmr.msra.gmra.mrb[54].mxu1 %v31965_v2 }
0x28d8   : > { %50754 = vmatpush3.bf16.msra.mxu1 %v53464_v1  ;;  %47267 = vmatprep.mubr.f32.mxu1 %v31956_v12 }
0x28d9   : > { %50756 = vmatprep.subr.bf16.mxu1 %v53466_v15 }
0x28dc   : > { %50758 = vmatpush3.bf16.msra.mxu1 %v53466_v15 }
0x28dd   : > { %50760 = vmatprep.subr.bf16.mxu1 %v53437_v40 }
0x28df   : > { %47268 = vmatmul.mubr.f32.vlgmr.msra.gmra.mrb[54].mxu1 %v31966_v55 }
0x28e0   : > { %50762 = vmatpush3.bf16.msra.mxu1 %v53437_v40  ;;  %47278 = vmatprep.mubr.f32.mxu1 %v31957_v38 }
0x28e1   : > { %50764 = vmatprep.subr.bf16.mxu1 %v53447_v26 }
0x28e4   : > { %50766 = vmatpush3.bf16.msra.mxu1 %v53447_v26 }
0x28e5   : > { %50768 = vmatprep.subr.bf16.mxu1 %v53468_v36 }
0x28e7   : > { %47279 = vmatmul.mubr.f32.vlgmr.msra.gmra.mrb[54].mxu1 %v31967_v17 }
0x28e8   : > { %50770 = vmatpush3.bf16.msra.mxu1 %v53468_v36  ;;  %47289 = vmatprep.mubr.f32.mxu1 %v31955_v34 }
0x28e9   : > { %50772 = vmatprep.subr.bf16.mxu1 %v53470_v7 }
0x28ec   : > { %50774 = vmatpush3.bf16.msra.mxu1 %v53470_v7 }
0x28ed   : > { %50776 = vmatprep.subr.bf16.mxu1 %v53437_v40 }
0x28ef   : > { %47290 = vmatmul.mubr.f32.vlgmr.msra.gmra.mrb[54].mxu1 %v31965_v2 }
0x28f0   : > { %50778 = vmatpush3.bf16.msra.mxu1 %v53437_v40  ;;  %47300 = vmatprep.mubr.f32.mxu1 %v31955_v34 }
0x28f1   : > { %50780 = vmatprep.subr.bf16.mxu1 %v53447_v26 }
0x28f4   : > { %50782 = vmatpush3.bf16.msra.mxu1 %v53447_v26 }
0x28f7   : > { %47301 = vmatmul.mubr.f32.vlgmr.msra.gmra.mrb[54].mxu1 %v31965_v2  ;;  %v32429_v2 = vmul.f32 %v32427_v57, %v55079_v47 }
0x28f8   : > { %47307 = vmatprep.mubr.f32.mxu1 %v56327_v31 }
0x29ca   : > { %v47302_v4 = vpop.f32.mrb[54].mxu1 }
0x29cb   : > { %32418 = vrot.lane.b32.xlu1 %v47302_v4, %s52743_s29  ;;  %v32404_v44 = vpop.f32.mrb[55].mxu1 }
0x29cc   : > { %32416 = vrot.lane.b32.xlu0 %v32404_v44, %s52743_s29 }
0x2a3d   : > { %v32419_v38 = vpop.permute.xlu1 %32418 }
0x2a3e   : > { %v32423_v55 = vadd.f32 %v55288_v54, %v32419_v38  ;;  %v32417_v17 = vpop.permute.xlu0 %32416 }
0x2a3f   : > { %v32422_v12 = vadd.f32 %v55291_v33, %v32417_v17  ;;  %v32428_v33 = vmul.f32 %v32426_v49, %v55081_v25 }
0x2a40   : > { %52643 = vtanh.f32 %v32423_v55 }
0x2a41   : > { %52645 = vtanh.f32 %v32422_v12 }
0x2a4a   : > { %v52644_v42 = vpop.eup %52643 }
0x2a4b   : > { %v52646_v37 = vpop.eup %52645  ;;  %32434 = vrot.lane.b32.xlu1 %v52644_v42, %s52743_s29 }
0x2a4c   : > { %32432 = vrot.lane.b32.xlu0 %v52646_v37, %s52743_s29 }
0x2abd   : > { %v32435_v39 = vpop.permute.xlu1 %32434 }
0x2abe   : > { %v32439_v54 = vmul.f32 %v55295_v43, %v32435_v39  ;;  %v32433_v41 = vpop.permute.xlu0 %32432  ;;  %v56561_v39 = vld [vmem:[#allocation6_spill] sm:$0xff] }
0x2abf   : > { %v32438_v34 = vmul.f32 %v55297_v0, %v32433_v41  ;;  %v56564_v41 = vld [vmem:[#allocation10_spill] sm:$0xff] }
0x2ac0   : > { %v55337_v45 = vadd.f32 %v32439_v54, %v32429_v2  ;;  %v56562_v2 = vld [vmem:[#allocation7_spill] sm:$0xff]  ;;  %v56563_v54 = vld [vmem:[#allocation8_spill] sm:$0xff] }
0x2ac1   : > { %v55339_v22 = vadd.f32 %v32438_v34, %v32428_v33  ;;  %v56565_v33 = vld [vmem:[#allocation12_spill] sm:$0xff]  ;;  %v56566_v34 = vld [vmem:[#allocation14_spill] sm:$0xff] }
0x2ac2   : > { %v32446_v4 = vand.u32 4294901760, %v55337_v45  ;;  %35896 = vrot.lane.b32.xlu1 %v55337_v45, %s52741_s7 }
0x2ac3   : > { %v32443_v44 = vand.u32 4294901760, %v55339_v22  ;;  %35894 = vrot.lane.b32.xlu0 %v55339_v22, %s52741_s7 }
0x2ac4   : > { %v32598_v47 = vsub.f32 %v55337_v45, %v32446_v4 }
0x2ac5   : > { %v50783_v43 = vpack.c.bf16 %v32446_v4, %v32443_v44  ;;  %v32591_v25 = vsub.f32 %v55339_v22, %v32443_v44  ;;  %v56567_v4 = vld [vmem:[#allocation16_spill] sm:$0xff]  ;;  %v56568_v44 = vld [vmem:[#allocation18_spill] sm:$0xff] }
0x2ac6   : > { %v32599_v0 = vand.u32 4294901760, %v32598_v47 }
0x2ac7   : > { %50784 = vmatprep.subr.bf16.mxu1 %v50783_v43  ;;  %v32592_v38 = vand.u32 4294901760, %v32591_v25  ;;  %v50791_v57 = vpack.c.bf16 %v32598_v47, %v32591_v25 }
0x2ac8   : > { %50786 = vmatpush3.bf16.msra.mxu1 %v50783_v43  ;;  %v32600_v55 = vsub.f32 %v32598_v47, %v32599_v0  ;;  %v56569_v47 = vld [vmem:[#allocation19_spill] sm:$0xff] }
0x2ac9   : > { %v32593_v17 = vsub.f32 %v32591_v25, %v32592_v38  ;;  %v50799_v49 = vpack.c.bf16 %v32599_v0, %v32592_v38  ;;  %v33203_v25 = vsel %vm973_vm1, %v55339_v22, 0  ;;  %v33206_v0 = vsel %vm973_vm1, %v55337_v45, 0 }
0x2aca   : > { %v32601_v12 = vand.u32 4294901760, %v32600_v55  ;;  %v33277_v38 = vand.u32 4294901760, %v33203_v25 }
0x2acb   : > { %47308 = vmatmul.mubr.f32.vlgmr.msra.gmra.mrb[56].mxu1 %v52929_v46  ;;  %v32594_v42 = vand.u32 4294901760, %v32593_v17 }
0x2acc   : > { %47310 = vmatprep.mubr.f32.mxu1 %v52939_v50  ;;  %v33278_v55 = vsub.f32 %v33203_v25, %v33277_v38 }
0x2acd   : > { %v50787_v37 = vpack.c.bf16 %v32601_v12, %v32594_v42  ;;  %v56570_v12 = vld [vmem:[#allocation20_spill] sm:$0xff] }
0x2ace   : > { %v33279_v42 = vand.u32 4294901760, %v33278_v55 }
0x2acf   : > { %47311 = vmatmul.mubr.f32.gmra.mrb[58].mxu1 %v52958_v58  ;;  %50788 = vmatprep.subr.bf16.mxu1 %v50787_v37 }
0x2ad0   : > { %50790 = vmatpush3.bf16.msra.mxu1 %v50787_v37  ;;  %47313 = vmatprep.mubr.f32.mxu1 %v52963_v62 }
0x2ad1   : > { %50792 = vmatprep.subr.bf16.mxu1 %v50791_v57 }
0x2ad3   : > { %47314 = vmatmul.mubr.f32.gmra.mrb[60].mxu1 %v52975_v3 }
0x2ad4   : > { %47316 = vmatprep.mubr.f32.mxu1 %v52980_v5 }
0x2ad7   : > { %47317 = vmatmul.mubr.f32.gmra.mrb[62].mxu1 %v52985_v6 }
0x2ad8   : > { %47323 = vmatprep.mubr.f32.mxu1 %v52838_v9 }
0x2adb   : > { %47324 = vmatmul.mubr.f32.vlgmr.msra.gmra.mrb[56].mxu1 %v52840_v10 }
0x2adc   : > { %50794 = vmatpush3.bf16.msra.mxu1 %v50791_v57  ;;  %47326 = vmatprep.mubr.f32.mxu1 %v52842_v11  ;;  %v56571_v57 = vld [vmem:[#allocation21_spill] sm:$0xff] }
0x2add   : > { %50796 = vmatprep.subr.bf16.mxu1 %v50783_v43 }
0x2adf   : > { %47327 = vmatmul.mubr.f32.gmra.mrb[58].mxu1 %v52848_v14 }
0x2ae0   : > { %47329 = vmatprep.mubr.f32.mxu1 %v52862_v21 }
0x2ae3   : > { %47330 = vmatmul.mubr.f32.gmra.mrb[60].mxu1 %v52873_v23 }
0x2ae4   : > { %47332 = vmatprep.mubr.f32.mxu1 %v52875_v24 }
0x2ae7   : > { %47333 = vmatmul.mubr.f32.gmra.mrb[62].mxu1 %v52946_v53 }
0x2ae8   : > { %47339 = vmatprep.mubr.f32.mxu1 %v52854_v18 }
0x2aeb   : > { %47340 = vmatmul.mubr.f32.vlgmr.msra.gmra.mrb[56].mxu1 %v52857_v19 }
0x2aec   : > { %50798 = vmatpush3.bf16.msra.mxu1 %v50783_v43  ;;  %47342 = vmatprep.mubr.f32.mxu1 %v52860_v20 }
0x2aed   : > { %50800 = vmatprep.subr.bf16.mxu1 %v50799_v49 }
0x2aef   : > { %47343 = vmatmul.mubr.f32.gmra.mrb[58].mxu1 %v56366_v28 }
0x2af0   : > { %47345 = vmatprep.mubr.f32.mxu1 %v56405_v29 }
0x2af3   : > { %47346 = vmatmul.mubr.f32.gmra.mrb[60].mxu1 %v56444_v16 }
0x2af4   : > { %47348 = vmatprep.mubr.f32.mxu1 %v56483_v61 }
0x2af7   : > { %47349 = vmatmul.mubr.f32.gmra.mrb[62].mxu1 %v56522_v35 }
0x2af8   : > { %47355 = vmatprep.mubr.f32.mxu1 %v56561_v39 }
0x2afb   : > { %47356 = vmatmul.mubr.f32.vlgmr.msra.gmra.mrb[56].mxu1 %v56562_v2 }
0x2afc   : > { %50802 = vmatpush3.bf16.msra.mxu1 %v50799_v49  ;;  %47358 = vmatprep.mubr.f32.mxu1 %v56563_v54  ;;  %v33280_v49 = vsub.f32 %v33278_v55, %v33279_v42 }
0x2afd   : > { %50804 = vmatprep.subr.bf16.mxu1 %v50783_v43 }
0x2aff   : > { %47359 = vmatmul.mubr.f32.gmra.mrb[58].mxu1 %v56564_v41 }
0x2b00   : > { %47361 = vmatprep.mubr.f32.mxu1 %v56565_v33  ;;  %v56574_v33 = vld [vmem:[#allocation24_spill] sm:$0xff] }
0x2b03   : > { %47362 = vmatmul.mubr.f32.gmra.mrb[60].mxu1 %v56566_v34  ;;  %v56573_v34 = vld [vmem:[#allocation23_spill] sm:$0xff] }
0x2b04   : > { %47364 = vmatprep.mubr.f32.mxu1 %v56567_v4  ;;  %v56572_v4 = vld [vmem:[#allocation22_spill] sm:$0xff] }
0x2b07   : > { %47365 = vmatmul.mubr.f32.gmra.mrb[62].mxu1 %v56568_v44  ;;  %v33281_v44 = vand.u32 4294901760, %v33280_v49 }
0x2b08   : > { %47371 = vmatprep.mubr.f32.mxu1 %v52838_v9 }
0x2b0b   : > { %47372 = vmatmul.mubr.f32.vlgmr.msra.gmra.mrb[56].mxu1 %v52840_v10 }
0x2b0c   : > { %50806 = vmatpush3.bf16.msra.mxu1 %v50783_v43  ;;  %47374 = vmatprep.mubr.f32.mxu1 %v52842_v11  ;;  %v33287_v43 = vand.u32 4294901760, %v33206_v0 }
0x2b0d   : > { %50808 = vmatprep.subr.bf16.mxu1 %v56569_v47 }
0x2b0e   : > { %v33288_v17 = vsub.f32 %v33206_v0, %v33287_v43 }
0x2b0f   : > { %47375 = vmatmul.mubr.f32.gmra.mrb[58].mxu1 %v52848_v14 }
0x2b10   : > { %47377 = vmatprep.mubr.f32.mxu1 %v52862_v21  ;;  %v33289_v37 = vand.u32 4294901760, %v33288_v17 }
0x2b12   : > { %v33290_v25 = vsub.f32 %v33288_v17, %v33289_v37 }
0x2b13   : > { %47378 = vmatmul.mubr.f32.gmra.mrb[60].mxu1 %v52873_v23 }
0x2b14   : > { %47380 = vmatprep.mubr.f32.mxu1 %v52875_v24  ;;  %v33291_v0 = vand.u32 4294901760, %v33290_v25 }
0x2b17   : > { %47381 = vmatmul.mubr.f32.gmra.mrb[62].mxu1 %v52946_v53 }
0x2b18   : > { %47387 = vmatprep.mubr.f32.mxu1 %v52838_v9 }
0x2b1b   : > { %47388 = vmatmul.mubr.f32.vlgmr.msra.gmra.mrb[56].mxu1 %v52840_v10 }
0x2b1c   : > { %47390 = vmatprep.mubr.f32.mxu1 %v52842_v11  ;;  %50810 = vmatpush3.bf16.msra.mxu1 %v56569_v47 }
0x2b1d   : > { %50812 = vmatprep.subr.bf16.mxu1 %v56570_v12 }
0x2b1f   : > { %47391 = vmatmul.mubr.f32.gmra.mrb[58].mxu1 %v52848_v14 }
0x2b20   : > { %47393 = vmatprep.mubr.f32.mxu1 %v52862_v21  ;;  %50814 = vmatpush3.bf16.msra.mxu1 %v56570_v12 }
0x2b21   : > { %50816 = vmatprep.subr.bf16.mxu1 %v56571_v57 }
0x2b23   : > { %47394 = vmatmul.mubr.f32.gmra.mrb[60].mxu1 %v52873_v23 }
0x2b24   : > { %47396 = vmatprep.mubr.f32.mxu1 %v52875_v24 }
0x2b27   : > { %47397 = vmatmul.mubr.f32.gmra.mrb[62].mxu1 %v52946_v53 }
0x2b28   : > { %47407 = vmatprep.mubr.f32.mxu1 %v33281_v44  ;;  %v56575_v44 = vld [vmem:[#allocation25_spill] sm:$0xff] }
0x2b2b   : > { %47408 = vmatmul.mubr.f32.vlgmr.msra.gmra.mrb[64].mxu1 %v33291_v0 }
0x2b2c   : > { %50818 = vmatpush3.bf16.msra.mxu1 %v56571_v57  ;;  %47418 = vmatprep.mubr.f32.mxu1 %v33277_v38 }
0x2b2d   : > { %50820 = vmatprep.subr.bf16.mxu1 %v56572_v4 }
0x2b30   : > { %50822 = vmatpush3.bf16.msra.mxu1 %v56572_v4 }
0x2b31   : > { %50824 = vmatprep.subr.bf16.mxu1 %v56573_v34 }
0x2b33   : > { %47419 = vmatmul.mubr.f32.vlgmr.msra.gmra.mrb[64].mxu1 %v33287_v43 }
0x2b34   : > { %50826 = vmatpush3.bf16.msra.mxu1 %v56573_v34  ;;  %47429 = vmatprep.mubr.f32.mxu1 %v33278_v55  ;;  %v56576_v55 = vld [vmem:[#allocation26_spill] sm:$0xff] }
0x2b35   : > { %50828 = vmatprep.subr.bf16.mxu1 %v56574_v33 }
0x2b38   : > { %50830 = vmatpush3.bf16.msra.mxu1 %v56574_v33 }
0x2b39   : > { %50832 = vmatprep.subr.bf16.mxu1 %v56569_v47 }
0x2b3b   : > { %47430 = vmatmul.mubr.f32.vlgmr.msra.gmra.mrb[64].mxu1 %v33288_v17 }
0x2b3c   : > { %50834 = vmatpush3.bf16.msra.mxu1 %v56569_v47  ;;  %47440 = vmatprep.mubr.f32.mxu1 %v33279_v42 }
0x2b3d   : > { %50836 = vmatprep.subr.bf16.mxu1 %v56570_v12 }
0x2b40   : > { %50838 = vmatpush3.bf16.msra.mxu1 %v56570_v12 }
0x2b41   : > { %50840 = vmatprep.subr.bf16.mxu1 %v56575_v44 }
0x2b43   : > { %47441 = vmatmul.mubr.f32.vlgmr.msra.gmra.mrb[64].mxu1 %v33289_v37 }
0x2b44   : > { %50842 = vmatpush3.bf16.msra.mxu1 %v56575_v44  ;;  %47451 = vmatprep.mubr.f32.mxu1 %v33277_v38 }
0x2b45   : > { %50844 = vmatprep.subr.bf16.mxu1 %v56576_v55 }
0x2b48   : > { %50846 = vmatpush3.bf16.msra.mxu1 %v56576_v55 }
0x2b49   : > { %50848 = vmatprep.subr.bf16.mxu1 %v56569_v47 }
0x2b4b   : > { %47452 = vmatmul.mubr.f32.vlgmr.msra.gmra.mrb[64].mxu1 %v33287_v43 }
0x2b4c   : > { %50850 = vmatpush3.bf16.msra.mxu1 %v56569_v47  ;;  %47462 = vmatprep.mubr.f32.mxu1 %v33277_v38 }
0x2b4d   : > { %50852 = vmatprep.subr.bf16.mxu1 %v56570_v12 }
0x2b50   : > { %50854 = vmatpush3.bf16.msra.mxu1 %v56570_v12 }
0x2b51   : > { %50856 = vmatprep.subr.bf16.mxu1 %v53118_v59 }
0x2b53   : > { %47463 = vmatmul.mubr.f32.vlgmr.msra.gmra.mrb[64].mxu1 %v33287_v43 }
0x2b54   : > { %50858 = vmatpush3.bf16.msra.mxu1 %v53118_v59 }
0x2b55   : > { %50860 = vmatprep.subr.bf16.mxu1 %v53128_v8 }
0x2b58   : > { %50862 = vmatpush3.bf16.msra.mxu1 %v53128_v8 }
0x2b59   : > { %50864 = vmatprep.subr.bf16.mxu1 %v56302_v56 }
0x2bee   : > { %v47389_v17 = vpop.f32.mrb[56].mxu1 }
0x2bef   : > { %v33742_v42 = vsel %vm973_vm1, %v47389_v17, 0  ;;  %v33156_v37 = vpop.f32.mrb[57].mxu1 }
0x2bf0   : > { %v33823_v38 = vand.u32 4294901760, %v33742_v42  ;;  %v33739_v49 = vsel %vm973_vm1, %v33156_v37, 0 }
0x2bf1   : > { %v33813_v25 = vand.u32 4294901760, %v33739_v49 }
0x2bf2   : > { %v33824_v0 = vsub.f32 %v33742_v42, %v33823_v38  ;;  %v47392_v55 = vpop.f32.mrb[58].mxu1 }
0x2bf3   : > { %v33814_v44 = vsub.f32 %v33739_v49, %v33813_v25  ;;  %v33168_v43 = vpop.f32.mrb[59].mxu1 }
0x2bf4   : > { %v33825_v33 = vand.u32 4294901760, %v33824_v0 }
0x2bf5   : > { %v33815_v34 = vand.u32 4294901760, %v33814_v44 }
0x2bf6   : > { %v33826_v4 = vsub.f32 %v33824_v0, %v33825_v33  ;;  %v55431_v57 = vpop.f32.mrb[60].mxu1 }
0x2bf7   : > { %v55433_v12 = vpop.f32.mrb[61].mxu1  ;;  %v33816_v47 = vsub.f32 %v33814_v44, %v33815_v34 }
0x2bf8   : > { %v33827_v54 = vand.u32 4294901760, %v33826_v4  ;;  %v34278_v4 = vsel %vm973_vm1, %v47392_v55, 0 }
0x2bf9   : > { %v33817_v41 = vand.u32 4294901760, %v33816_v47 }
0x2bfa   : > { %v55435_v17 = vpop.f32.mrb[62].mxu1 }
0x2bfb   : > { %v55437_v2 = vpop.f32.mrb[63].mxu1  ;;  %47473 = vmatprep.mubr.f32.mxu1 %v33817_v41 }
0x2bfc   : > { %47474 = vmatmul.mubr.f32.vlgmr.msra.gmra.mrb[64].mxu1 %v33827_v54  ;;  %v34275_v54 = vsel %vm973_vm1, %v33168_v43, 0  ;;  %v56578_v43 = vld [vmem:[#allocation35_spill] sm:$0xff] }
0x2bfd   : > { %50866 = vmatpush3.bf16.msra.mxu1 %v56302_v56  ;;  %47484 = vmatprep.mubr.f32.mxu1 %v33813_v25  ;;  %v34349_v41 = vand.u32 4294901760, %v34275_v54 }
0x2bfe   : > { %50868 = vmatprep.subr.bf16.mxu1 %v56303_v52 }
0x2bff   : > { %v34350_v47 = vsub.f32 %v34275_v54, %v34349_v41  ;;  %v56580_v54 = vld [vmem:[#allocation37_spill] sm:$0xff] }
0x2c01   : > { %50870 = vmatpush3.bf16.msra.mxu1 %v56303_v52 }
0x2c02   : > { %50872 = vmatprep.subr.bf16.mxu1 %v56304_v51 }
0x2c04   : > { %47485 = vmatmul.mubr.f32.vlgmr.msra.gmra.mrb[64].mxu1 %v33823_v38 }
0x2c05   : > { %50874 = vmatpush3.bf16.msra.mxu1 %v56304_v51  ;;  %47495 = vmatprep.mubr.f32.mxu1 %v33814_v44  ;;  %v34351_v44 = vand.u32 4294901760, %v34350_v47 }
0x2c06   : > { %50876 = vmatprep.subr.bf16.mxu1 %v56305_v30 }
0x2c09   : > { %50878 = vmatpush3.bf16.msra.mxu1 %v56305_v30 }
0x2c0a   : > { %50880 = vmatprep.subr.bf16.mxu1 %v53118_v59 }
0x2c0c   : > { %47496 = vmatmul.mubr.f32.vlgmr.msra.gmra.mrb[64].mxu1 %v33824_v0  ;;  %v56577_v0 = vld [vmem:[#allocation34_spill] sm:$0xff] }
0x2c0d   : > { %50882 = vmatpush3.bf16.msra.mxu1 %v53118_v59  ;;  %47506 = vmatprep.mubr.f32.mxu1 %v33815_v34  ;;  %v34359_v34 = vand.u32 4294901760, %v34278_v4 }
0x2c0e   : > { %50884 = vmatprep.subr.bf16.mxu1 %v53128_v8 }
0x2c0f   : > { %v34360_v42 = vsub.f32 %v34278_v4, %v34359_v34  ;;  %v34811_v4 = vsel %vm973_vm1, %v55433_v12, 0 }
0x2c11   : > { %50886 = vmatpush3.bf16.msra.mxu1 %v53128_v8  ;;  %v34361_v37 = vand.u32 4294901760, %v34360_v42 }
0x2c12   : > { %50888 = vmatprep.subr.bf16.mxu1 %v56306_v13 }
0x2c13   : > { %v34362_v49 = vsub.f32 %v34360_v42, %v34361_v37 }
0x2c14   : > { %47507 = vmatmul.mubr.f32.vlgmr.msra.gmra.mrb[64].mxu1 %v33825_v33  ;;  %v34352_v33 = vsub.f32 %v34350_v47, %v34351_v44 }
0x2c15   : > { %50890 = vmatpush3.bf16.msra.mxu1 %v56306_v13  ;;  %47517 = vmatprep.mubr.f32.mxu1 %v33813_v25 }
0x2c16   : > { %50892 = vmatprep.subr.bf16.mxu1 %v56307_v27  ;;  %v34353_v55 = vand.u32 4294901760, %v34352_v33  ;;  %v56581_v33 = vld [vmem:[#allocation38_spill] sm:$0xff] }
0x2c19   : > { %50894 = vmatpush3.bf16.msra.mxu1 %v56307_v27 }
0x2c1a   : > { %50896 = vmatprep.subr.bf16.mxu1 %v53118_v59 }
0x2c1c   : > { %47518 = vmatmul.mubr.f32.vlgmr.msra.gmra.mrb[64].mxu1 %v33823_v38 }
0x2c1d   : > { %50898 = vmatpush3.bf16.msra.mxu1 %v53118_v59  ;;  %47528 = vmatprep.mubr.f32.mxu1 %v33813_v25  ;;  %v34363_v25 = vand.u32 4294901760, %v34362_v49 }
0x2c1e   : > { %50900 = vmatprep.subr.bf16.mxu1 %v53128_v8 }
0x2c21   : > { %50902 = vmatpush3.bf16.msra.mxu1 %v53128_v8 }
0x2c22   : > { %50904 = vmatprep.subr.bf16.mxu1 %v53212_v32 }
0x2c24   : > { %47529 = vmatmul.mubr.f32.vlgmr.msra.gmra.mrb[64].mxu1 %v33823_v38  ;;  %v56579_v38 = vld [vmem:[#allocation36_spill] sm:$0xff] }
0x2c25   : > { %50906 = vmatpush3.bf16.msra.mxu1 %v53212_v32  ;;  %47539 = vmatprep.mubr.f32.mxu1 %v34353_v55  ;;  %v56582_v55 = vld [vmem:[#allocation39_spill] sm:$0xff] }
0x2c26   : > { %50908 = vmatprep.subr.bf16.mxu1 %v53221_v63 }
0x2c29   : > { %50910 = vmatpush3.bf16.msra.mxu1 %v53221_v63 }
0x2c2a   : > { %50912 = vmatprep.subr.bf16.mxu1 %v56577_v0 }
0x2c2c   : > { %47540 = vmatmul.mubr.f32.vlgmr.msra.gmra.mrb[64].mxu1 %v34363_v25 }
0x2c2d   : > { %50914 = vmatpush3.bf16.msra.mxu1 %v56577_v0  ;;  %47550 = vmatprep.mubr.f32.mxu1 %v34349_v41 }
0x2c2e   : > { %50916 = vmatprep.subr.bf16.mxu1 %v56578_v43 }
0x2c31   : > { %50918 = vmatpush3.bf16.msra.mxu1 %v56578_v43 }
0x2c32   : > { %50920 = vmatprep.subr.bf16.mxu1 %v56579_v38 }
0x2c34   : > { %47551 = vmatmul.mubr.f32.vlgmr.msra.gmra.mrb[64].mxu1 %v34359_v34 }
0x2c35   : > { %50922 = vmatpush3.bf16.msra.mxu1 %v56579_v38  ;;  %47561 = vmatprep.mubr.f32.mxu1 %v34350_v47  ;;  %v34885_v47 = vand.u32 4294901760, %v34811_v4  ;;  %v56586_v38 = vld [vmem:[#allocation43_spill] sm:$0xff] }
0x2c36   : > { %50924 = vmatprep.subr.bf16.mxu1 %v56580_v54 }
0x2c39   : > { %50926 = vmatpush3.bf16.msra.mxu1 %v56580_v54  ;;  %v56583_v54 = vld [vmem:[#allocation40_spill] sm:$0xff] }
0x2c3a   : > { %50928 = vmatprep.subr.bf16.mxu1 %v53212_v32 }
0x2c3c   : > { %47562 = vmatmul.mubr.f32.vlgmr.msra.gmra.mrb[64].mxu1 %v34360_v42  ;;  %v34814_v42 = vsel %vm973_vm1, %v55431_v57, 0 }
0x2c3d   : > { %50930 = vmatpush3.bf16.msra.mxu1 %v53212_v32  ;;  %47572 = vmatprep.mubr.f32.mxu1 %v34351_v44  ;;  %v34886_v44 = vsub.f32 %v34811_v4, %v34885_v47  ;;  %v34895_v49 = vand.u32 4294901760, %v34814_v42 }
0x2c3e   : > { %50932 = vmatprep.subr.bf16.mxu1 %v53221_v63 }
0x2c3f   : > { %v34887_v12 = vand.u32 4294901760, %v34886_v44 }
0x2c41   : > { %50934 = vmatpush3.bf16.msra.mxu1 %v53221_v63  ;;  %v34888_v25 = vsub.f32 %v34886_v44, %v34887_v12 }
0x2c42   : > { %50936 = vmatprep.subr.bf16.mxu1 %v56581_v33 }
0x2c43   : > { %v34889_v57 = vand.u32 4294901760, %v34888_v25  ;;  %v56588_v25 = vld [vmem:[#allocation45_spill] sm:$0xff] }
0x2c44   : > { %47573 = vmatmul.mubr.f32.vlgmr.msra.gmra.mrb[64].mxu1 %v34361_v37  ;;  %v34896_v37 = vsub.f32 %v34814_v42, %v34895_v49  ;;  %v56585_v42 = vld [vmem:[#allocation42_spill] sm:$0xff] }
0x2c45   : > { %50938 = vmatpush3.bf16.msra.mxu1 %v56581_v33  ;;  %47583 = vmatprep.mubr.f32.mxu1 %v34349_v41 }
0x2c46   : > { %50940 = vmatprep.subr.bf16.mxu1 %v56582_v55  ;;  %v34897_v33 = vand.u32 4294901760, %v34896_v37 }
0x2c48   : > { %v34898_v4 = vsub.f32 %v34896_v37, %v34897_v33 }
0x2c49   : > { %50942 = vmatpush3.bf16.msra.mxu1 %v56582_v55  ;;  %v56584_v55 = vld [vmem:[#allocation41_spill] sm:$0xff] }
0x2c4a   : > { %50944 = vmatprep.subr.bf16.mxu1 %v53212_v32 }
0x2c4c   : > { %47584 = vmatmul.mubr.f32.vlgmr.msra.gmra.mrb[64].mxu1 %v34359_v34 }
0x2c4d   : > { %50946 = vmatpush3.bf16.msra.mxu1 %v53212_v32  ;;  %47594 = vmatprep.mubr.f32.mxu1 %v34349_v41  ;;  %v34899_v41 = vand.u32 4294901760, %v34898_v4  ;;  %v56589_v4 = vld [vmem:[#allocation46_spill] sm:$0xff] }
0x2c4e   : > { %50948 = vmatprep.subr.bf16.mxu1 %v53221_v63 }
0x2c51   : > { %50950 = vmatpush3.bf16.msra.mxu1 %v53221_v63 }
0x2c52   : > { %50952 = vmatprep.subr.bf16.mxu1 %v56583_v54 }
0x2c54   : > { %47595 = vmatmul.mubr.f32.vlgmr.msra.gmra.mrb[64].mxu1 %v34359_v34  ;;  %v56587_v34 = vld [vmem:[#allocation44_spill] sm:$0xff] }
0x2c55   : > { %50954 = vmatpush3.bf16.msra.mxu1 %v56583_v54  ;;  %47605 = vmatprep.mubr.f32.mxu1 %v34889_v57  ;;  %v35347_v57 = vsel %vm973_vm1, %v55437_v2, 0 }
0x2c56   : > { %50956 = vmatprep.subr.bf16.mxu1 %v56584_v55 }
0x2c59   : > { %50958 = vmatpush3.bf16.msra.mxu1 %v56584_v55 }
0x2c5a   : > { %50960 = vmatprep.subr.bf16.mxu1 %v56585_v42 }
0x2c5c   : > { %47606 = vmatmul.mubr.f32.vlgmr.msra.gmra.mrb[64].mxu1 %v34899_v41  ;;  %v56590_v41 = vld [vmem:[#allocation47_spill] sm:$0xff] }
0x2c5d   : > { %50962 = vmatpush3.bf16.msra.mxu1 %v56585_v42  ;;  %47616 = vmatprep.mubr.f32.mxu1 %v34885_v47  ;;  %v56594_v42 = vld [vmem:[#allocation51_spill] sm:$0xff] }
0x2c5e   : > { %50964 = vmatprep.subr.bf16.mxu1 %v56586_v38 }
0x2c61   : > { %50966 = vmatpush3.bf16.msra.mxu1 %v56586_v38  ;;  %v56591_v38 = vld [vmem:[#allocation48_spill] sm:$0xff] }
0x2c62   : > { %50968 = vmatprep.subr.bf16.mxu1 %v56587_v34 }
0x2c64   : > { %47617 = vmatmul.mubr.f32.vlgmr.msra.gmra.mrb[64].mxu1 %v34895_v49 }
0x2c65   : > { %50970 = vmatpush3.bf16.msra.mxu1 %v56587_v34  ;;  %47627 = vmatprep.mubr.f32.mxu1 %v34886_v44  ;;  %v35421_v44 = vand.u32 4294901760, %v35347_v57 }
0x2c66   : > { %50972 = vmatprep.subr.bf16.mxu1 %v56588_v25 }
0x2c69   : > { %50974 = vmatpush3.bf16.msra.mxu1 %v56588_v25 }
0x2c6a   : > { %50976 = vmatprep.subr.bf16.mxu1 %v56583_v54 }
0x2c6c   : > { %47628 = vmatmul.mubr.f32.vlgmr.msra.gmra.mrb[64].mxu1 %v34896_v37  ;;  %v35350_v37 = vsel %vm973_vm1, %v55435_v17, 0 }
0x2c6d   : > { %50978 = vmatpush3.bf16.msra.mxu1 %v56583_v54  ;;  %47638 = vmatprep.mubr.f32.mxu1 %v34887_v12  ;;  %v35422_v12 = vsub.f32 %v35347_v57, %v35421_v44  ;;  %v35431_v25 = vand.u32 4294901760, %v35350_v37 }
0x2c6e   : > { %50980 = vmatprep.subr.bf16.mxu1 %v56584_v55 }
0x2c6f   : > { %v35423_v2 = vand.u32 4294901760, %v35422_v12 }
0x2c71   : > { %50982 = vmatpush3.bf16.msra.mxu1 %v56584_v55 }
0x2c72   : > { %50984 = vmatprep.subr.bf16.mxu1 %v56589_v4 }
0x2c74   : > { %47639 = vmatmul.mubr.f32.vlgmr.msra.gmra.mrb[64].mxu1 %v34897_v33  ;;  %v35432_v33 = vsub.f32 %v35350_v37, %v35431_v25  ;;  %v56593_v37 = vld [vmem:[#allocation50_spill] sm:$0xff] }
0x2c75   : > { %50986 = vmatpush3.bf16.msra.mxu1 %v56589_v4  ;;  %47649 = vmatprep.mubr.f32.mxu1 %v34885_v47  ;;  %v35424_v4 = vsub.f32 %v35422_v12, %v35423_v2 }
0x2c76   : > { %50988 = vmatprep.subr.bf16.mxu1 %v56590_v41  ;;  %v35433_v34 = vand.u32 4294901760, %v35432_v33 }
0x2c77   : > { %v35425_v17 = vand.u32 4294901760, %v35424_v4  ;;  %v56596_v4 = vld [vmem:[#allocation53_spill] sm:$0xff] }
0x2c78   : > { %v35434_v57 = vsub.f32 %v35432_v33, %v35433_v34 }
0x2c79   : > { %50990 = vmatpush3.bf16.msra.mxu1 %v56590_v41  ;;  %v56592_v41 = vld [vmem:[#allocation49_spill] sm:$0xff] }
0x2c7a   : > { %50992 = vmatprep.subr.bf16.mxu1 %v56583_v54 }
0x2c7c   : > { %47650 = vmatmul.mubr.f32.vlgmr.msra.gmra.mrb[64].mxu1 %v34895_v49 }
0x2c7d   : > { %50994 = vmatpush3.bf16.msra.mxu1 %v56583_v54  ;;  %47660 = vmatprep.mubr.f32.mxu1 %v34885_v47  ;;  %v35435_v47 = vand.u32 4294901760, %v35434_v57 }
0x2c7e   : > { %50996 = vmatprep.subr.bf16.mxu1 %v56584_v55 }
0x2c81   : > { %50998 = vmatpush3.bf16.msra.mxu1 %v56584_v55 }
0x2c82   : > { %51000 = vmatprep.subr.bf16.mxu1 %v56591_v38 }
0x2c84   : > { %47661 = vmatmul.mubr.f32.vlgmr.msra.gmra.mrb[64].mxu1 %v34895_v49  ;;  %v56595_v49 = vld [vmem:[#allocation52_spill] sm:$0xff] }
0x2c85   : > { %51002 = vmatpush3.bf16.msra.mxu1 %v56591_v38  ;;  %47671 = vmatprep.mubr.f32.mxu1 %v35425_v17  ;;  %v56597_v17 = vld [vmem:[#allocation54_spill] sm:$0xff] }
0x2c86   : > { %51004 = vmatprep.subr.bf16.mxu1 %v56592_v41 }
0x2c89   : > { %51006 = vmatpush3.bf16.msra.mxu1 %v56592_v41 }
0x2c8a   : > { %51008 = vmatprep.subr.bf16.mxu1 %v56593_v37 }
0x2c8c   : > { %47672 = vmatmul.mubr.f32.vlgmr.msra.gmra.mrb[64].mxu1 %v35435_v47 }
0x2c8d   : > { %51010 = vmatpush3.bf16.msra.mxu1 %v56593_v37  ;;  %47682 = vmatprep.mubr.f32.mxu1 %v35421_v44 }
0x2c8e   : > { %51012 = vmatprep.subr.bf16.mxu1 %v56594_v42 }
0x2c91   : > { %51014 = vmatpush3.bf16.msra.mxu1 %v56594_v42 }
0x2c92   : > { %51016 = vmatprep.subr.bf16.mxu1 %v56595_v49 }
0x2c94   : > { %47683 = vmatmul.mubr.f32.vlgmr.msra.gmra.mrb[64].mxu1 %v35431_v25 }
0x2c95   : > { %51018 = vmatpush3.bf16.msra.mxu1 %v56595_v49  ;;  %47693 = vmatprep.mubr.f32.mxu1 %v35422_v12  ;;  %v56598_v12 = vld [vmem:[#allocation55_spill] sm:$0xff] }
0x2c96   : > { %51020 = vmatprep.subr.bf16.mxu1 %v56596_v4 }
0x2c99   : > { %51022 = vmatpush3.bf16.msra.mxu1 %v56596_v4 }
0x2c9a   : > { %51024 = vmatprep.subr.bf16.mxu1 %v56591_v38 }
0x2c9c   : > { %47694 = vmatmul.mubr.f32.vlgmr.msra.gmra.mrb[64].mxu1 %v35432_v33 }
0x2c9d   : > { %51026 = vmatpush3.bf16.msra.mxu1 %v56591_v38  ;;  %47704 = vmatprep.mubr.f32.mxu1 %v35423_v2 }
0x2c9e   : > { %51028 = vmatprep.subr.bf16.mxu1 %v56592_v41 }
0x2ca1   : > { %51030 = vmatpush3.bf16.msra.mxu1 %v56592_v41 }
0x2ca2   : > { %51032 = vmatprep.subr.bf16.mxu1 %v56597_v17 }
0x2ca4   : > { %47705 = vmatmul.mubr.f32.vlgmr.msra.gmra.mrb[64].mxu1 %v35433_v34 }
0x2ca5   : > { %51034 = vmatpush3.bf16.msra.mxu1 %v56597_v17  ;;  %47715 = vmatprep.mubr.f32.mxu1 %v35421_v44 }
0x2ca6   : > { %51036 = vmatprep.subr.bf16.mxu1 %v56598_v12 }
0x2ca9   : > { %51038 = vmatpush3.bf16.msra.mxu1 %v56598_v12 }
0x2caa   : > { %51040 = vmatprep.subr.bf16.mxu1 %v56591_v38 }
0x2cac   : > { %47716 = vmatmul.mubr.f32.vlgmr.msra.gmra.mrb[64].mxu1 %v35431_v25 }
0x2cad   : > { %51042 = vmatpush3.bf16.msra.mxu1 %v56591_v38  ;;  %47726 = vmatprep.mubr.f32.mxu1 %v35421_v44  ;;  %v55548_v44 = vld [vmem:[%s55906_s2 + $0xa0] ss:$0 sm:$0xff] }
0x2cae   : > { %51044 = vmatprep.subr.bf16.mxu1 %v56592_v41  ;;  %56599 = vst [vmem:[#allocation30_spill] sm:$0xff] %v55548_v44 }
0x2cb1   : > { %51046 = vmatpush3.bf16.msra.mxu1 %v56592_v41  ;;  %v35895_v41 = vpop.permute.xlu0 %35894 }
0x2cb2   : > { %51360 = vmatprep.subr.bf16.mxu1 %v53437_v40 }
0x2cb4   : > { %47727 = vmatmul.mubr.f32.vlgmr.msra.gmra.mrb[64].mxu1 %v35431_v25 }
0x2cb5   : > { %51362 = vmatpush3.bf16.msra.mxu1 %v53437_v40 }
0x2cb6   : > { %51364 = vmatprep.subr.bf16.mxu1 %v53447_v26 }
0x2cb9   : > { %51366 = vmatpush3.bf16.msra.mxu1 %v53447_v26 }
0x2cba   : > { %51368 = vmatprep.subr.bf16.mxu1 %v53457_v60 }
0x2d87   : > { %v47728_v34 = vpop.f32.mrb[64].mxu1 }
0x2d88   : > { %v55551_v2 = vadd.f32 %v55548_v44, %v47728_v34  ;;  %v35870_v33 = vpop.f32.mrb[65].mxu1  ;;  %v35897_v34 = vpop.permute.xlu1 %35896 }
0x2d89   : > { %v55554_v25 = vadd.f32 %v55548_v44, %v35870_v33 }
0x2d8a   : > { %v40597_v57 = vmul.f32 -1.442695, %v55551_v2 }
0x2d8b   : > { %v40596_v47 = vmul.f32 -1.442695, %v55554_v25 }
0x2d8c   : > { %52647 = vpow2.f32 %v40597_v57 }
0x2d8d   : > { %52649 = vpow2.f32 %v40596_v47 }
0x2d96   : > { %v52648_v12 = vpop.eup %52647 }
0x2d97   : > { %v52650_v17 = vpop.eup %52649  ;;  %v35889_v4 = vadd.f32 1.0, %v52648_v12 }
0x2d98   : > { %v35888_v49 = vadd.f32 1.0, %v52650_v17 }
0x2d99   : > { %52651 = vrcp.f32 %v35889_v4 }
0x2d9a   : > { %52653 = vrcp.f32 %v35888_v49 }
0x2da3   : > { %v55558_v42 = vpop.eup %52651 }
0x2da4   : > { %v55560_v37 = vpop.eup %52653  ;;  %v35901_v33 = vmul.f32 %v55558_v42, %v35897_v34 }
0x2da5   : > { %v35900_v44 = vmul.f32 %v55560_v37, %v35895_v41 }
0x2da6   : > { %35906 = vrot.lane.b32.xlu1 %v35901_v33, %s52742_s28 }
0x2da7   : > { %35904 = vrot.lane.b32.xlu0 %v35900_v44, %s52742_s28 }
0x2e18   : > { %v35907_v57 = vpop.permute.xlu1 %35906 }
0x2e19   : > { %v35910_v12 = vsel %vm973_vm1, %v35907_v57, 0  ;;  %v35905_v17 = vpop.permute.xlu0 %35904  ;;  %v36452_v57 = vsub.f32 1.0, %v55560_v37 }
0x2e1a   : > { %v35991_v4 = vand.u32 4294901760, %v35910_v12  ;;  %v35908_v49 = vsel %vm973_vm1, %v35905_v17, 0 }
0x2e1b   : > { %v35981_v47 = vand.u32 4294901760, %v35908_v49 }
0x2e1c   : > { %v35992_v38 = vsub.f32 %v35910_v12, %v35991_v4 }
0x2e1d   : > { %v35982_v55 = vsub.f32 %v35908_v49, %v35981_v47 }
0x2e1e   : > { %v35993_v54 = vand.u32 4294901760, %v35992_v38 }
0x2e1f   : > { %v35983_v43 = vand.u32 4294901760, %v35982_v55 }
0x2e20   : > { %v35994_v0 = vsub.f32 %v35992_v38, %v35993_v54 }
0x2e21   : > { %v35984_v34 = vsub.f32 %v35982_v55, %v35983_v43 }
0x2e22   : > { %v35995_v41 = vand.u32 4294901760, %v35994_v0 }
0x2e23   : > { %v35985_v63 = vand.u32 4294901760, %v35984_v34 }
0x2e25   : > { %47737 = vmatprep.mubr.f32.mxu0 %v35985_v63 }
0x2e26   : > { %47738 = vmatmul.mubr.f32.vlgmr.msra.gmra.mrb[56].mxu0 %v35995_v41 }
0x2e27   : > { %51058 = vmatpush3.bf16.msra.mxu0 %v53457_v60  ;;  %47748 = vmatprep.mubr.f32.mxu0 %v35981_v47 }
0x2e28   : > { %51060 = vmatprep.subr.bf16.mxu0 %v53462_v48 }
0x2e2b   : > { %51062 = vmatpush3.bf16.msra.mxu0 %v53462_v48 }
0x2e2c   : > { %51064 = vmatprep.subr.bf16.mxu0 %v53464_v1 }
0x2e2e   : > { %47749 = vmatmul.mubr.f32.vlgmr.msra.gmra.mrb[56].mxu0 %v35991_v4 }
0x2e2f   : > { %51066 = vmatpush3.bf16.msra.mxu0 %v53464_v1  ;;  %47759 = vmatprep.mubr.f32.mxu0 %v35982_v55 }
0x2e30   : > { %51068 = vmatprep.subr.bf16.mxu0 %v53466_v15 }
0x2e33   : > { %51070 = vmatpush3.bf16.msra.mxu0 %v53466_v15 }
0x2e34   : > { %51072 = vmatprep.subr.bf16.mxu0 %v53437_v40 }
0x2e36   : > { %47760 = vmatmul.mubr.f32.vlgmr.msra.gmra.mrb[56].mxu0 %v35992_v38 }
0x2e37   : > { %51074 = vmatpush3.bf16.msra.mxu0 %v53437_v40  ;;  %47770 = vmatprep.mubr.f32.mxu0 %v35983_v43 }
0x2e38   : > { %51076 = vmatprep.subr.bf16.mxu0 %v53447_v26 }
0x2e3b   : > { %51078 = vmatpush3.bf16.msra.mxu0 %v53447_v26 }
0x2e3c   : > { %51080 = vmatprep.subr.bf16.mxu0 %v53468_v36 }
0x2e3e   : > { %47771 = vmatmul.mubr.f32.vlgmr.msra.gmra.mrb[56].mxu0 %v35993_v54 }
0x2e3f   : > { %51082 = vmatpush3.bf16.msra.mxu0 %v53468_v36  ;;  %47781 = vmatprep.mubr.f32.mxu0 %v35981_v47 }
0x2e40   : > { %51084 = vmatprep.subr.bf16.mxu0 %v53470_v7 }
0x2e43   : > { %51086 = vmatpush3.bf16.msra.mxu0 %v53470_v7 }
0x2e44   : > { %51088 = vmatprep.subr.bf16.mxu0 %v53437_v40 }
0x2e46   : > { %47782 = vmatmul.mubr.f32.vlgmr.msra.gmra.mrb[56].mxu0 %v35991_v4 }
0x2e47   : > { %51090 = vmatpush3.bf16.msra.mxu0 %v53437_v40  ;;  %47792 = vmatprep.mubr.f32.mxu0 %v35981_v47 }
0x2e48   : > { %51092 = vmatprep.subr.bf16.mxu0 %v53447_v26 }
0x2e4b   : > { %51094 = vmatpush3.bf16.msra.mxu0 %v53447_v26 }
0x2e4e   : > { %47793 = vmatmul.mubr.f32.vlgmr.msra.gmra.mrb[56].mxu0 %v35991_v4 }
0x2e4f   : > { %47799 = vmatprep.mubr.f32.mxu0 %v56327_v31  ;;  %v36453_v31 = vsub.f32 1.0, %v55558_v42 }
0x2e51   : > { %v36455_v17 = vmul.f32 %v36453_v31, %v55337_v45 }
0x2f21   : > { %v47794_v63 = vpop.f32.mrb[56].mxu0 }
0x2f22   : > { %36444 = vrot.lane.b32.xlu1 %v47794_v63, %s52743_s29  ;;  %v36430_v0 = vpop.f32.mrb[57].mxu0 }
0x2f23   : > { %36442 = vrot.lane.b32.xlu0 %v36430_v0, %s52743_s29 }
0x2f94   : > { %v36445_v43 = vpop.permute.xlu1 %36444 }
0x2f95   : > { %v36449_v38 = vadd.f32 %v55551_v2, %v36445_v43  ;;  %v36443_v54 = vpop.permute.xlu0 %36442 }
0x2f96   : > { %v36448_v55 = vadd.f32 %v55554_v25, %v36443_v54  ;;  %v36454_v25 = vmul.f32 %v36452_v57, %v55339_v22 }
0x2f97   : > { %52655 = vtanh.f32 %v36449_v38 }
0x2f98   : > { %52657 = vtanh.f32 %v36448_v55 }
0x2fa1   : > { %v52656_v44 = vpop.eup %52655 }
0x2fa2   : > { %v52658_v33 = vpop.eup %52657  ;;  %36460 = vrot.lane.b32.xlu1 %v52656_v44, %s52743_s29 }
0x2fa3   : > { %36458 = vrot.lane.b32.xlu0 %v52658_v33, %s52743_s29 }
0x3014   : > { %v36461_v12 = vpop.permute.xlu1 %36460 }
0x3015   : > { %v36465_v2 = vmul.f32 %v55558_v42, %v36461_v12  ;;  %v36459_v4 = vpop.permute.xlu0 %36458 }
0x3016   : > { %v36464_v49 = vmul.f32 %v55560_v37, %v36459_v4 }
0x3017   : > { %v55600_v47 = vadd.f32 %v36465_v2, %v36455_v17 }
0x3018   : > { %v55602_v34 = vadd.f32 %v36464_v49, %v36454_v25 }
0x3019   : > { %v36472_v41 = vand.u32 4294901760, %v55600_v47  ;;  %39922 = vrot.lane.b32.xlu1 %v55600_v47, %s52741_s7 }
0x301a   : > { %v36469_v63 = vand.u32 4294901760, %v55602_v34  ;;  %39920 = vrot.lane.b32.xlu0 %v55602_v34, %s52741_s7  ;;  %s161_s7 = sand.u32 1, %s52731_s13  }
0x301b   : > { %v36624_v45 = vsub.f32 %v55600_v47, %v36472_v41  ;;  %s40576_s11 = sshll.u32 %s161_s7, 4  ;;  %s55863_s16 = scalar_lea.sflag [#allocation3], %s161_s7 }
0x301c   : > { %v51095_v42 = vpack.c.bf16 %v36472_v41, %v36469_v63  ;;  %v36617_v22 = vsub.f32 %v55602_v34, %v36469_v63  ;;  %s163_s17 = scalar_lea.vmem [#allocation2], %s40576_s11 }
0x301d   : > { %v36625_v37 = vand.u32 4294901760, %v36624_v45  ;;  %s40510_s19 = sshll.u32 %s163_s17, 4  ;;  %s55859_s19 = int_to_ptr.vmem [resolvable:$true] %s40510_s19 }
0x301e   : > { %51096 = vmatprep.subr.bf16.mxu0 %v51095_v42  ;;  %v36618_v0 = vand.u32 4294901760, %v36617_v22  ;;  %v51103_v33 = vpack.c.bf16 %v36624_v45, %v36617_v22 }
0x301f   : > { %51098 = vmatpush3.bf16.msra.mxu0 %v51095_v42  ;;  %v36626_v43 = vsub.f32 %v36624_v45, %v36625_v37 }
0x3020   : > { %v36619_v38 = vsub.f32 %v36617_v22, %v36618_v0 }
0x3021   : > { %v36627_v54 = vand.u32 4294901760, %v36626_v43 }
0x3022   : > { %47800 = vmatmul.mubr.f32.vlgmr.msra.gmra.mrb[58].mxu0 %v52929_v46  ;;  %v36620_v55 = vand.u32 4294901760, %v36619_v38  ;;  %v51111_v46 = vpack.c.bf16 %v36625_v37, %v36618_v0 }
0x3023   : > { %47802 = vmatprep.mubr.f32.mxu0 %v52939_v50  ;;  %v56603_v50 = vld [vmem:[#allocation12_spill] sm:$0xff] }
0x3024   : > { %v51099_v44 = vpack.c.bf16 %v36627_v54, %v36620_v55 }
0x3026   : > { %47803 = vmatmul.mubr.f32.gmra.mrb[60].mxu0 %v52958_v58  ;;  %51100 = vmatprep.subr.bf16.mxu0 %v51099_v44  ;;  %v56604_v58 = vld [vmem:[#allocation14_spill] sm:$0xff] }
0x3027   : > { %51102 = vmatpush3.bf16.msra.mxu0 %v51099_v44  ;;  %47805 = vmatprep.mubr.f32.mxu0 %v52963_v62  ;;  %v56605_v62 = vld [vmem:[#allocation16_spill] sm:$0xff] }
0x3028   : > { %51104 = vmatprep.subr.bf16.mxu0 %v51103_v33 }
0x302a   : > { %47806 = vmatmul.mubr.f32.gmra.mrb[62].mxu0 %v52975_v3  ;;  %v56606_v3 = vld [vmem:[#allocation18_spill] sm:$0xff] }
0x302b   : > { %47808 = vmatprep.mubr.f32.mxu0 %v52980_v5  ;;  %v56607_v5 = vld [vmem:[#allocation19_spill] sm:$0xff] }
0x302e   : > { %47809 = vmatmul.mubr.f32.gmra.mrb[64].mxu0 %v52985_v6  ;;  %v37229_v6 = vsel %vm973_vm1, %v55602_v34, 0 }
0x302f   : > { %47815 = vmatprep.mubr.f32.mxu0 %v52838_v9 }
0x3032   : > { %47816 = vmatmul.mubr.f32.vlgmr.msra.gmra.mrb[58].mxu0 %v52840_v10 }
0x3033   : > { %51106 = vmatpush3.bf16.msra.mxu0 %v51103_v33  ;;  %47818 = vmatprep.mubr.f32.mxu0 %v52842_v11 }
0x3034   : > { %51108 = vmatprep.subr.bf16.mxu0 %v51095_v42 }
0x3036   : > { %47819 = vmatmul.mubr.f32.gmra.mrb[60].mxu0 %v52848_v14 }
0x3037   : > { %47821 = vmatprep.mubr.f32.mxu0 %v52862_v21 }
0x303a   : > { %47822 = vmatmul.mubr.f32.gmra.mrb[62].mxu0 %v52873_v23 }
0x303b   : > { %47824 = vmatprep.mubr.f32.mxu0 %v52875_v24 }
0x303e   : > { %47825 = vmatmul.mubr.f32.gmra.mrb[64].mxu0 %v52946_v53 }
0x303f   : > { %47831 = vmatprep.mubr.f32.mxu0 %v52854_v18  ;;  %v56600_v18 = vld [vmem:[#allocation7_spill] sm:$0xff] }
0x3042   : > { %47832 = vmatmul.mubr.f32.vlgmr.msra.gmra.mrb[58].mxu0 %v52857_v19  ;;  %v56601_v19 = vld [vmem:[#allocation8_spill] sm:$0xff] }
0x3043   : > { %51110 = vmatpush3.bf16.msra.mxu0 %v51095_v42  ;;  %47834 = vmatprep.mubr.f32.mxu0 %v52860_v20  ;;  %v56602_v20 = vld [vmem:[#allocation10_spill] sm:$0xff] }
0x3044   : > { %51112 = vmatprep.subr.bf16.mxu0 %v51111_v46 }
0x3046   : > { %47835 = vmatmul.mubr.f32.gmra.mrb[60].mxu0 %v56366_v28  ;;  %v37232_v28 = vsel %vm973_vm1, %v55600_v47, 0 }
0x3047   : > { %47837 = vmatprep.mubr.f32.mxu0 %v56405_v29  ;;  %v37303_v29 = vand.u32 4294901760, %v37229_v6 }
0x304a   : > { %47838 = vmatmul.mubr.f32.gmra.mrb[62].mxu0 %v56444_v16  ;;  %v37313_v16 = vand.u32 4294901760, %v37232_v28 }
0x304b   : > { %47840 = vmatprep.mubr.f32.mxu0 %v56483_v61  ;;  %v37304_v61 = vsub.f32 %v37229_v6, %v37303_v29  ;;  %v56616_v6 = vld [vmem:[#allocation34_spill] sm:$0xff] }
0x304d   : > { %v37305_v31 = vand.u32 4294901760, %v37304_v61 }
0x304e   : > { %47841 = vmatmul.mubr.f32.gmra.mrb[64].mxu0 %v56522_v35  ;;  %v37314_v35 = vsub.f32 %v37232_v28, %v37313_v16  ;;  %v56618_v28 = vld [vmem:[#allocation36_spill] sm:$0xff] }
0x304f   : > { %47847 = vmatprep.mubr.f32.mxu0 %v56561_v39  ;;  %v56608_v39 = vld [vmem:[#allocation20_spill] sm:$0xff]  ;;  %v37306_v12 = vsub.f32 %v37304_v61, %v37305_v31 }
0x3050   : > { %v37315_v57 = vand.u32 4294901760, %v37314_v35 }
0x3052   : > { %47848 = vmatmul.mubr.f32.vlgmr.msra.gmra.mrb[58].mxu0 %v56600_v18 }
0x3053   : > { %51114 = vmatpush3.bf16.msra.mxu0 %v51111_v46  ;;  %47850 = vmatprep.mubr.f32.mxu0 %v56601_v19 }
0x3054   : > { %51116 = vmatprep.subr.bf16.mxu0 %v51095_v42 }
0x3056   : > { %47851 = vmatmul.mubr.f32.gmra.mrb[60].mxu0 %v56602_v20 }
0x3057   : > { %47853 = vmatprep.mubr.f32.mxu0 %v56603_v50 }
0x305a   : > { %47854 = vmatmul.mubr.f32.gmra.mrb[62].mxu0 %v56604_v58 }
0x305b   : > { %47856 = vmatprep.mubr.f32.mxu0 %v56605_v62 }
0x305e   : > { %47857 = vmatmul.mubr.f32.gmra.mrb[64].mxu0 %v56606_v3 }
0x305f   : > { %47863 = vmatprep.mubr.f32.mxu0 %v52838_v9 }
0x3062   : > { %47864 = vmatmul.mubr.f32.vlgmr.msra.gmra.mrb[58].mxu0 %v52840_v10 }
0x3063   : > { %51118 = vmatpush3.bf16.msra.mxu0 %v51095_v42  ;;  %47866 = vmatprep.mubr.f32.mxu0 %v52842_v11 }
0x3064   : > { %51120 = vmatprep.subr.bf16.mxu0 %v56607_v5 }
0x3066   : > { %47867 = vmatmul.mubr.f32.gmra.mrb[60].mxu0 %v52848_v14 }
0x3067   : > { %47869 = vmatprep.mubr.f32.mxu0 %v52862_v21 }
0x306a   : > { %47870 = vmatmul.mubr.f32.gmra.mrb[62].mxu0 %v52873_v23 }
0x306b   : > { %47872 = vmatprep.mubr.f32.mxu0 %v52875_v24 }
0x306e   : > { %47873 = vmatmul.mubr.f32.gmra.mrb[64].mxu0 %v52946_v53 }
0x306f   : > { %47879 = vmatprep.mubr.f32.mxu0 %v52838_v9  ;;  %v56609_v9 = vld [vmem:[#allocation21_spill] sm:$0xff] }
0x3072   : > { %47880 = vmatmul.mubr.f32.vlgmr.msra.gmra.mrb[58].mxu0 %v52840_v10  ;;  %v37316_v10 = vsub.f32 %v37314_v35, %v37315_v57 }
0x3073   : > { %47882 = vmatprep.mubr.f32.mxu0 %v52842_v11  ;;  %51122 = vmatpush3.bf16.msra.mxu0 %v56607_v5  ;;  %v37307_v11 = vand.u32 4294901760, %v37306_v12 }
0x3074   : > { %51124 = vmatprep.subr.bf16.mxu0 %v56608_v39  ;;  %v37317_v17 = vand.u32 4294901760, %v37316_v10 }
0x3076   : > { %47883 = vmatmul.mubr.f32.gmra.mrb[60].mxu0 %v52848_v14  ;;  %v56610_v14 = vld [vmem:[#allocation22_spill] sm:$0xff] }
0x3077   : > { %47885 = vmatprep.mubr.f32.mxu0 %v52862_v21  ;;  %51126 = vmatpush3.bf16.msra.mxu0 %v56608_v39  ;;  %v56611_v21 = vld [vmem:[#allocation23_spill] sm:$0xff] }
0x3078   : > { %51128 = vmatprep.subr.bf16.mxu0 %v56609_v9 }
0x307a   : > { %47886 = vmatmul.mubr.f32.gmra.mrb[62].mxu0 %v52873_v23  ;;  %v56612_v23 = vld [vmem:[#allocation24_spill] sm:$0xff] }
0x307b   : > { %47888 = vmatprep.mubr.f32.mxu0 %v52875_v24  ;;  %v56613_v24 = vld [vmem:[#allocation25_spill] sm:$0xff] }
0x307e   : > { %47889 = vmatmul.mubr.f32.gmra.mrb[64].mxu0 %v52946_v53  ;;  %v56614_v53 = vld [vmem:[#allocation26_spill] sm:$0xff] }
0x307f   : > { %47899 = vmatprep.mubr.f32.mxu0 %v37307_v11 }
0x3082   : > { %47900 = vmatmul.mubr.f32.vlgmr.msra.gmra.mrb[66].mxu0 %v37317_v17 }
0x3083   : > { %51130 = vmatpush3.bf16.msra.mxu0 %v56609_v9  ;;  %47910 = vmatprep.mubr.f32.mxu0 %v37303_v29 }
0x3084   : > { %51132 = vmatprep.subr.bf16.mxu0 %v56610_v14 }
0x3087   : > { %51134 = vmatpush3.bf16.msra.mxu0 %v56610_v14  ;;  %v56622_v14 = vld [vmem:[#allocation40_spill] sm:$0xff] }
0x3088   : > { %51136 = vmatprep.subr.bf16.mxu0 %v56611_v21 }
0x308a   : > { %47911 = vmatmul.mubr.f32.vlgmr.msra.gmra.mrb[66].mxu0 %v37313_v16 }
0x308b   : > { %51138 = vmatpush3.bf16.msra.mxu0 %v56611_v21  ;;  %47921 = vmatprep.mubr.f32.mxu0 %v37304_v61  ;;  %v56620_v61 = vld [vmem:[#allocation38_spill] sm:$0xff] }
0x308c   : > { %51140 = vmatprep.subr.bf16.mxu0 %v56612_v23 }
0x308f   : > { %51142 = vmatpush3.bf16.msra.mxu0 %v56612_v23 }
0x3090   : > { %51144 = vmatprep.subr.bf16.mxu0 %v56607_v5 }
0x3092   : > { %47922 = vmatmul.mubr.f32.vlgmr.msra.gmra.mrb[66].mxu0 %v37314_v35 }
0x3093   : > { %51146 = vmatpush3.bf16.msra.mxu0 %v56607_v5  ;;  %47932 = vmatprep.mubr.f32.mxu0 %v37305_v31 }
0x3094   : > { %51148 = vmatprep.subr.bf16.mxu0 %v56608_v39 }
0x3097   : > { %51150 = vmatpush3.bf16.msra.mxu0 %v56608_v39 }
0x3098   : > { %51152 = vmatprep.subr.bf16.mxu0 %v56613_v24 }
0x309a   : > { %47933 = vmatmul.mubr.f32.vlgmr.msra.gmra.mrb[66].mxu0 %v37315_v57 }
0x309b   : > { %51154 = vmatpush3.bf16.msra.mxu0 %v56613_v24  ;;  %47943 = vmatprep.mubr.f32.mxu0 %v37303_v29  ;;  %v56623_v24 = vld [vmem:[#allocation41_spill] sm:$0xff] }
0x309c   : > { %51156 = vmatprep.subr.bf16.mxu0 %v56614_v53 }
0x309f   : > { %51158 = vmatpush3.bf16.msra.mxu0 %v56614_v53  ;;  %v56624_v53 = vld [vmem:[#allocation42_spill] sm:$0xff] }
0x30a0   : > { %51160 = vmatprep.subr.bf16.mxu0 %v56607_v5 }
0x30a2   : > { %47944 = vmatmul.mubr.f32.vlgmr.msra.gmra.mrb[66].mxu0 %v37313_v16 }
0x30a3   : > { %51162 = vmatpush3.bf16.msra.mxu0 %v56607_v5  ;;  %47954 = vmatprep.mubr.f32.mxu0 %v37303_v29  ;;  %v56615_v5 = vld [vmem:[#allocation33_spill] sm:$0xff] }
0x30a4   : > { %51164 = vmatprep.subr.bf16.mxu0 %v56608_v39  ;;  %v56619_v29 = vld [vmem:[#allocation37_spill] sm:$0xff] }
0x30a7   : > { %51166 = vmatpush3.bf16.msra.mxu0 %v56608_v39  ;;  %v56621_v39 = vld [vmem:[#allocation39_spill] sm:$0xff] }
0x30a8   : > { %51168 = vmatprep.subr.bf16.mxu0 %v53118_v59 }
0x30aa   : > { %47955 = vmatmul.mubr.f32.vlgmr.msra.gmra.mrb[66].mxu0 %v37313_v16 }
0x30ab   : > { %51170 = vmatpush3.bf16.msra.mxu0 %v53118_v59 }
0x30ac   : > { %51172 = vmatprep.subr.bf16.mxu0 %v53128_v8 }
0x30af   : > { %51174 = vmatpush3.bf16.msra.mxu0 %v53128_v8 }
0x30b0   : > { %51176 = vmatprep.subr.bf16.mxu0 %v56302_v56 }
0x3145   : > { %v47881_v2 = vpop.f32.mrb[58].mxu0 }
0x3146   : > { %v37768_v4 = vsel %vm973_vm1, %v47881_v2, 0  ;;  %v37182_v25 = vpop.f32.mrb[59].mxu0  ;;  %v56625_v2 = vld [vmem:[#allocation43_spill] sm:$0xff] }
0x3147   : > { %v37849_v49 = vand.u32 4294901760, %v37768_v4  ;;  %v37765_v41 = vsel %vm973_vm1, %v37182_v25, 0  ;;  %v56627_v25 = vld [vmem:[#allocation45_spill] sm:$0xff] }
0x3148   : > { %v37839_v63 = vand.u32 4294901760, %v37765_v41 }
0x3149   : > { %v37850_v45 = vsub.f32 %v37768_v4, %v37849_v49  ;;  %v47884_v42 = vpop.f32.mrb[60].mxu0  ;;  %v56626_v4 = vld [vmem:[#allocation44_spill] sm:$0xff] }
0x314a   : > { %v37840_v22 = vsub.f32 %v37765_v41, %v37839_v63  ;;  %v37194_v37 = vpop.f32.mrb[61].mxu0  ;;  %v56628_v41 = vld [vmem:[#allocation46_spill] sm:$0xff] }
0x314b   : > { %v37851_v0 = vand.u32 4294901760, %v37850_v45 }
0x314c   : > { %v37841_v43 = vand.u32 4294901760, %v37840_v22 }
0x314d   : > { %v37852_v38 = vsub.f32 %v37850_v45, %v37851_v0  ;;  %v55694_v54 = vpop.f32.mrb[62].mxu0 }
0x314e   : > { %v55696_v55 = vpop.f32.mrb[63].mxu0  ;;  %v37842_v44 = vsub.f32 %v37840_v22, %v37841_v43  ;;  %v38840_v31 = vsel %vm973_vm1, %v55694_v54, 0 }
0x314f   : > { %v37853_v46 = vand.u32 4294901760, %v37852_v38  ;;  %v38837_v16 = vsel %vm973_vm1, %v55696_v55, 0  ;;  %v38921_v9 = vand.u32 4294901760, %v38840_v31  ;;  %v56630_v55 = vld [vmem:[#allocation48_spill] sm:$0xff] }
0x3150   : > { %v37843_v33 = vand.u32 4294901760, %v37842_v44  ;;  %v38911_v35 = vand.u32 4294901760, %v38837_v16 }
0x3151   : > { %v55698_v18 = vpop.f32.mrb[64].mxu0  ;;  %v38922_v10 = vsub.f32 %v38840_v31, %v38921_v9 }
0x3152   : > { %v55700_v19 = vpop.f32.mrb[65].mxu0  ;;  %47965 = vmatprep.mubr.f32.mxu0 %v37843_v33  ;;  %v38912_v57 = vsub.f32 %v38837_v16, %v38911_v35  ;;  %v39923_v16 = vpop.permute.xlu1 %39922 }
0x3153   : > { %47966 = vmatmul.mubr.f32.vlgmr.msra.gmra.mrb[66].mxu0 %v37853_v46  ;;  %v38923_v17 = vand.u32 4294901760, %v38922_v10  ;;  %v56631_v46 = vld [vmem:[#allocation49_spill] sm:$0xff] }
0x3154   : > { %51178 = vmatpush3.bf16.msra.mxu0 %v56302_v56  ;;  %47976 = vmatprep.mubr.f32.mxu0 %v37839_v63  ;;  %v38301_v56 = vsel %vm973_vm1, %v37194_v37, 0  ;;  %v38913_v12 = vand.u32 4294901760, %v38912_v57 }
0x3155   : > { %51180 = vmatprep.subr.bf16.mxu0 %v56303_v52  ;;  %v38924_v23 = vsub.f32 %v38922_v10, %v38923_v17 }
0x3156   : > { %v38914_v11 = vsub.f32 %v38912_v57, %v38913_v12 }
0x3158   : > { %51182 = vmatpush3.bf16.msra.mxu0 %v56303_v52  ;;  %v38375_v52 = vand.u32 4294901760, %v38301_v56  ;;  %v38915_v21 = vand.u32 4294901760, %v38914_v11 }
0x3159   : > { %51184 = vmatprep.subr.bf16.mxu0 %v56304_v51 }
0x315b   : > { %47977 = vmatmul.mubr.f32.vlgmr.msra.gmra.mrb[66].mxu0 %v37849_v49 }
0x315c   : > { %51186 = vmatpush3.bf16.msra.mxu0 %v56304_v51  ;;  %47987 = vmatprep.mubr.f32.mxu0 %v37840_v22  ;;  %v38304_v51 = vsel %vm973_vm1, %v47884_v42, 0  ;;  %v39376_v42 = vsel %vm973_vm1, %v55698_v18, 0 }
0x315d   : > { %51188 = vmatprep.subr.bf16.mxu0 %v56305_v30  ;;  %v38385_v20 = vand.u32 4294901760, %v38304_v51  ;;  %v39457_v37 = vand.u32 4294901760, %v39376_v42 }
0x315f   : > { %v38386_v58 = vsub.f32 %v38304_v51, %v38385_v20  ;;  %v56635_v51 = vld [vmem:[#allocation53_spill] sm:$0xff] }
0x3160   : > { %51190 = vmatpush3.bf16.msra.mxu0 %v56305_v30  ;;  %v38376_v30 = vsub.f32 %v38301_v56, %v38375_v52  ;;  %v56633_v56 = vld [vmem:[#allocation51_spill] sm:$0xff] }
0x3161   : > { %51192 = vmatprep.subr.bf16.mxu0 %v53118_v59  ;;  %v38387_v62 = vand.u32 4294901760, %v38386_v58 }
0x3162   : > { %v38377_v50 = vand.u32 4294901760, %v38376_v30 }
0x3163   : > { %47988 = vmatmul.mubr.f32.vlgmr.msra.gmra.mrb[66].mxu0 %v37850_v45  ;;  %v56629_v45 = vld [vmem:[#allocation47_spill] sm:$0xff] }
0x3164   : > { %51194 = vmatpush3.bf16.msra.mxu0 %v53118_v59  ;;  %47998 = vmatprep.mubr.f32.mxu0 %v37841_v43  ;;  %v39458_v43 = vsub.f32 %v39376_v42, %v39457_v37 }
0x3165   : > { %51196 = vmatprep.subr.bf16.mxu0 %v53128_v8 }
0x3166   : > { %v39459_v54 = vand.u32 4294901760, %v39458_v43 }
0x3168   : > { %51198 = vmatpush3.bf16.msra.mxu0 %v53128_v8  ;;  %v39460_v33 = vsub.f32 %v39458_v43, %v39459_v54 }
0x3169   : > { %51200 = vmatprep.subr.bf16.mxu0 %v56306_v13 }
0x316a   : > { %v39461_v18 = vand.u32 4294901760, %v39460_v33 }
0x316b   : > { %47999 = vmatmul.mubr.f32.vlgmr.msra.gmra.mrb[66].mxu0 %v37851_v0 }
0x316c   : > { %51202 = vmatpush3.bf16.msra.mxu0 %v56306_v13  ;;  %48009 = vmatprep.mubr.f32.mxu0 %v37839_v63  ;;  %v38378_v13 = vsub.f32 %v38376_v30, %v38377_v50 }
0x316d   : > { %51204 = vmatprep.subr.bf16.mxu0 %v56307_v27 }
0x316e   : > { %v38379_v3 = vand.u32 4294901760, %v38378_v13 }
0x3170   : > { %51206 = vmatpush3.bf16.msra.mxu0 %v56307_v27  ;;  %v38388_v27 = vsub.f32 %v38386_v58, %v38387_v62 }
0x3171   : > { %51208 = vmatprep.subr.bf16.mxu0 %v53118_v59 }
0x3173   : > { %48010 = vmatmul.mubr.f32.vlgmr.msra.gmra.mrb[66].mxu0 %v37849_v49 }
0x3174   : > { %51210 = vmatpush3.bf16.msra.mxu0 %v53118_v59  ;;  %48020 = vmatprep.mubr.f32.mxu0 %v37839_v63  ;;  %v38389_v59 = vand.u32 4294901760, %v38388_v27 }
0x3175   : > { %51212 = vmatprep.subr.bf16.mxu0 %v53128_v8 }
0x3178   : > { %51214 = vmatpush3.bf16.msra.mxu0 %v53128_v8  ;;  %v56617_v8 = vld [vmem:[#allocation35_spill] sm:$0xff] }
0x3179   : > { %51216 = vmatprep.subr.bf16.mxu0 %v53212_v32 }
0x317b   : > { %48021 = vmatmul.mubr.f32.vlgmr.msra.gmra.mrb[66].mxu0 %v37849_v49  ;;  %v39373_v49 = vsel %vm973_vm1, %v55700_v19, 0  ;;  %v56632_v19 = vld [vmem:[#allocation50_spill] sm:$0xff] }
0x317c   : > { %51218 = vmatpush3.bf16.msra.mxu0 %v53212_v32  ;;  %48031 = vmatprep.mubr.f32.mxu0 %v38379_v3  ;;  %v39447_v63 = vand.u32 4294901760, %v39373_v49 }
0x317d   : > { %51220 = vmatprep.subr.bf16.mxu0 %v56615_v5 }
0x317e   : > { %v39448_v22 = vsub.f32 %v39373_v49, %v39447_v63 }
0x3180   : > { %51222 = vmatpush3.bf16.msra.mxu0 %v56615_v5  ;;  %v39449_v0 = vand.u32 4294901760, %v39448_v22 }
0x3181   : > { %51224 = vmatprep.subr.bf16.mxu0 %v56616_v6 }
0x3182   : > { %v39450_v38 = vsub.f32 %v39448_v22, %v39449_v0 }
0x3183   : > { %48032 = vmatmul.mubr.f32.vlgmr.msra.gmra.mrb[66].mxu0 %v38389_v59 }
0x3184   : > { %51226 = vmatpush3.bf16.msra.mxu0 %v56616_v6  ;;  %48042 = vmatprep.mubr.f32.mxu0 %v38375_v52  ;;  %v39451_v44 = vand.u32 4294901760, %v39450_v38 }
0x3185   : > { %51228 = vmatprep.subr.bf16.mxu0 %v56617_v8 }
0x3188   : > { %51230 = vmatpush3.bf16.msra.mxu0 %v56617_v8 }
0x3189   : > { %51232 = vmatprep.subr.bf16.mxu0 %v56618_v28 }
0x318b   : > { %48043 = vmatmul.mubr.f32.vlgmr.msra.gmra.mrb[66].mxu0 %v38385_v20 }
0x318c   : > { %51234 = vmatpush3.bf16.msra.mxu0 %v56618_v28  ;;  %48053 = vmatprep.mubr.f32.mxu0 %v38376_v30  ;;  %v56636_v30 = vld [vmem:[#allocation54_spill] sm:$0xff] }
0x318d   : > { %51236 = vmatprep.subr.bf16.mxu0 %v56619_v29 }
0x3190   : > { %51238 = vmatpush3.bf16.msra.mxu0 %v56619_v29 }
0x3191   : > { %51240 = vmatprep.subr.bf16.mxu0 %v53212_v32 }
0x3193   : > { %48054 = vmatmul.mubr.f32.vlgmr.msra.gmra.mrb[66].mxu0 %v38386_v58  ;;  %v56638_v58 = vld [vmem:[#allocation30_spill] sm:$0xff] }
0x3194   : > { %51242 = vmatpush3.bf16.msra.mxu0 %v53212_v32  ;;  %48064 = vmatprep.mubr.f32.mxu0 %v38377_v50 }
0x3195   : > { %51244 = vmatprep.subr.bf16.mxu0 %v56615_v5 }
0x3198   : > { %51246 = vmatpush3.bf16.msra.mxu0 %v56615_v5 }
0x3199   : > { %51248 = vmatprep.subr.bf16.mxu0 %v56620_v61 }
0x319b   : > { %48065 = vmatmul.mubr.f32.vlgmr.msra.gmra.mrb[66].mxu0 %v38387_v62 }
0x319c   : > { %51250 = vmatpush3.bf16.msra.mxu0 %v56620_v61  ;;  %48075 = vmatprep.mubr.f32.mxu0 %v38375_v52 }
0x319d   : > { %51252 = vmatprep.subr.bf16.mxu0 %v56621_v39 }
0x31a0   : > { %51254 = vmatpush3.bf16.msra.mxu0 %v56621_v39 }
0x31a1   : > { %51256 = vmatprep.subr.bf16.mxu0 %v53212_v32 }
0x31a3   : > { %48076 = vmatmul.mubr.f32.vlgmr.msra.gmra.mrb[66].mxu0 %v38385_v20 }
0x31a4   : > { %51258 = vmatpush3.bf16.msra.mxu0 %v53212_v32  ;;  %48086 = vmatprep.mubr.f32.mxu0 %v38375_v52  ;;  %v38925_v32 = vand.u32 4294901760, %v38924_v23  ;;  %v56634_v52 = vld [vmem:[#allocation52_spill] sm:$0xff] }
0x31a5   : > { %51260 = vmatprep.subr.bf16.mxu0 %v56615_v5 }
0x31a8   : > { %51262 = vmatpush3.bf16.msra.mxu0 %v56615_v5 }
0x31a9   : > { %51264 = vmatprep.subr.bf16.mxu0 %v56622_v14 }
0x31ab   : > { %48087 = vmatmul.mubr.f32.vlgmr.msra.gmra.mrb[66].mxu0 %v38385_v20  ;;  %v56637_v20 = vld [vmem:[#allocation55_spill] sm:$0xff] }
0x31ac   : > { %51266 = vmatpush3.bf16.msra.mxu0 %v56622_v14  ;;  %48097 = vmatprep.mubr.f32.mxu0 %v38915_v21 }
0x31ad   : > { %51268 = vmatprep.subr.bf16.mxu0 %v56623_v24 }
0x31b0   : > { %51270 = vmatpush3.bf16.msra.mxu0 %v56623_v24 }
0x31b1   : > { %51272 = vmatprep.subr.bf16.mxu0 %v56624_v53 }
0x31b3   : > { %48098 = vmatmul.mubr.f32.vlgmr.msra.gmra.mrb[66].mxu0 %v38925_v32 }
0x31b4   : > { %51274 = vmatpush3.bf16.msra.mxu0 %v56624_v53  ;;  %48108 = vmatprep.mubr.f32.mxu0 %v38911_v35 }
0x31b5   : > { %51276 = vmatprep.subr.bf16.mxu0 %v56625_v2 }
0x31b8   : > { %51278 = vmatpush3.bf16.msra.mxu0 %v56625_v2 }
0x31b9   : > { %51280 = vmatprep.subr.bf16.mxu0 %v56626_v4 }
0x31bb   : > { %48109 = vmatmul.mubr.f32.vlgmr.msra.gmra.mrb[66].mxu0 %v38921_v9 }
0x31bc   : > { %51282 = vmatpush3.bf16.msra.mxu0 %v56626_v4  ;;  %48119 = vmatprep.mubr.f32.mxu0 %v38912_v57 }
0x31bd   : > { %51284 = vmatprep.subr.bf16.mxu0 %v56627_v25 }
0x31c0   : > { %51286 = vmatpush3.bf16.msra.mxu0 %v56627_v25 }
0x31c1   : > { %51288 = vmatprep.subr.bf16.mxu0 %v56622_v14 }
0x31c3   : > { %48120 = vmatmul.mubr.f32.vlgmr.msra.gmra.mrb[66].mxu0 %v38922_v10 }
0x31c4   : > { %51290 = vmatpush3.bf16.msra.mxu0 %v56622_v14  ;;  %48130 = vmatprep.mubr.f32.mxu0 %v38913_v12 }
0x31c5   : > { %51292 = vmatprep.subr.bf16.mxu0 %v56623_v24 }
0x31c8   : > { %51294 = vmatpush3.bf16.msra.mxu0 %v56623_v24 }
0x31c9   : > { %51296 = vmatprep.subr.bf16.mxu0 %v56628_v41 }
0x31cb   : > { %48131 = vmatmul.mubr.f32.vlgmr.msra.gmra.mrb[66].mxu0 %v38923_v17 }
0x31cc   : > { %51298 = vmatpush3.bf16.msra.mxu0 %v56628_v41  ;;  %48141 = vmatprep.mubr.f32.mxu0 %v38911_v35 }
0x31cd   : > { %51300 = vmatprep.subr.bf16.mxu0 %v56629_v45 }
0x31d0   : > { %51302 = vmatpush3.bf16.msra.mxu0 %v56629_v45 }
0x31d1   : > { %51304 = vmatprep.subr.bf16.mxu0 %v56622_v14 }
0x31d3   : > { %48142 = vmatmul.mubr.f32.vlgmr.msra.gmra.mrb[66].mxu0 %v38921_v9 }
0x31d4   : > { %51306 = vmatpush3.bf16.msra.mxu0 %v56622_v14  ;;  %48152 = vmatprep.mubr.f32.mxu0 %v38911_v35  ;;  %v39921_v35 = vpop.permute.xlu0 %39920 }
0x31d5   : > { %51308 = vmatprep.subr.bf16.mxu0 %v56623_v24 }
0x31d8   : > { %51310 = vmatpush3.bf16.msra.mxu0 %v56623_v24 }
0x31d9   : > { %51312 = vmatprep.subr.bf16.mxu0 %v56630_v55 }
0x31db   : > { %48153 = vmatmul.mubr.f32.vlgmr.msra.gmra.mrb[66].mxu0 %v38921_v9 }
0x31dc   : > { %51314 = vmatpush3.bf16.msra.mxu0 %v56630_v55  ;;  %48163 = vmatprep.mubr.f32.mxu0 %v39451_v44 }
0x31dd   : > { %51316 = vmatprep.subr.bf16.mxu0 %v56631_v46 }
0x31e0   : > { %51318 = vmatpush3.bf16.msra.mxu0 %v56631_v46 }
0x31e1   : > { %51320 = vmatprep.subr.bf16.mxu0 %v56632_v19 }
0x31e3   : > { %48164 = vmatmul.mubr.f32.vlgmr.msra.gmra.mrb[66].mxu0 %v39461_v18 }
0x31e4   : > { %51322 = vmatpush3.bf16.msra.mxu0 %v56632_v19  ;;  %48174 = vmatprep.mubr.f32.mxu0 %v39447_v63 }
0x31e5   : > { %51324 = vmatprep.subr.bf16.mxu0 %v56633_v56 }
0x31e8   : > { %51326 = vmatpush3.bf16.msra.mxu0 %v56633_v56 }
0x31e9   : > { %51328 = vmatprep.subr.bf16.mxu0 %v56634_v52 }
0x31eb   : > { %48175 = vmatmul.mubr.f32.vlgmr.msra.gmra.mrb[66].mxu0 %v39457_v37 }
0x31ec   : > { %51330 = vmatpush3.bf16.msra.mxu0 %v56634_v52  ;;  %48185 = vmatprep.mubr.f32.mxu0 %v39448_v22 }
0x31ed   : > { %51332 = vmatprep.subr.bf16.mxu0 %v56635_v51 }
0x31f0   : > { %51334 = vmatpush3.bf16.msra.mxu0 %v56635_v51 }
0x31f1   : > { %51336 = vmatprep.subr.bf16.mxu0 %v56630_v55 }
0x31f3   : > { %48186 = vmatmul.mubr.f32.vlgmr.msra.gmra.mrb[66].mxu0 %v39458_v43 }
0x31f4   : > { %51338 = vmatpush3.bf16.msra.mxu0 %v56630_v55  ;;  %48196 = vmatprep.mubr.f32.mxu0 %v39449_v0 }
0x31f5   : > { %51340 = vmatprep.subr.bf16.mxu0 %v56631_v46 }
0x31f8   : > { %51342 = vmatpush3.bf16.msra.mxu0 %v56631_v46 }
0x31f9   : > { %51344 = vmatprep.subr.bf16.mxu0 %v56636_v30 }
0x31fb   : > { %48197 = vmatmul.mubr.f32.vlgmr.msra.gmra.mrb[66].mxu0 %v39459_v54 }
0x31fc   : > { %51346 = vmatpush3.bf16.msra.mxu0 %v56636_v30  ;;  %48207 = vmatprep.mubr.f32.mxu0 %v39447_v63 }
0x31fd   : > { %51348 = vmatprep.subr.bf16.mxu0 %v56637_v20 }
0x3200   : > { %51350 = vmatpush3.bf16.msra.mxu0 %v56637_v20 }
0x3201   : > { %51352 = vmatprep.subr.bf16.mxu0 %v56630_v55 }
0x3203   : > { %48208 = vmatmul.mubr.f32.vlgmr.msra.gmra.mrb[66].mxu0 %v39457_v37 }
0x3204   : > { %51354 = vmatpush3.bf16.msra.mxu0 %v56630_v55  ;;  %48218 = vmatprep.mubr.f32.mxu0 %v39447_v63 }
0x3205   : > { %51356 = vmatprep.subr.bf16.mxu0 %v56631_v46 }
0x3208   : > { %51358 = vmatpush3.bf16.msra.mxu0 %v56631_v46 }
0x320b   : > { %48219 = vmatmul.mubr.f32.vlgmr.msra.gmra.mrb[66].mxu0 %v39457_v37 }
0x32de   : > { %v48220_v50 = vpop.f32.mrb[66].mxu0 }
0x32df   : > { %v55804_v13 = vadd.f32 %v56638_v58, %v48220_v50  ;;  %v39896_v62 = vpop.f32.mrb[67].mxu0 }
0x32e0   : > { %v55807_v3 = vadd.f32 %v56638_v58, %v39896_v62 }
0x32e1   : > { %v40599_v27 = vmul.f32 -1.442695, %v55804_v13 }
0x32e2   : > { %v40598_v5 = vmul.f32 -1.442695, %v55807_v3 }
0x32e3   : > { %52659 = vpow2.f32 %v40599_v27 }
0x32e4   : > { %52661 = vpow2.f32 %v40598_v5 }
0x32ed   : > { %v52660_v59 = vpop.eup %52659 }
0x32ee   : > { %v52662_v6 = vpop.eup %52661  ;;  %v39915_v8 = vadd.f32 1.0, %v52660_v59 }
0x32ef   : > { %v39914_v28 = vadd.f32 1.0, %v52662_v6 }
0x32f0   : > { %52663 = vrcp.f32 %v39915_v8 }
0x32f1   : > { %52665 = vrcp.f32 %v39914_v28 }
0x32fa   : > { %v55811_v29 = vpop.eup %52663 }
0x32fb   : > { %v55813_v61 = vpop.eup %52665  ;;  %v39927_v39 = vmul.f32 %v55811_v29, %v39923_v16 }
0x32fc   : > { %v39926_v31 = vmul.f32 %v55813_v61, %v39921_v35  ;;  %v40478_v49 = vsub.f32 1.0, %v55813_v61 }
0x32fd   : > { %39932 = vrot.lane.b32.xlu1 %v39927_v39, %s52742_s28 }
0x32fe   : > { %39930 = vrot.lane.b32.xlu0 %v39926_v31, %s52742_s28  ;;  %v40480_v22 = vmul.f32 %v40478_v49, %v55602_v34  ;;  %s52677_s28 = scalar_lea.vmem %s55859_s19, 256 }
0x32ff   : > { %p52678_p11 = scmp.ne.s32.totalorder %s55859_s19, %s52677_s28 }
0x3301   : > { %p52679_p12 = pnand %p52678_p11, %p52805_p5 }
0x3303   : > { %p52680_p13 = pneg %p52679_p12 }
0x336f   : > { %v39933_v57 = vpop.permute.xlu1 %39932 }
0x3370   : > { %v39936_v9 = vsel %vm973_vm1, %v39933_v57, 0  ;;  %v39931_v12 = vpop.permute.xlu0 %39930 }
0x3371   : > { %v40017_v10 = vand.u32 4294901760, %v39936_v9  ;;  %v39934_v11 = vsel %vm973_vm1, %v39931_v12, 0 }
0x3372   : > { %v40007_v17 = vand.u32 4294901760, %v39934_v11 }
0x3373   : > { %v40018_v14 = vsub.f32 %v39936_v9, %v40017_v10 }
0x3374   : > { %v40008_v21 = vsub.f32 %v39934_v11, %v40007_v17 }
0x3375   : > { %v40019_v23 = vand.u32 4294901760, %v40018_v14 }
0x3376   : > { %v40009_v24 = vand.u32 4294901760, %v40008_v21 }
0x3377   : > { %v40020_v32 = vsub.f32 %v40018_v14, %v40019_v23 }
0x3378   : > { %v40010_v53 = vsub.f32 %v40008_v21, %v40009_v24 }
0x3379   : > { %v40021_v4 = vand.u32 4294901760, %v40020_v32 }
0x337a   : > { %v40011_v2 = vand.u32 4294901760, %v40010_v53 }
0x337c   : > { %48229 = vmatprep.mubr.f32.mxu1 %v40011_v2 }
0x337d   : > { %48230 = vmatmul.mubr.f32.vlgmr.msra.gmra.mrb[66].mxu1 %v40021_v4 }
0x337e   : > { %51370 = vmatpush3.bf16.msra.mxu1 %v53457_v60  ;;  %48240 = vmatprep.mubr.f32.mxu1 %v40007_v17 }
0x337f   : > { %51372 = vmatprep.subr.bf16.mxu1 %v53462_v48 }
0x3382   : > { %51374 = vmatpush3.bf16.msra.mxu1 %v53462_v48 }
0x3383   : > { %51376 = vmatprep.subr.bf16.mxu1 %v53464_v1 }
0x3385   : > { %48241 = vmatmul.mubr.f32.vlgmr.msra.gmra.mrb[66].mxu1 %v40017_v10 }
0x3386   : > { %51378 = vmatpush3.bf16.msra.mxu1 %v53464_v1  ;;  %48251 = vmatprep.mubr.f32.mxu1 %v40008_v21 }
0x3387   : > { %51380 = vmatprep.subr.bf16.mxu1 %v53466_v15 }
0x338a   : > { %51382 = vmatpush3.bf16.msra.mxu1 %v53466_v15 }
0x338b   : > { %51384 = vmatprep.subr.bf16.mxu1 %v53437_v40 }
0x338d   : > { %48252 = vmatmul.mubr.f32.vlgmr.msra.gmra.mrb[66].mxu1 %v40018_v14 }
0x338e   : > { %51386 = vmatpush3.bf16.msra.mxu1 %v53437_v40  ;;  %48262 = vmatprep.mubr.f32.mxu1 %v40009_v24 }
0x338f   : > { %51388 = vmatprep.subr.bf16.mxu1 %v53447_v26 }
0x3392   : > { %51390 = vmatpush3.bf16.msra.mxu1 %v53447_v26 }
0x3393   : > { %51392 = vmatprep.subr.bf16.mxu1 %v53468_v36 }
0x3395   : > { %48263 = vmatmul.mubr.f32.vlgmr.msra.gmra.mrb[66].mxu1 %v40019_v23 }
0x3396   : > { %51394 = vmatpush3.bf16.msra.mxu1 %v53468_v36  ;;  %48273 = vmatprep.mubr.f32.mxu1 %v40007_v17 }
0x3397   : > { %51396 = vmatprep.subr.bf16.mxu1 %v53470_v7 }
0x339a   : > { %51398 = vmatpush3.bf16.msra.mxu1 %v53470_v7 }
0x339b   : > { %51400 = vmatprep.subr.bf16.mxu1 %v53437_v40 }
0x339d   : > { %48274 = vmatmul.mubr.f32.vlgmr.msra.gmra.mrb[66].mxu1 %v40017_v10 }
0x339e   : > { %51402 = vmatpush3.bf16.msra.mxu1 %v53437_v40  ;;  %48284 = vmatprep.mubr.f32.mxu1 %v40007_v17 }
0x339f   : > { %51404 = vmatprep.subr.bf16.mxu1 %v53447_v26 }
0x33a2   : > { %51406 = vmatpush3.bf16.msra.mxu1 %v53447_v26  ;;  %v40479_v26 = vsub.f32 1.0, %v55811_v29 }
0x33a4   : > { %v40481_v63 = vmul.f32 %v40479_v26, %v55600_v47 }
0x33a5   : > { %48285 = vmatmul.mubr.f32.vlgmr.msra.gmra.mrb[66].mxu1 %v40017_v10 }
0x3478   : > { %v48286_v15 = vpop.f32.mrb[66].mxu1 }
0x3479   : > { %40470 = vrot.lane.b32.xlu1 %v48286_v15, %s52743_s29  ;;  %v40456_v36 = vpop.f32.mrb[67].mxu1 }
0x347a   : > { %40468 = vrot.lane.b32.xlu0 %v40456_v36, %s52743_s29 }
0x34eb   : > { %v40471_v1 = vpop.permute.xlu1 %40470 }
0x34ec   : > { %v40475_v60 = vadd.f32 %v55804_v13, %v40471_v1  ;;  %v40469_v48 = vpop.permute.xlu0 %40468 }
0x34ed   : > { %v40474_v40 = vadd.f32 %v55807_v3, %v40469_v48 }
0x34ee   : > { %52667 = vtanh.f32 %v40475_v60 }
0x34ef   : > { %52669 = vtanh.f32 %v40474_v40 }
0x34f8   : > { %v52668_v7 = vpop.eup %52667 }
0x34f9   : > { %v52670_v25 = vpop.eup %52669  ;;  %40486 = vrot.lane.b32.xlu1 %v52668_v7, %s52743_s29 }
0x34fa   : > { %40484 = vrot.lane.b32.xlu0 %v52670_v25, %s52743_s29  ;;  %s52744_s29 = smov [#allocation2]  }
0x34fb   : > { %s52681_s24 = sshll.u32 %s52744_s29, 4  ;;  %s52682_s24 = int_to_ptr.vmem [resolvable:$false] %s52681_s24 }
0x34fc   : > { %s52683_s30 = scalar_lea.vmem %s52682_s24, 512  ;;  %p52684_p0 = scmp.lt.s32.totalorder %s55859_s19, %s52682_s24 }
0x34fd   : > { %p52685_p1 = scmp.lt.s32.totalorder %s52683_s30, %s52677_s28 }
0x34ff   : > { %p52686_p2 = por %p52685_p1, %p52684_p0 }
0x3501   : > { %p52687_p3 = pnand %p52686_p2, %p52680_p13 }
0x356b   : > { %v40487_v41 = vpop.permute.xlu1 %40486 }
0x356c   : > { %v40491_v45 = vmul.f32 %v55811_v29, %v40487_v41  ;;  %v40485_v42 = vpop.permute.xlu0 %40484 }
0x356d   : > { %v40490_v37 = vmul.f32 %v55813_v61, %v40485_v42 }
0x356e   : > { %v40493_v0 = vadd.f32 %v40491_v45, %v40481_v63 }
0x356f   : > { %v40492_v43 = vadd.f32 %v40490_v37, %v40480_v22 }
0x3570   : > { %40495 = vst.msk [vmem:[%s163_s17 + $0x8] sm:$0xff] %vm973_vm1, %v40493_v0 }
0x3571   : > { %40494 = vst.msk [vmem:[%s163_s17] sm:$0xff] %vm973_vm1, %v40492_v43 }
0x3572   : > { %52690 = shalt.err (!%p52687_p3)
}
0x3573   : > { %s52691_s4 = scalar_lea.hbm %s55857_s27, 256  ;;  %s52695_s8 = scalar_lea.hbm %s55907_s3, 1024 }
0x3574   : > { %p52692_p4 = scmp.ne.s32.totalorder %s55857_s27, %s52691_s4  ;;  %p52696_p9 = scmp.lt.u32.totalorder %s55857_s27, %s55907_s3 }
0x3575   : > { %p52697_p10 = scmp.lt.u32.totalorder %s52695_s8, %s52691_s4  ;;  %p52699_p12 = scmp.lt.u32.totalorder %s52691_s4, %s55857_s27 }
0x3576   : > { %p52693_p7 = pnand %p52692_p4, %p52805_p5 }
0x3577   : > { %p52698_p11 = por %p52697_p10, %p52696_p9 }
0x3578   : > { %p52694_p8 = pneg %p52693_p7 }
0x3579   : > { %p52700_p13 = por %p52699_p12, %p52698_p11 }
0x357b   : > { %p52701_p0 = pnand %p52700_p13, %p52694_p8 }
0x357d   : > { %52704 = shalt.err (!%p52701_p0)
}
0x357e   : > { %s52745_s7 = smov 128   ;;  %s52746_s11 = smov 8  }
0x357f   : > { %52507 = dma.vmem_to_hbm [thread:$0]  (%p52805_p5), %s55859_s19, 256, %s55857_s27, %s55863_s16, %s52745_s7, %s52745_s7, %s52746_s11  }
0x3580 PF: > { %p52513_p1 = scmp.ge.s32.totalorder %s52739_s15, 2  ;;  %s40525_s17 = sand.u32 1, %s52727_s12  }
0x3581   : > { %s40526_s20 = scalar_lea.sflag [#allocation3], %s40525_s17 }
0x3582   : > { %p52510_p2 = pnand %p52513_p1, %p52809_p6 }
0x3584   : > { %52722 = dma.done.wait (!%p52510_p2), %s40526_s20, 256  }
0x3585   : > { %52724 = vsyncadd (!%p52510_p2), %s40526_s20, 4294967040  ;;  %p13_p3 = scmp.ge.s32.totalorder %s52792_s18, 6   ;;  %s56639_s12 = smov %s52731_s13 }
0x3586   : > { %s56640_s13 = smov %s52735_s14  ;;  %s56641_s14 = smov %s52803_s21 }
0x3587   : > { %s56642_s15 = smov %s52792_s18  ;;  %15 = sbr.rel (!%p13_p3) target bundleno = 3 (0x3), region = 67 }
0x358e   :  { %40531 = vsyncpa [#allocation3], 1 }
0x358f   :  { %40533 = vsyncpa [#allocation3 + $0x1], 1 }

</bundles_post_ra>
